<compile_context>
chip_gen: v7x
topology: tpu7x:2x2x1
jax: 0.10.0
libtpu: 0.0.40
codegen_flags: <defaults>
</compile_context>

<pallas_src>
import jax
import jax.numpy as jnp
from jax.experimental import pallas as pl
from jax.experimental.pallas import tpu as pltpu

HALO = 2   # max spatial halo needed (5x5 conv, padding=2)


# --------------------------- in-kernel conv helpers --------------------------
def _zero_halo(ref):
    """Zero only the four halo border strips (interior is overwritten each step)."""
    h, w, c = ref.shape
    zr = jnp.zeros((HALO, w, c), ref.dtype)
    ref[:HALO, :, :] = zr
    ref[h - HALO:, :, :] = zr
    zc = jnp.zeros((h, HALO, c), ref.dtype)
    ref[:, :HALO, :] = zc
    ref[:, w - HALO:, :] = zc


def _row_taps(src_ref, i, k, ho, wo, base):
    """Concat the k column-shifted taps of kernel row i -> (ho, wo, k*cin) bf16."""
    taps = [src_ref[base + i:base + i + ho, base + j:base + j + wo, :]
            for j in range(k)]
    return taps[0] if k == 1 else jnp.concatenate(taps, axis=-1)


def _conv3x3(src_ref, w_ref, s_ref, t_ref, ho, wo):
    """3x3 'same' conv as ONE matmul on the full (ho*wo, 9*cin) im2col slab."""
    base = HALO - 1
    rows = [_row_taps(src_ref, i, 3, ho, wo, base) for i in range(3)]
    slab = jnp.concatenate(rows, axis=-1)                 # (ho, wo, 9*cin) bf16
    slab = slab.reshape(ho * wo, slab.shape[-1])
    y = jnp.dot(slab, w_ref[...], preferred_element_type=jnp.float32)
    return jnp.maximum(y * s_ref[...] + t_ref[...], 0.0)


def _conv5x5(src_ref, w_ref, s_ref, t_ref, ho, wo):
    """5x5 'same' conv: per-kernel-row slabs accumulated in f32 (no 25-tap slab)."""
    base = HALO - 2
    acc = None
    for i in range(5):
        row = _row_taps(src_ref, i, 5, ho, wo, base)      # (ho, wo, 5*cin) bf16
        row = row.reshape(ho * wo, row.shape[-1])
        y = jnp.dot(row, w_ref[i], preferred_element_type=jnp.float32)
        acc = y if acc is None else acc + y
    return jnp.maximum(acc * s_ref[...] + t_ref[...], 0.0)


def _conv1x1(x2d_bf16, w_ref, s_ref, t_ref):
    """1x1 conv straight off a flat (ho*wo, cin) bf16 activation (no halo needed)."""
    y = jnp.dot(x2d_bf16, w_ref[...], preferred_element_type=jnp.float32)
    return jnp.maximum(y * s_ref[...] + t_ref[...], 0.0)


# ------------------------------ fused kernel ---------------------------------
def _inception_kernel(x_ref,
                      w14a, s14a, t14a,          # fused b1a + b4a (3x3, cin->2*cmid)
                      w1b, s1b, t1b,             # b1b (3x3, cmid->cout)
                      w2a, s2a, t2a,             # b2a (5x5, cin->cmid)
                      w2b, s2b, t2b,             # b2b (5x5, cmid->cout)
                      w3a, s3a, t3a,             # b3a (1x1, cin->cmid)
                      w4b, s4b, t4b,             # b4b (1x1, cmid->cout)
                      o_ref, pin_ref, pmid_ref):
    # x_ref:    (1, Ho, 2, Wo, 2, Cin) bf16  (2x2 pooling windows exposed)
    # o_ref:    (1, Ho*Wo, 3*cout+cmid) f32  (branches packed along lanes)
    # pin_ref:  (Ho+4, Wo+4, Cin)  bf16 scratch (pooled input, zero halo)
    # pmid_ref: (Ho+4, Wo+4, Cmid) bf16 scratch (branch mid activation, zero halo)
    ho = x_ref.shape[1]
    wo = x_ref.shape[3]
    cmid = pmid_ref.shape[-1]

    # Only the halo border strips need zeroing (interiors are fully overwritten
    # below; re-zeroed every step so the invariant also holds per-core under
    # "parallel" sharding).
    _zero_halo(pin_ref)
    _zero_halo(pmid_ref)

    # Fused shared 2x2 / stride-2 max-pool (bf16; exact).
    x6 = x_ref[0]                                   # (ho, 2, wo, 2, cin)
    p = jnp.max(jnp.max(x6, axis=3), axis=1)        # (ho, wo, cin)
    pin_ref[HALO:HALO + ho, HALO:HALO + wo, :] = p
    p_flat = p.reshape(ho * wo, p.shape[-1])        # flat pooled image for 1x1

    def store_mid(y):                               # y: (ho*wo, cmid) f32
        pmid_ref[HALO:HALO + ho, HALO:HALO + wo, :] = (
            y.reshape(ho, wo, cmid).astype(pmid_ref.dtype))

    # branches 1 & 4, fused first 3x3 conv: one matmul with N = 2*cmid.
    ym = _conv3x3(pin_ref, w14a, s14a, t14a, ho, wo)     # (ho*wo, 2*cmid)
    y1m = ym[:, :cmid]
    y4m = ym[:, cmid:]

    # branch 1: second 3x3
    store_mid(y1m)
    y1 = _conv3x3(pmid_ref, w1b, s1b, t1b, ho, wo)

    # branch 2: 5x5 -> 5x5 (row-accumulated)
    y2m = _conv5x5(pin_ref, w2a, s2a, t2a, ho, wo)
    store_mid(y2m)
    y2 = _conv5x5(pmid_ref, w2b, s2b, t2b, ho, wo)

    # branch 3: 1x1 on the pooled image
    y3 = _conv1x1(p_flat, w3a, s3a, t3a)

    # branch 4: 1x1 on its fused-first-conv activation
    y4 = _conv1x1(y4m.astype(jnp.bfloat16), w4b, s4b, t4b)

    # Pack branch channels (torch.cat order) and write the output slab once.
    o_ref[0] = jnp.concatenate([y1, y2, y3, y4], axis=-1).astype(o_ref.dtype)


# ------------------------- parameter construction ----------------------------
def make_cbr_params(key, cin, cout, k):
    """Deterministic ConvBatchRelu params; BN folded to per-channel scale/shift."""
    kw_, kg, kb, km, kv = jax.random.split(key, 5)
    w = jax.random.normal(kw_, (cout, cin, k, k), jnp.float32)     # torch OIHW
    w = w * (1.0 / (cin * k * k) ** 0.5)
    gamma = 1.0 + 0.1 * jax.random.normal(kg, (cout,), jnp.float32)
    beta = 0.1 * jax.random.normal(kb, (cout,), jnp.float32)
    mean = 0.1 * jax.random.normal(km, (cout,), jnp.float32)
    var = jnp.abs(jax.random.normal(kv, (cout,), jnp.float32)) + 0.5
    eps = 1e-5
    # TODO(synk): BatchNorm is implemented in eval mode (running stats folded into
    # scale/shift); training-mode batch statistics are not reproduced.
    scale = gamma / jnp.sqrt(var + eps)
    shift = beta - mean * scale
    return (w, scale, shift)


def make_inception_params(key, in_channels, out_channels, mid_channels=None):
    if not mid_channels:
        mid_channels = out_channels
    keys = jax.random.split(key, 7)
    return {
        "out_channels": out_channels,
        "mid_channels": mid_channels,
        "b1a": make_cbr_params(keys[0], in_channels, mid_channels, 3),
        "b1b": make_cbr_params(keys[1], mid_channels, out_channels, 3),
        "b2a": make_cbr_params(keys[2], in_channels, mid_channels, 5),
        "b2b": make_cbr_params(keys[3], mid_channels, out_channels, 5),
        "b3a": make_cbr_params(keys[4], in_channels, mid_channels, 1),
        "b4a": make_cbr_params(keys[5], in_channels, mid_channels, 3),
        "b4b": make_cbr_params(keys[6], mid_channels, out_channels, 1),
    }


def _w_flat(w_oihw):
    """(cout, cin, k, k) -> (k*k*cin, cout) bf16, rows ordered (i, j, cin)."""
    co, ci, kh, kw = w_oihw.shape
    return jnp.transpose(w_oihw, (2, 3, 1, 0)).reshape(kh * kw * ci, co).astype(jnp.bfloat16)


def _w_rows(w_oihw):
    """(cout, cin, k, k) -> (k, k*cin, cout) bf16 for per-row accumulation."""
    co, ci, kh, kw = w_oihw.shape
    return jnp.transpose(w_oihw, (2, 3, 1, 0)).reshape(kh, kw * ci, co).astype(jnp.bfloat16)


def _vec(v):
    return v.reshape(1, -1).astype(jnp.float32)


def _const_idx(nd):
    return lambda i: (0,) * nd


# ------------------------------ forward pass ---------------------------------
def inception_block(x_nchw, params):
    n, cin, h, w = x_nchw.shape
    # TODO(synk): nn.MaxPool2d(2) silently truncates odd spatial dims; only even
    # H/W is handled here.
    assert h % 2 == 0 and w % 2 == 0
    ho, wo = h // 2, w // 2
    cmid = params["mid_channels"]
    cout = params["out_channels"]
    tot = 3 * cout + cmid            # packed output channels (torch.cat order)

    # NCHW -> NHWC bf16, channels left UNPADDED; expose the 2x2 pooling windows.
    x = jnp.transpose(x_nchw, (0, 2, 3, 1)).astype(jnp.bfloat16)
    x6 = x.reshape(n, ho, 2, wo, 2, cin)

    w1a, s1a, t1a = params["b1a"]
    w1b, s1b, t1b = params["b1b"]
    w2a, s2a, t2a = params["b2a"]
    w2b, s2b, t2b = params["b2b"]
    w3a, s3a, t3a = params["b3a"]
    w4a, s4a, t4a = params["b4a"]
    w4b, s4b, t4b = params["b4b"]

    # Fuse the two 3x3 (cin->cmid) first convs of branches 1 & 4 along the output
    # dim: one (ho*wo, 9*cin) x (9*cin, 2*cmid) matmul in the kernel.
    w14a = jnp.concatenate([_w_flat(w1a), _w_flat(w4a)], axis=1)
    s14a = jnp.concatenate([_vec(s1a), _vec(s4a)], axis=1)
    t14a = jnp.concatenate([_vec(t1a), _vec(t4a)], axis=1)

    conv_args = [
        w14a, s14a, t14a,
        _w_flat(w1b), _vec(s1b), _vec(t1b),
        _w_rows(w2a), _vec(s2a), _vec(t2a),
        _w_rows(w2b), _vec(s2b), _vec(t2b),
        _w_flat(w3a), _vec(s3a), _vec(t3a),
        _w_flat(w4b), _vec(s4b), _vec(t4b),
    ]
    # Constant index_map weights/scales: single-buffered (never re-fetched).
    conv_specs = [
        pl.BlockSpec(a.shape, _const_idx(a.ndim), pipeline_mode=pl.Buffered(1))
        for a in conv_args
    ]

    # TODO(synk): for large UNet spatial sizes add a second, "parallel" row-strip
    # grid axis (halo'd strips) so the working set fits v7x's 64 MiB VMEM and both
    # TensorCores stay busy at batch=1; strip heights should stay multiples of 8.
    out = pl.pallas_call(
        _inception_kernel,
        out_shape=jax.ShapeDtypeStruct((n, ho * wo, tot), jnp.float32),
        grid=(n,),
        in_specs=[pl.BlockSpec((1, ho, 2, wo, 2, cin),
                               lambda i: (i, 0, 0, 0, 0, 0))] + conv_specs,
        out_specs=pl.BlockSpec((1, ho * wo, tot), lambda i: (i, 0, 0)),
        scratch_shapes=[
            pltpu.VMEM((ho + 2 * HALO, wo + 2 * HALO, cin), jnp.bfloat16),
            pltpu.VMEM((ho + 2 * HALO, wo + 2 * HALO, cmid), jnp.bfloat16),
        ],
        compiler_params=pltpu.CompilerParams(
            dimension_semantics=("parallel",),      # batch items are independent
            vmem_limit_bytes=32 * 1024 * 1024),
    )(x6, *conv_args)

    # (n, ho*wo, tot) -> NCHW; channel order already matches torch.cat.
    out = out.reshape(n, ho, wo, tot)
    return jnp.transpose(out, (0, 3, 1, 2))


# --------------------------- pure-JAX reference -------------------------------
def _reference(x_nchw, params):
    """Reference with matching bf16 rounding of conv operands (f32 accumulate)."""
    n, cin, h, w = x_nchw.shape
    ho, wo = h // 2, w // 2
    x = jnp.transpose(x_nchw, (0, 2, 3, 1)).astype(jnp.bfloat16).astype(jnp.float32)
    p = x.reshape(n, ho, 2, wo, 2, cin).max(axis=(2, 4))

    def cbr(z, pr, round_out):
        w_oihw, scale, shift = pr
        w_hwio = jnp.transpose(w_oihw, (2, 3, 1, 0)).astype(jnp.bfloat16).astype(jnp.float32)
        y = jax.lax.conv_general_dilated(
            z, w_hwio, window_strides=(1, 1), padding="SAME",
            dimension_numbers=("NHWC", "HWIO", "NHWC"))
        y = jnp.maximum(y * scale + shift, 0.0)
        if round_out:
            y = y.astype(jnp.bfloat16).astype(jnp.float32)
        return y

    y1 = cbr(cbr(p, params["b1a"], True), params["b1b"], False)
    y2 = cbr(cbr(p, params["b2a"], True), params["b2b"], False)
    y3 = cbr(p, params["b3a"], False)
    y4 = cbr(cbr(p, params["b4a"], True), params["b4b"], False)
    y = jnp.concatenate([y1, y2, y3, y4], axis=-1)
    return jnp.transpose(y, (0, 3, 1, 2))


if __name__ == "__main__":
    key = jax.random.PRNGKey(0)
    k_x, k_p = jax.random.split(key)

    # small shapes: batch=2, in_channels=4, spatial=16x16; out=8 (mid defaults to out)
    N, C_IN, H, W = 2, 4, 16, 16
    C_OUT = 8

    x = jax.random.normal(k_x, (N, C_IN, H, W), jnp.float32)
    params = make_inception_params(k_p, C_IN, C_OUT)

    y = inception_block(x, params)
    y = jax.block_until_ready(y)

    expected = (N, 3 * C_OUT + C_OUT, H // 2, W // 2)   # (2, 32, 8, 8)
    assert y.shape == expected, (y.shape, expected)
    assert bool(jnp.all(jnp.isfinite(y)))

    # Explicit-tolerance check against a bf16-operand / f32-accumulate reference.
    y_ref = _reference(x, params)
    err = float(jnp.max(jnp.abs(y - y_ref)))
    assert err < 5e-2, f"max abs err {err}"

    print("KERNEL_OK")
</pallas_src>

<mosaic_0001>
module attributes {stable_mosaic.version = 11 : i64} {
  func.func @_inception_kernel(%arg0: i32, %arg1: memref<1x8x2x8x2x4xbf16, #tpu.memory_space<vmem>>, %arg2: memref<36x16xbf16, #tpu.memory_space<vmem>>, %arg3: memref<1x16xf32, #tpu.memory_space<vmem>>, %arg4: memref<1x16xf32, #tpu.memory_space<vmem>>, %arg5: memref<72x8xbf16, #tpu.memory_space<vmem>>, %arg6: memref<1x8xf32, #tpu.memory_space<vmem>>, %arg7: memref<1x8xf32, #tpu.memory_space<vmem>>, %arg8: memref<5x20x8xbf16, #tpu.memory_space<vmem>>, %arg9: memref<1x8xf32, #tpu.memory_space<vmem>>, %arg10: memref<1x8xf32, #tpu.memory_space<vmem>>, %arg11: memref<5x40x8xbf16, #tpu.memory_space<vmem>>, %arg12: memref<1x8xf32, #tpu.memory_space<vmem>>, %arg13: memref<1x8xf32, #tpu.memory_space<vmem>>, %arg14: memref<4x8xbf16, #tpu.memory_space<vmem>>, %arg15: memref<1x8xf32, #tpu.memory_space<vmem>>, %arg16: memref<1x8xf32, #tpu.memory_space<vmem>>, %arg17: memref<8x8xbf16, #tpu.memory_space<vmem>>, %arg18: memref<1x8xf32, #tpu.memory_space<vmem>>, %arg19: memref<1x8xf32, #tpu.memory_space<vmem>>, %arg20: memref<1x64x32xf32, #tpu.memory_space<vmem>>, %arg21: memref<12x12x4xbf16, #tpu.memory_space<vmem>>, %arg22: memref<12x12x8xbf16, #tpu.memory_space<vmem>>) attributes {dimension_semantics = [#tpu.dimension_semantics<parallel>], iteration_bounds = array<i64: 2>, scalar_prefetch = 0 : i64, scratch_operands = 2 : i64, tpu.core_type = #tpu.core_type<tc>, window_params = [{transform_indices = @transform_0, window_bounds = array<i64: 1, 8, 2, 8, 2, 4>}, {pipeline_mode = #tpu.pipeline_mode<synchronous>, transform_indices = @transform_1, window_bounds = array<i64: 36, 16>}, {pipeline_mode = #tpu.pipeline_mode<synchronous>, transform_indices = @transform_2, window_bounds = array<i64: 1, 16>}, {pipeline_mode = #tpu.pipeline_mode<synchronous>, transform_indices = @transform_3, window_bounds = array<i64: 1, 16>}, {pipeline_mode = #tpu.pipeline_mode<synchronous>, transform_indices = @transform_4, window_bounds = array<i64: 72, 8>}, {pipeline_mode = #tpu.pipeline_mode<synchronous>, transform_indices = @transform_5, window_bounds = array<i64: 1, 8>}, {pipeline_mode = #tpu.pipeline_mode<synchronous>, transform_indices = @transform_6, window_bounds = array<i64: 1, 8>}, {pipeline_mode = #tpu.pipeline_mode<synchronous>, transform_indices = @transform_7, window_bounds = array<i64: 5, 20, 8>}, {pipeline_mode = #tpu.pipeline_mode<synchronous>, transform_indices = @transform_8, window_bounds = array<i64: 1, 8>}, {pipeline_mode = #tpu.pipeline_mode<synchronous>, transform_indices = @transform_9, window_bounds = array<i64: 1, 8>}, {pipeline_mode = #tpu.pipeline_mode<synchronous>, transform_indices = @transform_10, window_bounds = array<i64: 5, 40, 8>}, {pipeline_mode = #tpu.pipeline_mode<synchronous>, transform_indices = @transform_11, window_bounds = array<i64: 1, 8>}, {pipeline_mode = #tpu.pipeline_mode<synchronous>, transform_indices = @transform_12, window_bounds = array<i64: 1, 8>}, {pipeline_mode = #tpu.pipeline_mode<synchronous>, transform_indices = @transform_13, window_bounds = array<i64: 4, 8>}, {pipeline_mode = #tpu.pipeline_mode<synchronous>, transform_indices = @transform_14, window_bounds = array<i64: 1, 8>}, {pipeline_mode = #tpu.pipeline_mode<synchronous>, transform_indices = @transform_15, window_bounds = array<i64: 1, 8>}, {pipeline_mode = #tpu.pipeline_mode<synchronous>, transform_indices = @transform_16, window_bounds = array<i64: 8, 8>}, {pipeline_mode = #tpu.pipeline_mode<synchronous>, transform_indices = @transform_17, window_bounds = array<i64: 1, 8>}, {pipeline_mode = #tpu.pipeline_mode<synchronous>, transform_indices = @transform_18, window_bounds = array<i64: 1, 8>}, {transform_indices = @transform_19, window_bounds = array<i64: 1, 64, 32>}]} {
    %cst = arith.constant 0.000000e+00 : bf16
    %0 = vector.broadcast %cst : bf16 to vector<2x12x4xbf16>
    %c0 = arith.constant 0 : index
    %c0_0 = arith.constant 0 : index
    %c0_1 = arith.constant 0 : index
    %1 = vector.load %arg21[%c0, %c0_0, %c0_1] : memref<12x12x4xbf16, #tpu.memory_space<vmem>>, vector<2x12x4xbf16>
    tpu.vector_store %arg21[%c0, %c0_0, %c0_1], %0 {strides = array<i32>} : memref<12x12x4xbf16, #tpu.memory_space<vmem>>, vector<2x12x4xbf16>,
    %c10 = arith.constant 10 : index
    %c0_2 = arith.constant 0 : index
    %c0_3 = arith.constant 0 : index
    %2 = vector.load %arg21[%c10, %c0_2, %c0_3] : memref<12x12x4xbf16, #tpu.memory_space<vmem>>, vector<2x12x4xbf16>
    tpu.vector_store %arg21[%c10, %c0_2, %c0_3], %0 {strides = array<i32>} : memref<12x12x4xbf16, #tpu.memory_space<vmem>>, vector<2x12x4xbf16>,
    %cst_4 = arith.constant 0.000000e+00 : bf16
    %3 = vector.broadcast %cst_4 : bf16 to vector<12x2x4xbf16>
    %c0_5 = arith.constant 0 : index
    %c0_6 = arith.constant 0 : index
    %c0_7 = arith.constant 0 : index
    %4 = vector.load %arg21[%c0_5, %c0_6, %c0_7] : memref<12x12x4xbf16, #tpu.memory_space<vmem>>, vector<12x2x4xbf16>
    tpu.vector_store %arg21[%c0_5, %c0_6, %c0_7], %3 {strides = array<i32>} : memref<12x12x4xbf16, #tpu.memory_space<vmem>>, vector<12x2x4xbf16>,
    %c0_8 = arith.constant 0 : index
    %c10_9 = arith.constant 10 : index
    %c0_10 = arith.constant 0 : index
    %5 = vector.load %arg21[%c0_8, %c10_9, %c0_10] : memref<12x12x4xbf16, #tpu.memory_space<vmem>>, vector<12x2x4xbf16>
    tpu.vector_store %arg21[%c0_8, %c10_9, %c0_10], %3 {strides = array<i32>} : memref<12x12x4xbf16, #tpu.memory_space<vmem>>, vector<12x2x4xbf16>,
    %cst_11 = arith.constant 0.000000e+00 : bf16
    %6 = vector.broadcast %cst_11 : bf16 to vector<2x12x8xbf16>
    %c0_12 = arith.constant 0 : index
    %c0_13 = arith.constant 0 : index
    %c0_14 = arith.constant 0 : index
    %7 = vector.load %arg22[%c0_12, %c0_13, %c0_14] : memref<12x12x8xbf16, #tpu.memory_space<vmem>>, vector<2x12x8xbf16>
    tpu.vector_store %arg22[%c0_12, %c0_13, %c0_14], %6 {strides = array<i32>} : memref<12x12x8xbf16, #tpu.memory_space<vmem>>, vector<2x12x8xbf16>,
    %c10_15 = arith.constant 10 : index
    %c0_16 = arith.constant 0 : index
    %c0_17 = arith.constant 0 : index
    %8 = vector.load %arg22[%c10_15, %c0_16, %c0_17] : memref<12x12x8xbf16, #tpu.memory_space<vmem>>, vector<2x12x8xbf16>
    tpu.vector_store %arg22[%c10_15, %c0_16, %c0_17], %6 {strides = array<i32>} : memref<12x12x8xbf16, #tpu.memory_space<vmem>>, vector<2x12x8xbf16>,
    %cst_18 = arith.constant 0.000000e+00 : bf16
    %9 = vector.broadcast %cst_18 : bf16 to vector<12x2x8xbf16>
    %c0_19 = arith.constant 0 : index
    %c0_20 = arith.constant 0 : index
    %c0_21 = arith.constant 0 : index
    %10 = vector.load %arg22[%c0_19, %c0_20, %c0_21] : memref<12x12x8xbf16, #tpu.memory_space<vmem>>, vector<12x2x8xbf16>
    tpu.vector_store %arg22[%c0_19, %c0_20, %c0_21], %9 {strides = array<i32>} : memref<12x12x8xbf16, #tpu.memory_space<vmem>>, vector<12x2x8xbf16>,
    %c0_22 = arith.constant 0 : index
    %c10_23 = arith.constant 10 : index
    %c0_24 = arith.constant 0 : index
    %11 = vector.load %arg22[%c0_22, %c10_23, %c0_24] : memref<12x12x8xbf16, #tpu.memory_space<vmem>>, vector<12x2x8xbf16>
    tpu.vector_store %arg22[%c0_22, %c10_23, %c0_24], %9 {strides = array<i32>} : memref<12x12x8xbf16, #tpu.memory_space<vmem>>, vector<12x2x8xbf16>,
    %c0_25 = arith.constant 0 : index
    %c0_26 = arith.constant 0 : index
    %c0_27 = arith.constant 0 : index
    %c0_28 = arith.constant 0 : index
    %c0_29 = arith.constant 0 : index
    %c0_30 = arith.constant 0 : index
    %12 = vector.load %arg1[%c0_25, %c0_26, %c0_27, %c0_28, %c0_29, %c0_30] : memref<1x8x2x8x2x4xbf16, #tpu.memory_space<vmem>>, vector<1x8x2x8x2x4xbf16>
    %13 = vector.shape_cast %12 : vector<1x8x2x8x2x4xbf16> to vector<8x2x8x2x4xbf16>
    %cst_31 = arith.constant dense<0xFF80> : vector<8x2x8x4xbf16>
    %14 = vector.multi_reduction <maximumf>, %13, %cst_31 [3] : vector<8x2x8x2x4xbf16> to vector<8x2x8x4xbf16>
    %cst_32 = arith.constant dense<0xFF80> : vector<8x8x4xbf16>
    %15 = vector.multi_reduction <maximumf>, %14, %cst_32 [1] : vector<8x2x8x4xbf16> to vector<8x8x4xbf16>
    %c2 = arith.constant 2 : index
    %c2_33 = arith.constant 2 : index
    %c0_34 = arith.constant 0 : index
    %16 = vector.load %arg21[%c2, %c2_33, %c0_34] : memref<12x12x4xbf16, #tpu.memory_space<vmem>>, vector<8x8x4xbf16>
    tpu.vector_store %arg21[%c2, %c2_33, %c0_34], %15 {strides = array<i32>} : memref<12x12x4xbf16, #tpu.memory_space<vmem>>, vector<8x8x4xbf16>,
    %17 = vector.shape_cast %15 : vector<8x8x4xbf16> to vector<64x4xbf16>
    %c1 = arith.constant 1 : index
    %c1_35 = arith.constant 1 : index
    %c0_36 = arith.constant 0 : index
    %18 = vector.load %arg21[%c1, %c1_35, %c0_36] : memref<12x12x4xbf16, #tpu.memory_space<vmem>>, vector<8x8x4xbf16>
    %c1_37 = arith.constant 1 : index
    %c2_38 = arith.constant 2 : index
    %c0_39 = arith.constant 0 : index
    %19 = vector.load %arg21[%c1_37, %c2_38, %c0_39] : memref<12x12x4xbf16, #tpu.memory_space<vmem>>, vector<8x8x4xbf16>
    %c1_40 = arith.constant 1 : index
    %c3 = arith.constant 3 : index
    %c0_41 = arith.constant 0 : index
    %20 = vector.load %arg21[%c1_40, %c3, %c0_41] : memref<12x12x4xbf16, #tpu.memory_space<vmem>>, vector<8x8x4xbf16>
    %21 = tpu.concatenate %18, %19, %20 in 2 : vector<8x8x4xbf16>, vector<8x8x4xbf16>, vector<8x8x4xbf16> -> vector<8x8x12xbf16>
    %c2_42 = arith.constant 2 : index
    %c1_43 = arith.constant 1 : index
    %c0_44 = arith.constant 0 : index
    %22 = vector.load %arg21[%c2_42, %c1_43, %c0_44] : memref<12x12x4xbf16, #tpu.memory_space<vmem>>, vector<8x8x4xbf16>
    %c2_45 = arith.constant 2 : index
    %c2_46 = arith.constant 2 : index
    %c0_47 = arith.constant 0 : index
    %23 = vector.load %arg21[%c2_45, %c2_46, %c0_47] : memref<12x12x4xbf16, #tpu.memory_space<vmem>>, vector<8x8x4xbf16>
    %c2_48 = arith.constant 2 : index
    %c3_49 = arith.constant 3 : index
    %c0_50 = arith.constant 0 : index
    %24 = vector.load %arg21[%c2_48, %c3_49, %c0_50] : memref<12x12x4xbf16, #tpu.memory_space<vmem>>, vector<8x8x4xbf16>
    %25 = tpu.concatenate %22, %23, %24 in 2 : vector<8x8x4xbf16>, vector<8x8x4xbf16>, vector<8x8x4xbf16> -> vector<8x8x12xbf16>
    %c3_51 = arith.constant 3 : index
    %c1_52 = arith.constant 1 : index
    %c0_53 = arith.constant 0 : index
    %26 = vector.load %arg21[%c3_51, %c1_52, %c0_53] : memref<12x12x4xbf16, #tpu.memory_space<vmem>>, vector<8x8x4xbf16>
    %c3_54 = arith.constant 3 : index
    %c2_55 = arith.constant 2 : index
    %c0_56 = arith.constant 0 : index
    %27 = vector.load %arg21[%c3_54, %c2_55, %c0_56] : memref<12x12x4xbf16, #tpu.memory_space<vmem>>, vector<8x8x4xbf16>
    %c3_57 = arith.constant 3 : index
    %c3_58 = arith.constant 3 : index
    %c0_59 = arith.constant 0 : index
    %28 = vector.load %arg21[%c3_57, %c3_58, %c0_59] : memref<12x12x4xbf16, #tpu.memory_space<vmem>>, vector<8x8x4xbf16>
    %29 = tpu.concatenate %26, %27, %28 in 2 : vector<8x8x4xbf16>, vector<8x8x4xbf16>, vector<8x8x4xbf16> -> vector<8x8x12xbf16>
    %30 = tpu.concatenate %21, %25, %29 in 2 : vector<8x8x12xbf16>, vector<8x8x12xbf16>, vector<8x8x12xbf16> -> vector<8x8x36xbf16>
    %31 = vector.shape_cast %30 : vector<8x8x36xbf16> to vector<64x36xbf16>
    %c0_60 = arith.constant 0 : index
    %c0_61 = arith.constant 0 : index
    %32 = vector.load %arg2[%c0_60, %c0_61] : memref<36x16xbf16, #tpu.memory_space<vmem>>, vector<36x16xbf16>
    %cst_62 = arith.constant dense<0.000000e+00> : vector<64x16xf32>
    %33 = tpu.matmul %31, %32, %cst_62 {dimension_numbers = #tpu.dot_dimension_numbers<[1], [0], [0], [1], [0, 0, 1, 1], [], []>} : vector<64x36xbf16>, vector<36x16xbf16>, vector<64x16xf32> -> vector<64x16xf32>
    %c0_63 = arith.constant 0 : index
    %c0_64 = arith.constant 0 : index
    %34 = vector.load %arg3[%c0_63, %c0_64] : memref<1x16xf32, #tpu.memory_space<vmem>>, vector<1x16xf32>
    %35 = vector.broadcast %34 : vector<1x16xf32> to vector<64x16xf32>
    %36 = arith.mulf %33, %35 : vector<64x16xf32>
    %c0_65 = arith.constant 0 : index
    %c0_66 = arith.constant 0 : index
    %37 = vector.load %arg4[%c0_65, %c0_66] : memref<1x16xf32, #tpu.memory_space<vmem>>, vector<1x16xf32>
    %38 = vector.broadcast %37 : vector<1x16xf32> to vector<64x16xf32>
    %39 = arith.addf %36, %38 : vector<64x16xf32>
    %cst_67 = arith.constant 0.000000e+00 : f32
    %40 = vector.broadcast %cst_67 : f32 to vector<64x16xf32>
    %41 = arith.maximumf %39, %40 : vector<64x16xf32>
    %42 = vector.extract_strided_slice %41 {offsets = [0, 0], sizes = [64, 8], strides = [1, 1]} : vector<64x16xf32> to vector<64x8xf32>
    %43 = vector.extract_strided_slice %41 {offsets = [0, 8], sizes = [64, 8], strides = [1, 1]} : vector<64x16xf32> to vector<64x8xf32>
    %44 = vector.shape_cast %42 : vector<64x8xf32> to vector<8x8x8xf32>
    %45 = arith.truncf %44 : vector<8x8x8xf32> to vector<8x8x8xbf16>
    %c2_68 = arith.constant 2 : index
    %c2_69 = arith.constant 2 : index
    %c0_70 = arith.constant 0 : index
    %46 = vector.load %arg22[%c2_68, %c2_69, %c0_70] : memref<12x12x8xbf16, #tpu.memory_space<vmem>>, vector<8x8x8xbf16>
    tpu.vector_store %arg22[%c2_68, %c2_69, %c0_70], %45 {strides = array<i32>} : memref<12x12x8xbf16, #tpu.memory_space<vmem>>, vector<8x8x8xbf16>,
    %c1_71 = arith.constant 1 : index
    %c1_72 = arith.constant 1 : index
    %c0_73 = arith.constant 0 : index
    %47 = vector.load %arg22[%c1_71, %c1_72, %c0_73] : memref<12x12x8xbf16, #tpu.memory_space<vmem>>, vector<8x8x8xbf16>
    %c1_74 = arith.constant 1 : index
    %c2_75 = arith.constant 2 : index
    %c0_76 = arith.constant 0 : index
    %48 = vector.load %arg22[%c1_74, %c2_75, %c0_76] : memref<12x12x8xbf16, #tpu.memory_space<vmem>>, vector<8x8x8xbf16>
    %c1_77 = arith.constant 1 : index
    %c3_78 = arith.constant 3 : index
    %c0_79 = arith.constant 0 : index
    %49 = vector.load %arg22[%c1_77, %c3_78, %c0_79] : memref<12x12x8xbf16, #tpu.memory_space<vmem>>, vector<8x8x8xbf16>
    %50 = tpu.concatenate %47, %48, %49 in 2 : vector<8x8x8xbf16>, vector<8x8x8xbf16>, vector<8x8x8xbf16> -> vector<8x8x24xbf16>
    %c2_80 = arith.constant 2 : index
    %c1_81 = arith.constant 1 : index
    %c0_82 = arith.constant 0 : index
    %51 = vector.load %arg22[%c2_80, %c1_81, %c0_82] : memref<12x12x8xbf16, #tpu.memory_space<vmem>>, vector<8x8x8xbf16>
    %c2_83 = arith.constant 2 : index
    %c2_84 = arith.constant 2 : index
    %c0_85 = arith.constant 0 : index
    %52 = vector.load %arg22[%c2_83, %c2_84, %c0_85] : memref<12x12x8xbf16, #tpu.memory_space<vmem>>, vector<8x8x8xbf16>
    %c2_86 = arith.constant 2 : index
    %c3_87 = arith.constant 3 : index
    %c0_88 = arith.constant 0 : index
    %53 = vector.load %arg22[%c2_86, %c3_87, %c0_88] : memref<12x12x8xbf16, #tpu.memory_space<vmem>>, vector<8x8x8xbf16>
    %54 = tpu.concatenate %51, %52, %53 in 2 : vector<8x8x8xbf16>, vector<8x8x8xbf16>, vector<8x8x8xbf16> -> vector<8x8x24xbf16>
    %c3_89 = arith.constant 3 : index
    %c1_90 = arith.constant 1 : index
    %c0_91 = arith.constant 0 : index
    %55 = vector.load %arg22[%c3_89, %c1_90, %c0_91] : memref<12x12x8xbf16, #tpu.memory_space<vmem>>, vector<8x8x8xbf16>
    %c3_92 = arith.constant 3 : index
    %c2_93 = arith.constant 2 : index
    %c0_94 = arith.constant 0 : index
    %56 = vector.load %arg22[%c3_92, %c2_93, %c0_94] : memref<12x12x8xbf16, #tpu.memory_space<vmem>>, vector<8x8x8xbf16>
    %c3_95 = arith.constant 3 : index
    %c3_96 = arith.constant 3 : index
    %c0_97 = arith.constant 0 : index
    %57 = vector.load %arg22[%c3_95, %c3_96, %c0_97] : memref<12x12x8xbf16, #tpu.memory_space<vmem>>, vector<8x8x8xbf16>
    %58 = tpu.concatenate %55, %56, %57 in 2 : vector<8x8x8xbf16>, vector<8x8x8xbf16>, vector<8x8x8xbf16> -> vector<8x8x24xbf16>
    %59 = tpu.concatenate %50, %54, %58 in 2 : vector<8x8x24xbf16>, vector<8x8x24xbf16>, vector<8x8x24xbf16> -> vector<8x8x72xbf16>
    %60 = vector.shape_cast %59 : vector<8x8x72xbf16> to vector<64x72xbf16>
    %c0_98 = arith.constant 0 : index
    %c0_99 = arith.constant 0 : index
    %61 = vector.load %arg5[%c0_98, %c0_99] : memref<72x8xbf16, #tpu.memory_space<vmem>>, vector<72x8xbf16>
    %cst_100 = arith.constant dense<0.000000e+00> : vector<64x8xf32>
    %62 = tpu.matmul %60, %61, %cst_100 {dimension_numbers = #tpu.dot_dimension_numbers<[1], [0], [0], [1], [0, 0, 1, 1], [], []>} : vector<64x72xbf16>, vector<72x8xbf16>, vector<64x8xf32> -> vector<64x8xf32>
    %c0_101 = arith.constant 0 : index
    %c0_102 = arith.constant 0 : index
    %63 = vector.load %arg6[%c0_101, %c0_102] : memref<1x8xf32, #tpu.memory_space<vmem>>, vector<1x8xf32>
    %64 = vector.broadcast %63 : vector<1x8xf32> to vector<64x8xf32>
    %65 = arith.mulf %62, %64 : vector<64x8xf32>
    %c0_103 = arith.constant 0 : index
    %c0_104 = arith.constant 0 : index
    %66 = vector.load %arg7[%c0_103, %c0_104] : memref<1x8xf32, #tpu.memory_space<vmem>>, vector<1x8xf32>
    %67 = vector.broadcast %66 : vector<1x8xf32> to vector<64x8xf32>
    %68 = arith.addf %65, %67 : vector<64x8xf32>
    %cst_105 = arith.constant 0.000000e+00 : f32
    %69 = vector.broadcast %cst_105 : f32 to vector<64x8xf32>
    %70 = arith.maximumf %68, %69 : vector<64x8xf32>
    %c0_106 = arith.constant 0 : index
    %c0_107 = arith.constant 0 : index
    %c0_108 = arith.constant 0 : index
    %71 = vector.load %arg21[%c0_106, %c0_107, %c0_108] : memref<12x12x4xbf16, #tpu.memory_space<vmem>>, vector<8x8x4xbf16>
    %c0_109 = arith.constant 0 : index
    %c1_110 = arith.constant 1 : index
    %c0_111 = arith.constant 0 : index
    %72 = vector.load %arg21[%c0_109, %c1_110, %c0_111] : memref<12x12x4xbf16, #tpu.memory_space<vmem>>, vector<8x8x4xbf16>
    %c0_112 = arith.constant 0 : index
    %c2_113 = arith.constant 2 : index
    %c0_114 = arith.constant 0 : index
    %73 = vector.load %arg21[%c0_112, %c2_113, %c0_114] : memref<12x12x4xbf16, #tpu.memory_space<vmem>>, vector<8x8x4xbf16>
    %c0_115 = arith.constant 0 : index
    %c3_116 = arith.constant 3 : index
    %c0_117 = arith.constant 0 : index
    %74 = vector.load %arg21[%c0_115, %c3_116, %c0_117] : memref<12x12x4xbf16, #tpu.memory_space<vmem>>, vector<8x8x4xbf16>
    %c0_118 = arith.constant 0 : index
    %c4 = arith.constant 4 : index
    %c0_119 = arith.constant 0 : index
    %75 = vector.load %arg21[%c0_118, %c4, %c0_119] : memref<12x12x4xbf16, #tpu.memory_space<vmem>>, vector<8x8x4xbf16>
    %76 = tpu.concatenate %71, %72, %73, %74, %75 in 2 : vector<8x8x4xbf16>, vector<8x8x4xbf16>, vector<8x8x4xbf16>, vector<8x8x4xbf16>, vector<8x8x4xbf16> -> vector<8x8x20xbf16>
    %77 = vector.shape_cast %76 : vector<8x8x20xbf16> to vector<64x20xbf16>
    %c0_120 = arith.constant 0 : index
    %c0_121 = arith.constant 0 : index
    %c0_122 = arith.constant 0 : index
    %78 = vector.load %arg8[%c0_120, %c0_121, %c0_122] : memref<5x20x8xbf16, #tpu.memory_space<vmem>>, vector<1x20x8xbf16>
    %79 = vector.shape_cast %78 : vector<1x20x8xbf16> to vector<20x8xbf16>
    %cst_123 = arith.constant dense<0.000000e+00> : vector<64x8xf32>
    %80 = tpu.matmul %77, %79, %cst_123 {dimension_numbers = #tpu.dot_dimension_numbers<[1], [0], [0], [1], [0, 0, 1, 1], [], []>} : vector<64x20xbf16>, vector<20x8xbf16>, vector<64x8xf32> -> vector<64x8xf32>
    %c1_124 = arith.constant 1 : index
    %c0_125 = arith.constant 0 : index
    %c0_126 = arith.constant 0 : index
    %81 = vector.load %arg21[%c1_124, %c0_125, %c0_126] : memref<12x12x4xbf16, #tpu.memory_space<vmem>>, vector<8x8x4xbf16>
    %c1_127 = arith.constant 1 : index
    %c1_128 = arith.constant 1 : index
    %c0_129 = arith.constant 0 : index
    %82 = vector.load %arg21[%c1_127, %c1_128, %c0_129] : memref<12x12x4xbf16, #tpu.memory_space<vmem>>, vector<8x8x4xbf16>
    %c1_130 = arith.constant 1 : index
    %c2_131 = arith.constant 2 : index
    %c0_132 = arith.constant 0 : index
    %83 = vector.load %arg21[%c1_130, %c2_131, %c0_132] : memref<12x12x4xbf16, #tpu.memory_space<vmem>>, vector<8x8x4xbf16>
    %c1_133 = arith.constant 1 : index
    %c3_134 = arith.constant 3 : index
    %c0_135 = arith.constant 0 : index
    %84 = vector.load %arg21[%c1_133, %c3_134, %c0_135] : memref<12x12x4xbf16, #tpu.memory_space<vmem>>, vector<8x8x4xbf16>
    %c1_136 = arith.constant 1 : index
    %c4_137 = arith.constant 4 : index
    %c0_138 = arith.constant 0 : index
    %85 = vector.load %arg21[%c1_136, %c4_137, %c0_138] : memref<12x12x4xbf16, #tpu.memory_space<vmem>>, vector<8x8x4xbf16>
    %86 = tpu.concatenate %81, %82, %83, %84, %85 in 2 : vector<8x8x4xbf16>, vector<8x8x4xbf16>, vector<8x8x4xbf16>, vector<8x8x4xbf16>, vector<8x8x4xbf16> -> vector<8x8x20xbf16>
    %87 = vector.shape_cast %86 : vector<8x8x20xbf16> to vector<64x20xbf16>
    %c1_139 = arith.constant 1 : index
    %c0_140 = arith.constant 0 : index
    %c0_141 = arith.constant 0 : index
    %88 = vector.load %arg8[%c1_139, %c0_140, %c0_141] : memref<5x20x8xbf16, #tpu.memory_space<vmem>>, vector<1x20x8xbf16>
    %89 = vector.shape_cast %88 : vector<1x20x8xbf16> to vector<20x8xbf16>
    %cst_142 = arith.constant dense<0.000000e+00> : vector<64x8xf32>
    %90 = tpu.matmul %87, %89, %cst_142 {dimension_numbers = #tpu.dot_dimension_numbers<[1], [0], [0], [1], [0, 0, 1, 1], [], []>} : vector<64x20xbf16>, vector<20x8xbf16>, vector<64x8xf32> -> vector<64x8xf32>
    %91 = arith.addf %80, %90 : vector<64x8xf32>
    %c2_143 = arith.constant 2 : index
    %c0_144 = arith.constant 0 : index
    %c0_145 = arith.constant 0 : index
    %92 = vector.load %arg21[%c2_143, %c0_144, %c0_145] : memref<12x12x4xbf16, #tpu.memory_space<vmem>>, vector<8x8x4xbf16>
    %c2_146 = arith.constant 2 : index
    %c1_147 = arith.constant 1 : index
    %c0_148 = arith.constant 0 : index
    %93 = vector.load %arg21[%c2_146, %c1_147, %c0_148] : memref<12x12x4xbf16, #tpu.memory_space<vmem>>, vector<8x8x4xbf16>
    %c2_149 = arith.constant 2 : index
    %c2_150 = arith.constant 2 : index
    %c0_151 = arith.constant 0 : index
    %94 = vector.load %arg21[%c2_149, %c2_150, %c0_151] : memref<12x12x4xbf16, #tpu.memory_space<vmem>>, vector<8x8x4xbf16>
    %c2_152 = arith.constant 2 : index
    %c3_153 = arith.constant 3 : index
    %c0_154 = arith.constant 0 : index
    %95 = vector.load %arg21[%c2_152, %c3_153, %c0_154] : memref<12x12x4xbf16, #tpu.memory_space<vmem>>, vector<8x8x4xbf16>
    %c2_155 = arith.constant 2 : index
    %c4_156 = arith.constant 4 : index
    %c0_157 = arith.constant 0 : index
    %96 = vector.load %arg21[%c2_155, %c4_156, %c0_157] : memref<12x12x4xbf16, #tpu.memory_space<vmem>>, vector<8x8x4xbf16>
    %97 = tpu.concatenate %92, %93, %94, %95, %96 in 2 : vector<8x8x4xbf16>, vector<8x8x4xbf16>, vector<8x8x4xbf16>, vector<8x8x4xbf16>, vector<8x8x4xbf16> -> vector<8x8x20xbf16>
    %98 = vector.shape_cast %97 : vector<8x8x20xbf16> to vector<64x20xbf16>
    %c2_158 = arith.constant 2 : index
    %c0_159 = arith.constant 0 : index
    %c0_160 = arith.constant 0 : index
    %99 = vector.load %arg8[%c2_158, %c0_159, %c0_160] : memref<5x20x8xbf16, #tpu.memory_space<vmem>>, vector<1x20x8xbf16>
    %100 = vector.shape_cast %99 : vector<1x20x8xbf16> to vector<20x8xbf16>
    %cst_161 = arith.constant dense<0.000000e+00> : vector<64x8xf32>
    %101 = tpu.matmul %98, %100, %cst_161 {dimension_numbers = #tpu.dot_dimension_numbers<[1], [0], [0], [1], [0, 0, 1, 1], [], []>} : vector<64x20xbf16>, vector<20x8xbf16>, vector<64x8xf32> -> vector<64x8xf32>
    %102 = arith.addf %91, %101 : vector<64x8xf32>
    %c3_162 = arith.constant 3 : index
    %c0_163 = arith.constant 0 : index
    %c0_164 = arith.constant 0 : index
    %103 = vector.load %arg21[%c3_162, %c0_163, %c0_164] : memref<12x12x4xbf16, #tpu.memory_space<vmem>>, vector<8x8x4xbf16>
    %c3_165 = arith.constant 3 : index
    %c1_166 = arith.constant 1 : index
    %c0_167 = arith.constant 0 : index
    %104 = vector.load %arg21[%c3_165, %c1_166, %c0_167] : memref<12x12x4xbf16, #tpu.memory_space<vmem>>, vector<8x8x4xbf16>
    %c3_168 = arith.constant 3 : index
    %c2_169 = arith.constant 2 : index
    %c0_170 = arith.constant 0 : index
    %105 = vector.load %arg21[%c3_168, %c2_169, %c0_170] : memref<12x12x4xbf16, #tpu.memory_space<vmem>>, vector<8x8x4xbf16>
    %c3_171 = arith.constant 3 : index
    %c3_172 = arith.constant 3 : index
    %c0_173 = arith.constant 0 : index
    %106 = vector.load %arg21[%c3_171, %c3_172, %c0_173] : memref<12x12x4xbf16, #tpu.memory_space<vmem>>, vector<8x8x4xbf16>
    %c3_174 = arith.constant 3 : index
    %c4_175 = arith.constant 4 : index
    %c0_176 = arith.constant 0 : index
    %107 = vector.load %arg21[%c3_174, %c4_175, %c0_176] : memref<12x12x4xbf16, #tpu.memory_space<vmem>>, vector<8x8x4xbf16>
    %108 = tpu.concatenate %103, %104, %105, %106, %107 in 2 : vector<8x8x4xbf16>, vector<8x8x4xbf16>, vector<8x8x4xbf16>, vector<8x8x4xbf16>, vector<8x8x4xbf16> -> vector<8x8x20xbf16>
    %109 = vector.shape_cast %108 : vector<8x8x20xbf16> to vector<64x20xbf16>
    %c3_177 = arith.constant 3 : index
    %c0_178 = arith.constant 0 : index
    %c0_179 = arith.constant 0 : index
    %110 = vector.load %arg8[%c3_177, %c0_178, %c0_179] : memref<5x20x8xbf16, #tpu.memory_space<vmem>>, vector<1x20x8xbf16>
    %111 = vector.shape_cast %110 : vector<1x20x8xbf16> to vector<20x8xbf16>
    %cst_180 = arith.constant dense<0.000000e+00> : vector<64x8xf32>
    %112 = tpu.matmul %109, %111, %cst_180 {dimension_numbers = #tpu.dot_dimension_numbers<[1], [0], [0], [1], [0, 0, 1, 1], [], []>} : vector<64x20xbf16>, vector<20x8xbf16>, vector<64x8xf32> -> vector<64x8xf32>
    %113 = arith.addf %102, %112 : vector<64x8xf32>
    %c4_181 = arith.constant 4 : index
    %c0_182 = arith.constant 0 : index
    %c0_183 = arith.constant 0 : index
    %114 = vector.load %arg21[%c4_181, %c0_182, %c0_183] : memref<12x12x4xbf16, #tpu.memory_space<vmem>>, vector<8x8x4xbf16>
    %c4_184 = arith.constant 4 : index
    %c1_185 = arith.constant 1 : index
    %c0_186 = arith.constant 0 : index
    %115 = vector.load %arg21[%c4_184, %c1_185, %c0_186] : memref<12x12x4xbf16, #tpu.memory_space<vmem>>, vector<8x8x4xbf16>
    %c4_187 = arith.constant 4 : index
    %c2_188 = arith.constant 2 : index
    %c0_189 = arith.constant 0 : index
    %116 = vector.load %arg21[%c4_187, %c2_188, %c0_189] : memref<12x12x4xbf16, #tpu.memory_space<vmem>>, vector<8x8x4xbf16>
    %c4_190 = arith.constant 4 : index
    %c3_191 = arith.constant 3 : index
    %c0_192 = arith.constant 0 : index
    %117 = vector.load %arg21[%c4_190, %c3_191, %c0_192] : memref<12x12x4xbf16, #tpu.memory_space<vmem>>, vector<8x8x4xbf16>
    %c4_193 = arith.constant 4 : index
    %c4_194 = arith.constant 4 : index
    %c0_195 = arith.constant 0 : index
    %118 = vector.load %arg21[%c4_193, %c4_194, %c0_195] : memref<12x12x4xbf16, #tpu.memory_space<vmem>>, vector<8x8x4xbf16>
    %119 = tpu.concatenate %114, %115, %116, %117, %118 in 2 : vector<8x8x4xbf16>, vector<8x8x4xbf16>, vector<8x8x4xbf16>, vector<8x8x4xbf16>, vector<8x8x4xbf16> -> vector<8x8x20xbf16>
    %120 = vector.shape_cast %119 : vector<8x8x20xbf16> to vector<64x20xbf16>
    %c4_196 = arith.constant 4 : index
    %c0_197 = arith.constant 0 : index
    %c0_198 = arith.constant 0 : index
    %121 = vector.load %arg8[%c4_196, %c0_197, %c0_198] : memref<5x20x8xbf16, #tpu.memory_space<vmem>>, vector<1x20x8xbf16>
    %122 = vector.shape_cast %121 : vector<1x20x8xbf16> to vector<20x8xbf16>
    %cst_199 = arith.constant dense<0.000000e+00> : vector<64x8xf32>
    %123 = tpu.matmul %120, %122, %cst_199 {dimension_numbers = #tpu.dot_dimension_numbers<[1], [0], [0], [1], [0, 0, 1, 1], [], []>} : vector<64x20xbf16>, vector<20x8xbf16>, vector<64x8xf32> -> vector<64x8xf32>
    %124 = arith.addf %113, %123 : vector<64x8xf32>
    %c0_200 = arith.constant 0 : index
    %c0_201 = arith.constant 0 : index
    %125 = vector.load %arg9[%c0_200, %c0_201] : memref<1x8xf32, #tpu.memory_space<vmem>>, vector<1x8xf32>
    %126 = vector.broadcast %125 : vector<1x8xf32> to vector<64x8xf32>
    %127 = arith.mulf %124, %126 : vector<64x8xf32>
    %c0_202 = arith.constant 0 : index
    %c0_203 = arith.constant 0 : index
    %128 = vector.load %arg10[%c0_202, %c0_203] : memref<1x8xf32, #tpu.memory_space<vmem>>, vector<1x8xf32>
    %129 = vector.broadcast %128 : vector<1x8xf32> to vector<64x8xf32>
    %130 = arith.addf %127, %129 : vector<64x8xf32>
    %cst_204 = arith.constant 0.000000e+00 : f32
    %131 = vector.broadcast %cst_204 : f32 to vector<64x8xf32>
    %132 = arith.maximumf %130, %131 : vector<64x8xf32>
    %133 = vector.shape_cast %132 : vector<64x8xf32> to vector<8x8x8xf32>
    %134 = arith.truncf %133 : vector<8x8x8xf32> to vector<8x8x8xbf16>
    %c2_205 = arith.constant 2 : index
    %c2_206 = arith.constant 2 : index
    %c0_207 = arith.constant 0 : index
    %135 = vector.load %arg22[%c2_205, %c2_206, %c0_207] : memref<12x12x8xbf16, #tpu.memory_space<vmem>>, vector<8x8x8xbf16>
    tpu.vector_store %arg22[%c2_205, %c2_206, %c0_207], %134 {strides = array<i32>} : memref<12x12x8xbf16, #tpu.memory_space<vmem>>, vector<8x8x8xbf16>,
    %c0_208 = arith.constant 0 : index
    %c0_209 = arith.constant 0 : index
    %c0_210 = arith.constant 0 : index
    %136 = vector.load %arg22[%c0_208, %c0_209, %c0_210] : memref<12x12x8xbf16, #tpu.memory_space<vmem>>, vector<8x8x8xbf16>
    %c0_211 = arith.constant 0 : index
    %c1_212 = arith.constant 1 : index
    %c0_213 = arith.constant 0 : index
    %137 = vector.load %arg22[%c0_211, %c1_212, %c0_213] : memref<12x12x8xbf16, #tpu.memory_space<vmem>>, vector<8x8x8xbf16>
    %c0_214 = arith.constant 0 : index
    %c2_215 = arith.constant 2 : index
    %c0_216 = arith.constant 0 : index
    %138 = vector.load %arg22[%c0_214, %c2_215, %c0_216] : memref<12x12x8xbf16, #tpu.memory_space<vmem>>, vector<8x8x8xbf16>
    %c0_217 = arith.constant 0 : index
    %c3_218 = arith.constant 3 : index
    %c0_219 = arith.constant 0 : index
    %139 = vector.load %arg22[%c0_217, %c3_218, %c0_219] : memref<12x12x8xbf16, #tpu.memory_space<vmem>>, vector<8x8x8xbf16>
    %c0_220 = arith.constant 0 : index
    %c4_221 = arith.constant 4 : index
    %c0_222 = arith.constant 0 : index
    %140 = vector.load %arg22[%c0_220, %c4_221, %c0_222] : memref<12x12x8xbf16, #tpu.memory_space<vmem>>, vector<8x8x8xbf16>
    %141 = tpu.concatenate %136, %137, %138, %139, %140 in 2 : vector<8x8x8xbf16>, vector<8x8x8xbf16>, vector<8x8x8xbf16>, vector<8x8x8xbf16>, vector<8x8x8xbf16> -> vector<8x8x40xbf16>
    %142 = vector.shape_cast %141 : vector<8x8x40xbf16> to vector<64x40xbf16>
    %c0_223 = arith.constant 0 : index
    %c0_224 = arith.constant 0 : index
    %c0_225 = arith.constant 0 : index
    %143 = vector.load %arg11[%c0_223, %c0_224, %c0_225] : memref<5x40x8xbf16, #tpu.memory_space<vmem>>, vector<1x40x8xbf16>
    %144 = vector.shape_cast %143 : vector<1x40x8xbf16> to vector<40x8xbf16>
    %cst_226 = arith.constant dense<0.000000e+00> : vector<64x8xf32>
    %145 = tpu.matmul %142, %144, %cst_226 {dimension_numbers = #tpu.dot_dimension_numbers<[1], [0], [0], [1], [0, 0, 1, 1], [], []>} : vector<64x40xbf16>, vector<40x8xbf16>, vector<64x8xf32> -> vector<64x8xf32>
    %c1_227 = arith.constant 1 : index
    %c0_228 = arith.constant 0 : index
    %c0_229 = arith.constant 0 : index
    %146 = vector.load %arg22[%c1_227, %c0_228, %c0_229] : memref<12x12x8xbf16, #tpu.memory_space<vmem>>, vector<8x8x8xbf16>
    %c1_230 = arith.constant 1 : index
    %c1_231 = arith.constant 1 : index
    %c0_232 = arith.constant 0 : index
    %147 = vector.load %arg22[%c1_230, %c1_231, %c0_232] : memref<12x12x8xbf16, #tpu.memory_space<vmem>>, vector<8x8x8xbf16>
    %c1_233 = arith.constant 1 : index
    %c2_234 = arith.constant 2 : index
    %c0_235 = arith.constant 0 : index
    %148 = vector.load %arg22[%c1_233, %c2_234, %c0_235] : memref<12x12x8xbf16, #tpu.memory_space<vmem>>, vector<8x8x8xbf16>
    %c1_236 = arith.constant 1 : index
    %c3_237 = arith.constant 3 : index
    %c0_238 = arith.constant 0 : index
    %149 = vector.load %arg22[%c1_236, %c3_237, %c0_238] : memref<12x12x8xbf16, #tpu.memory_space<vmem>>, vector<8x8x8xbf16>
    %c1_239 = arith.constant 1 : index
    %c4_240 = arith.constant 4 : index
    %c0_241 = arith.constant 0 : index
    %150 = vector.load %arg22[%c1_239, %c4_240, %c0_241] : memref<12x12x8xbf16, #tpu.memory_space<vmem>>, vector<8x8x8xbf16>
    %151 = tpu.concatenate %146, %147, %148, %149, %150 in 2 : vector<8x8x8xbf16>, vector<8x8x8xbf16>, vector<8x8x8xbf16>, vector<8x8x8xbf16>, vector<8x8x8xbf16> -> vector<8x8x40xbf16>
    %152 = vector.shape_cast %151 : vector<8x8x40xbf16> to vector<64x40xbf16>
    %c1_242 = arith.constant 1 : index
    %c0_243 = arith.constant 0 : index
    %c0_244 = arith.constant 0 : index
    %153 = vector.load %arg11[%c1_242, %c0_243, %c0_244] : memref<5x40x8xbf16, #tpu.memory_space<vmem>>, vector<1x40x8xbf16>
    %154 = vector.shape_cast %153 : vector<1x40x8xbf16> to vector<40x8xbf16>
    %cst_245 = arith.constant dense<0.000000e+00> : vector<64x8xf32>
    %155 = tpu.matmul %152, %154, %cst_245 {dimension_numbers = #tpu.dot_dimension_numbers<[1], [0], [0], [1], [0, 0, 1, 1], [], []>} : vector<64x40xbf16>, vector<40x8xbf16>, vector<64x8xf32> -> vector<64x8xf32>
    %156 = arith.addf %145, %155 : vector<64x8xf32>
    %c2_246 = arith.constant 2 : index
    %c0_247 = arith.constant 0 : index
    %c0_248 = arith.constant 0 : index
    %157 = vector.load %arg22[%c2_246, %c0_247, %c0_248] : memref<12x12x8xbf16, #tpu.memory_space<vmem>>, vector<8x8x8xbf16>
    %c2_249 = arith.constant 2 : index
    %c1_250 = arith.constant 1 : index
    %c0_251 = arith.constant 0 : index
    %158 = vector.load %arg22[%c2_249, %c1_250, %c0_251] : memref<12x12x8xbf16, #tpu.memory_space<vmem>>, vector<8x8x8xbf16>
    %c2_252 = arith.constant 2 : index
    %c2_253 = arith.constant 2 : index
    %c0_254 = arith.constant 0 : index
    %159 = vector.load %arg22[%c2_252, %c2_253, %c0_254] : memref<12x12x8xbf16, #tpu.memory_space<vmem>>, vector<8x8x8xbf16>
    %c2_255 = arith.constant 2 : index
    %c3_256 = arith.constant 3 : index
    %c0_257 = arith.constant 0 : index
    %160 = vector.load %arg22[%c2_255, %c3_256, %c0_257] : memref<12x12x8xbf16, #tpu.memory_space<vmem>>, vector<8x8x8xbf16>
    %c2_258 = arith.constant 2 : index
    %c4_259 = arith.constant 4 : index
    %c0_260 = arith.constant 0 : index
    %161 = vector.load %arg22[%c2_258, %c4_259, %c0_260] : memref<12x12x8xbf16, #tpu.memory_space<vmem>>, vector<8x8x8xbf16>
    %162 = tpu.concatenate %157, %158, %159, %160, %161 in 2 : vector<8x8x8xbf16>, vector<8x8x8xbf16>, vector<8x8x8xbf16>, vector<8x8x8xbf16>, vector<8x8x8xbf16> -> vector<8x8x40xbf16>
    %163 = vector.shape_cast %162 : vector<8x8x40xbf16> to vector<64x40xbf16>
    %c2_261 = arith.constant 2 : index
    %c0_262 = arith.constant 0 : index
    %c0_263 = arith.constant 0 : index
    %164 = vector.load %arg11[%c2_261, %c0_262, %c0_263] : memref<5x40x8xbf16, #tpu.memory_space<vmem>>, vector<1x40x8xbf16>
    %165 = vector.shape_cast %164 : vector<1x40x8xbf16> to vector<40x8xbf16>
    %cst_264 = arith.constant dense<0.000000e+00> : vector<64x8xf32>
    %166 = tpu.matmul %163, %165, %cst_264 {dimension_numbers = #tpu.dot_dimension_numbers<[1], [0], [0], [1], [0, 0, 1, 1], [], []>} : vector<64x40xbf16>, vector<40x8xbf16>, vector<64x8xf32> -> vector<64x8xf32>
    %167 = arith.addf %156, %166 : vector<64x8xf32>
    %c3_265 = arith.constant 3 : index
    %c0_266 = arith.constant 0 : index
    %c0_267 = arith.constant 0 : index
    %168 = vector.load %arg22[%c3_265, %c0_266, %c0_267] : memref<12x12x8xbf16, #tpu.memory_space<vmem>>, vector<8x8x8xbf16>
    %c3_268 = arith.constant 3 : index
    %c1_269 = arith.constant 1 : index
    %c0_270 = arith.constant 0 : index
    %169 = vector.load %arg22[%c3_268, %c1_269, %c0_270] : memref<12x12x8xbf16, #tpu.memory_space<vmem>>, vector<8x8x8xbf16>
    %c3_271 = arith.constant 3 : index
    %c2_272 = arith.constant 2 : index
    %c0_273 = arith.constant 0 : index
    %170 = vector.load %arg22[%c3_271, %c2_272, %c0_273] : memref<12x12x8xbf16, #tpu.memory_space<vmem>>, vector<8x8x8xbf16>
    %c3_274 = arith.constant 3 : index
    %c3_275 = arith.constant 3 : index
    %c0_276 = arith.constant 0 : index
    %171 = vector.load %arg22[%c3_274, %c3_275, %c0_276] : memref<12x12x8xbf16, #tpu.memory_space<vmem>>, vector<8x8x8xbf16>
    %c3_277 = arith.constant 3 : index
    %c4_278 = arith.constant 4 : index
    %c0_279 = arith.constant 0 : index
    %172 = vector.load %arg22[%c3_277, %c4_278, %c0_279] : memref<12x12x8xbf16, #tpu.memory_space<vmem>>, vector<8x8x8xbf16>
    %173 = tpu.concatenate %168, %169, %170, %171, %172 in 2 : vector<8x8x8xbf16>, vector<8x8x8xbf16>, vector<8x8x8xbf16>, vector<8x8x8xbf16>, vector<8x8x8xbf16> -> vector<8x8x40xbf16>
    %174 = vector.shape_cast %173 : vector<8x8x40xbf16> to vector<64x40xbf16>
    %c3_280 = arith.constant 3 : index
    %c0_281 = arith.constant 0 : index
    %c0_282 = arith.constant 0 : index
    %175 = vector.load %arg11[%c3_280, %c0_281, %c0_282] : memref<5x40x8xbf16, #tpu.memory_space<vmem>>, vector<1x40x8xbf16>
    %176 = vector.shape_cast %175 : vector<1x40x8xbf16> to vector<40x8xbf16>
    %cst_283 = arith.constant dense<0.000000e+00> : vector<64x8xf32>
    %177 = tpu.matmul %174, %176, %cst_283 {dimension_numbers = #tpu.dot_dimension_numbers<[1], [0], [0], [1], [0, 0, 1, 1], [], []>} : vector<64x40xbf16>, vector<40x8xbf16>, vector<64x8xf32> -> vector<64x8xf32>
    %178 = arith.addf %167, %177 : vector<64x8xf32>
    %c4_284 = arith.constant 4 : index
    %c0_285 = arith.constant 0 : index
    %c0_286 = arith.constant 0 : index
    %179 = vector.load %arg22[%c4_284, %c0_285, %c0_286] : memref<12x12x8xbf16, #tpu.memory_space<vmem>>, vector<8x8x8xbf16>
    %c4_287 = arith.constant 4 : index
    %c1_288 = arith.constant 1 : index
    %c0_289 = arith.constant 0 : index
    %180 = vector.load %arg22[%c4_287, %c1_288, %c0_289] : memref<12x12x8xbf16, #tpu.memory_space<vmem>>, vector<8x8x8xbf16>
    %c4_290 = arith.constant 4 : index
    %c2_291 = arith.constant 2 : index
    %c0_292 = arith.constant 0 : index
    %181 = vector.load %arg22[%c4_290, %c2_291, %c0_292] : memref<12x12x8xbf16, #tpu.memory_space<vmem>>, vector<8x8x8xbf16>
    %c4_293 = arith.constant 4 : index
    %c3_294 = arith.constant 3 : index
    %c0_295 = arith.constant 0 : index
    %182 = vector.load %arg22[%c4_293, %c3_294, %c0_295] : memref<12x12x8xbf16, #tpu.memory_space<vmem>>, vector<8x8x8xbf16>
    %c4_296 = arith.constant 4 : index
    %c4_297 = arith.constant 4 : index
    %c0_298 = arith.constant 0 : index
    %183 = vector.load %arg22[%c4_296, %c4_297, %c0_298] : memref<12x12x8xbf16, #tpu.memory_space<vmem>>, vector<8x8x8xbf16>
    %184 = tpu.concatenate %179, %180, %181, %182, %183 in 2 : vector<8x8x8xbf16>, vector<8x8x8xbf16>, vector<8x8x8xbf16>, vector<8x8x8xbf16>, vector<8x8x8xbf16> -> vector<8x8x40xbf16>
    %185 = vector.shape_cast %184 : vector<8x8x40xbf16> to vector<64x40xbf16>
    %c4_299 = arith.constant 4 : index
    %c0_300 = arith.constant 0 : index
    %c0_301 = arith.constant 0 : index
    %186 = vector.load %arg11[%c4_299, %c0_300, %c0_301] : memref<5x40x8xbf16, #tpu.memory_space<vmem>>, vector<1x40x8xbf16>
    %187 = vector.shape_cast %186 : vector<1x40x8xbf16> to vector<40x8xbf16>
    %cst_302 = arith.constant dense<0.000000e+00> : vector<64x8xf32>
    %188 = tpu.matmul %185, %187, %cst_302 {dimension_numbers = #tpu.dot_dimension_numbers<[1], [0], [0], [1], [0, 0, 1, 1], [], []>} : vector<64x40xbf16>, vector<40x8xbf16>, vector<64x8xf32> -> vector<64x8xf32>
    %189 = arith.addf %178, %188 : vector<64x8xf32>
    %c0_303 = arith.constant 0 : index
    %c0_304 = arith.constant 0 : index
    %190 = vector.load %arg12[%c0_303, %c0_304] : memref<1x8xf32, #tpu.memory_space<vmem>>, vector<1x8xf32>
    %191 = vector.broadcast %190 : vector<1x8xf32> to vector<64x8xf32>
    %192 = arith.mulf %189, %191 : vector<64x8xf32>
    %c0_305 = arith.constant 0 : index
    %c0_306 = arith.constant 0 : index
    %193 = vector.load %arg13[%c0_305, %c0_306] : memref<1x8xf32, #tpu.memory_space<vmem>>, vector<1x8xf32>
    %194 = vector.broadcast %193 : vector<1x8xf32> to vector<64x8xf32>
    %195 = arith.addf %192, %194 : vector<64x8xf32>
    %cst_307 = arith.constant 0.000000e+00 : f32
    %196 = vector.broadcast %cst_307 : f32 to vector<64x8xf32>
    %197 = arith.maximumf %195, %196 : vector<64x8xf32>
    %c0_308 = arith.constant 0 : index
    %c0_309 = arith.constant 0 : index
    %198 = vector.load %arg14[%c0_308, %c0_309] : memref<4x8xbf16, #tpu.memory_space<vmem>>, vector<4x8xbf16>
    %cst_310 = arith.constant dense<0.000000e+00> : vector<64x8xf32>
    %199 = tpu.matmul %17, %198, %cst_310 {dimension_numbers = #tpu.dot_dimension_numbers<[1], [0], [0], [1], [0, 0, 1, 1], [], []>} : vector<64x4xbf16>, vector<4x8xbf16>, vector<64x8xf32> -> vector<64x8xf32>
    %c0_311 = arith.constant 0 : index
    %c0_312 = arith.constant 0 : index
    %200 = vector.load %arg15[%c0_311, %c0_312] : memref<1x8xf32, #tpu.memory_space<vmem>>, vector<1x8xf32>
    %201 = vector.broadcast %200 : vector<1x8xf32> to vector<64x8xf32>
    %202 = arith.mulf %199, %201 : vector<64x8xf32>
    %c0_313 = arith.constant 0 : index
    %c0_314 = arith.constant 0 : index
    %203 = vector.load %arg16[%c0_313, %c0_314] : memref<1x8xf32, #tpu.memory_space<vmem>>, vector<1x8xf32>
    %204 = vector.broadcast %203 : vector<1x8xf32> to vector<64x8xf32>
    %205 = arith.addf %202, %204 : vector<64x8xf32>
    %cst_315 = arith.constant 0.000000e+00 : f32
    %206 = vector.broadcast %cst_315 : f32 to vector<64x8xf32>
    %207 = arith.maximumf %205, %206 : vector<64x8xf32>
    %208 = arith.truncf %43 : vector<64x8xf32> to vector<64x8xbf16>
    %c0_316 = arith.constant 0 : index
    %c0_317 = arith.constant 0 : index
    %209 = vector.load %arg17[%c0_316, %c0_317] : memref<8x8xbf16, #tpu.memory_space<vmem>>, vector<8x8xbf16>
    %cst_318 = arith.constant dense<0.000000e+00> : vector<64x8xf32>
    %210 = tpu.matmul %208, %209, %cst_318 {dimension_numbers = #tpu.dot_dimension_numbers<[1], [0], [0], [1], [0, 0, 1, 1], [], []>} : vector<64x8xbf16>, vector<8x8xbf16>, vector<64x8xf32> -> vector<64x8xf32>
    %c0_319 = arith.constant 0 : index
    %c0_320 = arith.constant 0 : index
    %211 = vector.load %arg18[%c0_319, %c0_320] : memref<1x8xf32, #tpu.memory_space<vmem>>, vector<1x8xf32>
    %212 = vector.broadcast %211 : vector<1x8xf32> to vector<64x8xf32>
    %213 = arith.mulf %210, %212 : vector<64x8xf32>
    %c0_321 = arith.constant 0 : index
    %c0_322 = arith.constant 0 : index
    %214 = vector.load %arg19[%c0_321, %c0_322] : memref<1x8xf32, #tpu.memory_space<vmem>>, vector<1x8xf32>
    %215 = vector.broadcast %214 : vector<1x8xf32> to vector<64x8xf32>
    %216 = arith.addf %213, %215 : vector<64x8xf32>
    %cst_323 = arith.constant 0.000000e+00 : f32
    %217 = vector.broadcast %cst_323 : f32 to vector<64x8xf32>
    %218 = arith.maximumf %216, %217 : vector<64x8xf32>
    %219 = tpu.concatenate %70, %197, %207, %218 in 1 : vector<64x8xf32>, vector<64x8xf32>, vector<64x8xf32>, vector<64x8xf32> -> vector<64x32xf32>
    %c0_324 = arith.constant 0 : index
    %c0_325 = arith.constant 0 : index
    %c0_326 = arith.constant 0 : index
    %220 = vector.load %arg20[%c0_324, %c0_325, %c0_326] : memref<1x64x32xf32, #tpu.memory_space<vmem>>, vector<1x64x32xf32>
    %221 = vector.shape_cast %220 : vector<1x64x32xf32> to vector<64x32xf32>
    %222 = vector.shape_cast %219 : vector<64x32xf32> to vector<1x64x32xf32>
    tpu.vector_store %arg20[%c0_324, %c0_325, %c0_326], %222 {strides = array<i32>} : memref<1x64x32xf32, #tpu.memory_space<vmem>>, vector<1x64x32xf32>,
    return
  }
  func.func @transform_0(%arg0: i32) -> (i32, i32, i32, i32, i32, i32) {
    %c0_i32 = arith.constant 0 : i32
    %c0_i32_0 = arith.constant 0 : i32
    %c0_i32_1 = arith.constant 0 : i32
    %c0_i32_2 = arith.constant 0 : i32
    %c0_i32_3 = arith.constant 0 : i32
    %c0_i32_4 = arith.constant 0 : i32
    return %arg0, %c0_i32, %c0_i32_0, %c0_i32_1, %c0_i32_2, %c0_i32_3 : i32, i32, i32, i32, i32, i32
  }
  func.func @transform_1(%arg0: i32) -> (i32, i32) {
    %c0_i32 = arith.constant 0 : i32
    %c0_i32_0 = arith.constant 0 : i32
    %c0_i32_1 = arith.constant 0 : i32
    return %c0_i32, %c0_i32_0 : i32, i32
  }
  func.func @transform_2(%arg0: i32) -> (i32, i32) {
    %c0_i32 = arith.constant 0 : i32
    %c0_i32_0 = arith.constant 0 : i32
    %c0_i32_1 = arith.constant 0 : i32
    return %c0_i32, %c0_i32_0 : i32, i32
  }
  func.func @transform_3(%arg0: i32) -> (i32, i32) {
    %c0_i32 = arith.constant 0 : i32
    %c0_i32_0 = arith.constant 0 : i32
    %c0_i32_1 = arith.constant 0 : i32
    return %c0_i32, %c0_i32_0 : i32, i32
  }
  func.func @transform_4(%arg0: i32) -> (i32, i32) {
    %c0_i32 = arith.constant 0 : i32
    %c0_i32_0 = arith.constant 0 : i32
    %c0_i32_1 = arith.constant 0 : i32
    return %c0_i32, %c0_i32_0 : i32, i32
  }
  func.func @transform_5(%arg0: i32) -> (i32, i32) {
    %c0_i32 = arith.constant 0 : i32
    %c0_i32_0 = arith.constant 0 : i32
    %c0_i32_1 = arith.constant 0 : i32
    return %c0_i32, %c0_i32_0 : i32, i32
  }
  func.func @transform_6(%arg0: i32) -> (i32, i32) {
    %c0_i32 = arith.constant 0 : i32
    %c0_i32_0 = arith.constant 0 : i32
    %c0_i32_1 = arith.constant 0 : i32
    return %c0_i32, %c0_i32_0 : i32, i32
  }
  func.func @transform_7(%arg0: i32) -> (i32, i32, i32) {
    %c0_i32 = arith.constant 0 : i32
    %c0_i32_0 = arith.constant 0 : i32
    %c0_i32_1 = arith.constant 0 : i32
    %c0_i32_2 = arith.constant 0 : i32
    return %c0_i32, %c0_i32_0, %c0_i32_1 : i32, i32, i32
  }
  func.func @transform_8(%arg0: i32) -> (i32, i32) {
    %c0_i32 = arith.constant 0 : i32
    %c0_i32_0 = arith.constant 0 : i32
    %c0_i32_1 = arith.constant 0 : i32
    return %c0_i32, %c0_i32_0 : i32, i32
  }
  func.func @transform_9(%arg0: i32) -> (i32, i32) {
    %c0_i32 = arith.constant 0 : i32
    %c0_i32_0 = arith.constant 0 : i32
    %c0_i32_1 = arith.constant 0 : i32
    return %c0_i32, %c0_i32_0 : i32, i32
  }
  func.func @transform_10(%arg0: i32) -> (i32, i32, i32) {
    %c0_i32 = arith.constant 0 : i32
    %c0_i32_0 = arith.constant 0 : i32
    %c0_i32_1 = arith.constant 0 : i32
    %c0_i32_2 = arith.constant 0 : i32
    return %c0_i32, %c0_i32_0, %c0_i32_1 : i32, i32, i32
  }
  func.func @transform_11(%arg0: i32) -> (i32, i32) {
    %c0_i32 = arith.constant 0 : i32
    %c0_i32_0 = arith.constant 0 : i32
    %c0_i32_1 = arith.constant 0 : i32
    return %c0_i32, %c0_i32_0 : i32, i32
  }
  func.func @transform_12(%arg0: i32) -> (i32, i32) {
    %c0_i32 = arith.constant 0 : i32
    %c0_i32_0 = arith.constant 0 : i32
    %c0_i32_1 = arith.constant 0 : i32
    return %c0_i32, %c0_i32_0 : i32, i32
  }
  func.func @transform_13(%arg0: i32) -> (i32, i32) {
    %c0_i32 = arith.constant 0 : i32
    %c0_i32_0 = arith.constant 0 : i32
    %c0_i32_1 = arith.constant 0 : i32
    return %c0_i32, %c0_i32_0 : i32, i32
  }
  func.func @transform_14(%arg0: i32) -> (i32, i32) {
    %c0_i32 = arith.constant 0 : i32
    %c0_i32_0 = arith.constant 0 : i32
    %c0_i32_1 = arith.constant 0 : i32
    return %c0_i32, %c0_i32_0 : i32, i32
  }
  func.func @transform_15(%arg0: i32) -> (i32, i32) {
    %c0_i32 = arith.constant 0 : i32
    %c0_i32_0 = arith.constant 0 : i32
    %c0_i32_1 = arith.constant 0 : i32
    return %c0_i32, %c0_i32_0 : i32, i32
  }
  func.func @transform_16(%arg0: i32) -> (i32, i32) {
    %c0_i32 = arith.constant 0 : i32
    %c0_i32_0 = arith.constant 0 : i32
    %c0_i32_1 = arith.constant 0 : i32
    return %c0_i32, %c0_i32_0 : i32, i32
  }
  func.func @transform_17(%arg0: i32) -> (i32, i32) {
    %c0_i32 = arith.constant 0 : i32
    %c0_i32_0 = arith.constant 0 : i32
    %c0_i32_1 = arith.constant 0 : i32
    return %c0_i32, %c0_i32_0 : i32, i32
  }
  func.func @transform_18(%arg0: i32) -> (i32, i32) {
    %c0_i32 = arith.constant 0 : i32
    %c0_i32_0 = arith.constant 0 : i32
    %c0_i32_1 = arith.constant 0 : i32
    return %c0_i32, %c0_i32_0 : i32, i32
  }
  func.func @transform_19(%arg0: i32) -> (i32, i32, i32) {
    %c0_i32 = arith.constant 0 : i32
    %c0_i32_0 = arith.constant 0 : i32
    %c0_i32_1 = arith.constant 0 : i32
    return %arg0, %c0_i32, %c0_i32_0 : i32, i32, i32
  }
}

</mosaic_0001>

<bundles_post_ra>
// kernel: tpu_custom_call.1
= control target key start
LH: loop header
LB: loop body
LE: loop exit
PB: predicated region body
PF: predicated region fallthrough
CT: control target
= control target key end

     0   :  { %s18901_s0 = inlined_call_operand.vmem [shape: bf16[2,8,2,8,2,4], index: 0, kind: input, shape index: {}]   ;;  %s18902_s1 = inlined_call_operand.vmem [shape: bf16[36,16], index: 1, kind: input, shape index: {}]   ;;  %s18903_s2 = inlined_call_operand.vmem [shape: f32[1,16], index: 2, kind: input, shape index: {}]   ;;  %s18904_s3 = inlined_call_operand.vmem [shape: f32[1,16], index: 3, kind: input, shape index: {}]   ;;  %s18905_s4 = inlined_call_operand.vmem [shape: bf16[72,8], index: 4, kind: input, shape index: {}]   ;;  %s18906_s5 = inlined_call_operand.vmem [shape: f32[1,8], index: 5, kind: input, shape index: {}]   ;;  %s18907_s6 = inlined_call_operand.vmem [shape: f32[1,8], index: 6, kind: input, shape index: {}]   ;;  %s18908_s7 = inlined_call_operand.vmem [shape: bf16[5,20,8], index: 7, kind: input, shape index: {}]   ;;  %s18909_s8 = inlined_call_operand.vmem [shape: f32[1,8], index: 8, kind: input, shape index: {}]   ;;  %s18910_s9 = inlined_call_operand.vmem [shape: f32[1,8], index: 9, kind: input, shape index: {}]   ;;  %s18911_s10 = inlined_call_operand.vmem [shape: bf16[5,40,8], index: 10, kind: input, shape index: {}]   ;;  %s18912_s11 = inlined_call_operand.vmem [shape: f32[1,8], index: 11, kind: input, shape index: {}]   ;;  %s18913_s12 = inlined_call_operand.vmem [shape: f32[1,8], index: 12, kind: input, shape index: {}]   ;;  %s18914_s13 = inlined_call_operand.vmem [shape: bf16[4,8], index: 13, kind: input, shape index: {}]   ;;  %s18915_s14 = inlined_call_operand.vmem [shape: f32[1,8], index: 14, kind: input, shape index: {}]   ;;  %s18916_s15 = inlined_call_operand.vmem [shape: f32[1,8], index: 15, kind: input, shape index: {}]   ;;  %s18917_s16 = inlined_call_operand.vmem [shape: bf16[8,8], index: 16, kind: input, shape index: {}]   ;;  %s18918_s17 = inlined_call_operand.vmem [shape: f32[1,8], index: 17, kind: input, shape index: {}]   ;;  %s18919_s18 = inlined_call_operand.vmem [shape: f32[1,8], index: 18, kind: input, shape index: {}]   ;;  %s18920_s19 = inlined_call_operand.vmem [shape: f32[2,64,32], index: 19, kind: output, shape index: {}]  }
   0x1   :  { %19020 = sst [smem:[#allocation130_spill]] %s18901_s0  ;;  %s13622_s0 = smov 0  }
   0x2   :  { %19021 = sst [smem:[#allocation131_spill]] %s18902_s1 }
   0x3   :  { %19022 = sst [smem:[#allocation132_spill]] %s18903_s2 }
   0x4   :  { %19023 = sst [smem:[#allocation133_spill]] %s18904_s3 }
   0x5 LB: > { %s11807_s30 = sadd.s32 4294967295, %s13511_s0   ;;  %p11811_p0 = scmp.ge.s32.totalorder %s13511_s0, 1  ;;  %s13511_s0 = sphi %s13622_s0, %s29_s0  }
   0x6   : > { %p536_p1 = scmp.lt.s32.totalorder %s13511_s0, 3 }
   0x8   : > { %p537_p2 = pnand %p11811_p0, %p536_p1 }
   0xa   : > { %540 = sbr.rel (%p537_p2) target bundleno = 2133 (0x855), region = 96 }
  0x11   : > { %vm602_vm0 = vcmask 27648   ;;  %vm604_vm1 = vcmask 25600   ;;  %vm613_vm2 = vcmask 24576   ;;  %v18922_v0 = vmov 0   ;;  %p13656_p3 = scmp.lt.s32.totalorder %s11807_s30, 1  ;;  %s19025_s2 = sld [smem:[#allocation130_spill]] }
  0x12   : > { %605 = vst.msk [vmem:[#allocation2 + $0x4] sm:$0x3] %vm604_vm1, %v18922_v0  ;;  %607 = vst.msk [vmem:[#allocation2 + $0xc] sm:$0x3] %vm604_vm1, %v18922_v0  ;;  %vm626_vm3 = vcmask 25601   ;;  %s13514_s24 = smov 8  }
  0x13   : > { %606 = vst.msk [vmem:[#allocation2 + $0x8] sm:$0xf] %vm602_vm0, %v18922_v0  ;;  %611 = vst.msk [vmem:[#allocation2 + $0x58] sm:$0xf] %vm602_vm0, %v18922_v0  ;;  %s19507_s30 = smov (!%p13656_p3, %s11807_s30), 1  ;;  %s13515_s25 = smov 4  }
  0x14   : > { %612 = vst.msk [vmem:[#allocation2 + $0x5c] sm:$0x3] %vm604_vm1, %v18922_v0  ;;  %610 = vst.msk [vmem:[#allocation2 + $0x54] sm:$0x3] %vm604_vm1, %v18922_v0  ;;  %s11812_s21 = sshll.u32 %s19507_s30, 7  ;;  %vm2469_vm4 = vcmask 31744  }
  0x15   : > { %603 = vst.msk [vmem:[#allocation2] sm:$0xf] %vm602_vm0, %v18922_v0  ;;  %609 = vst.msk [vmem:[#allocation2 + $0x50] sm:$0xf] %vm602_vm0, %v18922_v0  ;;  %vm3174_vm5 = vcmask 1043459   ;;  %vm3176_vm6 = vcmask 1044484  }
  0x16   : > { %616 = vst.msk [vmem:[#allocation2 + $0x10] sm:$0x1] %vm613_vm2, %v18922_v0  ;;  %617 = vst.msk [vmem:[#allocation2 + $0x18] sm:$0x1] %vm613_vm2, %v18922_v0  ;;  %vm3178_vm7 = vcmask 1045509   ;;  %vm3180_vm8 = vcmask 1046534  }
  0x17   : > { %618 = vst.msk [vmem:[#allocation2 + $0x20] sm:$0x1] %vm613_vm2, %v18922_v0  ;;  %619 = vst.msk [vmem:[#allocation2 + $0x28] sm:$0x1] %vm613_vm2, %v18922_v0  ;;  %s13702_s23 = scalar_lea.vmem %s19025_s2, %s11812_s21  ;;  %vm3182_vm9 = vcmask 1047559   ;;  %vm3261_vm10 = vcmask 27649  }
  0x18   : > { %620 = vst.msk [vmem:[#allocation2 + $0x30] sm:$0x1] %vm613_vm2, %v18922_v0  ;;  %621 = vst.msk [vmem:[#allocation2 + $0x38] sm:$0x1] %vm613_vm2, %v18922_v0  ;;  %v692_v8 = vld [vmem:[%s13702_s23 + $0x10] sm:$0x1] }
  0x19   : > { %622 = vst.msk [vmem:[#allocation2 + $0x40] sm:$0x1] %vm613_vm2, %v18922_v0  ;;  %623 = vst.msk [vmem:[#allocation2 + $0x48] sm:$0x1] %vm613_vm2, %v18922_v0  ;;  %v3280_v1 = vld [vmem:[#allocation2 + $0xc] sm:$0x1] }
  0x1a   : > { %628 = vst.msk [vmem:[#allocation2 + $0xc] sm:$0x2] %vm626_vm3, %v18922_v0  ;;  %627 = vst.msk [vmem:[#allocation2 + $0x4] sm:$0x2] %vm626_vm3, %v18922_v0  ;;  %v3295_v2 = vld [vmem:[#allocation2 + $0x8] sm:$0xe] }
  0x1b   : > { %615 = vst.msk [vmem:[#allocation2 + $0x8] sm:$0x1] %vm613_vm2, %v18922_v0  ;;  %614 = vst.msk [vmem:[#allocation2] sm:$0x1] %vm613_vm2, %v18922_v0  ;;  %v11887_v4 = vcombine.low %v3295_v2, %v3280_v1  ;;  %v693_v10 = vld [vmem:[%s13702_s23 + $0x11] sm:$0x1] }
  0x1c   : > { %625 = vst.msk [vmem:[#allocation2 + $0x58] sm:$0x1] %vm613_vm2, %v18922_v0  ;;  %624 = vst.msk [vmem:[#allocation2 + $0x50] sm:$0x1] %vm613_vm2, %v18922_v0  ;;  %v694_v12 = vld [vmem:[%s13702_s23 + $0x12] sm:$0x1] }
  0x1d   : > { %629 = vst.msk [vmem:[#allocation2 + $0x14] sm:$0x2] %vm626_vm3, %v18922_v0  ;;  %630 = vst.msk [vmem:[#allocation2 + $0x1c] sm:$0x2] %vm626_vm3, %v18922_v0  ;;  %v3378_v6 = vshll.u32 %v11887_v4, 16  ;;  %v3376_v7 = vshrl.u32 %v11887_v4, 16 }
  0x1e   : > { %631 = vst.msk [vmem:[#allocation2 + $0x24] sm:$0x2] %vm626_vm3, %v18922_v0  ;;  %632 = vst.msk [vmem:[#allocation2 + $0x2c] sm:$0x2] %vm626_vm3, %v18922_v0  ;;  %v695_v13 = vld [vmem:[%s13702_s23 + $0x13] sm:$0x1] }
  0x1f   : > { %633 = vst.msk [vmem:[#allocation2 + $0x34] sm:$0x2] %vm626_vm3, %v18922_v0  ;;  %634 = vst.msk [vmem:[#allocation2 + $0x3c] sm:$0x2] %vm626_vm3, %v18922_v0  ;;  %v3380_v11 = vrot.slane %v3378_v6, 1  ;;  %vm3184_vm11 = vcmask 1041409  }
  0x20   : > { %635 = vst.msk [vmem:[#allocation2 + $0x44] sm:$0x2] %vm626_vm3, %v18922_v0  ;;  %636 = vst.msk [vmem:[#allocation2 + $0x4c] sm:$0x2] %vm626_vm3, %v18922_v0  ;;  %v1014_v14 = vsel %vm613_vm2, %v692_v8, 4286644096 }
  0x21   : > { %638 = vst.msk [vmem:[#allocation2 + $0x5c] sm:$0x2] %vm626_vm3, %v18922_v0  ;;  %637 = vst.msk [vmem:[#allocation2 + $0x54] sm:$0x2] %vm626_vm3, %v18922_v0  ;;  %v3303_v3 = vld [vmem:[#allocation2 + $0xc] sm:$0x3]  ;;  %v3381_v15 = vor.u32 %v3380_v11, %v3376_v7  ;;  %v1016_v18 = vunpack.i.l.bf16 %v1014_v14  ;;  %v1017_v19 = vunpack.i.h.bf16 %v1014_v14 }
  0x22   : > { %v11895_v5 = vcombine.low %v3295_v2, %v3303_v3  ;;  %v696_v16 = vld [vmem:[%s13702_s23 + $0x14] sm:$0x1]  ;;  %v697_v17 = vld [vmem:[%s13702_s23 + $0x15] sm:$0x1]  ;;  %v1027_v20 = vsel %vm613_vm2, %v693_v10, 4286644096 }
  0x23   : > { %v1029_v21 = vunpack.i.l.bf16 %v1027_v20  ;;  %v1030_v22 = vunpack.i.h.bf16 %v1027_v20  ;;  %v1040_v23 = vsel %vm613_vm2, %v694_v12, 4286644096  ;;  %v1053_v24 = vsel %vm613_vm2, %v695_v13, 4286644096  ;;  %v698_v29 = vld [vmem:[%s13702_s23 + $0x16] sm:$0x1] }
  0x24   : > { %v3471_v9 = vrot.slane %v11895_v5, 1  ;;  %v1018_v25 = vmax.f32 %v1016_v18, %v1017_v19  ;;  %v1042_v26 = vunpack.i.l.bf16 %v1040_v23  ;;  %v1043_v27 = vunpack.i.h.bf16 %v1040_v23  ;;  %v699_v42 = vld [vmem:[%s13702_s23 + $0x17] sm:$0x1]  ;;  %s13516_s3 = smov 16   ;;  %s13517_s26 = smov 12  }
  0x25   : > { %v1055_v28 = vunpack.i.l.bf16 %v1053_v24  ;;  %v1031_v30 = vmax.f32 %v1029_v21, %v1030_v22  ;;  %v1056_v31 = vunpack.i.h.bf16 %v1053_v24  ;;  %v1066_v32 = vsel %vm613_vm2, %v696_v16, 4286644096  ;;  %v700_v16 = vld [vmem:[%s13702_s23 + $0x18] sm:$0x1]  ;;  %s13518_s27 = smov 24   ;;  %s19136_s20 = sld [smem:[#allocation131_spill]] }
  0x26   : > { %3479 = vrot.lane.b32.xlu0 %v3471_v9, %s13514_s24  ;;  %v1079_v33 = vsel %vm613_vm2, %v697_v17, 4286644096  ;;  %v1019_v34 = vrot.slane %v1018_v25, 4  ;;  %v1044_v35 = vmax.f32 %v1042_v26, %v1043_v27  ;;  %v1068_v36 = vunpack.i.l.bf16 %v1066_v32  ;;  %s19193_s28 = sld [smem:[#allocation132_spill]]  ;;  %s19194_s1 = sld [smem:[#allocation133_spill]] }
  0x27   : > { %v1069_v37 = vunpack.i.h.bf16 %v1066_v32  ;;  %v1032_v38 = vrot.slane %v1031_v30, 4  ;;  %v1057_v39 = vmax.f32 %v1055_v28, %v1056_v31  ;;  %v1081_v40 = vunpack.i.l.bf16 %v1079_v33  ;;  %s13519_s22 = smov 48   ;;  %s12574_s21 = sshll.u32 %s19507_s30, 6 }
  0x28   : > { %v1082_v41 = vunpack.i.h.bf16 %v1079_v33  ;;  %v1020_v43 = vmax.f32 %v1018_v25, %v1019_v34  ;;  %v1045_v44 = vrot.slane %v1044_v35, 4  ;;  %v1092_v46 = vsel %vm613_vm2, %v698_v29, 4286644096  ;;  %v701_v25 = vld [vmem:[%s13702_s23 + $0x19] sm:$0x1]  ;;  %s18853_s2 = scalar_lea.vmem %s18920_s19, %s12574_s21 }
  0x29   : > { %v1070_v45 = vmax.f32 %v1068_v36, %v1069_v37  ;;  %v1033_v47 = vmax.f32 %v1031_v30, %v1032_v38  ;;  %v1058_v48 = vrot.slane %v1057_v39, 4  ;;  %v1094_v50 = vunpack.i.l.bf16 %v1092_v46  ;;  %v702_v34 = vld [vmem:[%s13702_s23 + $0x1a] sm:$0x1] }
  0x2a   : > { %3431 = vrot.lane.b32.xlu0 %v3381_v15, %s13515_s25  ;;  %v1083_v49 = vmax.f32 %v1081_v40, %v1082_v41  ;;  %v1021_v51 = vrot.slane %v1020_v43, 2  ;;  %v1046_v52 = vmax.f32 %v1044_v35, %v1045_v44  ;;  %v1095_v54 = vunpack.i.h.bf16 %v1092_v46  ;;  %v703_v35 = vld [vmem:[%s13702_s23 + $0x1b] sm:$0x1] }
  0x2b   : > { %v1071_v53 = vrot.slane %v1070_v45, 4  ;;  %v1034_v55 = vrot.slane %v1033_v47, 2  ;;  %v1059_v56 = vmax.f32 %v1057_v39, %v1058_v48  ;;  %v1105_v58 = vsel %vm613_vm2, %v699_v42, 4286644096  ;;  %v704_v48 = vld [vmem:[%s13702_s23 + $0x1c] sm:$0x1] }
  0x2c   : > { %v1084_v57 = vrot.slane %v1083_v49, 4  ;;  %v1022_v59 = vmax.f32 %v1020_v43, %v1021_v51  ;;  %v1047_v60 = vrot.slane %v1046_v52, 2  ;;  %v1096_v62 = vmax.f32 %v1094_v50, %v1095_v54 }
  0x2d   : > { %v1072_v61 = vmax.f32 %v1070_v45, %v1071_v53  ;;  %v1035_v63 = vmax.f32 %v1033_v47, %v1034_v55  ;;  %v1060_v1 = vrot.slane %v1059_v56, 2  ;;  %v1107_v3 = vunpack.i.l.bf16 %v1105_v58 }
  0x2e   : > { %v1085_v2 = vmax.f32 %v1083_v49, %v1084_v57  ;;  %v1023_v4 = vrot.slane %v1022_v59, 1  ;;  %v1048_v5 = vmax.f32 %v1046_v52, %v1047_v60  ;;  %v1097_v7 = vrot.slane %v1096_v62, 4  ;;  %v705_v57 = vld [vmem:[%s13702_s23 + $0x1d] sm:$0x1] }
  0x2f   : > { %v1073_v6 = vrot.slane %v1072_v61, 2  ;;  %v1036_v8 = vrot.slane %v1035_v63, 1  ;;  %v1061_v9 = vmax.f32 %v1059_v56, %v1060_v1  ;;  %v1108_v11 = vunpack.i.h.bf16 %v1105_v58 }
  0x30   : > { %v1086_v10 = vrot.slane %v1085_v2, 2  ;;  %v13722_v12 = vmax.f32 %v1022_v59, %v1023_v4  ;;  %v1049_v13 = vrot.slane %v1048_v5, 1  ;;  %v1098_v15 = vmax.f32 %v1096_v62, %v1097_v7 }
  0x31   : > { %v1074_v14 = vmax.f32 %v1072_v61, %v1073_v6  ;;  %v13725_v17 = vmax.f32 %v1035_v63, %v1036_v8  ;;  %v1062_v18 = vrot.slane %v1061_v9, 1  ;;  %v1109_v20 = vmax.f32 %v1107_v3, %v1108_v11  ;;  %v706_v3 = vld [vmem:[%s13702_s23 + $0x1e] sm:$0x1] }
  0x32   : > { %v1087_v19 = vmax.f32 %v1085_v2, %v1086_v10  ;;  %v1025_v21 = vpack.i.bf16 %v13722_v12, %v13722_v12  ;;  %v13729_v22 = vmax.f32 %v1048_v5, %v1049_v13  ;;  %v1099_v24 = vrot.slane %v1098_v15, 2  ;;  %v707_v13 = vld [vmem:[%s13702_s23 + $0x1f] sm:$0x1] }
  0x33   : > { %v1075_v23 = vrot.slane %v1074_v14, 1  ;;  %v1038_v26 = vpack.i.bf16 %v13725_v17, %v13725_v17  ;;  %v13734_v27 = vmax.f32 %v1061_v9, %v1062_v18  ;;  %v1110_v29 = vrot.slane %v1109_v20, 4 }
  0x34   : > { %v1088_v28 = vrot.slane %v1087_v19, 1  ;;  %v1051_v30 = vpack.i.bf16 %v13729_v22, %v13729_v22  ;;  %v1100_v32 = vmax.f32 %v1098_v15, %v1099_v24  ;;  %v1118_v33 = vsel %vm613_vm2, %v700_v16, 4286644096 }
  0x35   : > { %v13738_v31 = vmax.f32 %v1074_v14, %v1075_v23  ;;  %v1064_v36 = vpack.i.bf16 %v13734_v27, %v13734_v27  ;;  %v1111_v38 = vmax.f32 %v1109_v20, %v1110_v29  ;;  %v1120_v39 = vunpack.i.l.bf16 %v1118_v33 }
  0x36   : > { %v13745_v37 = vmax.f32 %v1087_v19, %v1088_v28  ;;  %v1101_v41 = vrot.slane %v1100_v32, 1  ;;  %v1121_v42 = vunpack.i.h.bf16 %v1118_v33  ;;  %v1131_v43 = vsel %vm613_vm2, %v701_v25, 4286644096 }
  0x37   : > { %v1077_v40 = vpack.i.bf16 %v13738_v31, %v13738_v31  ;;  %v1112_v45 = vrot.slane %v1111_v38, 2  ;;  %v1133_v46 = vunpack.i.l.bf16 %v1131_v43  ;;  %v1134_v47 = vunpack.i.h.bf16 %v1131_v43 }
  0x38   : > { %v1090_v44 = vpack.i.bf16 %v13745_v37, %v13745_v37  ;;  %v13753_v49 = vmax.f32 %v1100_v32, %v1101_v41  ;;  %v1122_v50 = vmax.f32 %v1120_v39, %v1121_v42  ;;  %v1144_v51 = vsel %vm613_vm2, %v702_v34, 4286644096  ;;  %v676_v37 = vld [vmem:[%s13702_s23] sm:$0x1] }
  0x39   : > { %v1157_v52 = vsel %vm613_vm2, %v703_v35, 4286644096  ;;  %v1113_v53 = vmax.f32 %v1111_v38, %v1112_v45  ;;  %v1135_v54 = vmax.f32 %v1133_v46, %v1134_v47  ;;  %v1146_v55 = vunpack.i.l.bf16 %v1144_v51 }
  0x3a   : > { %v1147_v56 = vunpack.i.h.bf16 %v1144_v51  ;;  %v1103_v58 = vpack.i.bf16 %v13753_v49, %v13753_v49  ;;  %v1123_v59 = vrot.slane %v1122_v50, 4  ;;  %v1159_v60 = vunpack.i.l.bf16 %v1157_v52 }
  0x3b   : > { %v1160_v61 = vunpack.i.h.bf16 %v1157_v52  ;;  %v1114_v62 = vrot.slane %v1113_v53, 1  ;;  %v1136_v63 = vrot.slane %v1135_v54, 4  ;;  %v1170_v2 = vsel %vm613_vm2, %v704_v48, 4286644096 }
  0x3c   : > { %v1148_v1 = vmax.f32 %v1146_v55, %v1147_v56  ;;  %v1124_v4 = vmax.f32 %v1122_v50, %v1123_v59  ;;  %v1172_v6 = vunpack.i.l.bf16 %v1170_v2  ;;  %v1173_v7 = vunpack.i.h.bf16 %v1170_v2 }
  0x3d   : > { %v1161_v5 = vmax.f32 %v1159_v60, %v1160_v61  ;;  %v13762_v8 = vmax.f32 %v1113_v53, %v1114_v62  ;;  %v1137_v9 = vmax.f32 %v1135_v54, %v1136_v63  ;;  %v1183_v11 = vsel %vm613_vm2, %v705_v57, 4286644096 }
  0x3e   : > { %v1149_v10 = vrot.slane %v1148_v1, 4  ;;  %v1125_v14 = vrot.slane %v1124_v4, 2  ;;  %v1174_v16 = vmax.f32 %v1172_v6, %v1173_v7  ;;  %v1185_v18 = vunpack.i.l.bf16 %v1183_v11 }
  0x3f   : > { %v1162_v15 = vrot.slane %v1161_v5, 4  ;;  %v1116_v19 = vpack.i.bf16 %v13762_v8, %v13762_v8  ;;  %v1138_v20 = vrot.slane %v1137_v9, 2  ;;  %v1186_v24 = vunpack.i.h.bf16 %v1183_v11 }
  0x40   : > { %v1150_v23 = vmax.f32 %v1148_v1, %v1149_v10  ;;  %v1126_v25 = vmax.f32 %v1124_v4, %v1125_v14  ;;  %v1175_v29 = vrot.slane %v1174_v16, 4  ;;  %v1196_v32 = vsel %vm613_vm2, %v706_v3, 4286644096 }
  0x41   : > { %v1163_v28 = vmax.f32 %v1161_v5, %v1162_v15  ;;  %v1139_v33 = vmax.f32 %v1137_v9, %v1138_v20  ;;  %v1187_v35 = vmax.f32 %v1185_v18, %v1186_v24  ;;  %v1198_v38 = vunpack.i.l.bf16 %v1196_v32 }
  0x42   : > { %v1151_v34 = vrot.slane %v1150_v23, 2  ;;  %v1127_v39 = vrot.slane %v1126_v25, 1  ;;  %v1176_v42 = vmax.f32 %v1174_v16, %v1175_v29  ;;  %v1199_v43 = vunpack.i.h.bf16 %v1196_v32 }
  0x43   : > { %v1164_v41 = vrot.slane %v1163_v28, 2  ;;  %v1140_v45 = vrot.slane %v1139_v33, 1  ;;  %v1188_v47 = vrot.slane %v1187_v35, 4  ;;  %v1209_v48 = vsel %vm613_vm2, %v707_v13, 4286644096 }
  0x44   : > { %v1152_v46 = vmax.f32 %v1150_v23, %v1151_v34  ;;  %v1128_v50 = vmax.f32 %v1126_v25, %v1127_v39  ;;  %v1177_v52 = vrot.slane %v1176_v42, 2  ;;  %v1200_v53 = vmax.f32 %v1198_v38, %v1199_v43 }
  0x45   : > { %v1165_v51 = vmax.f32 %v1163_v28, %v1164_v41  ;;  %v1141_v54 = vmax.f32 %v1139_v33, %v1140_v45  ;;  %v1189_v56 = vmax.f32 %v1187_v35, %v1188_v47  ;;  %v1211_v57 = vunpack.i.l.bf16 %v1209_v48 }
  0x46   : > { %v1153_v55 = vrot.slane %v1152_v46, 1  ;;  %v1129_v59 = vpack.i.bf16 %v1128_v50, %v1128_v50  ;;  %v1178_v61 = vmax.f32 %v1176_v42, %v1177_v52  ;;  %v1201_v62 = vrot.slane %v1200_v53, 4 }
  0x47   : > { %v1166_v60 = vrot.slane %v1165_v51, 1  ;;  %v1142_v63 = vpack.i.bf16 %v1141_v54, %v1141_v54  ;;  %v1190_v2 = vrot.slane %v1189_v56, 2  ;;  %v1212_v3 = vunpack.i.h.bf16 %v1209_v48  ;;  %v677_v48 = vld [vmem:[%s13702_s23 + $0x1] sm:$0x1] }
  0x48   : > { %v1154_v1 = vmax.f32 %v1152_v46, %v1153_v55  ;;  %v1179_v5 = vrot.slane %v1178_v61, 1  ;;  %v1202_v6 = vmax.f32 %v1200_v53, %v1201_v62  ;;  %v2527_v7 = vsel %vm2469_vm4, %v1025_v21, 4286644096 }
  0x49   : > { %v1167_v4 = vmax.f32 %v1165_v51, %v1166_v60  ;;  %v1191_v10 = vmax.f32 %v1189_v56, %v1190_v2  ;;  %v1213_v11 = vmax.f32 %v1211_v57, %v1212_v3  ;;  %v2530_v13 = vsel %vm2469_vm4, %v1129_v59, 4286644096  ;;  %v678_v57 = vld [vmem:[%s13702_s23 + $0x2] sm:$0x1] }
  0x4a   : > { %v1155_v9 = vpack.i.bf16 %v1154_v1, %v1154_v1  ;;  %v1180_v15 = vmax.f32 %v1178_v61, %v1179_v5  ;;  %v1203_v16 = vrot.slane %v1202_v6, 2  ;;  %v13775_v18 = vmax.bf16 %v2530_v13, %v2527_v7 }
  0x4b   : > { %v1168_v14 = vpack.i.bf16 %v1167_v4, %v1167_v4  ;;  %v1192_v20 = vrot.slane %v1191_v10, 1  ;;  %v1214_v23 = vrot.slane %v1213_v11, 4  ;;  %v2534_v24 = vsel %vm2469_vm4, %v1038_v26, 4286644096 }
  0x4c   : > { %19026 = vst [vmem:[#allocation4_spill] sm:$0xff] %v13775_v18  ;;  %v2537_v12 = vsel %vm2469_vm4, %v1142_v63, 4286644096  ;;  %v1181_v21 = vpack.i.bf16 %v1180_v15, %v1180_v15  ;;  %v1204_v25 = vmax.f32 %v1202_v6, %v1203_v16  ;;  %v2541_v29 = vsel %vm2469_vm4, %v1051_v30, 4286644096 }
  0x4d   : > { %v13782_v28 = vmax.bf16 %v2537_v12, %v2534_v24  ;;  %v1193_v32 = vmax.f32 %v1191_v10, %v1192_v20  ;;  %v1215_v33 = vmax.f32 %v1213_v11, %v1214_v23  ;;  %v2544_v34 = vsel %vm2469_vm4, %v1155_v9, 4286644096  ;;  %v679_v10 = vld [vmem:[%s13702_s23 + $0x3] sm:$0x1] }
  0x4e   : > { %v2548_v17 = vsel %vm2469_vm4, %v1064_v36, 4286644096  ;;  %v1205_v26 = vrot.slane %v1204_v25, 1  ;;  %v13793_v35 = vmax.bf16 %v2544_v34, %v2541_v29  ;;  %v2551_v38 = vsel %vm2469_vm4, %v1168_v14, 4286644096 }
  0x4f   : > { %19027 = vst [vmem:[#allocation5_spill] sm:$0xff] %v13782_v28  ;;  %v2555_v22 = vsel %vm2469_vm4, %v1077_v40, 4286644096  ;;  %v1194_v30 = vpack.i.bf16 %v1193_v32, %v1193_v32  ;;  %v1216_v39 = vrot.slane %v1215_v33, 2  ;;  %v13800_v41 = vmax.bf16 %v2551_v38, %v2548_v17 }
  0x50   : > { %19028 = vst [vmem:[#allocation6_spill] sm:$0xff] %v13793_v35  ;;  %v2558_v27 = vsel %vm2469_vm4, %v1181_v21, 4286644096  ;;  %v1206_v36 = vmax.f32 %v1204_v25, %v1205_v26  ;;  %v2562_v31 = vsel %vm2469_vm4, %v1090_v44, 4286644096  ;;  %v11823_v47 = vcombine.low %v13775_v18, %v13775_v18 }
  0x51   : > { %19029 = vst [vmem:[#allocation7_spill] sm:$0xff] %v13800_v41  ;;  %v13803_v42 = vmax.bf16 %v2558_v27, %v2555_v22  ;;  %v2569_v40 = vsel %vm2469_vm4, %v1103_v58, 4286644096  ;;  %v1217_v43 = vmax.f32 %v1215_v33, %v1216_v39  ;;  %v2565_v45 = vsel %vm2469_vm4, %v1194_v30, 4286644096 }
  0x52   : > { %v2576_v46 = vsel %vm2469_vm4, %v1116_v19, 4286644096  ;;  %v1207_v44 = vpack.i.bf16 %v1206_v36, %v1206_v36  ;;  %v13822_v50 = vmax.bf16 %v2565_v45, %v2562_v31  ;;  %v11824_v49 = vcombine.low %v13782_v28, %v13782_v28  ;;  %v680_v21 = vld [vmem:[%s13702_s23 + $0x4] sm:$0x1]  ;;  %v681_v25 = vld [vmem:[%s13702_s23 + $0x5] sm:$0x1] }
  0x53   : > { %19030 = vst [vmem:[#allocation8_spill] sm:$0xff] %v13803_v42  ;;  %v11825_v58 = vcombine.low %v13793_v35, %v13793_v35  ;;  %v1218_v51 = vrot.slane %v1217_v43, 1  ;;  %v11826_v8 = vcombine.low %v13800_v41, %v13800_v41  ;;  %v11827_v19 = vcombine.low %v13803_v42, %v13803_v42 }
  0x54   : > { %19031 = vst [vmem:[#allocation9_spill] sm:$0xff] %v13822_v50  ;;  %v3118_v52 = vunpack.c.l.b16 %v11823_v47  ;;  %v2572_v53 = vsel %vm2469_vm4, %v1207_v44, 4286644096  ;;  %v11828_v54 = vcombine.low %v13822_v50, %v13822_v50  ;;  %v3119_v55 = vunpack.c.l.b16 %v11824_v49 }
  0x55   : > { %v3120_v56 = vunpack.c.l.b16 %v11825_v58  ;;  %v1219_v59 = vmax.f32 %v1217_v43, %v1218_v51  ;;  %v13836_v60 = vmax.bf16 %v2572_v53, %v2569_v40  ;;  %v3121_v61 = vunpack.c.l.b16 %v11826_v8 }
  0x56   : > { %v3122_v62 = vunpack.c.l.b16 %v11827_v19  ;;  %v3123_v63 = vunpack.c.l.b16 %v11828_v54  ;;  %v3186_v1 = vsel %vm3174_vm5, %v3119_v55, %v3118_v52  ;;  %v806_v2 = vsel %vm613_vm2, %v676_v37, 4286644096  ;;  %v682_v37 = vld [vmem:[%s13702_s23 + $0x6] sm:$0x1] }
  0x57   : > { %19032 = vst [vmem:[#allocation10_spill] sm:$0xff] %v13836_v60  ;;  %v819_v3 = vsel %vm613_vm2, %v677_v48, 4286644096  ;;  %v1220_v4 = vpack.i.bf16 %v1219_v59, %v1219_v59  ;;  %v11829_v5 = vcombine.low %v13836_v60, %v13836_v60  ;;  %v3187_v6 = vsel %vm3176_vm6, %v3120_v56, %v3186_v1 }
  0x58   : > { %v808_v7 = vunpack.i.l.bf16 %v806_v2  ;;  %v3188_v9 = vsel %vm3178_vm7, %v3121_v61, %v3187_v6  ;;  %v809_v11 = vunpack.i.h.bf16 %v806_v2  ;;  %v821_v13 = vunpack.i.l.bf16 %v819_v3 }
  0x59   : > { %v822_v14 = vunpack.i.h.bf16 %v819_v3  ;;  %v2579_v15 = vsel %vm2469_vm4, %v1220_v4, 4286644096  ;;  %v3124_v16 = vunpack.c.l.b16 %v11829_v5  ;;  %v3189_v20 = vsel %vm3180_vm8, %v3122_v62, %v3188_v9 }
  0x5a   : > { %v832_v23 = vsel %vm613_vm2, %v678_v57, 4286644096  ;;  %v13849_v24 = vmax.bf16 %v2579_v15, %v2576_v46  ;;  %v3190_v12 = vsel %vm3182_vm9, %v3123_v63, %v3189_v20  ;;  %v810_v29 = vmax.f32 %v808_v7, %v809_v11  ;;  %v683_v57 = vld [vmem:[%s13702_s23 + $0x7] sm:$0x1] }
  0x5b   : > { %v823_v32 = vmax.f32 %v821_v13, %v822_v14  ;;  %v3230_v33 = vpack.c.b16 %v3190_v12, %v3190_v12  ;;  %v834_v34 = vunpack.i.l.bf16 %v832_v23  ;;  %v835_v17 = vunpack.i.h.bf16 %v832_v23  ;;  %v684_v23 = vld [vmem:[%s13702_s23 + $0x8] sm:$0x1] }
  0x5c   : > { %19033 = vst [vmem:[#allocation11_spill] sm:$0xff] %v13849_v24  ;;  %v845_v26 = vsel %vm613_vm2, %v679_v10, 4286644096  ;;  %v11830_v38 = vcombine.low %v13849_v24, %v13849_v24  ;;  %v811_v22 = vrot.slane %v810_v29, 4  ;;  %v858_v31 = vsel %vm613_vm2, %v680_v21, 4286644096 }
  0x5d   : > { %v824_v30 = vrot.slane %v823_v32, 4  ;;  %v847_v39 = vunpack.i.l.bf16 %v845_v26  ;;  %3264 = vst.msk [vmem:[#allocation2 + $0x18] sm:$0xe] %vm3261_vm10, %v3230_v33  ;;  %v836_v27 = vmax.f32 %v834_v34, %v835_v17  ;;  %v848_v36 = vunpack.i.h.bf16 %v845_v26 }
  0x5e   : > { %v871_v40 = vsel %vm613_vm2, %v681_v25, 4286644096  ;;  %v3125_v43 = vunpack.c.l.b16 %v11830_v38  ;;  %v812_v45 = vmax.f32 %v810_v29, %v811_v22  ;;  %v860_v47 = vunpack.i.l.bf16 %v858_v31 }
  0x5f   : > { %v825_v46 = vmax.f32 %v823_v32, %v824_v30  ;;  %v837_v48 = vrot.slane %v836_v27, 4  ;;  %v849_v44 = vmax.f32 %v847_v39, %v848_v36  ;;  %v861_v49 = vunpack.i.h.bf16 %v858_v31 }
  0x60   : > { %v873_v58 = vunpack.i.l.bf16 %v871_v40  ;;  %v3191_v51 = vsel %vm3184_vm11, %v3125_v43, %v3124_v16  ;;  %v813_v8 = vrot.slane %v812_v45, 2  ;;  %v874_v52 = vunpack.i.h.bf16 %v871_v40 }
  0x61   : > { %v826_v19 = vrot.slane %v825_v46, 2  ;;  %v3231_v53 = vpack.c.b16 %v3191_v51, %v3191_v51  ;;  %v838_v54 = vmax.f32 %v836_v27, %v837_v48  ;;  %v850_v55 = vrot.slane %v849_v44, 4 }
  0x62   : > { %v862_v56 = vmax.f32 %v860_v47, %v861_v49  ;;  %v814_v59 = vmax.f32 %v812_v45, %v813_v8  ;;  %v875_v62 = vmax.f32 %v873_v58, %v874_v52  ;;  %v884_v63 = vsel %vm613_vm2, %v682_v37, 4286644096  ;;  %v685_v45 = vld [vmem:[%s13702_s23 + $0x9] sm:$0x1] }
  0x63   : > { %v827_v61 = vmax.f32 %v825_v46, %v826_v19  ;;  %3265 = vst.msk [vmem:[#allocation2 + $0x1c] sm:$0x1] %vm613_vm2, %v3231_v53  ;;  %v839_v1 = vrot.slane %v838_v54, 2  ;;  %v851_v2 = vmax.f32 %v849_v44, %v850_v55  ;;  %v886_v4 = vunpack.i.l.bf16 %v884_v63  ;;  %v686_v46 = vld [vmem:[%s13702_s23 + $0xa] sm:$0x1] }
  0x64   : > { %v863_v3 = vrot.slane %v862_v56, 4  ;;  %v815_v5 = vrot.slane %v814_v59, 1  ;;  %v876_v7 = vrot.slane %v875_v62, 4  ;;  %v887_v9 = vunpack.i.h.bf16 %v884_v63  ;;  %v13871_v32 = vld [vmem:[#allocation2 + $0x18] sm:$0xe] }
  0x65   : > { %v828_v6 = vrot.slane %v827_v61, 1  ;;  %v840_v10 = vmax.f32 %v838_v54, %v839_v1  ;;  %v852_v11 = vrot.slane %v851_v2, 2  ;;  %v897_v14 = vsel %vm613_vm2, %v683_v57, 4286644096  ;;  %v687_v44 = vld [vmem:[%s13702_s23 + $0xb] sm:$0x1] }
  0x66   : > { %v864_v13 = vmax.f32 %v862_v56, %v863_v3  ;;  %v13866_v15 = vmax.f32 %v814_v59, %v815_v5  ;;  %v877_v16 = vmax.f32 %v875_v62, %v876_v7  ;;  %v888_v20 = vmax.f32 %v886_v4, %v887_v9 }
  0x67   : > { %v13869_v12 = vmax.f32 %v827_v61, %v828_v6  ;;  %v841_v21 = vrot.slane %v840_v10, 1  ;;  %v853_v25 = vmax.f32 %v851_v2, %v852_v11  ;;  %v899_v17 = vunpack.i.l.bf16 %v897_v14  ;;  %v688_v2 = vld [vmem:[%s13702_s23 + $0xc] sm:$0x1] }
  0x68   : > { %v865_v29 = vrot.slane %v864_v13, 2  ;;  %v878_v33 = vrot.slane %v877_v16, 2  ;;  %v889_v34 = vrot.slane %v888_v20, 4  ;;  %v900_v30 = vunpack.i.h.bf16 %v897_v14 }
  0x69   : > { %v13873_v26 = vmax.f32 %v840_v10, %v841_v21  ;;  %v854_v38 = vrot.slane %v853_v25, 1  ;;  %v817_v27 = vpack.i.bf16 %v13866_v15, %v13866_v15  ;;  %v910_v40 = vsel %vm613_vm2, %v684_v23, 4286644096  ;;  %v689_v23 = vld [vmem:[%s13702_s23 + $0xd] sm:$0x1] }
  0x6a   : > { %v866_v22 = vmax.f32 %v864_v13, %v865_v29  ;;  %v3305_v39 = vld [vmem:[#allocation2 + $0x1c] sm:$0x3]  ;;  %v879_v36 = vmax.f32 %v877_v16, %v878_v33  ;;  %v890_v31 = vmax.f32 %v888_v20, %v889_v34  ;;  %v830_v47 = vpack.i.bf16 %v13869_v12, %v13869_v12  ;;  %v690_v21 = vld [vmem:[%s13702_s23 + $0xe] sm:$0x1] }
  0x6b   : > { %v11897_v43 = vcombine.low %v13871_v32, %v3305_v39  ;;  %v843_v37 = vpack.i.bf16 %v13873_v26, %v13873_v26  ;;  %v13885_v48 = vmax.f32 %v853_v25, %v854_v38  ;;  %v901_v8 = vmax.f32 %v899_v17, %v900_v30 }
  0x6c   : > { %v867_v49 = vrot.slane %v866_v22, 1  ;;  %v880_v58 = vrot.slane %v879_v36, 1  ;;  %v891_v51 = vrot.slane %v890_v31, 2  ;;  %v912_v53 = vunpack.i.l.bf16 %v910_v40 }
  0x6d   : > { %v3473_v19 = vrot.slane %v11897_v43, 1  ;;  %v856_v52 = vpack.i.bf16 %v13885_v48, %v13885_v48  ;;  %v913_v54 = vunpack.i.h.bf16 %v910_v40  ;;  %v902_v59 = vrot.slane %v901_v8, 4 }
  0x6e   : > { %v13890_v55 = vmax.f32 %v866_v22, %v867_v49  ;;  %v13892_v56 = vmax.f32 %v879_v36, %v880_v58  ;;  %v892_v57 = vmax.f32 %v890_v31, %v891_v51  ;;  %v923_v62 = vsel %vm613_vm2, %v685_v45, 4286644096 }
  0x6f   : > { %3483 = vrot.lane.b32.xlu0 %v3473_v19, %s13514_s24  ;;  %v914_v61 = vmax.f32 %v912_v53, %v913_v54  ;;  %v936_v63 = vsel %vm613_vm2, %v686_v46, 4286644096  ;;  %v949_v1 = vsel %vm613_vm2, %v687_v44, 4286644096  ;;  %v903_v6 = vmax.f32 %v901_v8, %v902_v59  ;;  %v691_v59 = vld [vmem:[%s13702_s23 + $0xf] sm:$0x1] }
  0x70   : > { %v869_v3 = vpack.i.bf16 %v13890_v55, %v13890_v55  ;;  %v882_v4 = vpack.i.bf16 %v13892_v56, %v13892_v56  ;;  %v893_v5 = vrot.slane %v892_v57, 1  ;;  %v925_v9 = vunpack.i.l.bf16 %v923_v62 }
  0x71   : > { %v915_v7 = vrot.slane %v914_v61, 4  ;;  %v926_v10 = vunpack.i.h.bf16 %v923_v62  ;;  %v938_v11 = vunpack.i.l.bf16 %v936_v63  ;;  %v904_v14 = vrot.slane %v903_v6, 2 }
  0x72   : > { %v13903_v13 = vmax.f32 %v892_v57, %v893_v5  ;;  %v939_v16 = vunpack.i.h.bf16 %v936_v63  ;;  %v951_v20 = vunpack.i.l.bf16 %v949_v1  ;;  %v952_v33 = vunpack.i.h.bf16 %v949_v1 }
  0x73   : > { %v916_v25 = vmax.f32 %v914_v61, %v915_v7  ;;  %v927_v29 = vmax.f32 %v925_v9, %v926_v10  ;;  %v962_v34 = vsel %vm613_vm2, %v688_v2, 4286644096  ;;  %v905_v38 = vmax.f32 %v903_v6, %v904_v14 }
  0x74   : > { %v895_v17 = vpack.i.bf16 %v13903_v13, %v13903_v13  ;;  %v940_v22 = vmax.f32 %v938_v11, %v939_v16  ;;  %v964_v30 = vunpack.i.l.bf16 %v962_v34  ;;  %v953_v31 = vmax.f32 %v951_v20, %v952_v33 }
  0x75   : > { %v917_v39 = vrot.slane %v916_v25, 2  ;;  %v928_v36 = vrot.slane %v927_v29, 4  ;;  %v965_v40 = vunpack.i.h.bf16 %v962_v34  ;;  %v906_v43 = vrot.slane %v905_v38, 1 }
  0x76   : > { %v941_v45 = vrot.slane %v940_v22, 4  ;;  %v975_v46 = vsel %vm613_vm2, %v689_v23, 4286644096  ;;  %v988_v44 = vsel %vm613_vm2, %v690_v21, 4286644096  ;;  %v954_v51 = vrot.slane %v953_v31, 4 }
  0x77   : > { %v918_v49 = vmax.f32 %v916_v25, %v917_v39  ;;  %v929_v58 = vmax.f32 %v927_v29, %v928_v36  ;;  %v966_v8 = vmax.f32 %v964_v30, %v965_v40  ;;  %v13912_v19 = vmax.f32 %v905_v38, %v906_v43 }
  0x78   : > { %v942_v53 = vmax.f32 %v940_v22, %v941_v45  ;;  %v977_v54 = vunpack.i.l.bf16 %v975_v46  ;;  %v978_v57 = vunpack.i.h.bf16 %v975_v46  ;;  %v955_v63 = vmax.f32 %v953_v31, %v954_v51 }
  0x79   : > { %v919_v61 = vrot.slane %v918_v49, 1  ;;  %v930_v62 = vrot.slane %v929_v58, 2  ;;  %v967_v1 = vrot.slane %v966_v8, 4  ;;  %v908_v2 = vpack.i.bf16 %v13912_v19, %v13912_v19 }
  0x7a   : > { %v943_v5 = vrot.slane %v942_v53, 2  ;;  %v979_v6 = vmax.f32 %v977_v54, %v978_v57  ;;  %v990_v7 = vunpack.i.l.bf16 %v988_v44  ;;  %v956_v11 = vrot.slane %v955_v63, 2 }
  0x7b   : > { %v920_v9 = vmax.f32 %v918_v49, %v919_v61  ;;  %v931_v10 = vmax.f32 %v929_v58, %v930_v62  ;;  %v968_v14 = vmax.f32 %v966_v8, %v967_v1  ;;  %v991_v23 = vunpack.i.h.bf16 %v988_v44 }
  0x7c   : > { %v944_v16 = vmax.f32 %v942_v53, %v943_v5  ;;  %v980_v20 = vrot.slane %v979_v6, 4  ;;  %v1001_v21 = vsel %vm613_vm2, %v691_v59, 4286644096  ;;  %v957_v33 = vmax.f32 %v955_v63, %v956_v11 }
  0x7d   : > { %v921_v25 = vpack.i.bf16 %v920_v9, %v920_v9  ;;  %v932_v29 = vrot.slane %v931_v10, 1  ;;  %v969_v34 = vrot.slane %v968_v14, 2  ;;  %v992_v30 = vmax.f32 %v990_v7, %v991_v23 }
  0x7e   : > { %v945_v38 = vrot.slane %v944_v16, 1  ;;  %v981_v22 = vmax.f32 %v979_v6, %v980_v20  ;;  %v1003_v39 = vunpack.i.l.bf16 %v1001_v21  ;;  %v958_v31 = vrot.slane %v957_v33, 1 }
  0x7f   : > { %v933_v36 = vmax.f32 %v931_v10, %v932_v29  ;;  %v970_v40 = vmax.f32 %v968_v14, %v969_v34  ;;  %v1004_v43 = vunpack.i.h.bf16 %v1001_v21  ;;  %v993_v49 = vrot.slane %v992_v30, 4 }
  0x80   : > { %v946_v45 = vmax.f32 %v944_v16, %v945_v38  ;;  %v982_v46 = vrot.slane %v981_v22, 2  ;;  %v2471_v44 = vsel %vm2469_vm4, %v817_v27, 4286644096  ;;  %v959_v51 = vmax.f32 %v957_v33, %v958_v31 }
  0x81   : > { %v934_v58 = vpack.i.bf16 %v933_v36, %v933_v36  ;;  %v971_v8 = vrot.slane %v970_v40, 1  ;;  %v1005_v53 = vmax.f32 %v1003_v39, %v1004_v43  ;;  %v994_v59 = vmax.f32 %v992_v30, %v993_v49 }
  0x82   : > { %v947_v54 = vpack.i.bf16 %v946_v45, %v946_v45  ;;  %v983_v57 = vmax.f32 %v981_v22, %v982_v46  ;;  %v2474_v61 = vsel %vm2469_vm4, %v921_v25, 4286644096  ;;  %v960_v62 = vpack.i.bf16 %v959_v51, %v959_v51 }
  0x83   : > { %v972_v63 = vmax.f32 %v970_v40, %v971_v8  ;;  %v1006_v1 = vrot.slane %v1005_v53, 4  ;;  %v13923_v5 = vmax.bf16 %v2474_v61, %v2471_v44  ;;  %v995_v7 = vrot.slane %v994_v59, 2  ;;  %v725_v44 = vld [vmem:[%s13702_s23 + $0x31] sm:$0x1] }
  0x84   : > { %v984_v6 = vrot.slane %v983_v57, 1  ;;  %v2478_v15 = vsel %vm2469_vm4, %v830_v47, 4286644096  ;;  %v2481_v27 = vsel %vm2469_vm4, %v934_v58, 4286644096  ;;  %vm639_vm12 = vcmask 60416  }
  0x85   : > { %19034 = vst [vmem:[#allocation12_spill] sm:$0xff] %v13923_v5  ;;  %v973_v9 = vpack.i.bf16 %v972_v63, %v972_v63  ;;  %v1007_v10 = vmax.f32 %v1005_v53, %v1006_v1  ;;  %v13930_v11 = vmax.bf16 %v2481_v27, %v2478_v15  ;;  %v2485_v14 = vsel %vm2469_vm4, %v843_v37, 4286644096  ;;  %v726_v63 = vld [vmem:[%s13702_s23 + $0x32] sm:$0x1] }
  0x86   : > { %v985_v16 = vmax.f32 %v983_v57, %v984_v6  ;;  %v996_v20 = vmax.f32 %v994_v59, %v995_v7  ;;  %v2488_v23 = vsel %vm2469_vm4, %v947_v54, 4286644096  ;;  %v2492_v12 = vsel %vm2469_vm4, %v856_v52, 4286644096  ;;  %v727_v1 = vld [vmem:[%s13702_s23 + $0x33] sm:$0x1] }
  0x87   : > { %19035 = vst [vmem:[#allocation13_spill] sm:$0xff] %v13930_v11  ;;  %v1008_v47 = vrot.slane %v1007_v10, 2  ;;  %v13941_v21 = vmax.bf16 %v2488_v23, %v2485_v14  ;;  %v2495_v25 = vsel %vm2469_vm4, %v960_v62, 4286644096  ;;  %v2499_v26 = vsel %vm2469_vm4, %v869_v3, 4286644096 }
  0x88   : > { %v986_v37 = vpack.i.bf16 %v985_v16, %v985_v16  ;;  %v997_v29 = vrot.slane %v996_v20, 1  ;;  %v13948_v33 = vmax.bf16 %v2495_v25, %v2492_v12  ;;  %v2502_v34 = vsel %vm2469_vm4, %v973_v9, 4286644096 }
  0x89   : > { %19036 = vst [vmem:[#allocation14_spill] sm:$0xff] %v13941_v21  ;;  %v1009_v48 = vmax.f32 %v1007_v10, %v1008_v47  ;;  %v13951_v38 = vmax.bf16 %v2502_v34, %v2499_v26  ;;  %v2506_v52 = vsel %vm2469_vm4, %v882_v4, 4286644096  ;;  %v2513_v55 = vsel %vm2469_vm4, %v895_v17, 4286644096 }
  0x8a   : > { %19037 = vst [vmem:[#allocation15_spill] sm:$0xff] %v13948_v33  ;;  %v998_v3 = vmax.f32 %v996_v20, %v997_v29  ;;  %v2509_v22 = vsel %vm2469_vm4, %v986_v37, 4286644096  ;;  %v2520_v30 = vsel %vm2469_vm4, %v908_v2, 4286644096  ;;  %v11815_v39 = vcombine.low %v13923_v5, %v13923_v5 }
  0x8b   : > { %19038 = vst [vmem:[#allocation16_spill] sm:$0xff] %v13951_v38  ;;  %v1010_v56 = vrot.slane %v1009_v48, 1  ;;  %v13968_v36 = vmax.bf16 %v2509_v22, %v2506_v52  ;;  %v11816_v4 = vcombine.low %v13930_v11, %v13930_v11  ;;  %v11817_v13 = vcombine.low %v13941_v21, %v13941_v21  ;;  %v724_v17 = vld [vmem:[%s13702_s23 + $0x30] sm:$0x1]  ;;  %v728_v26 = vld [vmem:[%s13702_s23 + $0x34] sm:$0x1] }
  0x8c   : > { %v999_v31 = vpack.i.bf16 %v998_v3, %v998_v3  ;;  %v11818_v19 = vcombine.low %v13948_v33, %v13948_v33  ;;  %v11819_v2 = vcombine.low %v13951_v38, %v13951_v38  ;;  %v3110_v40 = vunpack.c.l.b16 %v11815_v39  ;;  %v729_v3 = vld [vmem:[%s13702_s23 + $0x35] sm:$0x1] }
  0x8d   : > { %19039 = vst [vmem:[#allocation17_spill] sm:$0xff] %v13968_v36  ;;  %v1011_v43 = vmax.f32 %v1009_v48, %v1010_v56  ;;  %v11820_v45 = vcombine.low %v13968_v36, %v13968_v36  ;;  %v3111_v46 = vunpack.c.l.b16 %v11816_v4  ;;  %v3112_v49 = vunpack.c.l.b16 %v11817_v13 }
  0x8e   : > { %v2516_v58 = vsel %vm2469_vm4, %v999_v31, 4286644096  ;;  %v3113_v51 = vunpack.c.l.b16 %v11818_v19  ;;  %v3114_v8 = vunpack.c.l.b16 %v11819_v2  ;;  %v1430_v53 = vsel %vm613_vm2, %v724_v17, 4286644096 }
  0x8f   : > { %v1012_v54 = vpack.i.bf16 %v1011_v43, %v1011_v43  ;;  %v13984_v57 = vmax.bf16 %v2516_v58, %v2513_v55  ;;  %v3115_v59 = vunpack.c.l.b16 %v11820_v45  ;;  %v3175_v61 = vsel %vm3174_vm5, %v3111_v46, %v3110_v40  ;;  %v730_v46 = vld [vmem:[%s13702_s23 + $0x36] sm:$0x1] }
  0x90   : > { %v3177_v62 = vsel %vm3176_vm6, %v3112_v49, %v3175_v61  ;;  %v1432_v6 = vunpack.i.l.bf16 %v1430_v53  ;;  %v1433_v7 = vunpack.i.h.bf16 %v1430_v53  ;;  %v1443_v15 = vsel %vm613_vm2, %v725_v44, 4286644096 }
  0x91   : > { %19040 = vst [vmem:[#allocation18_spill] sm:$0xff] %v13984_v57  ;;  %v2523_v27 = vsel %vm2469_vm4, %v1012_v54, 4286644096  ;;  %v11821_v9 = vcombine.low %v13984_v57, %v13984_v57  ;;  %v3179_v10 = vsel %vm3178_vm7, %v3113_v51, %v3177_v62  ;;  %v1445_v14 = vunpack.i.l.bf16 %v1443_v15 }
  0x92   : > { %v13995_v16 = vmax.bf16 %v2523_v27, %v2520_v30  ;;  %v3181_v20 = vsel %vm3180_vm8, %v3114_v8, %v3179_v10  ;;  %v1434_v23 = vmax.f32 %v1432_v6, %v1433_v7  ;;  %v1446_v12 = vunpack.i.h.bf16 %v1443_v15 }
  0x93   : > { %v3116_v47 = vunpack.c.l.b16 %v11821_v9  ;;  %v3183_v25 = vsel %vm3182_vm9, %v3115_v59, %v3181_v20  ;;  %v1456_v37 = vsel %vm613_vm2, %v726_v63, 4286644096  ;;  %v1469_v29 = vsel %vm613_vm2, %v727_v1, 4286644096  ;;  %v731_v1 = vld [vmem:[%s13702_s23 + $0x37] sm:$0x1] }
  0x94   : > { %19041 = vst [vmem:[#allocation19_spill] sm:$0xff] %v13995_v16  ;;  %v11822_v34 = vcombine.low %v13995_v16, %v13995_v16  ;;  %v3228_v48 = vpack.c.b16 %v3183_v25, %v3183_v25  ;;  %v1435_v52 = vrot.slane %v1434_v23, 4  ;;  %v1447_v55 = vmax.f32 %v1445_v14, %v1446_v12 }
  0x95   : > { %v1458_v22 = vunpack.i.l.bf16 %v1456_v37  ;;  %v1459_v30 = vunpack.i.h.bf16 %v1456_v37  ;;  %v1471_v39 = vunpack.i.l.bf16 %v1469_v29  ;;  %v1472_v56 = vunpack.i.h.bf16 %v1469_v29 }
  0x96   : > { %v3117_v4 = vunpack.c.l.b16 %v11822_v34  ;;  %3262 = vst.msk [vmem:[#allocation2 + $0x10] sm:$0xe] %vm3261_vm10, %v3228_v48  ;;  %v1436_v13 = vmax.f32 %v1434_v23, %v1435_v52  ;;  %v1448_v17 = vrot.slane %v1447_v55, 4  ;;  %v1482_v31 = vsel %vm613_vm2, %v728_v26, 4286644096 }
  0x97   : > { %v1460_v19 = vmax.f32 %v1458_v22, %v1459_v30  ;;  %v1473_v2 = vmax.f32 %v1471_v39, %v1472_v56  ;;  %v1484_v40 = vunpack.i.l.bf16 %v1482_v31  ;;  %v1485_v43 = vunpack.i.h.bf16 %v1482_v31 }
  0x98   : > { %v3185_v45 = vsel %vm3184_vm11, %v3117_v4, %v3116_v47  ;;  %v1437_v49 = vrot.slane %v1436_v13, 2  ;;  %v1449_v44 = vmax.f32 %v1447_v55, %v1448_v17  ;;  %v1495_v58 = vsel %vm613_vm2, %v729_v3, 4286644096 }
  0x99   : > { %v3229_v51 = vpack.c.b16 %v3185_v45, %v3185_v45  ;;  %v1461_v8 = vrot.slane %v1460_v19, 4  ;;  %v1474_v53 = vrot.slane %v1473_v2, 4  ;;  %v1486_v54 = vmax.f32 %v1484_v40, %v1485_v43 }
  0x9a   : > { %v1438_v59 = vmax.f32 %v1436_v13, %v1437_v49  ;;  %v1450_v61 = vrot.slane %v1449_v44, 2  ;;  %v1497_v62 = vunpack.i.l.bf16 %v1495_v58  ;;  %v1498_v63 = vunpack.i.h.bf16 %v1495_v58  ;;  %v733_v58 = vld [vmem:[%s13702_s23 + $0x39] sm:$0x1] }
  0x9b   : > { %3263 = vst.msk [vmem:[#allocation2 + $0x14] sm:$0x1] %vm613_vm2, %v3229_v51  ;;  %v1462_v6 = vmax.f32 %v1460_v19, %v1461_v8  ;;  %v1475_v7 = vmax.f32 %v1473_v2, %v1474_v53  ;;  %v1487_v15 = vrot.slane %v1486_v54, 4  ;;  %v1508_v27 = vsel %vm613_vm2, %v730_v46, 4286644096 }
  0x9c   : > { %v1439_v9 = vrot.slane %v1438_v59, 1  ;;  %v1451_v10 = vmax.f32 %v1449_v44, %v1450_v61  ;;  %v1499_v14 = vmax.f32 %v1497_v62, %v1498_v63  ;;  %v1510_v20 = vunpack.i.l.bf16 %v1508_v27  ;;  %v732_v44 = vld [vmem:[%s13702_s23 + $0x38] sm:$0x1] }
  0x9d   : > { %v1463_v23 = vrot.slane %v1462_v6, 2  ;;  %v1476_v12 = vrot.slane %v1475_v7, 2  ;;  %v1488_v47 = vmax.f32 %v1486_v54, %v1487_v15  ;;  %v1511_v25 = vunpack.i.h.bf16 %v1508_v27  ;;  %v3296_v22 = vld [vmem:[#allocation2 + $0x10] sm:$0xe] }
  0x9e   : > { %v14013_v26 = vmax.f32 %v1438_v59, %v1439_v9  ;;  %v1452_v37 = vrot.slane %v1451_v10, 1  ;;  %v1500_v29 = vrot.slane %v1499_v14, 4  ;;  %v1521_v34 = vsel %vm613_vm2, %v731_v1, 4286644096  ;;  %v734_v1 = vld [vmem:[%s13702_s23 + $0x3a] sm:$0x1] }
  0x9f   : > { %v1464_v48 = vmax.f32 %v1462_v6, %v1463_v23  ;;  %v1477_v52 = vmax.f32 %v1475_v7, %v1476_v12  ;;  %v1489_v55 = vrot.slane %v1488_v47, 2  ;;  %v1512_v3 = vmax.f32 %v1510_v20, %v1511_v25  ;;  %v735_v6 = vld [vmem:[%s13702_s23 + $0x3b] sm:$0x1] }
  0xa0   : > { %v14016_v30 = vmax.f32 %v1451_v10, %v1452_v37  ;;  %v1501_v39 = vmax.f32 %v1499_v14, %v1500_v29  ;;  %v1523_v56 = vunpack.i.l.bf16 %v1521_v34  ;;  %v1524_v43 = vunpack.i.h.bf16 %v1521_v34  ;;  %v736_v29 = vld [vmem:[%s13702_s23 + $0x3c] sm:$0x1] }
  0xa1   : > { %v1465_v4 = vrot.slane %v1464_v48, 1  ;;  %v1478_v13 = vrot.slane %v1477_v52, 1  ;;  %v1490_v17 = vmax.f32 %v1488_v47, %v1489_v55  ;;  %v1513_v31 = vrot.slane %v1512_v3, 4 }
  0xa2   : > { %v3282_v19 = vld [vmem:[#allocation2 + $0x14] sm:$0x1]  ;;  %v1502_v40 = vrot.slane %v1501_v39, 2  ;;  %v1441_v46 = vpack.i.bf16 %v14013_v26, %v14013_v26  ;;  %v1454_v62 = vpack.i.bf16 %v14016_v30, %v14016_v30  ;;  %v1525_v63 = vmax.f32 %v1523_v56, %v1524_v43 }
  0xa3   : > { %v3304_v2 = vld [vmem:[#allocation2 + $0x14] sm:$0x3]  ;;  %v14020_v49 = vmax.f32 %v1464_v48, %v1465_v4  ;;  %v14024_v51 = vmax.f32 %v1477_v52, %v1478_v13  ;;  %v1491_v8 = vrot.slane %v1490_v17, 1  ;;  %v1514_v54 = vmax.f32 %v1512_v3, %v1513_v31 }
  0xa4   : > { %v11896_v45 = vcombine.low %v3296_v22, %v3304_v2  ;;  %v1503_v53 = vmax.f32 %v1501_v39, %v1502_v40  ;;  %v14026_v61 = vcombine.low %v3296_v22, %v3282_v19  ;;  %v1526_v14 = vrot.slane %v1525_v63, 4  ;;  %v737_v19 = vld [vmem:[%s13702_s23 + $0x3d] sm:$0x1] }
  0xa5   : > { %v1467_v7 = vpack.i.bf16 %v14020_v49, %v14020_v49  ;;  %v14034_v15 = vmax.f32 %v1490_v17, %v1491_v8  ;;  %v1515_v9 = vrot.slane %v1514_v54, 2  ;;  %v1480_v10 = vpack.i.bf16 %v14024_v51, %v14024_v51 }
  0xa6   : > { %v3472_v59 = vrot.slane %v11896_v45, 1  ;;  %v1504_v27 = vrot.slane %v1503_v53, 1  ;;  %v1534_v20 = vsel %vm613_vm2, %v732_v44, 4286644096  ;;  %v1547_v23 = vsel %vm613_vm2, %v733_v58, 4286644096 }
  0xa7   : > { %v1493_v12 = vpack.i.bf16 %v14034_v15, %v14034_v15  ;;  %v1516_v25 = vmax.f32 %v1514_v54, %v1515_v9  ;;  %v1536_v37 = vunpack.i.l.bf16 %v1534_v20  ;;  %v1527_v34 = vmax.f32 %v1525_v63, %v1526_v14  ;;  %v738_v44 = vld [vmem:[%s13702_s23 + $0x3e] sm:$0x1] }
  0xa8   : > { %3481 = vrot.lane.b32.xlu1 %v3472_v59, %s13514_s24  ;;  %v14043_v47 = vmax.f32 %v1503_v53, %v1504_v27  ;;  %v1537_v48 = vunpack.i.h.bf16 %v1534_v20  ;;  %v1549_v52 = vunpack.i.l.bf16 %v1547_v23  ;;  %v1550_v55 = vunpack.i.h.bf16 %v1547_v23 }
  0xa9   : > { %v1517_v22 = vrot.slane %v1516_v25, 1  ;;  %v1560_v39 = vsel %vm613_vm2, %v734_v1, 4286644096  ;;  %v1573_v56 = vsel %vm613_vm2, %v735_v6, 4286644096  ;;  %v1528_v4 = vrot.slane %v1527_v34, 2 }
  0xaa   : > { %v1538_v13 = vmax.f32 %v1536_v37, %v1537_v48  ;;  %v1551_v17 = vmax.f32 %v1549_v52, %v1550_v55  ;;  %v1562_v31 = vunpack.i.l.bf16 %v1560_v39  ;;  %v1563_v40 = vunpack.i.h.bf16 %v1560_v39 }
  0xab   : > { %v14051_v2 = vmax.f32 %v1516_v25, %v1517_v22  ;;  %v1575_v43 = vunpack.i.l.bf16 %v1573_v56  ;;  %v1576_v45 = vunpack.i.h.bf16 %v1573_v56  ;;  %v1529_v58 = vmax.f32 %v1527_v34, %v1528_v4 }
  0xac   : > { %v1539_v8 = vrot.slane %v1538_v13, 4  ;;  %v1552_v53 = vrot.slane %v1551_v17, 4  ;;  %v1586_v54 = vsel %vm613_vm2, %v736_v29, 4286644096  ;;  %v1564_v63 = vmax.f32 %v1562_v31, %v1563_v40  ;;  %v739_v31 = vld [vmem:[%s13702_s23 + $0x3f] sm:$0x1] }
  0xad   : > { %v1577_v1 = vmax.f32 %v1575_v43, %v1576_v45  ;;  %v1588_v6 = vunpack.i.l.bf16 %v1586_v54  ;;  %v1530_v27 = vrot.slane %v1529_v58, 1  ;;  %v1589_v20 = vunpack.i.h.bf16 %v1586_v54 }
  0xae   : > { %v1540_v9 = vmax.f32 %v1538_v13, %v1539_v8  ;;  %v1553_v14 = vmax.f32 %v1551_v17, %v1552_v53  ;;  %v1565_v23 = vrot.slane %v1564_v63, 4  ;;  %v1599_v37 = vsel %vm613_vm2, %v737_v19, 4286644096 }
  0xaf   : > { %v1578_v25 = vrot.slane %v1577_v1, 4  ;;  %v1612_v34 = vsel %vm613_vm2, %v738_v44, 4286644096  ;;  %v14059_v48 = vmax.f32 %v1529_v58, %v1530_v27  ;;  %v1590_v55 = vmax.f32 %v1588_v6, %v1589_v20 }
  0xb0   : > { %v1541_v29 = vrot.slane %v1540_v9, 2  ;;  %v1554_v52 = vrot.slane %v1553_v14, 2  ;;  %v1566_v22 = vmax.f32 %v1564_v63, %v1565_v23  ;;  %v1601_v56 = vunpack.i.l.bf16 %v1599_v37 }
  0xb1   : > { %v1579_v39 = vmax.f32 %v1577_v1, %v1578_v25  ;;  %v1602_v4 = vunpack.i.h.bf16 %v1599_v37  ;;  %v1591_v43 = vrot.slane %v1590_v55, 4  ;;  %v1614_v44 = vunpack.i.l.bf16 %v1612_v34 }
  0xb2   : > { %v1542_v17 = vmax.f32 %v1540_v9, %v1541_v29  ;;  %v1555_v40 = vmax.f32 %v1553_v14, %v1554_v52  ;;  %v1567_v45 = vrot.slane %v1566_v22, 2  ;;  %v1615_v27 = vunpack.i.h.bf16 %v1612_v34 }
  0xb3   : > { %v1580_v19 = vrot.slane %v1579_v39, 2  ;;  %v1603_v8 = vmax.f32 %v1601_v56, %v1602_v4  ;;  %v1592_v54 = vmax.f32 %v1590_v55, %v1591_v43  ;;  %v1625_v20 = vsel %vm613_vm2, %v739_v31, 4286644096 }
  0xb4   : > { %v1543_v58 = vrot.slane %v1542_v17, 1  ;;  %v1556_v53 = vrot.slane %v1555_v40, 1  ;;  %v1568_v6 = vmax.f32 %v1566_v22, %v1567_v45  ;;  %v1616_v0 = vmax.f32 %v1614_v44, %v1615_v27 }
  0xb5   : > { %v1581_v63 = vmax.f32 %v1579_v39, %v1580_v19  ;;  %v1604_v1 = vrot.slane %v1603_v8, 4  ;;  %v1593_v37 = vrot.slane %v1592_v54, 2  ;;  %v1627_v52 = vunpack.i.l.bf16 %v1625_v20 }
  0xb6   : > { %v1544_v23 = vmax.f32 %v1542_v17, %v1543_v58  ;;  %v1557_v25 = vmax.f32 %v1555_v40, %v1556_v53  ;;  %v1569_v9 = vrot.slane %v1568_v6, 1  ;;  %v1617_v59 = vrot.slane %v1616_v0, 4 }
  0xb7   : > { %v1582_v14 = vrot.slane %v1581_v63, 1  ;;  %v1605_v29 = vmax.f32 %v1603_v8, %v1604_v1  ;;  %v1594_v4 = vmax.f32 %v1592_v54, %v1593_v37  ;;  %v1628_v22 = vunpack.i.h.bf16 %v1625_v20 }
  0xb8   : > { %v1545_v13 = vpack.i.bf16 %v1544_v23, %v1544_v23  ;;  %v1558_v56 = vpack.i.bf16 %v1557_v25, %v1557_v25  ;;  %v1570_v3 = vmax.f32 %v1568_v6, %v1569_v9  ;;  %v1618_v43 = vmax.f32 %v1616_v0, %v1617_v59 }
  0xb9   : > { %v1583_v55 = vmax.f32 %v1581_v63, %v1582_v14  ;;  %v1606_v34 = vrot.slane %v1605_v29, 2  ;;  %v1595_v39 = vrot.slane %v1594_v4, 1  ;;  %v2639_v31 = vsel %vm2469_vm4, %v1441_v46, 4286644096 }
  0xba   : > { %v2642_v17 = vsel %vm2469_vm4, %v1545_v13, 4286644096  ;;  %v1571_v40 = vpack.i.bf16 %v1570_v3, %v1570_v3  ;;  %v1629_v8 = vmax.f32 %v1627_v52, %v1628_v22  ;;  %v1619_v58 = vrot.slane %v1618_v43, 2 }
  0xbb   : > { %v1584_v45 = vpack.i.bf16 %v1583_v55, %v1583_v55  ;;  %v1607_v19 = vmax.f32 %v1605_v29, %v1606_v34  ;;  %v1596_v44 = vmax.f32 %v1594_v4, %v1595_v39  ;;  %v14070_v53 = vmax.bf16 %v2642_v17, %v2639_v31 }
  0xbc   : > { %v2646_v0 = vsel %vm2469_vm4, %v1454_v62, 4286644096  ;;  %v1630_v54 = vrot.slane %v1629_v8, 4  ;;  %v2649_v26 = vsel %vm2469_vm4, %v1558_v56, 4286644096  ;;  %v1620_v13 = vmax.f32 %v1618_v43, %v1619_v58 }
  0xbd   : > { %19042 = vst [vmem:[#allocation20_spill] sm:$0xff] %v14070_v53  ;;  %v1608_v59 = vrot.slane %v1607_v19, 1  ;;  %v2653_v46 = vsel %vm2469_vm4, %v1467_v7, 4286644096  ;;  %v1597_v3 = vpack.i.bf16 %v1596_v44, %v1596_v44  ;;  %v14081_v27 = vmax.bf16 %v2649_v26, %v2646_v0 }
  0xbe   : > { %v2656_v6 = vsel %vm2469_vm4, %v1571_v40, 4286644096  ;;  %v1631_v1 = vmax.f32 %v1629_v8, %v1630_v54  ;;  %v2660_v62 = vsel %vm2469_vm4, %v1480_v10, 4286644096  ;;  %v1621_v20 = vrot.slane %v1620_v13, 1 }
  0xbf   : > { %19043 = vst [vmem:[#allocation21_spill] sm:$0xff] %v14081_v27  ;;  %v1609_v63 = vmax.f32 %v1607_v19, %v1608_v59  ;;  %v14084_v30 = vmax.bf16 %v2656_v6, %v2653_v46  ;;  %v2663_v49 = vsel %vm2469_vm4, %v1584_v45, 4286644096  ;;  %v2667_v7 = vsel %vm2469_vm4, %v1493_v12, 4286644096 }
  0xc0   : > { %v11839_v23 = vcombine.low %v14070_v53, %v14070_v53  ;;  %v1632_v37 = vrot.slane %v1631_v1, 2  ;;  %v14097_v9 = vmax.bf16 %v2663_v49, %v2660_v62  ;;  %v2670_v14 = vsel %vm2469_vm4, %v1597_v3, 4286644096  ;;  %v708_v45 = vld [vmem:[%s13702_s23 + $0x20] sm:$0x1] }
  0xc1   : > { %19044 = vst [vmem:[#allocation22_spill] sm:$0xff] %v14084_v30  ;;  %v1610_v25 = vpack.i.bf16 %v1609_v63, %v1609_v63  ;;  %v1622_v51 = vmax.f32 %v1620_v13, %v1621_v20  ;;  %v14100_v10 = vmax.bf16 %v2670_v14, %v2667_v7  ;;  %v19047_v29 = vpack.i.bf16 %v14043_v47, %v14043_v47  ;;  %v709_v19 = vld [vmem:[%s13702_s23 + $0x21] sm:$0x1]  ;;  %v710_v6 = vld [vmem:[%s13702_s23 + $0x22] sm:$0x1] }
  0xc2   : > { %19045 = vst [vmem:[#allocation23_spill] sm:$0xff] %v14097_v9  ;;  %v19048_v12 = vpack.i.bf16 %v14051_v2, %v14051_v2  ;;  %v1633_v56 = vmax.f32 %v1631_v1, %v1632_v37  ;;  %v19049_v55 = vpack.i.bf16 %v14059_v48, %v14059_v48  ;;  %v11840_v22 = vcombine.low %v14081_v27, %v14081_v27  ;;  %v712_v37 = vld [vmem:[%s13702_s23 + $0x24] sm:$0x1] }
  0xc3   : > { %19046 = vst [vmem:[#allocation24_spill] sm:$0xff] %v14100_v10  ;;  %v2674_v15 = vsel %vm2469_vm4, %v19047_v29, 4286644096  ;;  %v2677_v4 = vsel %vm2469_vm4, %v1610_v25, 4286644096  ;;  %v1623_v47 = vpack.i.bf16 %v1622_v51, %v1622_v51  ;;  %v11841_v43 = vcombine.low %v14084_v30, %v14084_v30 }
  0xc4   : > { %v2681_v52 = vsel %vm2469_vm4, %v19048_v12, 4286644096  ;;  %v2688_v34 = vsel %vm2469_vm4, %v19049_v55, 4286644096  ;;  %v14117_v39 = vmax.bf16 %v2677_v4, %v2674_v15  ;;  %v11842_v2 = vcombine.low %v14097_v9, %v14097_v9  ;;  %v711_v25 = vld [vmem:[%s13702_s23 + $0x23] sm:$0x1] }
  0xc5   : > { %v1634_v31 = vrot.slane %v1633_v56, 1  ;;  %v11843_v17 = vcombine.low %v14100_v10, %v14100_v10  ;;  %v3134_v48 = vunpack.c.l.b16 %v11839_v23  ;;  %v3135_v40 = vunpack.c.l.b16 %v11840_v22 }
  0xc6   : > { %19050 = vst [vmem:[#allocation25_spill] sm:$0xff] %v14117_v39  ;;  %v2684_v8 = vsel %vm2469_vm4, %v1623_v47, 4286644096  ;;  %v11844_v44 = vcombine.low %v14117_v39, %v14117_v39  ;;  %v3136_v58 = vunpack.c.l.b16 %v11841_v43  ;;  %v3137_v0 = vunpack.c.l.b16 %v11842_v2  ;;  %v713_v43 = vld [vmem:[%s13702_s23 + $0x25] sm:$0x1] }
  0xc7   : > { %v1635_v59 = vmax.f32 %v1633_v56, %v1634_v31  ;;  %v14130_v54 = vmax.bf16 %v2684_v8, %v2681_v52  ;;  %v3138_v26 = vunpack.c.l.b16 %v11843_v17  ;;  %v3198_v46 = vsel %vm3174_vm5, %v3135_v40, %v3134_v48 }
  0xc8   : > { %v3139_v3 = vunpack.c.l.b16 %v11844_v44  ;;  %v3199_v13 = vsel %vm3176_vm6, %v3136_v58, %v3198_v46  ;;  %v1222_v63 = vsel %vm613_vm2, %v708_v45, 4286644096  ;;  %v1235_v1 = vsel %vm613_vm2, %v709_v19, 4286644096 }
  0xc9   : > { %19051 = vst [vmem:[#allocation26_spill] sm:$0xff] %v14130_v54  ;;  %v1636_v62 = vpack.i.bf16 %v1635_v59, %v1635_v59  ;;  %v11845_v20 = vcombine.low %v14130_v54, %v14130_v54  ;;  %v3200_v49 = vsel %vm3178_vm7, %v3137_v0, %v3199_v13  ;;  %v1224_v7 = vunpack.i.l.bf16 %v1222_v63  ;;  %v714_v13 = vld [vmem:[%s13702_s23 + $0x26] sm:$0x1] }
  0xca   : > { %v3201_v23 = vsel %vm3180_vm8, %v3138_v26, %v3200_v49  ;;  %v1225_v14 = vunpack.i.h.bf16 %v1222_v63  ;;  %v1237_v51 = vunpack.i.l.bf16 %v1235_v1  ;;  %v1238_v29 = vunpack.i.h.bf16 %v1235_v1 }
  0xcb   : > { %v2691_v15 = vsel %vm2469_vm4, %v1636_v62, 4286644096  ;;  %v3140_v12 = vunpack.c.l.b16 %v11845_v20  ;;  %v3202_v52 = vsel %vm3182_vm9, %v3139_v3, %v3201_v23  ;;  %v1248_v56 = vsel %vm613_vm2, %v710_v6, 4286644096 }
  0xcc   : > { %v14146_v4 = vmax.bf16 %v2691_v15, %v2688_v34  ;;  %v3234_v55 = vpack.c.b16 %v3202_v52, %v3202_v52  ;;  %v1226_v22 = vmax.f32 %v1224_v7, %v1225_v14  ;;  %v1239_v47 = vmax.f32 %v1237_v51, %v1238_v29  ;;  %v715_v29 = vld [vmem:[%s13702_s23 + $0x27] sm:$0x1] }
  0xcd   : > { %v1250_v2 = vunpack.i.l.bf16 %v1248_v56  ;;  %v1251_v31 = vunpack.i.h.bf16 %v1248_v56  ;;  %v1261_v17 = vsel %vm613_vm2, %v711_v25, 4286644096  ;;  %v1274_v48 = vsel %vm613_vm2, %v712_v37, 4286644096 }
  0xce   : > { %19052 = vst [vmem:[#allocation27_spill] sm:$0xff] %v14146_v4  ;;  %v11846_v40 = vcombine.low %v14146_v4, %v14146_v4  ;;  %3268 = vst.msk [vmem:[#allocation2 + $0x28] sm:$0xe] %vm3261_vm10, %v3234_v55  ;;  %v1227_v45 = vrot.slane %v1226_v22, 4  ;;  %v1240_v19 = vrot.slane %v1239_v47, 4  ;;  %v1263_v34 = vunpack.i.l.bf16 %v1261_v17 }
  0xcf   : > { %v1252_v8 = vmax.f32 %v1250_v2, %v1251_v31  ;;  %v1264_v44 = vunpack.i.h.bf16 %v1261_v17  ;;  %v1276_v58 = vunpack.i.l.bf16 %v1274_v48  ;;  %v1277_v0 = vunpack.i.h.bf16 %v1274_v48 }
  0xd0   : > { %v3141_v59 = vunpack.c.l.b16 %v11846_v40  ;;  %v1228_v26 = vmax.f32 %v1226_v22, %v1227_v45  ;;  %v1241_v46 = vmax.f32 %v1239_v47, %v1240_v19  ;;  %v1287_v3 = vsel %vm613_vm2, %v713_v43, 4286644096  ;;  %v3284_v22 = vld [vmem:[#allocation2 + $0x1c] sm:$0x1] }
  0xd1   : > { %v1253_v6 = vrot.slane %v1252_v8, 4  ;;  %v1265_v63 = vmax.f32 %v1263_v34, %v1264_v44  ;;  %v1278_v1 = vmax.f32 %v1276_v58, %v1277_v0  ;;  %v1289_v62 = vunpack.i.l.bf16 %v1287_v3 }
  0xd2   : > { %v3203_v20 = vsel %vm3184_vm11, %v3141_v59, %v3140_v12  ;;  %v1229_v49 = vrot.slane %v1228_v26, 2  ;;  %v1242_v7 = vrot.slane %v1241_v46, 2  ;;  %v1290_v23 = vunpack.i.h.bf16 %v1287_v3 }
  0xd3   : > { %v3235_v25 = vpack.c.b16 %v3203_v20, %v3203_v20  ;;  %v1254_v37 = vmax.f32 %v1252_v8, %v1253_v6  ;;  %v1266_v14 = vrot.slane %v1265_v63, 4  ;;  %v1279_v51 = vrot.slane %v1278_v1, 4 }
  0xd4   : > { %v1230_v15 = vmax.f32 %v1228_v26, %v1229_v49  ;;  %v1243_v52 = vmax.f32 %v1241_v46, %v1242_v7  ;;  %v1291_v56 = vmax.f32 %v1289_v62, %v1290_v23  ;;  %v1300_v55 = vsel %vm613_vm2, %v714_v13, 4286644096  ;;  %v716_v26 = vld [vmem:[%s13702_s23 + $0x28] sm:$0x1] }
  0xd5   : > { %3269 = vst.msk [vmem:[#allocation2 + $0x2c] sm:$0x1] %vm613_vm2, %v3235_v25  ;;  %v1255_v47 = vrot.slane %v1254_v37, 2  ;;  %v1267_v43 = vmax.f32 %v1265_v63, %v1266_v14  ;;  %v1280_v12 = vmax.f32 %v1278_v1, %v1279_v51  ;;  %v1302_v2 = vunpack.i.l.bf16 %v1300_v55  ;;  %v14170_v1 = vld [vmem:[#allocation2 + $0x28] sm:$0xe] }
  0xd6   : > { %v1231_v31 = vrot.slane %v1230_v15, 1  ;;  %v1244_v17 = vrot.slane %v1243_v52, 1  ;;  %v1292_v48 = vrot.slane %v1291_v56, 4  ;;  %v1303_v40 = vunpack.i.h.bf16 %v1300_v55 }
  0xd7   : > { %v1256_v45 = vmax.f32 %v1254_v37, %v1255_v47  ;;  %v1268_v19 = vrot.slane %v1267_v43, 2  ;;  %v1281_v34 = vrot.slane %v1280_v12, 2  ;;  %v1313_v8 = vsel %vm613_vm2, %v715_v29, 4286644096 }
  0xd8   : > { %v14162_v44 = vcombine.low %v13871_v32, %v3284_v22  ;;  %v14164_v58 = vmax.f32 %v1230_v15, %v1231_v31  ;;  %v1293_v0 = vmax.f32 %v1291_v56, %v1292_v48  ;;  %v1304_v59 = vmax.f32 %v1302_v2, %v1303_v40  ;;  %v717_v56 = vld [vmem:[%s13702_s23 + $0x29] sm:$0x1] }
  0xd9   : > { %v14167_v46 = vmax.f32 %v1243_v52, %v1244_v17  ;;  %v1257_v3 = vrot.slane %v1256_v45, 1  ;;  %v1269_v13 = vmax.f32 %v1267_v43, %v1268_v19  ;;  %v1282_v6 = vmax.f32 %v1280_v12, %v1281_v34  ;;  %v718_v43 = vld [vmem:[%s13702_s23 + $0x2a] sm:$0x1]  ;;  %v719_v12 = vld [vmem:[%s13702_s23 + $0x2b] sm:$0x1] }
  0xda   : > { %v1294_v62 = vrot.slane %v1293_v0, 2  ;;  %v1305_v20 = vrot.slane %v1304_v59, 4  ;;  %v1315_v32 = vunpack.i.l.bf16 %v1313_v8  ;;  %v1316_v25 = vunpack.i.h.bf16 %v1313_v8 }
  0xdb   : > { %v14172_v49 = vmax.f32 %v1256_v45, %v1257_v3  ;;  %v1270_v7 = vrot.slane %v1269_v13, 1  ;;  %v1283_v23 = vrot.slane %v1282_v6, 1  ;;  %v1326_v15 = vsel %vm613_vm2, %v716_v26, 4286644096 }
  0xdc   : > { %v3307_v37 = vld [vmem:[#allocation2 + $0x2c] sm:$0x3]  ;;  %v1295_v51 = vmax.f32 %v1293_v0, %v1294_v62  ;;  %v1306_v29 = vmax.f32 %v1304_v59, %v1305_v20  ;;  %v1317_v48 = vmax.f32 %v1315_v32, %v1316_v25  ;;  %v1328_v19 = vunpack.i.l.bf16 %v1326_v15 }
  0xdd   : > { %v11899_v52 = vcombine.low %v14170_v1, %v3307_v37  ;;  %v14183_v47 = vmax.f32 %v1269_v13, %v1270_v7  ;;  %v14187_v2 = vmax.f32 %v1282_v6, %v1283_v23  ;;  %v1329_v34 = vunpack.i.h.bf16 %v1326_v15  ;;  %v720_v20 = vld [vmem:[%s13702_s23 + $0x2c] sm:$0x1] }
  0xde   : > { %v1296_v31 = vrot.slane %v1295_v51, 1  ;;  %v1307_v17 = vrot.slane %v1306_v29, 2  ;;  %v1318_v26 = vrot.slane %v1317_v48, 4  ;;  %v1339_v13 = vsel %vm613_vm2, %v717_v56, 4286644096 }
  0xdf   : > { %v3475_v40 = vrot.slane %v11899_v52, 1  ;;  %v1330_v3 = vmax.f32 %v1328_v19, %v1329_v34  ;;  %v1352_v6 = vsel %vm613_vm2, %v718_v43, 4286644096  ;;  %v1365_v62 = vsel %vm613_vm2, %v719_v12, 4286644096 }
  0xe0   : > { %v14193_v0 = vmax.f32 %v1295_v51, %v1296_v31  ;;  %v1308_v59 = vmax.f32 %v1306_v29, %v1307_v17  ;;  %v1319_v23 = vmax.f32 %v1317_v48, %v1318_v26  ;;  %v1341_v25 = vunpack.i.l.bf16 %v1339_v13  ;;  %v721_v43 = vld [vmem:[%s13702_s23 + $0x2d] sm:$0x1] }
  0xe1   : > { %3487 = vrot.lane.b32.xlu0 %v3475_v40, %s13514_s24  ;;  %v1331_v37 = vrot.slane %v1330_v3, 4  ;;  %v1342_v51 = vunpack.i.h.bf16 %v1339_v13  ;;  %v1354_v29 = vunpack.i.l.bf16 %v1352_v6  ;;  %v1355_v15 = vunpack.i.h.bf16 %v1352_v6  ;;  %v722_v40 = vld [vmem:[%s13702_s23 + $0x2e] sm:$0x1] }
  0xe2   : > { %v1309_v7 = vrot.slane %v1308_v59, 1  ;;  %v1320_v56 = vrot.slane %v1319_v23, 2  ;;  %v1367_v31 = vunpack.i.l.bf16 %v1365_v62  ;;  %v1368_v17 = vunpack.i.h.bf16 %v1365_v62 }
  0xe3   : > { %v1332_v19 = vmax.f32 %v1330_v3, %v1331_v37  ;;  %v1343_v12 = vmax.f32 %v1341_v25, %v1342_v51  ;;  %v1356_v34 = vmax.f32 %v1354_v29, %v1355_v15  ;;  %v1378_v63 = vsel %vm613_vm2, %v720_v20, 4286644096 }
  0xe4   : > { %v14202_v52 = vmax.f32 %v1308_v59, %v1309_v7  ;;  %v1321_v26 = vmax.f32 %v1319_v23, %v1320_v56  ;;  %v1369_v32 = vmax.f32 %v1367_v31, %v1368_v17  ;;  %v1380_v13 = vunpack.i.l.bf16 %v1378_v63  ;;  %v723_v31 = vld [vmem:[%s13702_s23 + $0x2f] sm:$0x1] }
  0xe5   : > { %v1333_v8 = vrot.slane %v1332_v19, 2  ;;  %v1344_v59 = vrot.slane %v1343_v12, 4  ;;  %v1357_v6 = vrot.slane %v1356_v34, 4  ;;  %v1381_v7 = vunpack.i.h.bf16 %v1378_v63 }
  0xe6   : > { %v1322_v45 = vrot.slane %v1321_v26, 1  ;;  %v1370_v62 = vrot.slane %v1369_v32, 4  ;;  %v1391_v22 = vsel %vm613_vm2, %v721_v43, 4286644096  ;;  %v1404_v3 = vsel %vm613_vm2, %v722_v40, 4286644096 }
  0xe7   : > { %v1334_v25 = vmax.f32 %v1332_v19, %v1333_v8  ;;  %v1345_v37 = vmax.f32 %v1343_v12, %v1344_v59  ;;  %v1358_v20 = vmax.f32 %v1356_v34, %v1357_v6  ;;  %v1382_v51 = vmax.f32 %v1380_v13, %v1381_v7 }
  0xe8   : > { %v14211_v29 = vmax.f32 %v1321_v26, %v1322_v45  ;;  %v1371_v23 = vmax.f32 %v1369_v32, %v1370_v62  ;;  %v1393_v15 = vunpack.i.l.bf16 %v1391_v22  ;;  %v1394_v56 = vunpack.i.h.bf16 %v1391_v22 }
  0xe9   : > { %v1335_v17 = vrot.slane %v1334_v25, 1  ;;  %v1346_v48 = vrot.slane %v1345_v37, 2  ;;  %v1359_v55 = vrot.slane %v1358_v20, 2  ;;  %v1383_v63 = vrot.slane %v1382_v51, 4 }
  0xea   : > { %v1372_v43 = vrot.slane %v1371_v23, 2  ;;  %v1395_v4 = vmax.f32 %v1393_v15, %v1394_v56  ;;  %v1406_v40 = vunpack.i.l.bf16 %v1404_v3  ;;  %v1407_v32 = vunpack.i.h.bf16 %v1404_v3 }
  0xeb   : > { %v1336_v8 = vmax.f32 %v1334_v25, %v1335_v17  ;;  %v1347_v19 = vmax.f32 %v1345_v37, %v1346_v48  ;;  %v1360_v12 = vmax.f32 %v1358_v20, %v1359_v55  ;;  %v1384_v34 = vmax.f32 %v1382_v51, %v1383_v63 }
  0xec   : > { %v1373_v45 = vmax.f32 %v1371_v23, %v1372_v43  ;;  %v1396_v26 = vrot.slane %v1395_v4, 4  ;;  %v1417_v22 = vsel %vm613_vm2, %v723_v31, 4286644096  ;;  %v1408_v39 = vmax.f32 %v1406_v40, %v1407_v32 }
  0xed   : > { %v1337_v13 = vpack.i.bf16 %v1336_v8, %v1336_v8  ;;  %v1348_v59 = vrot.slane %v1347_v19, 1  ;;  %v1361_v6 = vrot.slane %v1360_v12, 1  ;;  %v1385_v7 = vrot.slane %v1384_v34, 2 }
  0xee   : > { %v1374_v62 = vrot.slane %v1373_v45, 1  ;;  %v1397_v54 = vmax.f32 %v1395_v4, %v1396_v26  ;;  %v1419_v14 = vunpack.i.l.bf16 %v1417_v22  ;;  %v1420_v25 = vunpack.i.h.bf16 %v1417_v22 }
  0xef   : > { %v1349_v10 = vmax.f32 %v1347_v19, %v1348_v59  ;;  %v1362_v15 = vmax.f32 %v1360_v12, %v1361_v6  ;;  %v1386_v56 = vmax.f32 %v1384_v34, %v1385_v7  ;;  %v1409_v37 = vrot.slane %v1408_v39, 4 }
  0xf0   : > { %v1375_v48 = vmax.f32 %v1373_v45, %v1374_v62  ;;  %v1398_v55 = vrot.slane %v1397_v54, 2  ;;  %v19053_v3 = vpack.i.bf16 %v14164_v58, %v14164_v58  ;;  %v1421_v17 = vmax.f32 %v1419_v14, %v1420_v25 }
  0xf1   : > { %v1350_v51 = vpack.i.bf16 %v1349_v10, %v1349_v10  ;;  %v1363_v23 = vpack.i.bf16 %v1362_v15, %v1362_v15  ;;  %v1387_v31 = vrot.slane %v1386_v56, 1  ;;  %v1410_v43 = vmax.f32 %v1408_v39, %v1409_v37 }
  0xf2   : > { %v2583_v20 = vsel %vm2469_vm4, %v19053_v3, 4286644096  ;;  %v1376_v63 = vpack.i.bf16 %v1375_v48, %v1375_v48  ;;  %v1399_v4 = vmax.f32 %v1397_v54, %v1398_v55  ;;  %v2586_v40 = vsel %vm2469_vm4, %v1337_v13, 4286644096 }
  0xf3   : > { %v1388_v8 = vmax.f32 %v1386_v56, %v1387_v31  ;;  %v1422_v19 = vrot.slane %v1421_v17, 4  ;;  %v14222_v12 = vmax.bf16 %v2586_v40, %v2583_v20  ;;  %v19055_v34 = vpack.i.bf16 %v14167_v46, %v14167_v46 }
  0xf4   : > { %v1400_v45 = vrot.slane %v1399_v4, 1  ;;  %v1411_v26 = vrot.slane %v1410_v43, 2  ;;  %v2593_v10 = vsel %vm2469_vm4, %v1350_v51, 4286644096  ;;  %v19056_v14 = vpack.i.bf16 %v14172_v49, %v14172_v49 }
  0xf5   : > { %19054 = vst [vmem:[#allocation28_spill] sm:$0xff] %v14222_v12  ;;  %v2590_v58 = vsel %vm2469_vm4, %v19055_v34, 4286644096  ;;  %v1389_v54 = vpack.i.bf16 %v1388_v8, %v1388_v8  ;;  %v1423_v32 = vmax.f32 %v1421_v17, %v1422_v19  ;;  %v2600_v13 = vsel %vm2469_vm4, %v1363_v23, 4286644096 }
  0xf6   : > { %v2597_v39 = vsel %vm2469_vm4, %v19056_v14, 4286644096  ;;  %v14233_v22 = vmax.bf16 %v2593_v10, %v2590_v58  ;;  %v1401_v59 = vmax.f32 %v1399_v4, %v1400_v45  ;;  %v1412_v6 = vmax.f32 %v1410_v43, %v1411_v26  ;;  %v756_v58 = vld [vmem:[%s13702_s23 + $0x50] sm:$0x1] }
  0xf7   : > { %v14236_v46 = vmax.bf16 %v2600_v13, %v2597_v39  ;;  %v19059_v7 = vpack.i.bf16 %v14183_v47, %v14183_v47  ;;  %v1424_v15 = vrot.slane %v1423_v32, 2  ;;  %v2607_v49 = vsel %vm2469_vm4, %v1376_v63, 4286644096  ;;  %v757_v13 = vld [vmem:[%s13702_s23 + $0x51] sm:$0x1] }
  0xf8   : > { %19057 = vst [vmem:[#allocation29_spill] sm:$0xff] %v14233_v22  ;;  %v19060_v56 = vpack.i.bf16 %v14187_v2, %v14187_v2  ;;  %v11831_v48 = vcombine.low %v14222_v12, %v14222_v12  ;;  %v1402_v55 = vpack.i.bf16 %v1401_v59, %v1401_v59  ;;  %v1413_v37 = vrot.slane %v1412_v6, 1 }
  0xf9   : > { %19058 = vst [vmem:[#allocation30_spill] sm:$0xff] %v14236_v46  ;;  %v2604_v62 = vsel %vm2469_vm4, %v19059_v7, 4286644096  ;;  %v2614_v47 = vsel %vm2469_vm4, %v1389_v54, 4286644096  ;;  %v1425_v20 = vmax.f32 %v1423_v32, %v1424_v15  ;;  %v19063_v23 = vpack.i.bf16 %v14193_v0, %v14193_v0 }
  0xfa   : > { %v2611_v25 = vsel %vm2469_vm4, %v19060_v56, 4286644096  ;;  %v14249_v3 = vmax.bf16 %v2607_v49, %v2604_v62  ;;  %v19064_v31 = vpack.i.bf16 %v14202_v52, %v14202_v52  ;;  %v1414_v63 = vmax.f32 %v1412_v6, %v1413_v37  ;;  %v759_v37 = vld [vmem:[%s13702_s23 + $0x53] sm:$0x1] }
  0xfb   : > { %v14252_v51 = vmax.bf16 %v2614_v47, %v2611_v25  ;;  %v2618_v2 = vsel %vm2469_vm4, %v19063_v23, 4286644096  ;;  %v2621_v4 = vsel %vm2469_vm4, %v1402_v55, 4286644096  ;;  %v19065_v43 = vpack.i.bf16 %v14211_v29, %v14211_v29  ;;  %v758_v55 = vld [vmem:[%s13702_s23 + $0x52] sm:$0x1] }
  0xfc   : > { %19061 = vst [vmem:[#allocation31_spill] sm:$0xff] %v14249_v3  ;;  %v2625_v17 = vsel %vm2469_vm4, %v19064_v31, 4286644096  ;;  %v11832_v8 = vcombine.low %v14233_v22, %v14233_v22  ;;  %v1426_v0 = vrot.slane %v1425_v20, 1  ;;  %v14269_v19 = vmax.bf16 %v2621_v4, %v2618_v2 }
  0xfd   : > { %19062 = vst [vmem:[#allocation32_spill] sm:$0xff] %v14252_v51  ;;  %v2632_v40 = vsel %vm2469_vm4, %v19065_v43, 4286644096  ;;  %v11833_v52 = vcombine.low %v14236_v46, %v14236_v46  ;;  %v11834_v34 = vcombine.low %v14249_v3, %v14249_v3  ;;  %v1415_v45 = vpack.i.bf16 %v1414_v63, %v1414_v63 }
  0xfe   : > { %19066 = vst [vmem:[#allocation33_spill] sm:$0xff] %v14269_v19  ;;  %v11835_v29 = vcombine.low %v14252_v51, %v14252_v51  ;;  %v3126_v26 = vunpack.c.l.b16 %v11831_v48  ;;  %v3127_v10 = vunpack.c.l.b16 %v11832_v8  ;;  %v1427_v14 = vmax.f32 %v1425_v20, %v1426_v0  ;;  %v760_v8 = vld [vmem:[%s13702_s23 + $0x54] sm:$0x1] }
  0xff   : > { %v11836_v39 = vcombine.low %v14269_v19, %v14269_v19  ;;  %v3128_v54 = vunpack.c.l.b16 %v11833_v52  ;;  %v3129_v32 = vunpack.c.l.b16 %v11834_v34  ;;  %v2628_v59 = vsel %vm2469_vm4, %v1415_v45, 4286644096 }
 0x100   : > { %v3130_v6 = vunpack.c.l.b16 %v11835_v29  ;;  %v3192_v7 = vsel %vm3174_vm5, %v3127_v10, %v3126_v26  ;;  %v1846_v62 = vsel %vm613_vm2, %v756_v58, 4286644096  ;;  %v1428_v15 = vpack.i.bf16 %v1427_v14, %v1427_v14  ;;  %v761_v10 = vld [vmem:[%s13702_s23 + $0x55] sm:$0x1] }
 0x101   : > { %v14284_v49 = vmax.bf16 %v2628_v59, %v2625_v17  ;;  %v3131_v56 = vunpack.c.l.b16 %v11836_v39  ;;  %v3193_v25 = vsel %vm3176_vm6, %v3128_v54, %v3192_v7  ;;  %v1848_v47 = vunpack.i.l.bf16 %v1846_v62 }
 0x102   : > { %v3194_v48 = vsel %vm3178_vm7, %v3129_v32, %v3193_v25  ;;  %v1849_v20 = vunpack.i.h.bf16 %v1846_v62  ;;  %v1859_v23 = vsel %vm613_vm2, %v757_v13, 4286644096  ;;  %v2635_v2 = vsel %vm2469_vm4, %v1428_v15, 4286644096 }
 0x103   : > { %19067 = vst [vmem:[#allocation34_spill] sm:$0xff] %v14284_v49  ;;  %v11837_v31 = vcombine.low %v14284_v49, %v14284_v49  ;;  %v3195_v17 = vsel %vm3180_vm8, %v3130_v6, %v3194_v48  ;;  %v1861_v63 = vunpack.i.l.bf16 %v1859_v23  ;;  %v14295_v4 = vmax.bf16 %v2635_v2, %v2632_v40 }
 0x104   : > { %v3196_v43 = vsel %vm3182_vm9, %v3131_v56, %v3195_v17  ;;  %v1850_v0 = vmax.f32 %v1848_v47, %v1849_v20  ;;  %v1862_v52 = vunpack.i.h.bf16 %v1859_v23  ;;  %v1872_v45 = vsel %vm613_vm2, %v758_v55, 4286644096  ;;  %v762_v56 = vld [vmem:[%s13702_s23 + $0x56] sm:$0x1] }
 0x105   : > { %19068 = vst [vmem:[#allocation35_spill] sm:$0xff] %v14295_v4  ;;  %v3132_v34 = vunpack.c.l.b16 %v11837_v31  ;;  %v3232_v58 = vpack.c.b16 %v3196_v43, %v3196_v43  ;;  %v1885_v29 = vsel %vm613_vm2, %v759_v37, 4286644096  ;;  %v11838_v26 = vcombine.low %v14295_v4, %v14295_v4 }
 0x106   : > { %v1851_v14 = vrot.slane %v1850_v0, 4  ;;  %v1863_v39 = vmax.f32 %v1861_v63, %v1862_v52  ;;  %v1874_v40 = vunpack.i.l.bf16 %v1872_v45  ;;  %v1875_v54 = vunpack.i.h.bf16 %v1872_v45 }
 0x107   : > { %3266 = vst.msk [vmem:[#allocation2 + $0x20] sm:$0xe] %vm3261_vm10, %v3232_v58  ;;  %v1887_v32 = vunpack.i.l.bf16 %v1885_v29  ;;  %v1888_v13 = vunpack.i.h.bf16 %v1885_v29  ;;  %v1898_v59 = vsel %vm613_vm2, %v760_v8, 4286644096  ;;  %v3133_v6 = vunpack.c.l.b16 %v11838_v26  ;;  %v763_v8 = vld [vmem:[%s13702_s23 + $0x57] sm:$0x1] }
 0x108   : > { %v1852_v7 = vmax.f32 %v1850_v0, %v1851_v14  ;;  %v1864_v62 = vrot.slane %v1863_v39, 4  ;;  %v1900_v15 = vunpack.i.l.bf16 %v1898_v59  ;;  %v1876_v25 = vmax.f32 %v1874_v40, %v1875_v54 }
 0x109   : > { %v1889_v48 = vmax.f32 %v1887_v32, %v1888_v13  ;;  %v1901_v55 = vunpack.i.h.bf16 %v1898_v59  ;;  %v1911_v37 = vsel %vm613_vm2, %v761_v10, 4286644096  ;;  %v3197_v47 = vsel %vm3184_vm11, %v3133_v6, %v3132_v34  ;;  %v3288_v34 = vld [vmem:[#allocation2 + $0x2c] sm:$0x1] }
 0x10a   : > { %v1853_v20 = vrot.slane %v1852_v7, 2  ;;  %v1865_v23 = vmax.f32 %v1863_v39, %v1864_v62  ;;  %v1913_v2 = vunpack.i.l.bf16 %v1911_v37  ;;  %v3233_v31 = vpack.c.b16 %v3197_v47, %v3197_v47 }
 0x10b   : > { %v1877_v17 = vrot.slane %v1876_v25, 4  ;;  %v1890_v63 = vrot.slane %v1889_v48, 4  ;;  %v1902_v43 = vmax.f32 %v1900_v15, %v1901_v55  ;;  %v1914_v58 = vunpack.i.h.bf16 %v1911_v37 }
 0x10c   : > { %v1854_v0 = vmax.f32 %v1852_v7, %v1853_v20  ;;  %v1866_v52 = vrot.slane %v1865_v23, 2  ;;  %v1924_v45 = vsel %vm613_vm2, %v762_v56, 4286644096  ;;  %3267 = vst.msk [vmem:[#allocation2 + $0x24] sm:$0x1] %vm613_vm2, %v3233_v31  ;;  %vm641_vm13 = vcmask 58368  }
 0x10d   : > { %v1878_v29 = vmax.f32 %v1876_v25, %v1877_v17  ;;  %v1891_v26 = vmax.f32 %v1889_v48, %v1890_v63  ;;  %v1903_v10 = vrot.slane %v1902_v43, 4  ;;  %v1926_v14 = vunpack.i.l.bf16 %v1924_v45  ;;  %v14318_v20 = vld [vmem:[#allocation2 + $0x10] sm:$0xe] }
 0x10e   : > { %v1855_v40 = vrot.slane %v1854_v0, 1  ;;  %v1867_v39 = vmax.f32 %v1865_v23, %v1866_v52  ;;  %v1915_v54 = vmax.f32 %v1913_v2, %v1914_v58  ;;  %v1927_v32 = vunpack.i.h.bf16 %v1924_v45  ;;  %v14320_v23 = vld [vmem:[#allocation2 + $0x20] sm:$0xe]  ;;  %v764_v45 = vld [vmem:[%s13702_s23 + $0x58] sm:$0x1] }
 0x10f   : > { %v1879_v13 = vrot.slane %v1878_v29, 2  ;;  %v1892_v59 = vrot.slane %v1891_v26, 2  ;;  %v1904_v6 = vmax.f32 %v1902_v43, %v1903_v10  ;;  %v1937_v7 = vsel %vm613_vm2, %v763_v8, 4286644096  ;;  %v14324_v43 = vld [vmem:[#allocation2 + $0x14] sm:$0x3] }
 0x110   : > { %v14313_v62 = vmax.f32 %v1854_v0, %v1855_v40  ;;  %v1868_v15 = vrot.slane %v1867_v39, 1  ;;  %v1916_v56 = vrot.slane %v1915_v54, 4  ;;  %v1928_v55 = vmax.f32 %v1926_v14, %v1927_v32  ;;  %v765_v32 = vld [vmem:[%s13702_s23 + $0x59] sm:$0x1] }
 0x111   : > { %v14316_v25 = vcombine.low %v14170_v1, %v3288_v34  ;;  %v1880_v48 = vmax.f32 %v1878_v29, %v1879_v13  ;;  %v1893_v37 = vmax.f32 %v1891_v26, %v1892_v59  ;;  %v1905_v47 = vrot.slane %v1904_v6, 2  ;;  %v766_v13 = vld [vmem:[%s13702_s23 + $0x5a] sm:$0x1] }
 0x112   : > { %v14322_v2 = vmax.f32 %v1867_v39, %v1868_v15  ;;  %v1917_v31 = vmax.f32 %v1915_v54, %v1916_v56  ;;  %v1929_v17 = vrot.slane %v1928_v55, 4  ;;  %v1939_v63 = vunpack.i.l.bf16 %v1937_v7 }
 0x113   : > { %v1881_v8 = vrot.slane %v1880_v48, 1  ;;  %v1894_v1 = vrot.slane %v1893_v37, 1  ;;  %v1906_v0 = vmax.f32 %v1904_v6, %v1905_v47  ;;  %v1940_v52 = vunpack.i.h.bf16 %v1937_v7  ;;  %v3306_v58 = vld [vmem:[#allocation2 + $0x24] sm:$0x3] }
 0x114   : > { %v1918_v10 = vrot.slane %v1917_v31, 2  ;;  %v1930_v14 = vmax.f32 %v1928_v55, %v1929_v17  ;;  %v11898_v34 = vcombine.low %v14320_v23, %v3306_v58  ;;  %vm663_vm14 = vcmask 58369  }
 0x115   : > { %v14332_v40 = vmax.f32 %v1880_v48, %v1881_v8  ;;  %v14334_v39 = vmax.f32 %v1893_v37, %v1894_v1  ;;  %v1907_v59 = vrot.slane %v1906_v0, 1  ;;  %v1941_v15 = vmax.f32 %v1939_v63, %v1940_v52 }
 0x116   : > { %v1919_v6 = vmax.f32 %v1917_v31, %v1918_v10  ;;  %v1931_v7 = vrot.slane %v1930_v14, 2  ;;  %v3474_v56 = vrot.slane %v11898_v34, 1  ;;  %v1950_v37 = vsel %vm613_vm2, %v764_v45, 4286644096  ;;  %v767_v10 = vld [vmem:[%s13702_s23 + $0x5b] sm:$0x1] }
 0x117   : > { %v14345_v47 = vmax.f32 %v1906_v0, %v1907_v59  ;;  %v1942_v1 = vrot.slane %v1941_v15, 4  ;;  %v1952_v31 = vunpack.i.l.bf16 %v1950_v37  ;;  %v1953_v58 = vunpack.i.h.bf16 %v1950_v37  ;;  %v768_v34 = vld [vmem:[%s13702_s23 + $0x5c] sm:$0x1] }
 0x118   : > { %v1920_v17 = vrot.slane %v1919_v6, 1  ;;  %v1932_v8 = vmax.f32 %v1930_v14, %v1931_v7  ;;  %3485 = vrot.lane.b32.xlu1 %v3474_v56, %s13514_s24  ;;  %v1963_v63 = vsel %vm613_vm2, %v765_v32, 4286644096  ;;  %v1976_v52 = vsel %vm613_vm2, %v766_v13, 4286644096 }
 0x119   : > { %v1943_v59 = vmax.f32 %v1941_v15, %v1942_v1  ;;  %v1954_v14 = vmax.f32 %v1952_v31, %v1953_v58  ;;  %v1965_v7 = vunpack.i.l.bf16 %v1963_v63  ;;  %v1966_v48 = vunpack.i.h.bf16 %v1963_v63  ;;  %v769_v56 = vld [vmem:[%s13702_s23 + $0x5d] sm:$0x1]  ;;  %v771_v15 = vld [vmem:[%s13702_s23 + $0x5f] sm:$0x1] }
 0x11a   : > { %v14354_v45 = vmax.f32 %v1919_v6, %v1920_v17  ;;  %v1933_v0 = vrot.slane %v1932_v8, 1  ;;  %v1978_v55 = vunpack.i.l.bf16 %v1976_v52  ;;  %v1979_v26 = vunpack.i.h.bf16 %v1976_v52 }
 0x11b   : > { %v1944_v13 = vrot.slane %v1943_v59, 2  ;;  %v1955_v29 = vrot.slane %v1954_v14, 4  ;;  %v1967_v4 = vmax.f32 %v1965_v7, %v1966_v48  ;;  %v1989_v6 = vsel %vm613_vm2, %v767_v10, 4286644096 }
 0x11c   : > { %v14359_v32 = vmax.f32 %v1932_v8, %v1933_v0  ;;  %v2002_v17 = vsel %vm613_vm2, %v768_v34, 4286644096  ;;  %v1980_v31 = vmax.f32 %v1978_v55, %v1979_v26  ;;  %v1991_v58 = vunpack.i.l.bf16 %v1989_v6  ;;  %v770_v8 = vld [vmem:[%s13702_s23 + $0x5e] sm:$0x1] }
 0x11d   : > { %v1945_v1 = vmax.f32 %v1943_v59, %v1944_v13  ;;  %v1956_v63 = vmax.f32 %v1954_v14, %v1955_v29  ;;  %v1968_v54 = vrot.slane %v1967_v4, 4  ;;  %v1992_v37 = vunpack.i.h.bf16 %v1989_v6 }
 0x11e   : > { %v2004_v49 = vunpack.i.l.bf16 %v2002_v17  ;;  %v1981_v52 = vrot.slane %v1980_v31, 4  ;;  %v2005_v19 = vunpack.i.h.bf16 %v2002_v17  ;;  %v2015_v48 = vsel %vm613_vm2, %v769_v56, 4286644096 }
 0x11f   : > { %v1946_v0 = vrot.slane %v1945_v1, 1  ;;  %v1957_v10 = vrot.slane %v1956_v63, 2  ;;  %v1969_v7 = vmax.f32 %v1967_v4, %v1968_v54  ;;  %v1993_v34 = vmax.f32 %v1991_v58, %v1992_v37 }
 0x120   : > { %v2017_v51 = vunpack.i.l.bf16 %v2015_v48  ;;  %v1982_v59 = vmax.f32 %v1980_v31, %v1981_v52  ;;  %v2006_v26 = vmax.f32 %v2004_v49, %v2005_v19  ;;  %v2018_v55 = vunpack.i.h.bf16 %v2015_v48 }
 0x121   : > { %v14367_v9 = vmax.f32 %v1945_v1, %v1946_v0  ;;  %v1958_v29 = vmax.f32 %v1956_v63, %v1957_v10  ;;  %v1970_v14 = vrot.slane %v1969_v7, 2  ;;  %v1994_v13 = vrot.slane %v1993_v34, 4 }
 0x122   : > { %v2028_v6 = vsel %vm613_vm2, %v770_v8, 4286644096  ;;  %v1983_v30 = vrot.slane %v1982_v59, 2  ;;  %v2007_v56 = vrot.slane %v2006_v26, 4  ;;  %v2019_v27 = vmax.f32 %v2017_v51, %v2018_v55 }
 0x123   : > { %v1959_v4 = vrot.slane %v1958_v29, 1  ;;  %v1971_v54 = vmax.f32 %v1969_v7, %v1970_v14  ;;  %v1995_v37 = vmax.f32 %v1993_v34, %v1994_v13  ;;  %v2030_v1 = vunpack.i.l.bf16 %v2028_v6 }
 0x124   : > { %v1984_v58 = vmax.f32 %v1982_v59, %v1983_v30  ;;  %v2008_v31 = vmax.f32 %v2006_v26, %v2007_v56  ;;  %v2020_v19 = vrot.slane %v2019_v27, 4  ;;  %v2031_v49 = vunpack.i.h.bf16 %v2028_v6 }
 0x125   : > { %v1960_v63 = vmax.f32 %v1958_v29, %v1959_v4  ;;  %v1972_v0 = vrot.slane %v1971_v54, 1  ;;  %v1996_v52 = vrot.slane %v1995_v37, 2  ;;  %v2041_v8 = vsel %vm613_vm2, %v771_v15, 4286644096 }
 0x126   : > { %v1985_v48 = vrot.slane %v1984_v58, 1  ;;  %v2009_v10 = vrot.slane %v2008_v31, 2  ;;  %v2021_v53 = vmax.f32 %v2019_v27, %v2020_v19  ;;  %v2032_v17 = vmax.f32 %v2030_v1, %v2031_v49 }
 0x127   : > { %v1961_v3 = vpack.i.bf16 %v1960_v63, %v1960_v63  ;;  %v1973_v46 = vmax.f32 %v1971_v54, %v1972_v0  ;;  %v1997_v51 = vmax.f32 %v1995_v37, %v1996_v52  ;;  %v2043_v55 = vunpack.i.l.bf16 %v2041_v8 }
 0x128   : > { %v1986_v7 = vmax.f32 %v1984_v58, %v1985_v48  ;;  %v2010_v34 = vmax.f32 %v2008_v31, %v2009_v10  ;;  %v2022_v14 = vrot.slane %v2021_v53, 2  ;;  %v2033_v30 = vrot.slane %v2032_v17, 4 }
 0x129   : > { %v1974_v59 = vpack.i.bf16 %v1973_v46, %v1973_v46  ;;  %v1998_v26 = vrot.slane %v1997_v51, 1  ;;  %v2044_v13 = vunpack.i.h.bf16 %v2041_v8  ;;  %v19069_v29 = vpack.i.bf16 %v14313_v62, %v14313_v62 }
 0x12a   : > { %v1987_v6 = vpack.i.bf16 %v1986_v7, %v1986_v7  ;;  %v2011_v56 = vrot.slane %v2010_v34, 1  ;;  %v2023_v27 = vmax.f32 %v2021_v53, %v2022_v14  ;;  %v2034_v4 = vmax.f32 %v2032_v17, %v2033_v30 }
 0x12b   : > { %v2751_v15 = vsel %vm2469_vm4, %v19069_v29, 4286644096  ;;  %v1999_v1 = vmax.f32 %v1997_v51, %v1998_v26  ;;  %v2045_v54 = vmax.f32 %v2043_v55, %v2044_v13  ;;  %v2754_v37 = vsel %vm2469_vm4, %v1961_v3, 4286644096 }
 0x12c   : > { %v19070_v58 = vpack.i.bf16 %v14322_v2, %v14322_v2  ;;  %v2012_v31 = vmax.f32 %v2010_v34, %v2011_v56  ;;  %v2024_v19 = vrot.slane %v2023_v27, 1  ;;  %v2035_v49 = vrot.slane %v2034_v4, 2 }
 0x12d   : > { %v14383_v63 = vmax.bf16 %v2754_v37, %v2751_v15  ;;  %v2000_v62 = vpack.i.bf16 %v1999_v1, %v1999_v1  ;;  %v2046_v0 = vrot.slane %v2045_v54, 4  ;;  %v2761_v52 = vsel %vm2469_vm4, %v1974_v59, 4286644096 }
 0x12e   : > { %v2758_v46 = vsel %vm2469_vm4, %v19070_v58, 4286644096  ;;  %v19072_v53 = vpack.i.bf16 %v14332_v40, %v14332_v40  ;;  %v2013_v3 = vpack.i.bf16 %v2012_v31, %v2012_v31  ;;  %v2025_v8 = vmax.f32 %v2023_v27, %v2024_v19 }
 0x12f   : > { %19071 = vst [vmem:[#allocation36_spill] sm:$0xff] %v14383_v63  ;;  %v2036_v48 = vmax.f32 %v2034_v4, %v2035_v49  ;;  %v14390_v2 = vmax.bf16 %v2761_v52, %v2758_v46  ;;  %v2047_v10 = vmax.f32 %v2045_v54, %v2046_v0  ;;  %v2768_v51 = vsel %vm2469_vm4, %v1987_v6, 4286644096  ;;  %v740_v0 = vld [vmem:[%s13702_s23 + $0x40] sm:$0x1] }
 0x130   : > { %v2765_v17 = vsel %vm2469_vm4, %v19072_v53, 4286644096  ;;  %v19074_v55 = vpack.i.bf16 %v14334_v39, %v14334_v39  ;;  %v2775_v34 = vsel %vm2469_vm4, %v2000_v62, 4286644096  ;;  %v2026_v14 = vpack.i.bf16 %v2025_v8, %v2025_v8 }
 0x131   : > { %19073 = vst [vmem:[#allocation37_spill] sm:$0xff] %v14390_v2  ;;  %v2037_v30 = vrot.slane %v2036_v48, 1  ;;  %v14398_v40 = vmax.bf16 %v2768_v51, %v2765_v17  ;;  %v2048_v26 = vrot.slane %v2047_v10, 2  ;;  %v19077_v13 = vpack.i.bf16 %v14345_v47, %v14345_v47  ;;  %v741_v17 = vld [vmem:[%s13702_s23 + $0x41] sm:$0x1] }
 0x132   : > { %v2772_v7 = vsel %vm2469_vm4, %v19074_v55, 4286644096  ;;  %v2782_v15 = vsel %vm2469_vm4, %v2013_v3, 4286644096  ;;  %v11855_v39 = vcombine.low %v14383_v63, %v14383_v63  ;;  %v19079_v27 = vpack.i.bf16 %v14354_v45, %v14354_v45  ;;  %v742_v3 = vld [vmem:[%s13702_s23 + $0x42] sm:$0x1] }
 0x133   : > { %19075 = vst [vmem:[#allocation38_spill] sm:$0xff] %v14398_v40  ;;  %v14400_v59 = vmax.bf16 %v2775_v34, %v2772_v7  ;;  %v2779_v29 = vsel %vm2469_vm4, %v19077_v13, 4286644096  ;;  %v2038_v6 = vmax.f32 %v2036_v48, %v2037_v30  ;;  %v2789_v47 = vsel %vm2469_vm4, %v2026_v14, 4286644096 }
 0x134   : > { %v14409_v56 = vmax.bf16 %v2782_v15, %v2779_v29  ;;  %v2786_v4 = vsel %vm2469_vm4, %v19079_v27, 4286644096  ;;  %v2049_v1 = vmax.f32 %v2047_v10, %v2048_v26  ;;  %v19081_v37 = vpack.i.bf16 %v14359_v32, %v14359_v32 }
 0x135   : > { %19076 = vst [vmem:[#allocation39_spill] sm:$0xff] %v14400_v59  ;;  %v14416_v54 = vmax.bf16 %v2789_v47, %v2786_v4  ;;  %v19082_v46 = vpack.i.bf16 %v14367_v9, %v14367_v9  ;;  %v2039_v45 = vpack.i.bf16 %v2038_v6, %v2038_v6  ;;  %v11856_v19 = vcombine.low %v14390_v2, %v14390_v2  ;;  %v743_v47 = vld [vmem:[%s13702_s23 + $0x43] sm:$0x1] }
 0x136   : > { %19078 = vst [vmem:[#allocation40_spill] sm:$0xff] %v14409_v56  ;;  %v2793_v58 = vsel %vm2469_vm4, %v19081_v37, 4286644096  ;;  %v11857_v49 = vcombine.low %v14398_v40, %v14398_v40  ;;  %v11858_v62 = vcombine.low %v14400_v59, %v14400_v59  ;;  %v2050_v52 = vrot.slane %v2049_v1, 1 }
 0x137   : > { %19080 = vst [vmem:[#allocation41_spill] sm:$0xff] %v14416_v54  ;;  %v2800_v31 = vsel %vm2469_vm4, %v19082_v46, 4286644096  ;;  %v11859_v32 = vcombine.low %v14409_v56, %v14409_v56  ;;  %v11860_v9 = vcombine.low %v14416_v54, %v14416_v54  ;;  %v3150_v53 = vunpack.c.l.b16 %v11855_v39 }
 0x138   : > { %v2796_v8 = vsel %vm2469_vm4, %v2039_v45, 4286644096  ;;  %v3151_v48 = vunpack.c.l.b16 %v11856_v19  ;;  %v3152_v10 = vunpack.c.l.b16 %v11857_v49  ;;  %v3153_v51 = vunpack.c.l.b16 %v11858_v62 }
 0x139   : > { %v2051_v55 = vmax.f32 %v2049_v1, %v2050_v52  ;;  %v14440_v7 = vmax.bf16 %v2796_v8, %v2793_v58  ;;  %v3154_v34 = vunpack.c.l.b16 %v11859_v32  ;;  %v3155_v14 = vunpack.c.l.b16 %v11860_v9  ;;  %v744_v1 = vld [vmem:[%s13702_s23 + $0x44] sm:$0x1] }
 0x13a   : > { %v3210_v30 = vsel %vm3174_vm5, %v3151_v48, %v3150_v53  ;;  %v1638_v26 = vsel %vm613_vm2, %v740_v0, 4286644096  ;;  %v1651_v13 = vsel %vm613_vm2, %v741_v17, 4286644096  ;;  %v1664_v29 = vsel %vm613_vm2, %v742_v3, 4286644096 }
 0x13b   : > { %19083 = vst [vmem:[#allocation42_spill] sm:$0xff] %v14440_v7  ;;  %v2052_v15 = vpack.i.bf16 %v2051_v55, %v2051_v55  ;;  %v11861_v39 = vcombine.low %v14440_v7, %v14440_v7  ;;  %v3211_v6 = vsel %vm3176_vm6, %v3152_v10, %v3210_v30  ;;  %v1640_v27 = vunpack.i.l.bf16 %v1638_v26  ;;  %v745_v17 = vld [vmem:[%s13702_s23 + $0x45] sm:$0x1] }
 0x13c   : > { %v3212_v4 = vsel %vm3178_vm7, %v3153_v51, %v3211_v6  ;;  %v1641_v37 = vunpack.i.h.bf16 %v1638_v26  ;;  %v1653_v58 = vunpack.i.l.bf16 %v1651_v13  ;;  %v1654_v46 = vunpack.i.h.bf16 %v1651_v13  ;;  %v746_v6 = vld [vmem:[%s13702_s23 + $0x46] sm:$0x1] }
 0x13d   : > { %v2803_v45 = vsel %vm2469_vm4, %v2052_v15, 4286644096  ;;  %v3156_v19 = vunpack.c.l.b16 %v11861_v39  ;;  %v3213_v49 = vsel %vm3180_vm8, %v3154_v34, %v3212_v4  ;;  %v1666_v62 = vunpack.i.l.bf16 %v1664_v29 }
 0x13e   : > { %v14454_v0 = vmax.bf16 %v2803_v45, %v2800_v31  ;;  %v3214_v52 = vsel %vm3182_vm9, %v3155_v14, %v3213_v49  ;;  %v1642_v32 = vmax.f32 %v1640_v27, %v1641_v37  ;;  %v1655_v9 = vmax.f32 %v1653_v58, %v1654_v46 }
 0x13f   : > { %v3238_v53 = vpack.c.b16 %v3214_v52, %v3214_v52  ;;  %v1667_v3 = vunpack.i.h.bf16 %v1664_v29  ;;  %v1677_v8 = vsel %vm613_vm2, %v743_v47, 4286644096  ;;  %v1690_v48 = vsel %vm613_vm2, %v744_v1, 4286644096 }
 0x140   : > { %19084 = vst [vmem:[#allocation43_spill] sm:$0xff] %v14454_v0  ;;  %v11862_v10 = vcombine.low %v14454_v0, %v14454_v0  ;;  %v1643_v51 = vrot.slane %v1642_v32, 4  ;;  %v1656_v55 = vrot.slane %v1655_v9, 4  ;;  %v1679_v34 = vunpack.i.l.bf16 %v1677_v8 }
 0x141   : > { %3272 = vst.msk [vmem:[#allocation2 + $0x38] sm:$0xe] %vm3261_vm10, %v3238_v53  ;;  %v1668_v31 = vmax.f32 %v1666_v62, %v1667_v3  ;;  %v1680_v14 = vunpack.i.h.bf16 %v1677_v8  ;;  %v1692_v30 = vunpack.i.l.bf16 %v1690_v48  ;;  %v1693_v26 = vunpack.i.h.bf16 %v1690_v48  ;;  %v747_v3 = vld [vmem:[%s13702_s23 + $0x47] sm:$0x1] }
 0x142   : > { %v3157_v13 = vunpack.c.l.b16 %v11862_v10  ;;  %v1644_v15 = vmax.f32 %v1642_v32, %v1643_v51  ;;  %v1657_v29 = vmax.f32 %v1655_v9, %v1656_v55  ;;  %v1703_v39 = vsel %vm613_vm2, %v745_v17, 4286644096  ;;  %v3286_v55 = vld [vmem:[#allocation2 + $0x24] sm:$0x1] }
 0x143   : > { %v1669_v27 = vrot.slane %v1668_v31, 4  ;;  %v1681_v4 = vmax.f32 %v1679_v34, %v1680_v14  ;;  %v1694_v47 = vmax.f32 %v1692_v30, %v1693_v26  ;;  %v1705_v1 = vunpack.i.l.bf16 %v1703_v39 }
 0x144   : > { %v3215_v37 = vsel %vm3184_vm11, %v3157_v13, %v3156_v19  ;;  %v1645_v58 = vrot.slane %v1644_v15, 2  ;;  %v1658_v46 = vrot.slane %v1657_v29, 2  ;;  %v1706_v45 = vunpack.i.h.bf16 %v1703_v39 }
 0x145   : > { %v3239_v49 = vpack.c.b16 %v3215_v37, %v3215_v37  ;;  %v1670_v62 = vmax.f32 %v1668_v31, %v1669_v27  ;;  %v1682_v52 = vrot.slane %v1681_v4, 4  ;;  %v1695_v53 = vrot.slane %v1694_v47, 4 }
 0x146   : > { %v1646_v32 = vmax.f32 %v1644_v15, %v1645_v58  ;;  %v1659_v8 = vmax.f32 %v1657_v29, %v1658_v46  ;;  %v1707_v9 = vmax.f32 %v1705_v1, %v1706_v45  ;;  %v1716_v17 = vsel %vm613_vm2, %v746_v6, 4286644096 }
 0x147   : > { %3273 = vst.msk [vmem:[#allocation2 + $0x3c] sm:$0x1] %vm613_vm2, %v3239_v49  ;;  %v1671_v48 = vrot.slane %v1670_v62, 2  ;;  %v1683_v10 = vmax.f32 %v1681_v4, %v1682_v52  ;;  %v1696_v51 = vmax.f32 %v1694_v47, %v1695_v53  ;;  %v1718_v19 = vunpack.i.l.bf16 %v1716_v17  ;;  %v748_v47 = vld [vmem:[%s13702_s23 + $0x48] sm:$0x1] }
 0x148   : > { %v1647_v34 = vrot.slane %v1646_v32, 1  ;;  %v1660_v14 = vrot.slane %v1659_v8, 1  ;;  %v1708_v30 = vrot.slane %v1707_v9, 4  ;;  %v1719_v31 = vunpack.i.h.bf16 %v1716_v17  ;;  %v14478_v45 = vld [vmem:[#allocation2 + $0x38] sm:$0xe] }
 0x149   : > { %v1672_v26 = vmax.f32 %v1670_v62, %v1671_v48  ;;  %v1684_v13 = vrot.slane %v1683_v10, 2  ;;  %v1697_v39 = vrot.slane %v1696_v51, 2  ;;  %v1729_v15 = vsel %vm613_vm2, %v747_v3, 4286644096  ;;  %v3537_v3 = vld [vmem:[#allocation2 + $0x14] sm:$0x1] }
 0x14a   : > { %v14470_v29 = vmax.f32 %v1646_v32, %v1647_v34  ;;  %v14472_v6 = vmax.f32 %v1659_v8, %v1660_v14  ;;  %v1709_v27 = vmax.f32 %v1707_v9, %v1708_v30  ;;  %v1720_v1 = vmax.f32 %v1718_v19, %v1719_v31  ;;  %v749_v34 = vld [vmem:[%s13702_s23 + $0x49] sm:$0x1]  ;;  %v754_v48 = vld [vmem:[%s13702_s23 + $0x4e] sm:$0x1]  ;;  %v6157_v38 = vld [vmem:[#allocation2 + $0x38] sm:$0xc] }
 0x14b   : > { %v14475_v4 = vcombine.low %v14320_v23, %v3286_v55  ;;  %v1673_v37 = vrot.slane %v1672_v26, 1  ;;  %v1685_v58 = vmax.f32 %v1683_v10, %v1684_v13  ;;  %v1698_v46 = vmax.f32 %v1696_v51, %v1697_v39  ;;  %v751_v13 = vld [vmem:[%s13702_s23 + $0x4b] sm:$0x1] }
 0x14c   : > { %v1710_v62 = vrot.slane %v1709_v27, 2  ;;  %v1721_v52 = vrot.slane %v1720_v1, 4  ;;  %v1731_v53 = vunpack.i.l.bf16 %v1729_v15  ;;  %v1732_v9 = vunpack.i.h.bf16 %v1729_v15 }
 0x14d   : > { %v14482_v32 = vmax.f32 %v1672_v26, %v1673_v37  ;;  %v1686_v23 = vrot.slane %v1685_v58, 1  ;;  %v1699_v8 = vrot.slane %v1698_v46, 1  ;;  %v1742_v19 = vsel %vm613_vm2, %v748_v47, 4286644096  ;;  %v750_v26 = vld [vmem:[%s13702_s23 + $0x4a] sm:$0x1] }
 0x14e   : > { %v3309_v17 = vld [vmem:[#allocation2 + $0x3c] sm:$0x3]  ;;  %v1711_v10 = vmax.f32 %v1709_v27, %v1710_v62  ;;  %v1722_v51 = vmax.f32 %v1720_v1, %v1721_v52  ;;  %v14494_v31 = vcombine.low %v14318_v20, %v3537_v3  ;;  %v1733_v1 = vmax.f32 %v1731_v53, %v1732_v9 }
 0x14f   : > { %v11901_v55 = vcombine.low %v14478_v45, %v3309_v17  ;;  %v14491_v30 = vmax.f32 %v1685_v58, %v1686_v23  ;;  %v14498_v39 = vmax.f32 %v1698_v46, %v1699_v8  ;;  %v1744_v62 = vunpack.i.l.bf16 %v1742_v19 }
 0x150   : > { %v1712_v15 = vrot.slane %v1711_v10, 1  ;;  %v1723_v27 = vrot.slane %v1722_v51, 2  ;;  %v1745_v52 = vunpack.i.h.bf16 %v1742_v19  ;;  %v1734_v17 = vrot.slane %v1733_v1, 4 }
 0x151   : > { %v3477_v47 = vrot.slane %v11901_v55, 1  ;;  %v1755_v8 = vsel %vm613_vm2, %v749_v34, 4286644096  ;;  %v1768_v53 = vsel %vm613_vm2, %v750_v26, 4286644096  ;;  %vm650_vm15 = vcmask 57344  }
 0x152   : > { %v14504_v23 = vmax.f32 %v1711_v10, %v1712_v15  ;;  %v1724_v3 = vmax.f32 %v1722_v51, %v1723_v27  ;;  %v1746_v46 = vmax.f32 %v1744_v62, %v1745_v52  ;;  %v1781_v9 = vsel %vm613_vm2, %v751_v13, 4286644096  ;;  %v752_v55 = vld [vmem:[%s13702_s23 + $0x4c] sm:$0x1]  ;;  %v753_v26 = vld [vmem:[%s13702_s23 + $0x4d] sm:$0x1] }
 0x153   : > { %3491 = vrot.lane.b32.xlu0 %v3477_v47, %s13514_s24  ;;  %v1735_v10 = vmax.f32 %v1733_v1, %v1734_v17  ;;  %v1757_v15 = vunpack.i.l.bf16 %v1755_v8  ;;  %v1758_v27 = vunpack.i.h.bf16 %v1755_v8  ;;  %v1770_v37 = vunpack.i.l.bf16 %v1768_v53 }
 0x154   : > { %v1725_v58 = vrot.slane %v1724_v3, 1  ;;  %v1747_v51 = vrot.slane %v1746_v46, 4  ;;  %v1771_v47 = vunpack.i.h.bf16 %v1768_v53  ;;  %v1783_v52 = vunpack.i.l.bf16 %v1781_v9 }
 0x155   : > { %v1736_v34 = vrot.slane %v1735_v10, 2  ;;  %v1784_v14 = vunpack.i.h.bf16 %v1781_v9  ;;  %v1759_v13 = vmax.f32 %v1757_v15, %v1758_v27  ;;  %v1794_v7 = vsel %vm613_vm2, %v752_v55, 4286644096 }
 0x156   : > { %v14513_v62 = vmax.f32 %v1724_v3, %v1725_v58  ;;  %v1748_v49 = vmax.f32 %v1746_v46, %v1747_v51  ;;  %v1772_v0 = vmax.f32 %v1770_v37, %v1771_v47  ;;  %v1796_v8 = vunpack.i.l.bf16 %v1794_v7 }
 0x157   : > { %v1737_v17 = vmax.f32 %v1735_v10, %v1736_v34  ;;  %v1785_v19 = vmax.f32 %v1783_v52, %v1784_v14  ;;  %v1760_v58 = vrot.slane %v1759_v13, 4  ;;  %v1797_v53 = vunpack.i.h.bf16 %v1794_v7  ;;  %v755_v34 = vld [vmem:[%s13702_s23 + $0x4f] sm:$0x1] }
 0x158   : > { %v1749_v54 = vrot.slane %v1748_v49, 2  ;;  %v1773_v3 = vrot.slane %v1772_v0, 4  ;;  %v1807_v59 = vsel %vm613_vm2, %v753_v26, 4286644096  ;;  %v1820_v46 = vsel %vm613_vm2, %v754_v48, 4286644096 }
 0x159   : > { %v1738_v56 = vrot.slane %v1737_v17, 1  ;;  %v1786_v9 = vrot.slane %v1785_v19, 4  ;;  %v1761_v15 = vmax.f32 %v1759_v13, %v1760_v58  ;;  %v1798_v51 = vmax.f32 %v1796_v8, %v1797_v53 }
 0x15a   : > { %v1750_v37 = vmax.f32 %v1748_v49, %v1749_v54  ;;  %v1774_v55 = vmax.f32 %v1772_v0, %v1773_v3  ;;  %v1809_v14 = vunpack.i.l.bf16 %v1807_v59  ;;  %v1810_v47 = vunpack.i.h.bf16 %v1807_v59 }
 0x15b   : > { %v14522_v27 = vmax.f32 %v1737_v17, %v1738_v56  ;;  %v1787_v10 = vmax.f32 %v1785_v19, %v1786_v9  ;;  %v1762_v1 = vrot.slane %v1761_v15, 2  ;;  %v1799_v7 = vrot.slane %v1798_v51, 4 }
 0x15c   : > { %v1751_v52 = vrot.slane %v1750_v37, 1  ;;  %v1775_v40 = vrot.slane %v1774_v55, 2  ;;  %v1811_v63 = vmax.f32 %v1809_v14, %v1810_v47  ;;  %v1822_v48 = vunpack.i.l.bf16 %v1820_v46 }
 0x15d   : > { %v1788_v26 = vrot.slane %v1787_v10, 2  ;;  %v1763_v49 = vmax.f32 %v1761_v15, %v1762_v1  ;;  %v1800_v13 = vmax.f32 %v1798_v51, %v1799_v7  ;;  %v1823_v19 = vunpack.i.h.bf16 %v1820_v46 }
 0x15e   : > { %v1752_v54 = vmax.f32 %v1750_v37, %v1751_v52  ;;  %v1776_v0 = vmax.f32 %v1774_v55, %v1775_v40  ;;  %v1812_v17 = vrot.slane %v1811_v63, 4  ;;  %v1833_v59 = vsel %vm613_vm2, %v755_v34, 4286644096 }
 0x15f   : > { %v1789_v56 = vmax.f32 %v1787_v10, %v1788_v26  ;;  %v1764_v58 = vrot.slane %v1763_v49, 1  ;;  %v1801_v53 = vrot.slane %v1800_v13, 2  ;;  %v1824_v12 = vmax.f32 %v1822_v48, %v1823_v19 }
 0x160   : > { %v1753_v8 = vpack.i.bf16 %v1752_v54, %v1752_v54  ;;  %v1777_v3 = vrot.slane %v1776_v0, 1  ;;  %v1813_v22 = vmax.f32 %v1811_v63, %v1812_v17  ;;  %v1835_v2 = vunpack.i.l.bf16 %v1833_v59 }
 0x161   : > { %v1790_v9 = vrot.slane %v1789_v56, 1  ;;  %v1765_v24 = vmax.f32 %v1763_v49, %v1764_v58  ;;  %v1802_v47 = vmax.f32 %v1800_v13, %v1801_v53  ;;  %v1836_v37 = vunpack.i.h.bf16 %v1833_v59 }
 0x162   : > { %v1778_v14 = vmax.f32 %v1776_v0, %v1777_v3  ;;  %v1814_v40 = vrot.slane %v1813_v22, 2  ;;  %v1825_v15 = vrot.slane %v1824_v12, 4  ;;  %v19085_v46 = vpack.i.bf16 %v14470_v29, %v14470_v29 }
 0x163   : > { %v1791_v1 = vmax.f32 %v1789_v56, %v1790_v9  ;;  %v1766_v51 = vpack.i.bf16 %v1765_v24, %v1765_v24  ;;  %v1803_v34 = vrot.slane %v1802_v47, 1  ;;  %v1837_v52 = vmax.f32 %v1835_v2, %v1836_v37 }
 0x164   : > { %v2695_v55 = vsel %vm2469_vm4, %v19085_v46, 4286644096  ;;  %v1779_v10 = vpack.i.bf16 %v1778_v14, %v1778_v14  ;;  %v1815_v63 = vmax.f32 %v1813_v22, %v1814_v40  ;;  %v1826_v26 = vmax.f32 %v1824_v12, %v1825_v15 }
 0x165   : > { %v1792_v7 = vpack.i.bf16 %v1791_v1, %v1791_v1  ;;  %v2698_v48 = vsel %vm2469_vm4, %v1753_v8, 4286644096  ;;  %v1804_v54 = vmax.f32 %v1802_v47, %v1803_v34  ;;  %v1838_v49 = vrot.slane %v1837_v52, 4 }
 0x166   : > { %v14533_v0 = vmax.bf16 %v2698_v48, %v2695_v55  ;;  %v19087_v13 = vpack.i.bf16 %v14472_v6, %v14472_v6  ;;  %v1816_v56 = vrot.slane %v1815_v63, 1  ;;  %v1827_v17 = vrot.slane %v1826_v26, 2 }
 0x167   : > { %v2705_v24 = vsel %vm2469_vm4, %v1766_v51, 4286644096  ;;  %v19088_v2 = vpack.i.bf16 %v14482_v32, %v14482_v32  ;;  %v1805_v22 = vpack.i.bf16 %v1804_v54, %v1804_v54  ;;  %v1839_v19 = vmax.f32 %v1837_v52, %v1838_v49 }
 0x168   : > { %19086 = vst [vmem:[#allocation44_spill] sm:$0xff] %v14533_v0  ;;  %v2702_v29 = vsel %vm2469_vm4, %v19087_v13, 4286644096  ;;  %v2712_v8 = vsel %vm2469_vm4, %v1779_v10, 4286644096  ;;  %v1817_v58 = vmax.f32 %v1815_v63, %v1816_v56  ;;  %v1828_v3 = vmax.f32 %v1826_v26, %v1827_v17 }
 0x169   : > { %v2709_v12 = vsel %vm2469_vm4, %v19088_v2, 4286644096  ;;  %v14544_v59 = vmax.bf16 %v2705_v24, %v2702_v29  ;;  %v19091_v53 = vpack.i.bf16 %v14491_v30, %v14491_v30  ;;  %v1840_v14 = vrot.slane %v1839_v19, 2 }
 0x16a   : > { %v14547_v6 = vmax.bf16 %v2712_v8, %v2709_v12  ;;  %v2719_v32 = vsel %vm2469_vm4, %v1792_v7, 4286644096  ;;  %v19092_v47 = vpack.i.bf16 %v14498_v39, %v14498_v39  ;;  %v11847_v1 = vcombine.low %v14533_v0, %v14533_v0  ;;  %v773_v8 = vld [vmem:[%s13702_s23 + $0x61] sm:$0x1]  ;;  %v13411_v0 = vld [vmem:[#allocation2 + $0x14] sm:$0x1] }
 0x16b   : > { %19089 = vst [vmem:[#allocation45_spill] sm:$0xff] %v14544_v59  ;;  %v2716_v9 = vsel %vm2469_vm4, %v19091_v53, 4286644096  ;;  %v1818_v40 = vpack.i.bf16 %v1817_v58, %v1817_v58  ;;  %v1829_v15 = vrot.slane %v1828_v3, 1  ;;  %v2726_v55 = vsel %vm2469_vm4, %v1805_v22, 4286644096 }
 0x16c   : > { %19090 = vst [vmem:[#allocation46_spill] sm:$0xff] %v14547_v6  ;;  %v2723_v37 = vsel %vm2469_vm4, %v19092_v47, 4286644096  ;;  %v14560_v46 = vmax.bf16 %v2719_v32, %v2716_v9  ;;  %v1841_v30 = vmax.f32 %v1839_v19, %v1840_v14  ;;  %v19095_v10 = vpack.i.bf16 %v14504_v23, %v14504_v23  ;;  %v772_v19 = vld [vmem:[%s13702_s23 + $0x60] sm:$0x1] }
 0x16d   : > { %v14563_v51 = vmax.bf16 %v2726_v55, %v2723_v37  ;;  %v19096_v39 = vpack.i.bf16 %v14513_v62, %v14513_v62  ;;  %v1830_v7 = vmax.f32 %v1828_v3, %v1829_v15  ;;  %v2733_v63 = vsel %vm2469_vm4, %v1818_v40, 4286644096  ;;  %v774_v58 = vld [vmem:[%s13702_s23 + $0x62] sm:$0x1] }
 0x16e   : > { %19093 = vst [vmem:[#allocation47_spill] sm:$0xff] %v14560_v46  ;;  %v2730_v34 = vsel %vm2469_vm4, %v19095_v10, 4286644096  ;;  %v19097_v26 = vpack.i.bf16 %v14522_v27, %v14522_v27  ;;  %v11848_v23 = vcombine.low %v14544_v59, %v14544_v59  ;;  %v1842_v54 = vrot.slane %v1841_v30, 1 }
 0x16f   : > { %19094 = vst [vmem:[#allocation48_spill] sm:$0xff] %v14563_v51  ;;  %v2737_v52 = vsel %vm2469_vm4, %v19096_v39, 4286644096  ;;  %v14580_v49 = vmax.bf16 %v2733_v63, %v2730_v34  ;;  %v11849_v62 = vcombine.low %v14547_v6, %v14547_v6  ;;  %v11850_v13 = vcombine.low %v14560_v46, %v14560_v46  ;;  %v775_v39 = vld [vmem:[%s13702_s23 + $0x63] sm:$0x1] }
 0x170   : > { %v2744_v48 = vsel %vm2469_vm4, %v19097_v26, 4286644096  ;;  %v1831_v29 = vpack.i.bf16 %v1830_v7, %v1830_v7  ;;  %v11851_v27 = vcombine.low %v14563_v51, %v14563_v51  ;;  %v3142_v56 = vunpack.c.l.b16 %v11847_v1  ;;  %v776_v26 = vld [vmem:[%s13702_s23 + $0x64] sm:$0x1] }
 0x171   : > { %19098 = vst [vmem:[#allocation49_spill] sm:$0xff] %v14580_v49  ;;  %v3143_v17 = vunpack.c.l.b16 %v11848_v23  ;;  %v1843_v24 = vmax.f32 %v1841_v30, %v1842_v54  ;;  %v11852_v2 = vcombine.low %v14580_v49, %v14580_v49  ;;  %v3144_v12 = vunpack.c.l.b16 %v11849_v62 }
 0x172   : > { %v3145_v22 = vunpack.c.l.b16 %v11850_v13  ;;  %v2740_v3 = vsel %vm2469_vm4, %v1831_v29, 4286644096  ;;  %v3146_v53 = vunpack.c.l.b16 %v11851_v27  ;;  %v19099_v14 = vcombine.low %v14318_v20, %v14324_v43 }
 0x173   : > { %v3204_v9 = vsel %vm3174_vm5, %v3143_v17, %v3142_v56  ;;  %v1844_v47 = vpack.i.bf16 %v1843_v24, %v1843_v24  ;;  %v14598_v37 = vmax.bf16 %v2740_v3, %v2737_v52  ;;  %v3147_v1 = vunpack.c.l.b16 %v11852_v2  ;;  %v777_v17 = vld [vmem:[%s13702_s23 + $0x65] sm:$0x1] }
 0x174   : > { %v3728_v32 = vrot.slane %v19099_v14, 1  ;;  %v3205_v40 = vsel %vm3176_vm6, %v3144_v12, %v3204_v9  ;;  %v2054_v55 = vsel %vm613_vm2, %v772_v19, 4286644096  ;;  %v2067_v30 = vsel %vm613_vm2, %v773_v8, 4286644096 }
 0x175   : > { %19100 = vst [vmem:[#allocation50_spill] sm:$0xff] %v14598_v37  ;;  %v3206_v15 = vsel %vm3178_vm7, %v3145_v22, %v3205_v40  ;;  %v2080_v10 = vsel %vm613_vm2, %v774_v58, 4286644096  ;;  %v2747_v20 = vsel %vm2469_vm4, %v1844_v47, 4286644096  ;;  %v11853_v43 = vcombine.low %v14598_v37, %v14598_v37 }
 0x176   : > { %3736 = vrot.lane.b32.xlu0 %v3728_v32, %s13514_s24  ;;  %v3207_v34 = vsel %vm3180_vm8, %v3146_v53, %v3206_v15  ;;  %v2056_v52 = vunpack.i.l.bf16 %v2054_v55  ;;  %v14611_v7 = vmax.bf16 %v2747_v20, %v2744_v48  ;;  %v2057_v23 = vunpack.i.h.bf16 %v2054_v55  ;;  %v778_v14 = vld [vmem:[%s13702_s23 + $0x66] sm:$0x1] }
 0x177   : > { %v3208_v63 = vsel %vm3182_vm9, %v3147_v1, %v3207_v34  ;;  %v2069_v54 = vunpack.i.l.bf16 %v2067_v30  ;;  %v3148_v62 = vunpack.c.l.b16 %v11853_v43  ;;  %v2070_v29 = vunpack.i.h.bf16 %v2067_v30 }
 0x178   : > { %19101 = vst [vmem:[#allocation51_spill] sm:$0xff] %v14611_v7  ;;  %v3236_v13 = vpack.c.b16 %v3208_v63, %v3208_v63  ;;  %v2082_v27 = vunpack.i.l.bf16 %v2080_v10  ;;  %v11854_v56 = vcombine.low %v14611_v7, %v14611_v7  ;;  %v2058_v24 = vmax.f32 %v2056_v52, %v2057_v23  ;;  %v779_v52 = vld [vmem:[%s13702_s23 + $0x67] sm:$0x1] }
 0x179   : > { %v2083_v2 = vunpack.i.h.bf16 %v2080_v10  ;;  %v2093_v12 = vsel %vm613_vm2, %v775_v39, 4286644096  ;;  %v2071_v48 = vmax.f32 %v2069_v54, %v2070_v29  ;;  %v2106_v8 = vsel %vm613_vm2, %v776_v26, 4286644096 }
 0x17a   : > { %3270 = vst.msk [vmem:[#allocation2 + $0x30] sm:$0xe] %vm3261_vm10, %v3236_v13  ;;  %v2095_v22 = vunpack.i.l.bf16 %v2093_v12  ;;  %v2096_v19 = vunpack.i.h.bf16 %v2093_v12  ;;  %v3149_v58 = vunpack.c.l.b16 %v11854_v56  ;;  %v2059_v3 = vrot.slane %v2058_v24, 4 }
 0x17b   : > { %v2084_v53 = vmax.f32 %v2082_v27, %v2083_v2  ;;  %v2108_v9 = vunpack.i.l.bf16 %v2106_v8  ;;  %v2072_v32 = vrot.slane %v2071_v48, 4  ;;  %v2109_v1 = vunpack.i.h.bf16 %v2106_v8 }
 0x17c   : > { %v2097_v47 = vmax.f32 %v2095_v22, %v2096_v19  ;;  %v2119_v40 = vsel %vm613_vm2, %v777_v17, 4286644096  ;;  %v3209_v15 = vsel %vm3184_vm11, %v3149_v58, %v3148_v62  ;;  %v2060_v55 = vmax.f32 %v2058_v24, %v2059_v3 }
 0x17d   : > { %v2085_v30 = vrot.slane %v2084_v53, 4  ;;  %v2121_v10 = vunpack.i.l.bf16 %v2119_v40  ;;  %v3237_v20 = vpack.c.b16 %v3209_v15, %v3209_v15  ;;  %v2073_v43 = vmax.f32 %v2071_v48, %v2072_v32 }
 0x17e   : > { %v2098_v34 = vrot.slane %v2097_v47, 4  ;;  %v2110_v39 = vmax.f32 %v2108_v9, %v2109_v1  ;;  %v2061_v63 = vrot.slane %v2060_v55, 2  ;;  %v2122_v23 = vunpack.i.h.bf16 %v2119_v40  ;;  %v3292_v9 = vld [vmem:[#allocation2 + $0x3c] sm:$0x1] }
 0x17f   : > { %v2086_v26 = vmax.f32 %v2084_v53, %v2085_v30  ;;  %v2132_v54 = vsel %vm613_vm2, %v778_v14, 4286644096  ;;  %3271 = vst.msk [vmem:[#allocation2 + $0x34] sm:$0x1] %vm613_vm2, %v3237_v20  ;;  %v2074_v13 = vrot.slane %v2073_v43, 2  ;;  %vm3519_vm0 = vcmask 64512  }
 0x180   : > { %v2099_v29 = vmax.f32 %v2097_v47, %v2098_v34  ;;  %v2111_v27 = vrot.slane %v2110_v39, 4  ;;  %v2134_v56 = vunpack.i.l.bf16 %v2132_v54  ;;  %v2062_v62 = vmax.f32 %v2060_v55, %v2061_v63  ;;  %v780_v20 = vld [vmem:[%s13702_s23 + $0x68] sm:$0x1] }
 0x181   : > { %v2087_v17 = vrot.slane %v2086_v26, 2  ;;  %v2123_v24 = vmax.f32 %v2121_v10, %v2122_v23  ;;  %v2135_v2 = vunpack.i.h.bf16 %v2132_v54  ;;  %v2075_v12 = vmax.f32 %v2073_v43, %v2074_v13  ;;  %v3300_v40 = vld [vmem:[#allocation2 + $0x30] sm:$0xe] }
 0x182   : > { %v2100_v48 = vrot.slane %v2099_v29, 2  ;;  %v2112_v22 = vmax.f32 %v2110_v39, %v2111_v27  ;;  %v2145_v19 = vsel %vm613_vm2, %v779_v52, 4286644096  ;;  %v2063_v8 = vrot.slane %v2062_v62, 1 }
 0x183   : > { %v2088_v58 = vmax.f32 %v2086_v26, %v2087_v17  ;;  %v2124_v3 = vrot.slane %v2123_v24, 4  ;;  %v2136_v53 = vmax.f32 %v2134_v56, %v2135_v2  ;;  %v2076_v14 = vrot.slane %v2075_v12, 1  ;;  %v782_v2 = vld [vmem:[%s13702_s23 + $0x6a] sm:$0x1] }
 0x184   : > { %v2101_v32 = vmax.f32 %v2099_v29, %v2100_v48  ;;  %v2113_v47 = vrot.slane %v2112_v22, 2  ;;  %v2147_v1 = vunpack.i.l.bf16 %v2145_v19  ;;  %v14628_v15 = vmax.f32 %v2062_v62, %v2063_v8 }
 0x185   : > { %v2089_v55 = vrot.slane %v2088_v58, 1  ;;  %v2125_v30 = vmax.f32 %v2123_v24, %v2124_v3  ;;  %v2137_v10 = vrot.slane %v2136_v53, 4  ;;  %v14631_v43 = vmax.f32 %v2075_v12, %v2076_v14  ;;  %v781_v24 = vld [vmem:[%s13702_s23 + $0x69] sm:$0x1] }
 0x186   : > { %v2102_v34 = vrot.slane %v2101_v32, 1  ;;  %v2114_v39 = vmax.f32 %v2112_v22, %v2113_v47  ;;  %v2148_v52 = vunpack.i.h.bf16 %v2145_v19  ;;  %v14634_v63 = vcombine.low %v14478_v45, %v3292_v9  ;;  %v3290_v26 = vld [vmem:[#allocation2 + $0x34] sm:$0x1] }
 0x187   : > { %v3308_v23 = vld [vmem:[#allocation2 + $0x34] sm:$0x3]  ;;  %v14636_v54 = vmax.f32 %v2088_v58, %v2089_v55  ;;  %v2126_v13 = vrot.slane %v2125_v30, 2  ;;  %v2138_v29 = vmax.f32 %v2136_v53, %v2137_v10  ;;  %v14638_v27 = vcombine.low %v3300_v40, %v3290_v26  ;;  %v783_v53 = vld [vmem:[%s13702_s23 + $0x6b] sm:$0x1] }
 0x188   : > { %v11900_v56 = vcombine.low %v3300_v40, %v3308_v23  ;;  %v14646_v45 = vmax.f32 %v2101_v32, %v2102_v34  ;;  %v2115_v12 = vrot.slane %v2114_v39, 1  ;;  %v2149_v58 = vmax.f32 %v2147_v1, %v2148_v52  ;;  %v784_v52 = vld [vmem:[%s13702_s23 + $0x6c] sm:$0x1] }
 0x189   : > { %v2127_v48 = vmax.f32 %v2125_v30, %v2126_v13  ;;  %v2139_v22 = vrot.slane %v2138_v29, 2  ;;  %v2158_v3 = vsel %vm613_vm2, %v780_v20, 4286644096  ;;  %v2171_v30 = vsel %vm613_vm2, %v781_v24, 4286644096 }
 0x18a   : > { %v3476_v19 = vrot.slane %v11900_v56, 1  ;;  %v14652_v9 = vmax.f32 %v2114_v39, %v2115_v12  ;;  %v2160_v40 = vunpack.i.l.bf16 %v2158_v3  ;;  %v2150_v32 = vrot.slane %v2149_v58, 4  ;;  %v786_v24 = vld [vmem:[%s13702_s23 + $0x6e] sm:$0x1] }
 0x18b   : > { %v2128_v14 = vrot.slane %v2127_v48, 1  ;;  %v2140_v47 = vmax.f32 %v2138_v29, %v2139_v22  ;;  %v2161_v55 = vunpack.i.h.bf16 %v2158_v3  ;;  %v2184_v10 = vsel %vm613_vm2, %v782_v2, 4286644096  ;;  %v785_v22 = vld [vmem:[%s13702_s23 + $0x6d] sm:$0x1] }
 0x18c   : > { %3489 = vrot.lane.b32.xlu1 %v3476_v19, %s13514_s24  ;;  %v2173_v39 = vunpack.i.l.bf16 %v2171_v30  ;;  %v2151_v26 = vmax.f32 %v2149_v58, %v2150_v32  ;;  %v2174_v13 = vunpack.i.h.bf16 %v2171_v30  ;;  %v2186_v29 = vunpack.i.l.bf16 %v2184_v10 }
 0x18d   : > { %v14659_v34 = vmax.f32 %v2127_v48, %v2128_v14  ;;  %v2141_v20 = vrot.slane %v2140_v47, 1  ;;  %v2162_v23 = vmax.f32 %v2160_v40, %v2161_v55  ;;  %v2187_v2 = vunpack.i.h.bf16 %v2184_v10 }
 0x18e   : > { %v2197_v12 = vsel %vm613_vm2, %v783_v53, 4286644096  ;;  %v2152_v48 = vrot.slane %v2151_v26, 2  ;;  %v2175_v3 = vmax.f32 %v2173_v39, %v2174_v13  ;;  %v2210_v32 = vsel %vm613_vm2, %v784_v52, 4286644096 }
 0x18f   : > { %v2163_v19 = vrot.slane %v2162_v23, 4  ;;  %v2199_v14 = vunpack.i.l.bf16 %v2197_v12  ;;  %v14668_v1 = vmax.f32 %v2140_v47, %v2141_v20  ;;  %v2188_v58 = vmax.f32 %v2186_v29, %v2187_v2 }
 0x190   : > { %v2200_v40 = vunpack.i.h.bf16 %v2197_v12  ;;  %v2153_v55 = vmax.f32 %v2151_v26, %v2152_v48  ;;  %v2176_v56 = vrot.slane %v2175_v3, 4  ;;  %v2212_v8 = vunpack.i.l.bf16 %v2210_v32 }
 0x191   : > { %v2164_v30 = vmax.f32 %v2162_v23, %v2163_v19  ;;  %v2189_v17 = vrot.slane %v2188_v58, 4  ;;  %v2213_v53 = vunpack.i.h.bf16 %v2210_v32  ;;  %v2223_v62 = vsel %vm613_vm2, %v785_v22, 4286644096  ;;  %v787_v19 = vld [vmem:[%s13702_s23 + $0x6f] sm:$0x1] }
 0x192   : > { %v2201_v10 = vmax.f32 %v2199_v14, %v2200_v40  ;;  %v2154_v7 = vrot.slane %v2153_v55, 1  ;;  %v2177_v13 = vmax.f32 %v2175_v3, %v2176_v56  ;;  %v2225_v47 = vunpack.i.l.bf16 %v2223_v62 }
 0x193   : > { %v2165_v39 = vrot.slane %v2164_v30, 2  ;;  %v2190_v20 = vmax.f32 %v2188_v58, %v2189_v17  ;;  %v2214_v2 = vmax.f32 %v2212_v8, %v2213_v53  ;;  %v2226_v12 = vunpack.i.h.bf16 %v2223_v62 }
 0x194   : > { %v2202_v29 = vrot.slane %v2201_v10, 4  ;;  %v2178_v23 = vrot.slane %v2177_v13, 2  ;;  %v2236_v48 = vsel %vm613_vm2, %v786_v24, 4286644096  ;;  %v14677_v37 = vmax.f32 %v2153_v55, %v2154_v7 }
 0x195   : > { %v2166_v26 = vmax.f32 %v2164_v30, %v2165_v39  ;;  %v2191_v14 = vrot.slane %v2190_v20, 2  ;;  %v2215_v32 = vrot.slane %v2214_v2, 4  ;;  %v2227_v22 = vmax.f32 %v2225_v47, %v2226_v12 }
 0x196   : > { %v2203_v40 = vmax.f32 %v2201_v10, %v2202_v29  ;;  %v2179_v3 = vmax.f32 %v2177_v13, %v2178_v23  ;;  %v2238_v17 = vunpack.i.l.bf16 %v2236_v48  ;;  %v2239_v30 = vunpack.i.h.bf16 %v2236_v48 }
 0x197   : > { %v2167_v56 = vrot.slane %v2166_v26, 1  ;;  %v2192_v58 = vmax.f32 %v2190_v20, %v2191_v14  ;;  %v2216_v62 = vmax.f32 %v2214_v2, %v2215_v32  ;;  %v2228_v53 = vrot.slane %v2227_v22, 4 }
 0x198   : > { %v2204_v8 = vrot.slane %v2203_v40, 2  ;;  %v2180_v52 = vrot.slane %v2179_v3, 1  ;;  %v2249_v39 = vsel %vm613_vm2, %v787_v19, 4286644096  ;;  %v2240_v7 = vmax.f32 %v2238_v17, %v2239_v30 }
 0x199   : > { %v2168_v49 = vmax.f32 %v2166_v26, %v2167_v56  ;;  %v2193_v24 = vrot.slane %v2192_v58, 1  ;;  %v2217_v46 = vrot.slane %v2216_v62, 2  ;;  %v2229_v10 = vmax.f32 %v2227_v22, %v2228_v53 }
 0x19a   : > { %v2205_v51 = vmax.f32 %v2203_v40, %v2204_v8  ;;  %v2181_v47 = vmax.f32 %v2179_v3, %v2180_v52  ;;  %v2251_v55 = vunpack.i.l.bf16 %v2249_v39  ;;  %v2241_v2 = vrot.slane %v2240_v7, 4 }
 0x19b   : > { %v2169_v29 = vpack.i.bf16 %v2168_v49, %v2168_v49  ;;  %v2194_v12 = vmax.f32 %v2192_v58, %v2193_v24  ;;  %v2218_v23 = vmax.f32 %v2216_v62, %v2217_v46  ;;  %v2230_v20 = vrot.slane %v2229_v10, 2 }
 0x19c   : > { %v2206_v13 = vrot.slane %v2205_v51, 1  ;;  %v2182_v14 = vpack.i.bf16 %v2181_v47, %v2181_v47  ;;  %v2252_v32 = vunpack.i.h.bf16 %v2249_v39  ;;  %v19102_v26 = vpack.i.bf16 %v14628_v15, %v14628_v15 }
 0x19d   : > { %v2195_v19 = vpack.i.bf16 %v2194_v12, %v2194_v12  ;;  %v2219_v56 = vrot.slane %v2218_v23, 1  ;;  %v2231_v22 = vmax.f32 %v2229_v10, %v2230_v20  ;;  %v2242_v49 = vmax.f32 %v2240_v7, %v2241_v2 }
 0x19e   : > { %v2807_v48 = vsel %vm2469_vm4, %v19102_v26, 4286644096  ;;  %v2207_v40 = vmax.f32 %v2205_v51, %v2206_v13  ;;  %v2253_v52 = vmax.f32 %v2251_v55, %v2252_v32  ;;  %v2810_v3 = vsel %vm2469_vm4, %v2169_v29, 4286644096 }
 0x19f   : > { %v19103_v46 = vpack.i.bf16 %v14631_v43, %v14631_v43  ;;  %v2220_v8 = vmax.f32 %v2218_v23, %v2219_v56  ;;  %v2232_v62 = vrot.slane %v2231_v22, 1  ;;  %v14689_v53 = vmax.bf16 %v2810_v3, %v2807_v48 }
 0x1a0   : > { %v2208_v58 = vpack.i.bf16 %v2207_v40, %v2207_v40  ;;  %v2243_v15 = vrot.slane %v2242_v49, 2  ;;  %v2254_v30 = vrot.slane %v2253_v52, 4  ;;  %v2817_v51 = vsel %vm2469_vm4, %v2182_v14, 4286644096 }
 0x1a1   : > { %v2814_v17 = vsel %vm2469_vm4, %v19103_v46, 4286644096  ;;  %19104 = vst [vmem:[#allocation52_spill] sm:$0xff] %v14689_v53  ;;  %v19105_v39 = vpack.i.bf16 %v14636_v54, %v14636_v54  ;;  %v2221_v10 = vpack.i.bf16 %v2220_v8, %v2220_v8  ;;  %v2233_v29 = vmax.f32 %v2231_v22, %v2232_v62 }
 0x1a2   : > { %v14696_v47 = vmax.bf16 %v2817_v51, %v2814_v17  ;;  %v2824_v43 = vsel %vm2469_vm4, %v2195_v19, 4286644096  ;;  %v2244_v7 = vmax.f32 %v2242_v49, %v2243_v15  ;;  %v2255_v55 = vmax.f32 %v2253_v52, %v2254_v30  ;;  %v3554_v15 = vld [vmem:[#allocation2 + $0x20] sm:$0xe]  ;;  %v3562_v30 = vld [vmem:[#allocation2 + $0x24] sm:$0x3] }
 0x1a3   : > { %v2821_v24 = vsel %vm2469_vm4, %v19105_v39, 4286644096  ;;  %v19108_v13 = vpack.i.bf16 %v14646_v45, %v14646_v45  ;;  %v2234_v20 = vpack.i.bf16 %v2233_v29, %v2233_v29  ;;  %v2831_v54 = vsel %vm2469_vm4, %v2208_v58, 4286644096  ;;  %v3539_v29 = vld [vmem:[#allocation2 + $0x1c] sm:$0x1] }
 0x1a4   : > { %19106 = vst [vmem:[#allocation53_spill] sm:$0xff] %v14696_v47  ;;  %v14699_v12 = vmax.bf16 %v2824_v43, %v2821_v24  ;;  %v19109_v14 = vpack.i.bf16 %v14652_v9, %v14652_v9  ;;  %v2838_v32 = vsel %vm2469_vm4, %v2221_v10, 4286644096  ;;  %v2245_v26 = vrot.slane %v2244_v7, 1  ;;  %v3541_v10 = vld [vmem:[#allocation2 + $0x24] sm:$0x1] }
 0x1a5   : > { %v2828_v23 = vsel %vm2469_vm4, %v19108_v13, 4286644096  ;;  %v2256_v48 = vrot.slane %v2255_v55, 2  ;;  %v2156_v45 = vpack.i.bf16 %v14677_v37, %v14677_v37  ;;  %v19112_v56 = vpack.i.bf16 %v14659_v34, %v14659_v34 }
 0x1a6   : > { %19107 = vst [vmem:[#allocation54_spill] sm:$0xff] %v14699_v12  ;;  %v2835_v2 = vsel %vm2469_vm4, %v19109_v14, 4286644096  ;;  %v14711_v19 = vmax.bf16 %v2831_v54, %v2828_v23  ;;  %v2845_v9 = vsel %vm2469_vm4, %v2234_v20, 4286644096  ;;  %v11863_v49 = vcombine.low %v14689_v53, %v14689_v53 }
 0x1a7   : > { %v14713_v40 = vmax.bf16 %v2838_v32, %v2835_v2  ;;  %v2842_v22 = vsel %vm2469_vm4, %v19112_v56, 4286644096  ;;  %v2246_v52 = vmax.f32 %v2244_v7, %v2245_v26  ;;  %v2257_v3 = vmax.f32 %v2255_v55, %v2256_v48  ;;  %v3553_v23 = vld [vmem:[#allocation2 + $0x18] sm:$0xe]  ;;  %v3561_v20 = vld [vmem:[#allocation2 + $0x1c] sm:$0x3] }
 0x1a8   : > { %19110 = vst [vmem:[#allocation55_spill] sm:$0xff] %v14711_v19  ;;  %v14724_v46 = vmax.bf16 %v2845_v9, %v2842_v22  ;;  %v19114_v17 = vpack.i.bf16 %v14668_v1, %v14668_v1  ;;  %v11864_v37 = vcombine.low %v14696_v47, %v14696_v47  ;;  %v11865_v34 = vcombine.low %v14699_v12, %v14699_v12  ;;  %v3555_v26 = vld [vmem:[#allocation2 + $0x28] sm:$0xe]  ;;  %v3563_v48 = vld [vmem:[#allocation2 + $0x2c] sm:$0x3] }
 0x1a9   : > { %19111 = vst [vmem:[#allocation56_spill] sm:$0xff] %v14713_v40  ;;  %v11866_v8 = vcombine.low %v14711_v19, %v14711_v19  ;;  %v11867_v62 = vcombine.low %v14713_v40, %v14713_v40  ;;  %v2247_v51 = vpack.i.bf16 %v2246_v52, %v2246_v52  ;;  %v2258_v39 = vrot.slane %v2257_v3, 1 }
 0x1aa   : > { %19113 = vst [vmem:[#allocation57_spill] sm:$0xff] %v14724_v46  ;;  %v2849_v58 = vsel %vm2469_vm4, %v19114_v17, 4286644096  ;;  %v11868_v1 = vcombine.low %v14724_v46, %v14724_v46  ;;  %v3158_v24 = vunpack.c.l.b16 %v11863_v49  ;;  %v2856_v43 = vsel %vm2469_vm4, %v2156_v45, 4286644096 }
 0x1ab   : > { %v3159_v7 = vunpack.c.l.b16 %v11864_v37  ;;  %v3160_v55 = vunpack.c.l.b16 %v11865_v34  ;;  %v3161_v13 = vunpack.c.l.b16 %v11866_v8  ;;  %v2259_v54 = vmax.f32 %v2257_v3, %v2258_v39  ;;  %v3543_v45 = vld [vmem:[#allocation2 + $0x2c] sm:$0x1] }
 0x1ac   : > { %v2852_v14 = vsel %vm2469_vm4, %v2247_v51, 4286644096  ;;  %v3162_v2 = vunpack.c.l.b16 %v11867_v62  ;;  %v3163_v32 = vunpack.c.l.b16 %v11868_v1  ;;  %v14745_v9 = vcombine.low %v3554_v15, %v3541_v10 }
 0x1ad   : > { %v14742_v56 = vmax.bf16 %v2852_v14, %v2849_v58  ;;  %v3216_v22 = vsel %vm3174_vm5, %v3159_v7, %v3158_v24  ;;  %v11921_v49 = vcombine.low %v3554_v15, %v3562_v30  ;;  %v2260_v52 = vpack.i.bf16 %v2259_v54, %v2259_v54 }
 0x1ae   : > { %v3217_v17 = vsel %vm3176_vm6, %v3160_v55, %v3216_v22  ;;  %v14748_v37 = vcombine.low %v3553_v23, %v3539_v29  ;;  %v11920_v3 = vcombine.low %v3553_v23, %v3561_v20  ;;  %v11922_v58 = vcombine.low %v3555_v26, %v3563_v48 }
 0x1af   : > { %19115 = vst [vmem:[#allocation58_spill] sm:$0xff] %v14742_v56  ;;  %v11869_v34 = vcombine.low %v14742_v56, %v14742_v56  ;;  %v3218_v8 = vsel %vm3178_vm7, %v3161_v13, %v3217_v17  ;;  %v3730_v62 = vrot.slane %v11921_v49, 1  ;;  %v2859_v51 = vsel %vm2469_vm4, %v2260_v52, 4286644096 }
 0x1b0   : > { %v3219_v39 = vsel %vm3180_vm8, %v3162_v2, %v3218_v8  ;;  %v14755_v1 = vcombine.low %v3555_v26, %v3543_v45  ;;  %v3383_v15 = vshrl.u32 %v14026_v61, 16  ;;  %v14758_v30 = vmax.bf16 %v2859_v51, %v2856_v43  ;;  %v3545_v51 = vld [vmem:[#allocation2 + $0x34] sm:$0x1] }
 0x1b1   : > { %v3164_v24 = vunpack.c.l.b16 %v11869_v34  ;;  %v3220_v10 = vsel %vm3182_vm9, %v3163_v32, %v3219_v39  ;;  %3740 = vrot.lane.b32.xlu0 %v3730_v62, %s13514_s24  ;;  %v14762_v29 = vrot.slane %v11920_v3, 1  ;;  %v19117_v55 = vshll.u32 %v14026_v61, 16  ;;  %v3547_v34 = vld [vmem:[#allocation2 + $0x3c] sm:$0x1]  ;;  %v14786_v39 = vld [vmem:[#allocation2 + $0x30] sm:$0xe] }
 0x1b2   : > { %19116 = vst [vmem:[#allocation59_spill] sm:$0xff] %v14758_v30  ;;  %v3240_v7 = vpack.c.b16 %v3220_v10, %v3220_v10  ;;  %v3390_v23 = vshrl.u32 %v14162_v44, 16  ;;  %v3392_v20 = vshll.u32 %v14162_v44, 16  ;;  %v11870_v54 = vcombine.low %v14758_v30, %v14758_v30  ;;  %v791_v30 = vld [vmem:[%s13702_s23 + $0x73] sm:$0x1] }
 0x1b3   : > { %v3387_v13 = vrot.slane %v19117_v55, 1  ;;  %v14770_v43 = vrot.slane %v11922_v58, 1  ;;  %v3404_v14 = vshrl.u32 %v14316_v25, 16  ;;  %v3406_v2 = vshll.u32 %v14316_v25, 16  ;;  %v14791_v55 = vld [vmem:[#allocation2 + $0x38] sm:$0xe] }
 0x1b4   : > { %3274 = vst.msk [vmem:[#allocation2 + $0x40] sm:$0xe] %vm3261_vm10, %v3240_v7  ;;  %v3394_v26 = vrot.slane %v3392_v20, 1  ;;  %v3397_v61 = vshrl.u32 %v14475_v4, 16  ;;  %v3399_v48 = vshll.u32 %v14475_v4, 16  ;;  %v3165_v22 = vunpack.c.l.b16 %v11870_v54 }
 0x1b5   : > { %v3388_v32 = vor.u32 %v3387_v13, %v3383_v15  ;;  %v3408_v49 = vrot.slane %v3406_v2, 1  ;;  %v3418_v44 = vshrl.u32 %v14634_v63, 16  ;;  %v3420_v45 = vshll.u32 %v14634_v63, 16  ;;  %v3796_v13 = vld [vmem:[#allocation2 + $0x24] sm:$0x1] }
 0x1b6   : > { %v14780_v52 = vor.u32 %v3394_v26, %v3390_v23  ;;  %v3401_v17 = vrot.slane %v3399_v48, 1  ;;  %v3411_v25 = vshrl.u32 %v14638_v27, 16  ;;  %v3413_v3 = vshll.u32 %v14638_v27, 16  ;;  %v14795_v54 = vld [vmem:[#allocation2 + $0x20] sm:$0xe] }
 0x1b7   : > { %3433 = vrot.lane.b32.xlu0 %v3388_v32, %s13515_s25  ;;  %v3221_v8 = vsel %vm3184_vm11, %v3165_v22, %v3164_v24  ;;  %v3409_v62 = vor.u32 %v3408_v49, %v3404_v14  ;;  %v3422_v4 = vrot.slane %v3420_v45, 1  ;;  %v3635_v58 = vshll.u32 %v14494_v31, 16 }
 0x1b8   : > { %v3241_v63 = vpack.c.b16 %v3221_v8, %v3221_v8  ;;  %v14788_v15 = vor.u32 %v3401_v17, %v3397_v61  ;;  %v3415_v10 = vrot.slane %v3413_v3, 1  ;;  %v3633_v7 = vshrl.u32 %v14494_v31, 16  ;;  %v788_v17 = vld [vmem:[%s13702_s23 + $0x70] sm:$0x1] }
 0x1b9   : > { %v3423_v27 = vor.u32 %v3422_v4, %v3418_v44  ;;  %v3637_v23 = vrot.slane %v3635_v58, 1  ;;  %v3647_v24 = vshrl.u32 %v14745_v9, 16  ;;  %v3649_v20 = vshll.u32 %v14745_v9, 16  ;;  %v3798_v4 = vld [vmem:[#allocation2 + $0x2c] sm:$0x1] }
 0x1ba   : > { %3275 = vst.msk [vmem:[#allocation2 + $0x44] sm:$0x1] %vm613_vm2, %v3241_v63  ;;  %v14799_v14 = vor.u32 %v3415_v10, %v3411_v25  ;;  %v3640_v31 = vshrl.u32 %v14748_v37, 16  ;;  %v3642_v2 = vshll.u32 %v14748_v37, 16  ;;  %v11915_v32 = vcombine.low %v14786_v39, %v3545_v51  ;;  %v789_v25 = vld [vmem:[%s13702_s23 + $0x71] sm:$0x1] }
 0x1bb   : > { %3439 = vrot.lane.b32.xlu0 %v3409_v62, %s13515_s25  ;;  %v3651_v26 = vrot.slane %v3649_v20, 1  ;;  %v3654_v61 = vshrl.u32 %v14755_v1, 16  ;;  %v3656_v9 = vshll.u32 %v14755_v1, 16  ;;  %v11916_v48 = vcombine.low %v14791_v55, %v3547_v34  ;;  %v14810_v58 = vld [vmem:[#allocation2 + $0x28] sm:$0xe] }
 0x1bc   : > { %v3638_v22 = vor.u32 %v3637_v23, %v3633_v7  ;;  %v3644_v49 = vrot.slane %v3642_v2, 1  ;;  %v3663_v44 = vshll.u32 %v11915_v32, 16  ;;  %v11936_v45 = vcombine.low %v14795_v54, %v3796_v13  ;;  %v3302_v51 = vld [vmem:[#allocation2 + $0x40] sm:$0xe] }
 0x1bd   : > { %v3661_v3 = vshrl.u32 %v11915_v32, 16  ;;  %v3658_v8 = vrot.slane %v3656_v9, 1  ;;  %v3668_v62 = vshrl.u32 %v11916_v48, 16  ;;  %v3670_v37 = vshll.u32 %v11916_v48, 16  ;;  %v14815_v10 = vld [vmem:[#allocation2 + $0x40] sm:$0xe] }
 0x1be   : > { %v3652_v1 = vor.u32 %v3651_v26, %v3647_v24  ;;  %v14813_v34 = vor.u32 %v3644_v49, %v3640_v31  ;;  %v3665_v63 = vrot.slane %v3663_v44, 1  ;;  %v3899_v7 = vshll.u32 %v11936_v45, 16  ;;  %v790_v48 = vld [vmem:[%s13702_s23 + $0x72] sm:$0x1] }
 0x1bf   : > { %3443 = vrot.lane.b32.xlu0 %v3423_v27, %s13515_s25  ;;  %v3672_v13 = vrot.slane %v3670_v37, 1  ;;  %v3897_v23 = vshrl.u32 %v11936_v45, 16  ;;  %v2262_v20 = vsel %vm613_vm2, %v788_v17, 4286644096  ;;  %v2275_v2 = vsel %vm613_vm2, %v789_v25, 4286644096 }
 0x1c0   : > { %v14819_v32 = vor.u32 %v3658_v8, %v3654_v61  ;;  %v3901_v9 = vrot.slane %v3899_v7, 1  ;;  %v2264_v56 = vunpack.i.l.bf16 %v2262_v20  ;;  %v2265_v27 = vunpack.i.h.bf16 %v2262_v20 }
 0x1c1   : > { %v3294_v24 = vld [vmem:[#allocation2 + $0x44] sm:$0x1]  ;;  %v3666_v26 = vor.u32 %v3665_v63, %v3661_v3  ;;  %v14823_v44 = vor.u32 %v3672_v13, %v3668_v62  ;;  %v2277_v37 = vunpack.i.l.bf16 %v2275_v2  ;;  %v2278_v45 = vunpack.i.h.bf16 %v2275_v2 }
 0x1c2   : > { %v3310_v31 = vld [vmem:[#allocation2 + $0x44] sm:$0x3]  ;;  %v14825_v46 = vcombine.low %v3302_v51, %v3294_v24  ;;  %v14830_v25 = vcombine.low %v14810_v58, %v3798_v4  ;;  %v2266_v8 = vmax.f32 %v2264_v56, %v2265_v27  ;;  %v2288_v3 = vsel %vm613_vm2, %v790_v48, 4286644096  ;;  %v793_v48 = vld [vmem:[%s13702_s23 + $0x75] sm:$0x1] }
 0x1c3   : > { %v3549_v49 = vld [vmem:[#allocation2 + $0x44] sm:$0x1]  ;;  %v11902_v17 = vcombine.low %v3302_v51, %v3310_v31  ;;  %3688 = vrot.lane.b32.xlu0 %v3638_v22, %s13515_s25  ;;  %v2279_v7 = vmax.f32 %v2277_v37, %v2278_v45  ;;  %v2301_v62 = vsel %vm613_vm2, %v791_v30, 4286644096  ;;  %v14835_v51 = vor.u32 %v3901_v9, %v3897_v23  ;;  %v792_v22 = vld [vmem:[%s13702_s23 + $0x74] sm:$0x1] }
 0x1c4   : > { %v11917_v61 = vcombine.low %v14815_v10, %v3549_v49  ;;  %v3427_v13 = vshll.u32 %v14825_v46, 16  ;;  %v2267_v24 = vrot.slane %v2266_v8, 4  ;;  %v2290_v4 = vunpack.i.l.bf16 %v2288_v3  ;;  %v794_v45 = vld [vmem:[%s13702_s23 + $0x76] sm:$0x1] }
 0x1c5   : > { %v3478_v63 = vrot.slane %v11902_v17, 1  ;;  %v2280_v31 = vrot.slane %v2279_v7, 4  ;;  %v3425_v56 = vshrl.u32 %v14825_v46, 16  ;;  %v2291_v30 = vunpack.i.h.bf16 %v2288_v3 }
 0x1c6   : > { %v3675_v20 = vshrl.u32 %v11917_v61, 16  ;;  %v3677_v2 = vshll.u32 %v11917_v61, 16  ;;  %v2303_v27 = vunpack.i.l.bf16 %v2301_v62  ;;  %v2304_v49 = vunpack.i.h.bf16 %v2301_v62  ;;  %v795_v62 = vld [vmem:[%s13702_s23 + $0x77] sm:$0x1] }
 0x1c7   : > { %3493 = vrot.lane.b32.xlu1 %v3478_v63, %s13514_s24  ;;  %3692 = vrot.lane.b32.xlu0 %v3652_v1, %s13515_s25  ;;  %v2268_v17 = vmax.f32 %v2266_v8, %v2267_v24  ;;  %v2281_v23 = vmax.f32 %v2279_v7, %v2280_v31  ;;  %v2314_v9 = vsel %vm613_vm2, %v792_v22, 4286644096  ;;  %v3429_v61 = vrot.slane %v3427_v13, 1 }
 0x1c8   : > { %v3679_v37 = vrot.slane %v3677_v2, 1  ;;  %v2292_v40 = vmax.f32 %v2290_v4, %v2291_v30  ;;  %v2305_v19 = vmax.f32 %v2303_v27, %v2304_v49  ;;  %v2316_v12 = vunpack.i.l.bf16 %v2314_v9 }
 0x1c9   : > { %v2269_v47 = vrot.slane %v2268_v17, 2  ;;  %v2282_v46 = vrot.slane %v2281_v23, 2  ;;  %v2317_v53 = vunpack.i.h.bf16 %v2314_v9  ;;  %v2327_v8 = vsel %vm613_vm2, %v793_v48, 4286644096 }
 0x1ca   : > { %v3680_v63 = vor.u32 %v3679_v37, %v3675_v20  ;;  %v2293_v1 = vrot.slane %v2292_v40, 4  ;;  %v2306_v3 = vrot.slane %v2305_v19, 4  ;;  %v2340_v7 = vsel %vm613_vm2, %v794_v45, 4286644096 }
 0x1cb   : > { %3738 = vrot.lane.b32.xlu1 %v14762_v29, %s13514_s24  ;;  %3696 = vrot.lane.b32.xlu0 %v3666_v26, %s13515_s25  ;;  %v2270_v13 = vmax.f32 %v2268_v17, %v2269_v47  ;;  %v2283_v22 = vmax.f32 %v2281_v23, %v2282_v46  ;;  %v2318_v2 = vmax.f32 %v2316_v12, %v2317_v53  ;;  %v2329_v24 = vunpack.i.l.bf16 %v2327_v8  ;;  %v796_v17 = vld [vmem:[%s13702_s23 + $0x78] sm:$0x1]  ;;  %v797_v23 = vld [vmem:[%s13702_s23 + $0x79] sm:$0x1] }
 0x1cc   : > { %v2294_v20 = vmax.f32 %v2292_v40, %v2293_v1  ;;  %v2307_v31 = vmax.f32 %v2305_v19, %v2306_v3  ;;  %v2330_v4 = vunpack.i.h.bf16 %v2327_v8  ;;  %v2342_v30 = vunpack.i.l.bf16 %v2340_v7 }
 0x1cd   : > { %v2271_v29 = vrot.slane %v2270_v13, 1  ;;  %v2284_v27 = vrot.slane %v2283_v22, 1  ;;  %v2319_v26 = vrot.slane %v2318_v2, 4  ;;  %v2343_v49 = vunpack.i.h.bf16 %v2340_v7 }
 0x1ce   : > { %v2295_v48 = vrot.slane %v2294_v20, 2  ;;  %v2308_v47 = vrot.slane %v2307_v31, 2  ;;  %v2331_v37 = vmax.f32 %v2329_v24, %v2330_v4  ;;  %v2353_v53 = vsel %vm613_vm2, %v795_v62, 4286644096 }
 0x1cf   : > { %3742 = vrot.lane.b32.xlu1 %v14770_v43, %s13514_s24  ;;  %3700 = vrot.lane.b32.xlu0 %v3680_v63, %s13515_s25  ;;  %v14854_v12 = vor.u32 %v3429_v61, %v3425_v56  ;;  %v14856_v19 = vmax.f32 %v2270_v13, %v2271_v29  ;;  %v2320_v40 = vmax.f32 %v2318_v2, %v2319_v26  ;;  %v2355_v3 = vunpack.i.l.bf16 %v2353_v53  ;;  %v798_v29 = vld [vmem:[%s13702_s23 + $0x7a] sm:$0x1] }
 0x1d0   : > { %v2344_v45 = vmax.f32 %v2342_v30, %v2343_v49  ;;  %v2296_v9 = vmax.f32 %v2294_v20, %v2295_v48  ;;  %v2309_v46 = vmax.f32 %v2307_v31, %v2308_v47  ;;  %v2332_v1 = vrot.slane %v2331_v37, 4 }
 0x1d1   : > { %v14862_v63 = vmax.f32 %v2283_v22, %v2284_v27  ;;  %v2321_v8 = vrot.slane %v2320_v40, 2  ;;  %v2356_v13 = vunpack.i.h.bf16 %v2353_v53  ;;  %v2366_v20 = vsel %vm613_vm2, %v796_v17, 4286644096 }
 0x1d2   : > { %v2345_v7 = vrot.slane %v2344_v45, 4  ;;  %v2297_v56 = vrot.slane %v2296_v9, 1  ;;  %v2310_v61 = vrot.slane %v2309_v46, 1  ;;  %v2333_v62 = vmax.f32 %v2331_v37, %v2332_v1 }
 0x1d3   : > { %3435 = vrot.lane.b32.xlu1 %v14780_v52, %s13515_s25  ;;  %3947 = vrot.lane.b32.xlu0 %v14835_v51, %s13515_s25  ;;  %v2322_v2 = vmax.f32 %v2320_v40, %v2321_v8  ;;  %v2379_v22 = vsel %vm613_vm2, %v797_v23, 4286644096  ;;  %v2357_v52 = vmax.f32 %v2355_v3, %v2356_v13  ;;  %v2368_v26 = vunpack.i.l.bf16 %v2366_v20  ;;  %v799_v40 = vld [vmem:[%s13702_s23 + $0x7b] sm:$0x1] }
 0x1d4   : > { %v2346_v24 = vmax.f32 %v2344_v45, %v2345_v7  ;;  %v14870_v31 = vmax.f32 %v2296_v9, %v2297_v56  ;;  %v14872_v4 = vmax.f32 %v2309_v46, %v2310_v61  ;;  %v2334_v30 = vrot.slane %v2333_v62, 2  ;;  %v800_v46 = vld [vmem:[%s13702_s23 + $0x7c] sm:$0x1] }
 0x1d5   : > { %v2323_v51 = vrot.slane %v2322_v2, 1  ;;  %v2369_v49 = vunpack.i.h.bf16 %v2366_v20  ;;  %v2358_v53 = vrot.slane %v2357_v52, 4  ;;  %v2381_v9 = vunpack.i.l.bf16 %v2379_v22 }
 0x1d6   : > { %v2347_v27 = vrot.slane %v2346_v24, 2  ;;  %v2335_v37 = vmax.f32 %v2333_v62, %v2334_v30  ;;  %v2382_v8 = vunpack.i.h.bf16 %v2379_v22  ;;  %vm4331_vm1 = vcmask 1041408  }
 0x1d7   : > { %3437 = vrot.lane.b32.xlu1 %v14788_v15, %s13515_s25  ;;  %v14882_v45 = vmax.f32 %v2322_v2, %v2323_v51  ;;  %v2370_v23 = vmax.f32 %v2368_v26, %v2369_v49  ;;  %v2359_v3 = vmax.f32 %v2357_v52, %v2358_v53  ;;  %v2392_v15 = vsel %vm613_vm2, %v798_v29, 4286644096  ;;  %v801_v51 = vld [vmem:[%s13702_s23 + $0x7d] sm:$0x1] }
 0x1d8   : > { %v2348_v17 = vmax.f32 %v2346_v24, %v2347_v27  ;;  %v2336_v1 = vrot.slane %v2335_v37, 1  ;;  %v2394_v62 = vunpack.i.l.bf16 %v2392_v15  ;;  %v2383_v24 = vmax.f32 %v2381_v9, %v2382_v8 }
 0x1d9   : > { %v2371_v61 = vrot.slane %v2370_v23, 4  ;;  %v2360_v2 = vrot.slane %v2359_v3, 2  ;;  %v2395_v20 = vunpack.i.h.bf16 %v2392_v15  ;;  %v2405_v52 = vsel %vm613_vm2, %v799_v40, 4286644096 }
 0x1da   : > { %v2349_v56 = vrot.slane %v2348_v17, 1  ;;  %v14890_v13 = vmax.f32 %v2335_v37, %v2336_v1  ;;  %v2418_v29 = vsel %vm613_vm2, %v800_v46, 4286644096  ;;  %v2384_v49 = vrot.slane %v2383_v24, 4  ;;  %v802_v46 = vld [vmem:[%s13702_s23 + $0x7e] sm:$0x1] }
 0x1db   : > { %3441 = vrot.lane.b32.xlu1 %v14799_v14, %s13515_s25  ;;  %v2372_v22 = vmax.f32 %v2370_v23, %v2371_v61  ;;  %v2361_v26 = vmax.f32 %v2359_v3, %v2360_v2  ;;  %v2396_v14 = vmax.f32 %v2394_v62, %v2395_v20  ;;  %v2407_v9 = vunpack.i.l.bf16 %v2405_v52 }
 0x1dc   : > { %v14897_v27 = vmax.f32 %v2348_v17, %v2349_v56  ;;  %v2408_v1 = vunpack.i.h.bf16 %v2405_v52  ;;  %v2385_v40 = vmax.f32 %v2383_v24, %v2384_v49  ;;  %v2420_v15 = vunpack.i.l.bf16 %v2418_v29 }
 0x1dd   : > { %v2373_v53 = vrot.slane %v2372_v22, 2  ;;  %v2362_v23 = vrot.slane %v2361_v26, 1  ;;  %v2397_v8 = vrot.slane %v2396_v14, 4  ;;  %v2421_v3 = vunpack.i.h.bf16 %v2418_v29 }
 0x1de   : > { %v2409_v17 = vmax.f32 %v2407_v9, %v2408_v1  ;;  %v2431_v56 = vsel %vm613_vm2, %v801_v51, 4286644096  ;;  %v2386_v2 = vrot.slane %v2385_v40, 2  ;;  %v2444_v29 = vsel %vm613_vm2, %v802_v46, 4286644096 }
 0x1df   : > { %3445 = vrot.lane.b32.xlu1 %v14854_v12, %s13515_s25  ;;  %v2374_v61 = vmax.f32 %v2372_v22, %v2373_v53  ;;  %v2398_v20 = vmax.f32 %v2396_v14, %v2397_v8  ;;  %v2433_v52 = vunpack.i.l.bf16 %v2431_v56  ;;  %v2422_v12 = vmax.f32 %v2420_v15, %v2421_v3  ;;  %v803_v51 = vld [vmem:[%s13702_s23 + $0x7f] sm:$0x1] }
 0x1e0   : > { %v2410_v30 = vrot.slane %v2409_v17, 4  ;;  %v2434_v7 = vunpack.i.h.bf16 %v2431_v56  ;;  %v14909_v24 = vmax.f32 %v2361_v26, %v2362_v23  ;;  %v2387_v22 = vmax.f32 %v2385_v40, %v2386_v2 }
 0x1e1   : > { %v2375_v37 = vrot.slane %v2374_v61, 1  ;;  %v2399_v49 = vrot.slane %v2398_v20, 2  ;;  %v2423_v1 = vrot.slane %v2422_v12, 4  ;;  %v2446_v47 = vunpack.i.l.bf16 %v2444_v29 }
 0x1e2   : > { %v2411_v9 = vmax.f32 %v2409_v17, %v2410_v30  ;;  %v2435_v62 = vmax.f32 %v2433_v52, %v2434_v7  ;;  %v2388_v14 = vrot.slane %v2387_v22, 1  ;;  %v2447_v48 = vunpack.i.h.bf16 %v2444_v29 }
 0x1e3   : > { %3690 = vrot.lane.b32.xlu1 %v14813_v34, %s13515_s25  ;;  %v2376_v53 = vmax.f32 %v2374_v61, %v2375_v37  ;;  %v2400_v8 = vmax.f32 %v2398_v20, %v2399_v49  ;;  %v2424_v56 = vmax.f32 %v2422_v12, %v2423_v1  ;;  %v2457_v40 = vsel %vm613_vm2, %v803_v51, 4286644096 }
 0x1e4   : > { %v2412_v3 = vrot.slane %v2411_v9, 2  ;;  %v2436_v43 = vrot.slane %v2435_v62, 4  ;;  %v2389_v34 = vmax.f32 %v2387_v22, %v2388_v14  ;;  %v2448_v23 = vmax.f32 %v2446_v47, %v2447_v48 }
 0x1e5   : > { %v2377_v15 = vpack.i.bf16 %v2376_v53, %v2376_v53  ;;  %v2401_v26 = vrot.slane %v2400_v8, 1  ;;  %v2425_v30 = vrot.slane %v2424_v56, 2  ;;  %v2459_v7 = vunpack.i.l.bf16 %v2457_v40 }
 0x1e6   : > { %v2413_v37 = vmax.f32 %v2411_v9, %v2412_v3  ;;  %v2437_v46 = vmax.f32 %v2435_v62, %v2436_v43  ;;  %v2390_v61 = vpack.i.bf16 %v2389_v34, %v2389_v34  ;;  %v2449_v2 = vrot.slane %v2448_v23, 4 }
 0x1e7   : > { %3694 = vrot.lane.b32.xlu1 %v14819_v32, %s13515_s25  ;;  %v2402_v17 = vmax.f32 %v2400_v8, %v2401_v26  ;;  %v2460_v20 = vunpack.i.h.bf16 %v2457_v40  ;;  %v2426_v49 = vmax.f32 %v2424_v56, %v2425_v30  ;;  %v19118_v29 = vpack.i.bf16 %v14856_v19, %v14856_v19 }
 0x1e8   : > { %v2414_v52 = vrot.slane %v2413_v37, 1  ;;  %v2438_v12 = vrot.slane %v2437_v46, 2  ;;  %v2450_v47 = vmax.f32 %v2448_v23, %v2449_v2  ;;  %v2866_v43 = vsel %vm2469_vm4, %v2377_v15, 4286644096 }
 0x1e9   : > { %v2863_v32 = vsel %vm2469_vm4, %v19118_v29, 4286644096  ;;  %v2403_v48 = vpack.i.bf16 %v2402_v17, %v2402_v17  ;;  %v2461_v22 = vmax.f32 %v2459_v7, %v2460_v20  ;;  %v2427_v51 = vrot.slane %v2426_v49, 1 }
 0x1ea   : > { %v2415_v62 = vmax.f32 %v2413_v37, %v2414_v52  ;;  %v2439_v53 = vmax.f32 %v2437_v46, %v2438_v12  ;;  %v14923_v9 = vmax.bf16 %v2866_v43, %v2863_v32  ;;  %v2451_v1 = vrot.slane %v2450_v47, 2 }
 0x1eb   : > { %3698 = vrot.lane.b32.xlu1 %v14823_v44, %s13515_s25  ;;  %v2462_v14 = vrot.slane %v2461_v22, 4  ;;  %v19120_v19 = vpack.i.bf16 %v14862_v63, %v14862_v63  ;;  %v2873_v3 = vsel %vm2469_vm4, %v2390_v61, 4286644096  ;;  %v2428_v56 = vmax.f32 %v2426_v49, %v2427_v51 }
 0x1ec   : > { %19119 = vst [vmem:[#allocation60_spill] sm:$0xff] %v14923_v9  ;;  %v2416_v44 = vpack.i.bf16 %v2415_v62, %v2415_v62  ;;  %v2440_v34 = vrot.slane %v2439_v53, 1  ;;  %v2452_v15 = vmax.f32 %v2450_v47, %v2451_v1  ;;  %v19122_v40 = vpack.i.bf16 %v14870_v31, %v14870_v31 }
 0x1ed   : > { %v2870_v8 = vsel %vm2469_vm4, %v19120_v19, 4286644096  ;;  %v2463_v23 = vmax.f32 %v2461_v22, %v2462_v14  ;;  %v2880_v30 = vsel %vm2469_vm4, %v2403_v48, 4286644096  ;;  %v2429_v46 = vpack.i.bf16 %v2428_v56, %v2428_v56 }
 0x1ee   : > { %v14930_v26 = vmax.bf16 %v2873_v3, %v2870_v8  ;;  %v2877_v37 = vsel %vm2469_vm4, %v19122_v40, 4286644096  ;;  %v2441_v63 = vmax.f32 %v2439_v53, %v2440_v34  ;;  %v19124_v61 = vpack.i.bf16 %v14872_v4, %v14872_v4 }
 0x1ef   : > { %v14937_v7 = vmax.bf16 %v2880_v30, %v2877_v37  ;;  %v2453_v2 = vrot.slane %v2452_v15, 1  ;;  %v2464_v20 = vrot.slane %v2463_v23, 2  ;;  %v2887_v52 = vsel %vm2469_vm4, %v2416_v44, 4286644096 }
 0x1f0   : > { %19121 = vst [vmem:[#allocation61_spill] sm:$0xff] %v14930_v26  ;;  %v2884_v17 = vsel %vm2469_vm4, %v19124_v61, 4286644096  ;;  %v19125_v31 = vpack.i.bf16 %v14882_v45, %v14882_v45  ;;  %v2442_v12 = vpack.i.bf16 %v2441_v63, %v2441_v63  ;;  %v2894_v32 = vsel %vm2469_vm4, %v2429_v46, 4286644096 }
 0x1f1   : > { %19123 = vst [vmem:[#allocation62_spill] sm:$0xff] %v14937_v7  ;;  %v14948_v29 = vmax.bf16 %v2887_v52, %v2884_v17  ;;  %v19127_v48 = vpack.i.bf16 %v14890_v13, %v14890_v13  ;;  %v2364_v47 = vpack.i.bf16 %v14909_v24, %v14909_v24  ;;  %v2454_v22 = vmax.f32 %v2452_v15, %v2453_v2  ;;  %v3817_v52 = vld [vmem:[#allocation2 + $0x1c] sm:$0x3] }
 0x1f2   : > { %v2891_v49 = vsel %vm2469_vm4, %v19125_v31, 4286644096  ;;  %v2465_v43 = vmax.f32 %v2463_v23, %v2464_v20  ;;  %v2901_v45 = vsel %vm2469_vm4, %v2442_v12, 4286644096  ;;  %v19129_v51 = vpack.i.bf16 %v14897_v27, %v14897_v27 }
 0x1f3   : > { %19126 = vst [vmem:[#allocation63_spill] sm:$0xff] %v14948_v29  ;;  %v2898_v4 = vsel %vm2469_vm4, %v19127_v48, 4286644096  ;;  %v14957_v62 = vmax.bf16 %v2894_v32, %v2891_v49  ;;  %v11871_v1 = vcombine.low %v14923_v9, %v14923_v9  ;;  %v11872_v13 = vcombine.low %v14930_v26, %v14930_v26 }
 0x1f4   : > { %v2905_v53 = vsel %vm2469_vm4, %v19129_v51, 4286644096  ;;  %v2455_v14 = vpack.i.bf16 %v2454_v22, %v2454_v22  ;;  %v2466_v19 = vrot.slane %v2465_v43, 1  ;;  %v14968_v24 = vmax.bf16 %v2901_v45, %v2898_v4  ;;  %v3809_v22 = vld [vmem:[#allocation2 + $0x18] sm:$0xe] }
 0x1f5   : > { %19128 = vst [vmem:[#allocation64_spill] sm:$0xff] %v14957_v62  ;;  %v11873_v8 = vcombine.low %v14937_v7, %v14937_v7  ;;  %v11874_v3 = vcombine.low %v14948_v29, %v14948_v29  ;;  %v11875_v27 = vcombine.low %v14957_v62, %v14957_v62  ;;  %v3166_v44 = vunpack.c.l.b16 %v11871_v1  ;;  %v3819_v1 = vld [vmem:[#allocation2 + $0x2c] sm:$0x3]  ;;  %v15178_v29 = vld [vmem:[#allocation2 + $0x14] sm:$0x3] }
 0x1f6   : > { %19130 = vst [vmem:[#allocation65_spill] sm:$0xff] %v14968_v24  ;;  %v3167_v56 = vunpack.c.l.b16 %v11872_v13  ;;  %v2467_v34 = vmax.f32 %v2465_v43, %v2466_v19  ;;  %v2908_v15 = vsel %vm2469_vm4, %v2455_v14, 4286644096  ;;  %v11876_v23 = vcombine.low %v14968_v24, %v14968_v24  ;;  %v14994_v13 = vld [vmem:[#allocation2 + $0x3c] sm:$0x1] }
 0x1f7   : > { %v3168_v40 = vunpack.c.l.b16 %v11873_v8  ;;  %v14979_v37 = vmax.bf16 %v2908_v15, %v2905_v53  ;;  %v3169_v30 = vunpack.c.l.b16 %v11874_v3  ;;  %v3170_v46 = vunpack.c.l.b16 %v11875_v27  ;;  %v14996_v14 = vld [vmem:[#allocation2 + $0x38] sm:$0xe]  ;;  %v15132_v24 = vld [vmem:[#allocation2 + $0x24] sm:$0x1] }
 0x1f8   : > { %v3222_v63 = vsel %vm3174_vm5, %v3167_v56, %v3166_v44  ;;  %v2468_v61 = vpack.i.bf16 %v2467_v34, %v2467_v34  ;;  %v2912_v17 = vsel %vm2469_vm4, %v2364_v47, 4286644096  ;;  %v3171_v2 = vunpack.c.l.b16 %v11876_v23  ;;  %v3564_v34 = vld [vmem:[#allocation2 + $0x34] sm:$0x3] }
 0x1f9   : > { %19131 = vst [vmem:[#allocation66_spill] sm:$0xff] %v14979_v37  ;;  %v3223_v20 = vsel %vm3176_vm6, %v3168_v40, %v3222_v63  ;;  %v11877_v31 = vcombine.low %v14979_v37, %v14979_v37  ;;  %v3904_v12 = vshrl.u32 %v14830_v25, 16  ;;  %v3906_v32 = vshll.u32 %v14830_v25, 16  ;;  %v15009_v63 = vld [vmem:[#allocation2 + $0x1c] sm:$0x1] }
 0x1fa   : > { %v3224_v49 = vsel %vm3178_vm7, %v3169_v30, %v3223_v20  ;;  %v2915_v48 = vsel %vm2469_vm4, %v2468_v61, 4286644096  ;;  %v11943_v51 = vcombine.low %v3809_v22, %v3817_v52  ;;  %v11945_v44 = vcombine.low %v14810_v58, %v3819_v1  ;;  %v15011_v61 = vld [vmem:[#allocation2 + $0x34] sm:$0x1]  ;;  %v15015_v52 = vld [vmem:[#allocation2 + $0x30] sm:$0xe]  ;;  %v15065_v1 = vpop.permute.xlu0 %3479 }
 0x1fb   : > { %v3225_v4 = vsel %vm3180_vm8, %v3170_v46, %v3224_v49  ;;  %v14991_v43 = vmax.bf16 %v2915_v48, %v2912_v17  ;;  %v3908_v45 = vrot.slane %v3906_v32, 1  ;;  %v3172_v19 = vunpack.c.l.b16 %v11877_v31  ;;  %v3566_v31 = vld [vmem:[#allocation2 + $0x44] sm:$0x3]  ;;  %v6122_v37 = vld [vmem:[#allocation2 + $0x20] sm:$0xf] }
 0x1fc   : > { %v3226_v47 = vsel %vm3182_vm9, %v3171_v2, %v3225_v4  ;;  %v3985_v27 = vrot.slane %v11943_v51, 1  ;;  %v11939_v56 = vcombine.low %v14996_v14, %v14994_v13  ;;  %v3987_v40 = vrot.slane %v11945_v44, 1 }
 0x1fd   : > { %19132 = vst [vmem:[#allocation67_spill] sm:$0xff] %v14991_v43  ;;  %v3242_v53 = vpack.c.b16 %v3226_v47, %v3226_v47  ;;  %v11878_v25 = vcombine.low %v14991_v43, %v14991_v43  ;;  %v3909_v8 = vor.u32 %v3908_v45, %v3904_v12  ;;  %v11923_v30 = vcombine.low %v14786_v39, %v3564_v34 }
 0x1fe   : > { %v3920_v46 = vshll.u32 %v11939_v56, 16  ;;  %v3918_v17 = vshrl.u32 %v11939_v56, 16  ;;  %v11935_v20 = vcombine.low %v3809_v22, %v15009_v63  ;;  %v19133_v39 = vmov 0   ;;  %v3821_v56 = vld [vmem:[#allocation2 + $0x3c] sm:$0x3] }
 0x1ff   : > { %3276 = vst.msk [vmem:[#allocation2 + $0x48] sm:$0xe] %vm3261_vm10, %v3242_v53  ;;  %v3173_v3 = vunpack.c.l.b16 %v11878_v25  ;;  %3949 = vrot.lane.b32.xlu0 %v3909_v8, %s13515_s25  ;;  %v3732_v58 = vrot.slane %v11923_v30, 1  ;;  %v11938_v48 = vcombine.low %v15015_v52, %v15011_v61  ;;  %v11925_v22 = vcombine.low %v14815_v10, %v3566_v31 }
 0x200   : > { %v3922_v2 = vrot.slane %v3920_v46, 1  ;;  %643 = vst.msk [vmem:[#allocation3 + $0x8] sm:$0xf] %vm639_vm12, %v19133_v39  ;;  %640 = vst.msk [vmem:[#allocation3] sm:$0xf] %vm639_vm12, %v19133_v39  ;;  %v3892_v51 = vshll.u32 %v11935_v20, 16 }
 0x201   : > { %v3227_v15 = vsel %vm3184_vm11, %v3173_v3, %v3172_v19  ;;  %646 = vst.msk [vmem:[#allocation3 + $0x50] sm:$0xf] %vm639_vm12, %v19133_v39  ;;  %648 = vst.msk [vmem:[#allocation3 + $0x58] sm:$0xf] %vm639_vm12, %v19133_v39  ;;  %v3890_v8 = vshrl.u32 %v11935_v20, 16  ;;  %v3913_v3 = vshll.u32 %v11938_v48, 16 }
 0x202   : > { %v3243_v23 = vpack.c.b16 %v3227_v15, %v3227_v15  ;;  %644 = vst.msk [vmem:[#allocation3 + $0xc] sm:$0x3] %vm641_vm13, %v19133_v39  ;;  %642 = vst.msk [vmem:[#allocation3 + $0x4] sm:$0x3] %vm641_vm13, %v19133_v39  ;;  %v3923_v4 = vor.u32 %v3922_v2, %v3918_v17  ;;  %v3894_v15 = vrot.slane %v3892_v51, 1  ;;  %v11947_v2 = vcombine.low %v14996_v14, %v3821_v56 }
 0x203   : > { %3993 = vrot.lane.b32.xlu0 %v3985_v27, %s13514_s24  ;;  %647 = vst.msk [vmem:[#allocation3 + $0x54] sm:$0x3] %vm641_vm13, %v19133_v39  ;;  %649 = vst.msk [vmem:[#allocation3 + $0x5c] sm:$0x3] %vm641_vm13, %v19133_v39  ;;  %v3734_v27 = vrot.slane %v11925_v22, 1  ;;  %v3915_v22 = vrot.slane %v3913_v3, 1 }
 0x204   : > { %3277 = vst.msk [vmem:[#allocation2 + $0x4c] sm:$0x1] %vm613_vm2, %v3243_v23  ;;  %v3895_v31 = vor.u32 %v3894_v15, %v3890_v8  ;;  %v3989_v51 = vrot.slane %v11947_v2, 1  ;;  %v6119_v14 = vld [vmem:[#allocation2 + $0x8] sm:$0xf]  ;;  %vm4097_vm2 = vcmask 97280  }
 0x205   : > { %666 = vst.msk [vmem:[#allocation3 + $0x14] sm:$0x2] %vm663_vm14, %v19133_v39  ;;  %667 = vst.msk [vmem:[#allocation3 + $0x1c] sm:$0x2] %vm663_vm14, %v19133_v39  ;;  %v15081_v8 = vld [vmem:[#allocation2 + $0x44] sm:$0x1] }
 0x206   : > { %v15021_v49 = vld [vmem:[#allocation2 + $0x48] sm:$0xe]  ;;  %668 = vst.msk [vmem:[#allocation3 + $0x24] sm:$0x2] %vm663_vm14, %v19133_v39  ;;  %669 = vst.msk [vmem:[#allocation3 + $0x2c] sm:$0x2] %vm663_vm14, %v19133_v39 }
 0x207   : > { %3997 = vrot.lane.b32.xlu0 %v3987_v40, %s13514_s24  ;;  %v15023_v12 = vld [vmem:[#allocation2 + $0x48] sm:$0xe]  ;;  %670 = vst.msk [vmem:[#allocation3 + $0x34] sm:$0x2] %vm663_vm14, %v19133_v39  ;;  %671 = vst.msk [vmem:[#allocation3 + $0x3c] sm:$0x2] %vm663_vm14, %v19133_v39 }
 0x208   : > { %672 = vst.msk [vmem:[#allocation3 + $0x44] sm:$0x2] %vm663_vm14, %v19133_v39  ;;  %673 = vst.msk [vmem:[#allocation3 + $0x4c] sm:$0x2] %vm663_vm14, %v19133_v39  ;;  %v4537_v40 = vld [vmem:[#allocation3 + $0x8] sm:$0xe] }
 0x209   : > { %665 = vst.msk [vmem:[#allocation3 + $0xc] sm:$0x2] %vm663_vm14, %v19133_v39  ;;  %664 = vst.msk [vmem:[#allocation3 + $0x4] sm:$0x2] %vm663_vm14, %v19133_v39  ;;  %v4522_v23 = vld [vmem:[#allocation3 + $0xc] sm:$0x1] }
 0x20a   : > { %674 = vst.msk [vmem:[#allocation3 + $0x54] sm:$0x2] %vm663_vm14, %v19133_v39  ;;  %675 = vst.msk [vmem:[#allocation3 + $0x5c] sm:$0x2] %vm663_vm14, %v19133_v39  ;;  %v11996_v20 = vcombine.low %v4537_v40, %v4522_v23  ;;  %v15083_v3 = vld [vmem:[#allocation2 + $0x40] sm:$0xe] }
 0x20b   : > { %v15053_v32 = vld [vmem:[#allocation2 + $0x4c] sm:$0x1]  ;;  %3744 = vrot.lane.b32.xlu0 %v3732_v58, %s13514_s24  ;;  %v15068_v58 = vpop.permute.xlu0 %3431  ;;  %652 = vst.msk [vmem:[#allocation3 + $0x8] sm:$0x1] %vm650_vm15, %v19133_v39  ;;  %651 = vst.msk [vmem:[#allocation3] sm:$0x1] %vm650_vm15, %v19133_v39 }
 0x20c   : > { %v15059_v47 = vld [vmem:[#allocation2 + $0x4c] sm:$0x1]  ;;  %v11918_v45 = vcombine.low %v15021_v49, %v15053_v32  ;;  %653 = vst.msk [vmem:[#allocation3 + $0x10] sm:$0x1] %vm650_vm15, %v19133_v39  ;;  %654 = vst.msk [vmem:[#allocation3 + $0x18] sm:$0x1] %vm650_vm15, %v19133_v39 }
 0x20d   : > { %v11941_v53 = vcombine.low %v15023_v12, %v15059_v47  ;;  %655 = vst.msk [vmem:[#allocation3 + $0x20] sm:$0x1] %vm650_vm15, %v19133_v39  ;;  %656 = vst.msk [vmem:[#allocation3 + $0x28] sm:$0x1] %vm650_vm15, %v19133_v39  ;;  %v3805_v57 = vld [vmem:[#allocation2 + $0x48] sm:$0xf] }
 0x20e   : > { %v3682_v25 = vshrl.u32 %v11918_v45, 16  ;;  %v3684_v19 = vshll.u32 %v11918_v45, 16  ;;  %v3823_v45 = vld [vmem:[#allocation2 + $0x4c] sm:$0x3]  ;;  %657 = vst.msk [vmem:[#allocation3 + $0x30] sm:$0x1] %vm650_vm15, %v19133_v39 }
 0x20f   : > { %3953 = vrot.lane.b32.xlu0 %v3923_v4, %s13515_s25  ;;  %v3932_v44 = vshrl.u32 %v11941_v53, 16  ;;  %v3934_v10 = vshll.u32 %v11941_v53, 16  ;;  %v3911_v4 = vshrl.u32 %v11938_v48, 16  ;;  %v3818_v53 = vld [vmem:[#allocation2 + $0x24] sm:$0x3]  ;;  %v15079_v56 = vpop.permute.xlu0 %3483  ;;  %vm4114_vm3 = vcmask 195584  }
 0x210   : > { %v3686_v34 = vrot.slane %v3684_v19, 1  ;;  %v4620_v19 = vshll.u32 %v11996_v20, 16  ;;  %v3820_v48 = vld [vmem:[#allocation2 + $0x34] sm:$0x3]  ;;  %v4545_v2 = vld [vmem:[#allocation3 + $0xc] sm:$0x3] }
 0x211   : > { %v3936_v30 = vrot.slane %v3934_v10, 1  ;;  %v15077_v10 = vld [vmem:[#allocation2 + $0xc] sm:$0x1]  ;;  %658 = vst.msk [vmem:[#allocation3 + $0x38] sm:$0x1] %vm650_vm15, %v19133_v39  ;;  %vm4761_vm10 = vcmask 130048  }
 0x212   : > { %v3687_v46 = vor.u32 %v3686_v34, %v3682_v25  ;;  %v11949_v25 = vcombine.low %v15023_v12, %v3823_v45  ;;  %v4618_v12 = vshrl.u32 %v11996_v20, 16  ;;  %v4622_v15 = vrot.slane %v4620_v19, 1  ;;  %659 = vst.msk [vmem:[#allocation3 + $0x40] sm:$0x1] %vm650_vm15, %v19133_v39  ;;  %660 = vst.msk [vmem:[#allocation3 + $0x48] sm:$0x1] %vm650_vm15, %v19133_v39 }
 0x213   : > { %3748 = vrot.lane.b32.xlu0 %v3734_v27, %s13514_s24  ;;  %v3937_v17 = vor.u32 %v3936_v30, %v3932_v44  ;;  %v3916_v27 = vor.u32 %v3915_v22, %v3911_v4  ;;  %v11944_v44 = vcombine.low %v14795_v54, %v3818_v53  ;;  %v12123_v23 = vcombine.low %v6119_v14, %v15077_v10  ;;  %v6121_v30 = vld [vmem:[#allocation2 + $0x18] sm:$0xf]  ;;  %v3565_v4 = vld [vmem:[#allocation2 + $0x3c] sm:$0x3]  ;;  %v15093_v22 = vpop.permute.xlu0 %3487 }
 0x214   : > { %3702 = vrot.lane.b32.xlu1 %v3687_v46, %s13515_s25  ;;  %v3991_v34 = vrot.slane %v11949_v25, 1  ;;  %v11946_v46 = vcombine.low %v15015_v52, %v3820_v48  ;;  %v4623_v20 = vor.u32 %v4622_v15, %v4618_v12  ;;  %v12004_v45 = vcombine.low %v4537_v40, %v4545_v2  ;;  %661 = vst.msk [vmem:[#allocation3 + $0x50] sm:$0x1] %vm650_vm15, %v19133_v39 }
 0x215   : > { %v3986_v54 = vrot.slane %v11944_v44, 1  ;;  %v6202_v53 = vshll.u32 %v12123_v23, 16  ;;  %v11924_v52 = vcombine.low %v14791_v55, %v3565_v4  ;;  %v15101_v44 = vld [vmem:[#allocation2 + $0x50] sm:$0xe]  ;;  %v6200_v48 = vshrl.u32 %v12123_v23, 16 }
 0x216   : > { %v3988_v25 = vrot.slane %v11946_v46, 1  ;;  %v4713_v14 = vrot.slane %v12004_v45, 1  ;;  %v3567_v46 = vld [vmem:[#allocation2 + $0x4c] sm:$0x3]  ;;  %662 = vst.msk [vmem:[#allocation3 + $0x58] sm:$0x1] %vm650_vm15, %v19133_v39 }
 0x217   : > { %3957 = vrot.lane.b32.xlu0 %v3937_v17, %s13515_s25  ;;  %v11940_v17 = vcombine.low %v15083_v3, %v15081_v8  ;;  %v3733_v40 = vrot.slane %v11924_v52, 1  ;;  %v15107_v55 = vpop.permute.xlu0 %3491  ;;  %v11926_v45 = vcombine.low %v15021_v49, %v3567_v46  ;;  %v15120_v49 = vld [vmem:[#allocation2 + $0x1c] sm:$0x3]  ;;  %vm4171_vm12 = vsmask.f32 3328 }
 0x218   : > { %3945 = vrot.lane.b32.xlu1 %v3895_v31, %s13515_s25  ;;  %v15091_v31 = vld [vmem:[#allocation2 + $0x1c] sm:$0x1]  ;;  %vm4172_vm13 = vsmask.f32 7440 }
 0x219   : > { %v3927_v19 = vshll.u32 %v11940_v17, 16  ;;  %v3925_v15 = vshrl.u32 %v11940_v17, 16  ;;  %v6135_v17 = vld [vmem:[#allocation2 + $0x8] sm:$0xe]  ;;  %vm15875_vm14 = vmor %vm4171_vm12, %vm4172_vm13  ;;  %vm4318_vm12 = vcmask 293888   ;;  %vm6576_vm13 = vcmask 162816  }
 0x21a   : > { %v12131_v43 = vcombine.low %v6135_v17, %v15077_v10 }
 0x21b   : > { %4001 = vrot.lane.b32.xlu0 %v3989_v51, %s13514_s24  ;;  %v12125_v51 = vcombine.low %v6121_v30, %v15091_v31  ;;  %v3929_v30 = vrot.slane %v3927_v19, 1  ;;  %v15114_v52 = vpop.permute.xlu0 %3736 }
 0x21c   : > { %3951 = vrot.lane.b32.xlu1 %v3916_v27, %s13515_s25  ;;  %v15099_v27 = vld [vmem:[#allocation2 + $0x54] sm:$0x1]  ;;  %v6295_v10 = vrot.slane %v12131_v43, 1 }
 0x21d   : > { %v6216_v12 = vshll.u32 %v12125_v51, 16  ;;  %v6214_v4 = vshrl.u32 %v12125_v51, 16  ;;  %v3930_v23 = vor.u32 %v3929_v30, %v3925_v15  ;;  %v6137_v51 = vld [vmem:[#allocation2 + $0x18] sm:$0xe]  ;;  %v6120_v15 = vld [vmem:[#allocation2 + $0x10] sm:$0xf] }
 0x21e   : > { %v15122_v30 = vld [vmem:[#allocation2 + $0x14] sm:$0x1]  ;;  %v12133_v46 = vcombine.low %v6137_v51, %v15091_v31 }
 0x21f   : > { %4005 = vrot.lane.b32.xlu0 %v3991_v34, %s13514_s24  ;;  %v6204_v34 = vrot.slane %v6202_v53, 1 }
 0x220   : > { %3995 = vrot.lane.b32.xlu1 %v3986_v54, %s13514_s24  ;;  %v11942_v54 = vcombine.low %v15101_v44, %v15099_v27 }
 0x221   : > { %v6205_v2 = vor.u32 %v6204_v34, %v6200_v48  ;;  %v3735_v48 = vrot.slane %v11926_v45, 1 }
 0x222   : > { %v3941_v53 = vshll.u32 %v11942_v54, 16  ;;  %v3939_v34 = vshrl.u32 %v11942_v54, 16 }
 0x223   : > { %4673 = vrot.lane.b32.xlu0 %v4623_v20, %s13514_s24  ;;  %v6218_v20 = vrot.slane %v6216_v12, 1  ;;  %v15129_v45 = vpop.permute.xlu0 %3740 }
 0x224   : > { %3999 = vrot.lane.b32.xlu1 %v3988_v25, %s13514_s24  ;;  %v15112_v25 = vld [vmem:[#allocation2 + $0xc] sm:$0x3]  ;;  %v3943_v12 = vrot.slane %v3941_v53, 1  ;;  %v12124_v53 = vcombine.low %v6120_v15, %v15122_v30  ;;  %v6151_v15 = vld [vmem:[#allocation2 + $0x8] sm:$0xc] }
 0x225   : > { %v6219_v19 = vor.u32 %v6218_v20, %v6214_v4  ;;  %v12141_v4 = vcombine.low %v6137_v51, %v15120_v49 }
 0x226   : > { %v3944_v54 = vor.u32 %v3943_v12, %v3939_v34  ;;  %v12126_v34 = vcombine.low %v6122_v37, %v15132_v24 }
 0x227   : > { %4721 = vrot.lane.b32.xlu0 %v4713_v14, %s13516_s3  ;;  %v12139_v14 = vcombine.low %v6135_v17, %v15112_v25  ;;  %v6363_v62 = vshll.u32 %v12141_v4, 16 }
 0x228   : > { %3746 = vrot.lane.b32.xlu1 %v3733_v40, %s13514_s24  ;;  %v3822_v40 = vld [vmem:[#allocation2 + $0x44] sm:$0x3] }
 0x229   : > { %v6344_v20 = vshrl.u32 %v12139_v14, 16  ;;  %v6347_v17 = vshll.u32 %v12139_v14, 16  ;;  %v6360_v14 = vshrl.u32 %v12141_v4, 16  ;;  %v15162_v37 = vpop.permute.xlu0 %3433  ;;  %v15168_v4 = vld [vmem:[#allocation2 + $0x2c] sm:$0x1] }
 0x22b   : > { %6255 = vrot.lane.b32.xlu0 %v6205_v2, %s13515_s25  ;;  %v3824_v2 = vld [vmem:[#allocation2 + $0x54] sm:$0x3]  ;;  %v6346_v43 = vrot.slane %v6344_v20, 1  ;;  %v6349_v51 = vrot.slane %v6347_v17, 2  ;;  %v6362_v12 = vrot.slane %v6360_v14, 1  ;;  %v6207_v20 = vshrl.u32 %v12124_v53, 16 }
 0x22c   : > { %3955 = vrot.lane.b32.xlu1 %v3930_v23, %s13515_s25  ;;  %v11948_v23 = vcombine.low %v15083_v3, %v3822_v40  ;;  %v11950_v31 = vcombine.low %v15101_v44, %v3824_v2  ;;  %v6209_v3 = vshll.u32 %v12124_v53, 16  ;;  %v6365_v40 = vrot.slane %v6363_v62, 2 }
 0x22d   : > { %v6350_v44 = vor.u32 %v6349_v51, %v6346_v43  ;;  %v15174_v43 = vpop.permute.xlu0 %3439  ;;  %v15176_v51 = vld [vmem:[#allocation2 + $0x3c] sm:$0x1]  ;;  %v6221_v53 = vshrl.u32 %v12126_v34, 16 }
 0x22e   : > { %v3992_v2 = vrot.slane %v11950_v31, 1  ;;  %v6211_v17 = vrot.slane %v6209_v3, 1  ;;  %v6366_v39 = vor.u32 %v6365_v40, %v6362_v12  ;;  %v6125_v31 = vld [vmem:[#allocation2 + $0x38] sm:$0xf]  ;;  %v6136_v3 = vld [vmem:[#allocation2 + $0x10] sm:$0xe] }
 0x22f   : > { %6259 = vrot.lane.b32.xlu0 %v6219_v19, %s13515_s25  ;;  %v6297_v19 = vrot.slane %v12133_v46, 1  ;;  %v6123_v46 = vld [vmem:[#allocation2 + $0x28] sm:$0xf] }
 0x230   : > { %3750 = vrot.lane.b32.xlu1 %v3735_v48, %s13514_s24  ;;  %v3990_v48 = vrot.slane %v11948_v23, 1  ;;  %v12147_v23 = vcombine.low %v6151_v15, %v15112_v25  ;;  %v12127_v62 = vcombine.low %v6123_v46, %v15168_v4  ;;  %v6212_v14 = vor.u32 %v6211_v17, %v6207_v20  ;;  %v6138_v20 = vld [vmem:[#allocation2 + $0x20] sm:$0xe]  ;;  %v6146_v17 = vld [vmem:[#allocation2 + $0x24] sm:$0x3] }
 0x231   : > { %v12129_v15 = vcombine.low %v6125_v31, %v15176_v51  ;;  %v15188_v7 = vpop.permute.xlu0 %3443 }
 0x232   : > { %v6447_v12 = vrot.slane %v12147_v23, 2  ;;  %v6230_v40 = vshll.u32 %v12127_v62, 16 }
 0x233   : > { %6303 = vrot.lane.b32.xlu0 %v6295_v10, %s13514_s24  ;;  %v15166_v10 = vpop.permute.xlu1 %3481  ;;  %v6244_v23 = vshll.u32 %v12129_v15, 16  ;;  %v6242_v26 = vshrl.u32 %v12129_v15, 16 }
 0x234   : > { %3959 = vrot.lane.b32.xlu1 %v3944_v54, %s13515_s25  ;;  %v6223_v54 = vshll.u32 %v12126_v34, 16  ;;  %v12140_v34 = vcombine.low %v6136_v3, %v15178_v29 }
 0x235   : > { %v6246_v9 = vrot.slane %v6244_v23, 1  ;;  %v13412_v23 = vld [vmem:[#allocation2 + $0x24] sm:$0x1] }
 0x237   : > { %6307 = vrot.lane.b32.xlu0 %v6297_v19, %s13514_s24  ;;  %v6153_v19 = vld [vmem:[#allocation2 + $0x18] sm:$0xc] }
 0x238   : > { %4003 = vrot.lane.b32.xlu1 %v3990_v48, %s13514_s24  ;;  %v6225_v48 = vrot.slane %v6223_v54, 1  ;;  %v12149_v25 = vcombine.low %v6153_v19, %v15120_v49  ;;  %v6228_v49 = vshrl.u32 %v12127_v62, 16  ;;  %v12134_v19 = vcombine.low %v6138_v20, %v15132_v24  ;;  %v3689_v62 = vpop.permute.xlu0 %3688 }
 0x23a   : > { %v6226_v46 = vor.u32 %v6225_v48, %v6221_v53  ;;  %v6449_v54 = vrot.slane %v12149_v25, 2  ;;  %v6352_v53 = vshrl.u32 %v12140_v34, 16  ;;  %v6355_v48 = vshll.u32 %v12140_v34, 16 }
 0x23b   : > { %6407 = vrot.lane.b32.xlu0 %v6350_v44, %s13517_s26  ;;  %v15180_v44 = vpop.permute.xlu1 %3485  ;;  %v6247_v34 = vor.u32 %v6246_v9, %v6242_v26 }
 0x23c   : > { %4007 = vrot.lane.b32.xlu1 %v3992_v2, %s13514_s24  ;;  %v12132_v2 = vcombine.low %v6136_v3, %v15122_v30  ;;  %v12142_v30 = vcombine.low %v6138_v20, %v6146_v17  ;;  %v3536_v3 = vld [vmem:[#allocation2 + $0x10] sm:$0xf]  ;;  %v6357_v24 = vrot.slane %v6355_v48, 2  ;;  %v3540_v20 = vld [vmem:[#allocation2 + $0x20] sm:$0xf] }
 0x23e   : > { %v6368_v6 = vshrl.u32 %v12142_v30, 16  ;;  %v6371_v59 = vshll.u32 %v12142_v30, 16  ;;  %v15202_v30 = vld [vmem:[#allocation2 + $0x34] sm:$0x1] }
 0x23f   : > { %6411 = vrot.lane.b32.xlu0 %v6366_v39, %s13517_s26  ;;  %v6232_v39 = vrot.slane %v6230_v40, 1  ;;  %v15192_v31 = vpop.permute.xlu1 %3489  ;;  %v6354_v40 = vrot.slane %v6352_v53, 1  ;;  %v6124_v53 = vld [vmem:[#allocation2 + $0x30] sm:$0xf] }
 0x240   : > { %6257 = vrot.lane.b32.xlu1 %v6212_v14, %s13515_s25  ;;  %v6296_v14 = vrot.slane %v12132_v2, 1  ;;  %v12128_v26 = vcombine.low %v6124_v53, %v15202_v30  ;;  %v3544_v53 = vld [vmem:[#allocation2 + $0x30] sm:$0xf] }
 0x241   : > { %v6233_v25 = vor.u32 %v6232_v39, %v6228_v49  ;;  %v6358_v15 = vor.u32 %v6357_v24, %v6354_v40  ;;  %v6373_v49 = vrot.slane %v6371_v59, 2 }
 0x243   : > { %6455 = vrot.lane.b32.xlu0 %v6447_v12, %s13516_s3  ;;  %v6298_v12 = vrot.slane %v12134_v19, 1  ;;  %v15197_v2 = vpop.permute.xlu1 %3493  ;;  %v11905_v19 = vcombine.low %v3540_v20, %v13412_v23 }
 0x244   : > { %6261 = vrot.lane.b32.xlu1 %v6226_v46, %s13515_s25  ;;  %v11903_v46 = vcombine.low %v3536_v3, %v13411_v0  ;;  %v3693_v0 = vpop.permute.xlu0 %3692 }
 0x245   : > { %v3760_v3 = vsel %vm2469_vm4, %v11905_v19, %v3693_v0 }
 0x246   : > { %v3754_v39 = vsel %vm2469_vm4, %v11903_v46, %v3689_v62  ;;  %v6235_v46 = vshrl.u32 %v12128_v26, 16 }
 0x247   : > { %6459 = vrot.lane.b32.xlu0 %v6449_v54, %s13516_s3  ;;  %v6370_v54 = vrot.slane %v6368_v6, 1  ;;  %v15205_v48 = vpop.permute.xlu1 %3738  ;;  %v3777_v9 = vsel %vm3519_vm0, %v3754_v39, %v15114_v52  ;;  %v6237_v52 = vshll.u32 %v12128_v26, 16 }
 0x248   : > { %6305 = vrot.lane.b32.xlu1 %v6296_v14, %s13514_s24  ;;  %v6152_v14 = vld [vmem:[#allocation2 + $0x10] sm:$0xc] }
 0x249   : > { %v6374_v59 = vor.u32 %v6373_v49, %v6370_v54  ;;  %v12148_v6 = vcombine.low %v6152_v14, %v15178_v29  ;;  %v6239_v20 = vrot.slane %v6237_v52, 1 }
 0x24b   : > { %6263 = vrot.lane.b32.xlu0 %v6233_v25, %s13515_s25  ;;  %v6154_v25 = vld [vmem:[#allocation2 + $0x20] sm:$0xc]  ;;  %v6448_v62 = vrot.slane %v12148_v6, 2  ;;  %v15217_v24 = vpop.permute.xlu1 %3742 }
 0x24c   : > { %6309 = vrot.lane.b32.xlu1 %v6298_v12, %s13514_s24  ;;  %v3781_v12 = vsel %vm3519_vm0, %v3760_v3, %v15129_v45  ;;  %v12150_v40 = vcombine.low %v6154_v25, %v6146_v17  ;;  %v3697_v45 = vpop.permute.xlu0 %3696  ;;  %v3548_v25 = vld [vmem:[#allocation2 + $0x40] sm:$0xf] }
 0x24e   : > { %v6450_v29 = vrot.slane %v12150_v40, 2  ;;  %v13414_v40 = vld [vmem:[#allocation2 + $0x44] sm:$0x1] }
 0x24f   : > { %6267 = vrot.lane.b32.xlu0 %v6247_v34, %s13515_s25  ;;  %v15221_v34 = vpop.permute.xlu1 %3435  ;;  %v11909_v52 = vcombine.low %v3548_v25, %v13414_v40  ;;  %v3801_v25 = vld [vmem:[#allocation2 + $0x38] sm:$0xf] }
 0x250   : > { %6409 = vrot.lane.b32.xlu1 %v6358_v15, %s13517_s26  ;;  %v6240_v15 = vor.u32 %v6239_v20, %v6235_v46  ;;  %v3701_v17 = vpop.permute.xlu0 %3700 }
 0x251   : > { %v3772_v20 = vsel %vm2469_vm4, %v11909_v52, %v3701_v17  ;;  %v11931_v52 = vcombine.low %v3801_v25, %v14994_v13 }
 0x253   : > { %4057 = vrot.lane.b32.xlu0 %v3777_v9, %s13517_s26  ;;  %v15225_v54 = vpop.permute.xlu1 %3437  ;;  %v13413_v9 = vld [vmem:[#allocation2 + $0x34] sm:$0x1] }
 0x254   : > { %6413 = vrot.lane.b32.xlu1 %v6374_v59, %s13517_s26  ;;  %v15229_v39 = vpop.permute.xlu0 %3947  ;;  %v11907_v59 = vcombine.low %v3544_v53, %v13413_v9  ;;  %v3793_v53 = vld [vmem:[#allocation2 + $0x18] sm:$0xf] }
 0x256   : > { %v3766_v3 = vsel %vm2469_vm4, %v11907_v59, %v3697_v45  ;;  %v13415_v59 = vld [vmem:[#allocation2 + $0x2c] sm:$0x1] }
 0x257   : > { %4061 = vrot.lane.b32.xlu0 %v3781_v12, %s13517_s26  ;;  %v15227_v49 = vpop.permute.xlu1 %3441 }
 0x258   : > { %6457 = vrot.lane.b32.xlu1 %v6448_v62, %s13516_s3 }
 0x25b   : > { %v15231_v23 = vpop.permute.xlu1 %3445 }
 0x25c   : > { %6461 = vrot.lane.b32.xlu1 %v6450_v29, %s13516_s3 }
 0x25f   : > { %v15233_v14 = vpop.permute.xlu1 %3690 }
 0x260   : > { %6265 = vrot.lane.b32.xlu1 %v6240_v15, %s13515_s25  ;;  %v3797_v15 = vld [vmem:[#allocation2 + $0x28] sm:$0xf] }
 0x261   : > { %v11929_v16 = vcombine.low %v3797_v15, %v13415_v59 }
 0x263   : > { %v15235_v26 = vpop.permute.xlu1 %3694 }
 0x267   : > { %v15240_v29 = vpop.permute.xlu1 %3698 }
 0x271   : > { %v3950_v19 = vpop.permute.xlu0 %3949 }
 0x272   : > { %v4017_v40 = vsel %vm2469_vm4, %v11929_v16, %v3950_v19  ;;  %v6139_v19 = vld [vmem:[#allocation2 + $0x28] sm:$0xe] }
 0x273   : > { %v12135_v59 = vcombine.low %v6139_v19, %v15168_v4 }
 0x275   : > { %v3994_v0 = vpop.permute.xlu0 %3993 }
 0x279   : > { %v3998_v6 = vpop.permute.xlu0 %3997 }
 0x27d   : > { %v3745_v12 = vpop.permute.xlu0 %3744 }
 0x27e   : > { %v3785_v62 = vsel %vm3519_vm0, %v3766_v3, %v3745_v12  ;;  %v11927_v3 = vcombine.low %v3793_v53, %v15009_v63  ;;  %v4038_v63 = vsel %vm3519_vm0, %v4017_v40, %v3998_v6 }
 0x27f   : > { %4065 = vrot.lane.b32.xlu0 %v3785_v62, %s13517_s26 }
 0x281   : > { %v3954_v46 = vpop.permute.xlu0 %3953 }
 0x282   : > { %v4023_v53 = vsel %vm2469_vm4, %v11931_v52, %v3954_v46 }
 0x285   : > { %v3749_v9 = vpop.permute.xlu0 %3748 }
 0x286   : > { %v15243_v60 = vpop.permute.xlu1 %3702  ;;  %v3789_v45 = vsel %vm3519_vm0, %v3772_v20, %v3749_v9  ;;  %v11933_v9 = vcombine.low %v3805_v57, %v15059_v47  ;;  %v6149_v47 = vld [vmem:[#allocation2 + $0x3c] sm:$0x3] }
 0x287   : > { %4069 = vrot.lane.b32.xlu0 %v3789_v45, %s13517_s26  ;;  %v12153_v33 = vcombine.low %v6157_v38, %v6149_v47 }
 0x289   : > { %v3958_v12 = vpop.permute.xlu0 %3957 }
 0x28a   : > { %v3946_v62 = vpop.permute.xlu1 %3945  ;;  %v4029_v45 = vsel %vm2469_vm4, %v11933_v9, %v3958_v12 }
 0x28b   : > { %v4011_v17 = vsel %vm2469_vm4, %v11927_v3, %v3946_v62  ;;  %v6141_v3 = vld [vmem:[#allocation2 + $0x38] sm:$0xe]  ;;  %v6299_v62 = vrot.slane %v12135_v59, 1 }
 0x28c   : > { %v4034_v50 = vsel %vm3519_vm0, %v4011_v17, %v3994_v0  ;;  %v6147_v0 = vld [vmem:[#allocation2 + $0x2c] sm:$0x3]  ;;  %v12137_v25 = vcombine.low %v6141_v3, %v15176_v51  ;;  %v12145_v40 = vcombine.low %v6141_v3, %v6149_v47  ;;  %v6155_v3 = vld [vmem:[#allocation2 + $0x28] sm:$0xc] }
 0x28d   : > { %4081 = vrot.lane.b32.xlu0 %v4034_v50, %s13518_s27  ;;  %v4002_v20 = vpop.permute.xlu0 %4001  ;;  %v12143_v6 = vcombine.low %v6139_v19, %v6147_v0  ;;  %v6126_v19 = vld [vmem:[#allocation2 + $0x40] sm:$0xf] }
 0x28e   : > { %v15253_v15 = vpop.permute.xlu1 %3951  ;;  %v4042_v13 = vsel %vm3519_vm0, %v4023_v53, %v4002_v20  ;;  %v6301_v20 = vrot.slane %v12137_v25, 1  ;;  %v6392_v53 = vshrl.u32 %v12145_v40, 16  ;;  %v6395_v9 = vshll.u32 %v12145_v40, 16  ;;  %v5700_v25 = vld [vmem:[#allocation2 + $0x4] sm:$0x1] }
 0x28f   : > { %v6376_v17 = vshrl.u32 %v12143_v6, 16  ;;  %v6379_v12 = vshll.u32 %v12143_v6, 16 }
 0x290   : > { %v6397_v59 = vrot.slane %v6395_v9, 2 }
 0x291   : > { %4085 = vrot.lane.b32.xlu0 %v4038_v63, %s13518_s27  ;;  %v4006_v50 = vpop.permute.xlu0 %4005  ;;  %v6378_v4 = vrot.slane %v6376_v17, 1  ;;  %v6381_v63 = vrot.slane %v6379_v12, 2  ;;  %v12151_v12 = vcombine.low %v6155_v3, %v6147_v0  ;;  %v6453_v3 = vrot.slane %v12153_v33, 2 }
 0x292   : > { %v15259_v16 = vpop.permute.xlu1 %3995  ;;  %v4046_v57 = vsel %vm3519_vm0, %v4029_v45, %v4006_v50  ;;  %v15275_v45 = vld [vmem:[#allocation2 + $0x44] sm:$0x1]  ;;  %v6394_v50 = vrot.slane %v6392_v53, 1 }
 0x293   : > { %v6382_v51 = vor.u32 %v6381_v63, %v6378_v4  ;;  %v12130_v17 = vcombine.low %v6126_v19, %v15275_v45  ;;  %v5702_v4 = vld [vmem:[#allocation2 + $0x14] sm:$0x1]  ;;  %v3807_v63 = vld [vmem:[#allocation2 + $0x50] sm:$0xf]  ;;  %v6451_v41 = vrot.slane %v12151_v12, 2 }
 0x294   : > { %v6398_v40 = vor.u32 %v6397_v59, %v6394_v50  ;;  %v11934_v19 = vcombine.low %v3807_v63, %v15099_v27  ;;  %v3538_v59 = vld [vmem:[#allocation2 + $0x18] sm:$0xf]  ;;  %v13416_v12 = vld [vmem:[#allocation2 + $0x1c] sm:$0x1]  ;;  %v15297_v63 = vld [vmem:[#allocation2 + $0x4] sm:$0x3] }
 0x295   : > { %4089 = vrot.lane.b32.xlu0 %v4042_v13, %s13518_s27  ;;  %v6251_v53 = vshll.u32 %v12130_v17, 16  ;;  %v6249_v0 = vshrl.u32 %v12130_v17, 16  ;;  %v11904_v27 = vcombine.low %v3538_v59, %v13416_v12  ;;  %v3546_v59 = vld [vmem:[#allocation2 + $0x38] sm:$0xf] }
 0x296   : > { %v15265_v46 = vpop.permute.xlu1 %3999 }
 0x297   : > { %v6253_v50 = vrot.slane %v6251_v53, 1 }
 0x299   : > { %4093 = vrot.lane.b32.xlu0 %v4046_v57, %s13518_s27  ;;  %v5692_v57 = vld [vmem:[#allocation2] sm:$0xf]  ;;  %v6254_v17 = vor.u32 %v6253_v50, %v6249_v0 }
 0x29a   : > { %v15270_v52 = vpop.permute.xlu1 %3746  ;;  %v12091_v42 = vcombine.low %v5692_v57, %v5700_v25 }
 0x29c   : > { %v5775_v35 = vshll.u32 %v12091_v42, 16  ;;  %v5773_v57 = vshrl.u32 %v12091_v42, 16 }
 0x29d   : > { %6311 = vrot.lane.b32.xlu0 %v6299_v62, %s13514_s24  ;;  %v15280_v62 = vpop.permute.xlu0 %4673 }
 0x29e   : > { %v15273_v13 = vpop.permute.xlu1 %3955  ;;  %19134 = vst [vmem:[#allocation68_spill] sm:$0xff] %v15280_v62  ;;  %v5777_v18 = vrot.slane %v5775_v35, 1  ;;  %v5708_v35 = vld [vmem:[#allocation2] sm:$0xe] }
 0x29f   : > { %v12099_v50 = vcombine.low %v5708_v35, %v5700_v25 }
 0x2a1   : > { %6315 = vrot.lane.b32.xlu0 %v6301_v20, %s13514_s24  ;;  %v5694_v20 = vld [vmem:[#allocation2 + $0x10] sm:$0xf]  ;;  %v15284_v9 = vpop.permute.xlu0 %4721 }
 0x2a2   : > { %v15278_v6 = vpop.permute.xlu1 %3750  ;;  %19135 = vst [vmem:[#allocation69_spill] sm:$0xff] %v15284_v9  ;;  %v12093_v28 = vcombine.low %v5694_v20, %v5702_v4  ;;  %v3542_v20 = vld [vmem:[#allocation2 + $0x28] sm:$0xf] }
 0x2a3   : > { %v3279_v9 = vld [vmem:[#allocation2 + $0x8] sm:$0xf] }
 0x2a4   : > { %v5789_v21 = vshll.u32 %v12093_v28, 16  ;;  %v5787_v33 = vshrl.u32 %v12093_v28, 16  ;;  %v5710_v28 = vld [vmem:[#allocation2 + $0x10] sm:$0xe] }
 0x2a5   : > { %6415 = vrot.lane.b32.xlu0 %v6382_v51, %s13517_s26  ;;  %v15293_v47 = vpop.permute.xlu0 %6255 }
 0x2a6   : > { %v3960_v36 = vpop.permute.xlu1 %3959  ;;  %v5791_v42 = vrot.slane %v5789_v21, 1  ;;  %v15306_v21 = vld [vmem:[#allocation2 + $0x14] sm:$0x3] }
 0x2a7   : > { %v4032_v11 = vsel %vm2469_vm4, %v11934_v19, %v3960_v36  ;;  %v3757_v36 = vsel %vm2469_vm4, %v11904_v27, %v15233_v14  ;;  %v12109_v25 = vcombine.low %v5710_v28, %v15306_v21  ;;  %v13418_v27 = vld [vmem:[#allocation2 + $0x3c] sm:$0x1] }
 0x2a8   : > { %v5792_v0 = vor.u32 %v5791_v42, %v5787_v33  ;;  %v3795_v33 = vld [vmem:[#allocation2 + $0x20] sm:$0xf] }
 0x2a9   : > { %6419 = vrot.lane.b32.xlu0 %v6398_v40, %s13517_s26  ;;  %v15302_v19 = vpop.permute.xlu0 %6259 }
 0x2aa   : > { %v15288_v51 = vpop.permute.xlu1 %4003 }
 0x2ad   : > { %6463 = vrot.lane.b32.xlu0 %v6451_v41, %s13516_s3  ;;  %v5778_v41 = vor.u32 %v5777_v18, %v5773_v57  ;;  %v12107_v18 = vcombine.low %v5708_v35, %v15297_v63  ;;  %v12101_v57 = vcombine.low %v5710_v28, %v5702_v4  ;;  %v5933_v35 = vshrl.u32 %v12109_v25, 16 }
 0x2ae   : > { %v4008_v40 = vpop.permute.xlu1 %4007 }
 0x2af   : > { %v4048_v38 = vsel %vm3519_vm0, %v4032_v11, %v4008_v40  ;;  %v13417_v11 = vld [vmem:[#allocation2 + $0x2c] sm:$0x1]  ;;  %v5868_v40 = vrot.slane %v12099_v50, 1  ;;  %v5920_v12 = vshll.u32 %v12107_v18, 16 }
 0x2b0   : > { %4095 = vrot.lane.b32.xlu1 %v4048_v38, %s13518_s27  ;;  %v11906_v53 = vcombine.low %v3542_v20, %v13417_v11  ;;  %v5917_v38 = vshrl.u32 %v12107_v18, 16  ;;  %v3550_v20 = vld [vmem:[#allocation2 + $0x48] sm:$0xf]  ;;  %v13082_v18 = vld [vmem:[%s19136_s20] sm:$0xff]  }
 0x2b1   : > { %6467 = vrot.lane.b32.xlu0 %v6453_v3, %s13516_s3  ;;  %v3779_v3 = vsel %vm3519_vm0, %v3757_v36, %v15205_v48  ;;  %v15317_v48 = vpop.permute.xlu0 %6303  ;;  %v5922_v42 = vrot.slane %v5920_v12, 2  ;;  %v5936_v36 = vshll.u32 %v12109_v25, 16  ;;  %12682 = vmatprep.subr.bf16.mxu0 %v13082_v18 }
 0x2b2   : > { %v3763_v14 = vsel %vm2469_vm4, %v11906_v53, %v15235_v26  ;;  %v5870_v26 = vrot.slane %v12101_v57, 1  ;;  %v5919_v4 = vrot.slane %v5917_v38, 1  ;;  %v11910_v53 = vcombine.low %v3550_v20, %v15053_v32  ;;  %v15335_v57 = vld [vmem:[#allocation2 + $0x24] sm:$0x1]  ;;  %12683 = vmatpush3.bf16.msra.mxu0 %v13082_v18 }
 0x2b4   : > { %6269 = vrot.lane.b32.xlu1 %v6254_v17, %s13515_s25  ;;  %v11908_v17 = vcombine.low %v3546_v59, %v13418_v27  ;;  %v5923_v59 = vor.u32 %v5922_v42, %v5919_v4  ;;  %v3775_v32 = vsel %vm2469_vm4, %v11910_v53, %v15243_v60  ;;  %v13086_v60 = vld [vmem:[%s19136_s20 + $0x8] sm:$0xff]   ;;  %v13088_v42 = vld [vmem:[%s19136_s20 + $0x10] ss:$0 sps:$4 sm:$0x33]  }
 0x2b5   : > { %5828 = vrot.lane.b32.xlu0 %v5778_v41, %s13515_s25  ;;  %v3783_v41 = vsel %vm3519_vm0, %v3763_v14, %v15217_v24  ;;  %v15330_v28 = vpop.permute.xlu0 %6307  ;;  %v5724_v14 = vld [vmem:[#allocation2] sm:$0xc]  ;;  %v3791_v25 = vsel %vm3519_vm0, %v3775_v32, %v15278_v6  ;;  %v5726_v6 = vld [vmem:[#allocation2 + $0x10] sm:$0xc]  ;;  %12684 = vmatprep.subr.bf16.mxu0 %v13086_v60 }
 0x2b6   : > { %v3769_v11 = vsel %vm2469_vm4, %v11908_v17, %v15240_v29  ;;  %v5938_v29 = vrot.slane %v5936_v36, 2  ;;  %v12115_v12 = vcombine.low %v5724_v14, %v15297_v63  ;;  %12685 = vmatpush3.bf16.msra.mxu0 %v13086_v60  ;;  %v12117_v36 = vcombine.low %v5726_v6, %v15306_v21  ;;  %v15387_v6 = vld [vmem:[#allocation2 + $0x24] sm:$0x3] }
 0x2b7   : > { %v3787_v24 = vsel %vm3519_vm0, %v3769_v11, %v15270_v52  ;;  %v5696_v52 = vld [vmem:[#allocation2 + $0x20] sm:$0xf]  ;;  %12928 = vmatprep.subr.msk.bf16.mxu0 %vm4331_vm1, %v13088_v42 }
 0x2b8   : > { %4059 = vrot.lane.b32.xlu1 %v3779_v3, %s13517_s26  ;;  %v5935_v3 = vrot.slane %v5933_v35, 1  ;;  %v12095_v17 = vcombine.low %v5696_v52, %v15335_v57  ;;  %v6020_v4 = vrot.slane %v12115_v12, 2  ;;  %v15359_v35 = vld [vmem:[#allocation2 + $0x34] sm:$0x3] }
 0x2b9   : > { %5832 = vrot.lane.b32.xlu0 %v5792_v0, %s13515_s25  ;;  %v13419_v0 = vld [vmem:[#allocation2 + $0x24] sm:$0x1] }
 0x2ba   : > { %v11928_v50 = vcombine.low %v3795_v33, %v13419_v0  ;;  %v5939_v27 = vor.u32 %v5938_v29, %v5935_v3  ;;  %v15353_v33 = vpop.permute.xlu0 %6407  ;;  %v5803_v11 = vshll.u32 %v12095_v17, 16  ;;  %v5801_v29 = vshrl.u32 %v12095_v17, 16 }
 0x2bc   : > { %4063 = vrot.lane.b32.xlu1 %v3783_v41, %s13517_s26  ;;  %v4014_v38 = vsel %vm2469_vm4, %v11928_v50, %v15229_v39  ;;  %v5698_v41 = vld [vmem:[#allocation2 + $0x30] sm:$0xf]  ;;  %v3803_v39 = vld [vmem:[#allocation2 + $0x40] sm:$0xf]  ;;  %v4333_v50 = vsel %vm4331_vm1, %v13088_v42, 0  ;;  %v5805_v14 = vrot.slane %v5803_v11, 1 }
 0x2bd   : > { %5876 = vrot.lane.b32.xlu0 %v5868_v40, %s13514_s24  ;;  %v3799_v40 = vld [vmem:[#allocation2 + $0x30] sm:$0xf]  ;;  %v4036_v63 = vsel %vm3519_vm0, %v4014_v38, %v15259_v16  ;;  %12687 = vmatpush3.bf16.msra.mxu0 %v4333_v50 }
 0x2be   : > { %v11930_v20 = vcombine.low %v3799_v40, %v15011_v61  ;;  %v6140_v61 = vld [vmem:[#allocation2 + $0x30] sm:$0xe]  ;;  %v15374_v3 = vpop.permute.xlu0 %6411  ;;  %v5806_v60 = vor.u32 %v5805_v14, %v5801_v29 }
 0x2bf   : > { %v12136_v21 = vcombine.low %v6140_v61, %v15202_v30  ;;  %v12144_v18 = vcombine.low %v6140_v61, %v15359_v35  ;;  %v5714_v11 = vld [vmem:[#allocation2 + $0x30] sm:$0xe] }
 0x2c0   : > { %4067 = vrot.lane.b32.xlu1 %v3787_v24, %s13517_s26  ;;  %v4020_v53 = vsel %vm2469_vm4, %v11930_v20, %v15253_v15  ;;  %v11932_v24 = vcombine.low %v3803_v39, %v15081_v8  ;;  %v15376_v15 = vld [vmem:[#allocation2 + $0x44] sm:$0x3]  ;;  %v6022_v8 = vrot.slane %v12117_v36, 2  ;;  %v5712_v20 = vld [vmem:[#allocation2 + $0x20] sm:$0xe] }
 0x2c1   : > { %5880 = vrot.lane.b32.xlu0 %v5870_v26, %s13514_s24  ;;  %v15349_v26 = vld [vmem:[#allocation2 + $0x34] sm:$0x1]  ;;  %v4040_v0 = vsel %vm3519_vm0, %v4020_v53, %v15265_v46  ;;  %v6300_v40 = vrot.slane %v12136_v21, 1  ;;  %v6384_v38 = vshrl.u32 %v12144_v18, 16  ;;  %v6387_v12 = vshll.u32 %v12144_v18, 16 }
 0x2c2   : > { %v12097_v16 = vcombine.low %v5698_v41, %v15349_v26  ;;  %v4026_v32 = vsel %vm2469_vm4, %v11932_v24, %v15273_v13  ;;  %v15389_v13 = vpop.permute.xlu0 %6455  ;;  %v12103_v61 = vcombine.low %v5712_v20, %v15335_v57  ;;  %v12111_v36 = vcombine.low %v5712_v20, %v15387_v6  ;;  %v6156_v50 = vld [vmem:[#allocation2 + $0x30] sm:$0xc]  ;;  %v5693_v21 = vld [vmem:[#allocation2 + $0x8] sm:$0xf] }
 0x2c3   : > { %v4044_v30 = vsel %vm3519_vm0, %v4026_v32, %v15288_v51  ;;  %v6389_v41 = vrot.slane %v6387_v12, 2  ;;  %v12105_v18 = vcombine.low %v5714_v11, %v15349_v26  ;;  %v5695_v26 = vld [vmem:[#allocation2 + $0x18] sm:$0xf] }
 0x2c4   : > { %4071 = vrot.lane.b32.xlu1 %v3791_v25, %s13517_s26  ;;  %v5817_v46 = vshll.u32 %v12097_v16, 16  ;;  %v5872_v57 = vrot.slane %v12103_v61, 1  ;;  %v5949_v14 = vshrl.u32 %v12111_v36, 16  ;;  %v6766_v61 = vld [vmem:[#allocation2 + $0x10] sm:$0xf] }
 0x2c5   : > { %5980 = vrot.lane.b32.xlu0 %v5923_v59, %s13517_s26  ;;  %v6142_v59 = vld [vmem:[#allocation2 + $0x40] sm:$0xe] }
 0x2c6   : > { %v12138_v52 = vcombine.low %v6142_v59, %v15275_v45  ;;  %v12146_v25 = vcombine.low %v6142_v59, %v15376_v15  ;;  %v5819_v17 = vrot.slane %v5817_v46, 1  ;;  %v6386_v45 = vrot.slane %v6384_v38, 1  ;;  %v15402_v59 = vpop.permute.xlu0 %6459  ;;  %v15411_v38 = vld [vmem:[#allocation2 + $0x1c] sm:$0x1] }
 0x2c7   : > { %19137 = vst [vmem:[#allocation70_spill] sm:$0xff] %v15402_v59  ;;  %v5952_v46 = vshll.u32 %v12111_v36, 16  ;;  %v5951_v12 = vrot.slane %v5949_v14, 1  ;;  %v15420_v36 = vld [vmem:[#allocation2 + $0x14] sm:$0x1] }
 0x2c8   : > { %4083 = vrot.lane.b32.xlu1 %v4036_v63, %s13518_s27  ;;  %v6302_v51 = vrot.slane %v12138_v52, 1  ;;  %v6400_v39 = vshrl.u32 %v12146_v25, 16  ;;  %v6403_v63 = vshll.u32 %v12146_v25, 16  ;;  %v6390_v53 = vor.u32 %v6389_v41, %v6386_v45  ;;  %v6158_v52 = vld [vmem:[#allocation2 + $0x40] sm:$0xc] }
 0x2c9   : > { %5984 = vrot.lane.b32.xlu0 %v5939_v27, %s13517_s26  ;;  %v5815_v27 = vshrl.u32 %v12097_v16, 16  ;;  %v15398_v16 = vld [vmem:[#allocation2 + $0x34] sm:$0x3]  ;;  %v5874_v25 = vrot.slane %v12105_v18, 1  ;;  %v12094_v41 = vcombine.low %v5695_v26, %v15411_v38  ;;  %v12178_v18 = vcombine.low %v6766_v61, %v15420_v36  ;;  %v15428_v14 = vld [vmem:[#allocation2 + $0x24] sm:$0x1] }
 0x2ca   : > { %v6402_v24 = vrot.slane %v6400_v39, 1  ;;  %v12113_v29 = vcombine.low %v5714_v11, %v15398_v16  ;;  %v15414_v20 = vpop.permute.xlu0 %6263  ;;  %v3287_v59 = vld [vmem:[#allocation2 + $0x28] sm:$0xf] }
 0x2cb   : > { %v5820_v42 = vor.u32 %v5819_v17, %v5815_v27  ;;  %19138 = vst [vmem:[#allocation71_spill] sm:$0xff] %v15414_v20 }
 0x2cc   : > { %4087 = vrot.lane.b32.xlu1 %v4040_v0, %s13518_s27  ;;  %v6405_v0 = vrot.slane %v6403_v63, 2  ;;  %v5965_v27 = vshrl.u32 %v12113_v29, 16  ;;  %v5968_v17 = vshll.u32 %v12113_v29, 16  ;;  %v6768_v29 = vld [vmem:[#allocation2 + $0x20] sm:$0xf] }
 0x2cd   : > { %6028 = vrot.lane.b32.xlu0 %v6020_v4, %s13516_s3  ;;  %v13095_v4 = vld [vmem:[%s18908_s7 + $0xc] sm:$0xff]  }
 0x2ce   : > { %12714 = vmatprep.subr.bf16.mxu0 %v13095_v4  ;;  %v6406_v32 = vor.u32 %v6405_v0, %v6402_v24  ;;  %v5967_v63 = vrot.slane %v5965_v27, 1  ;;  %v5970_v4 = vrot.slane %v5968_v17, 2  ;;  %v5796_v0 = vshll.u32 %v12094_v41, 16 }
 0x2d0   : > { %4091 = vrot.lane.b32.xlu1 %v4044_v30, %s13518_s27  ;;  %v12152_v30 = vcombine.low %v6156_v50, %v15359_v35  ;;  %v12154_v35 = vcombine.low %v6158_v52, %v15376_v15  ;;  %v15423_v50 = vpop.permute.xlu0 %6267  ;;  %v5971_v15 = vor.u32 %v5970_v4, %v5967_v63  ;;  %v5709_v52 = vld [vmem:[#allocation2 + $0x8] sm:$0xe]  ;;  %v15444_v4 = vpop.permute.xlu1 %6257 }
 0x2d1   : > { %6032 = vrot.lane.b32.xlu0 %v6022_v8, %s13516_s3  ;;  %v15404_v8 = vld [vmem:[#allocation2 + $0xc] sm:$0x1]  ;;  %19139 = vst [vmem:[#allocation72_spill] sm:$0xff] %v15423_v50 }
 0x2d2   : > { %v6454_v11 = vrot.slane %v12154_v35, 2  ;;  %v12100_v17 = vcombine.low %v5709_v52, %v15404_v8  ;;  %v5711_v35 = vld [vmem:[#allocation2 + $0x18] sm:$0xe]  ;;  %v13420_v50 = vld [vmem:[#allocation2 + $0xc] sm:$0x1] }
 0x2d3   : > { %v11879_v20 = vcombine.low %v3279_v9, %v13420_v50 }
 0x2d4   : > { %6313 = vrot.lane.b32.xlu1 %v6300_v40, %s13514_s24  ;;  %v12092_v40 = vcombine.low %v5693_v21, %v15404_v8  ;;  %v5869_v61 = vrot.slane %v12100_v17, 1  ;;  %v15462_v17 = vld [vmem:[#allocation2 + $0x24] sm:$0x3] }
 0x2d5   : > { %5836 = vrot.lane.b32.xlu0 %v5806_v60, %s13515_s25  ;;  %v5954_v60 = vrot.slane %v5952_v46, 2 }
 0x2d6   : > { %v5782_v45 = vshll.u32 %v12092_v40, 16 }
 0x2d7   : > { %v5955_v39 = vor.u32 %v5954_v60, %v5951_v12  ;;  %v12180_v12 = vcombine.low %v6768_v29, %v15428_v14  ;;  %v15436_v60 = vpop.permute.xlu0 %4057 }
 0x2d8   : > { %6317 = vrot.lane.b32.xlu1 %v6302_v51, %s13514_s24  ;;  %v6452_v51 = vrot.slane %v12152_v30, 2  ;;  %v5784_v24 = vrot.slane %v5782_v45, 1  ;;  %v5798_v30 = vrot.slane %v5796_v0, 1  ;;  %v15441_v45 = vld [vmem:[#allocation2 + $0x1c] sm:$0x3] }
 0x2d9   : > { %5840 = vrot.lane.b32.xlu0 %v5820_v42, %s13515_s25  ;;  %v5728_v42 = vld [vmem:[#allocation2 + $0x20] sm:$0xc]  ;;  %v6863_v63 = vshll.u32 %v12180_v12, 16  ;;  %v12110_v8 = vcombine.low %v5711_v35, %v15441_v45 }
 0x2da   : > { %v12119_v21 = vcombine.low %v5728_v42, %v15387_v6  ;;  %v6849_v6 = vshll.u32 %v12178_v18, 16  ;;  %v12102_v42 = vcombine.low %v5711_v35, %v15411_v38 }
 0x2dc   : > { %6417 = vrot.lane.b32.xlu1 %v6390_v53, %s13517_s26  ;;  %v5780_v53 = vshrl.u32 %v12092_v40, 16  ;;  %v15431_v40 = vld [vmem:[#allocation2 + $0xc] sm:$0x3]  ;;  %v6024_v26 = vrot.slane %v12119_v21, 2  ;;  %v6865_v21 = vrot.slane %v6863_v63, 1  ;;  %v5871_v29 = vrot.slane %v12102_v42, 1 }
 0x2dd   : > { %5884 = vrot.lane.b32.xlu0 %v5872_v57, %s13514_s24  ;;  %v5730_v57 = vld [vmem:[#allocation2 + $0x30] sm:$0xc]  ;;  %v15466_v42 = vld [vmem:[#allocation2 + $0x2c] sm:$0x1] }
 0x2de   : > { %v5785_v46 = vor.u32 %v5784_v24, %v5780_v53  ;;  %v15449_v24 = vpop.permute.xlu0 %4061 }
 0x2df   : > { %19140 = vst [vmem:[#allocation73_spill] sm:$0xff] %v15449_v24 }
 0x2e0   : > { %6421 = vrot.lane.b32.xlu1 %v6406_v32, %s13517_s26  ;;  %v5794_v32 = vshrl.u32 %v12094_v41, 16 }
 0x2e1   : > { %5888 = vrot.lane.b32.xlu0 %v5874_v25, %s13514_s24  ;;  %v12121_v25 = vcombine.low %v5730_v57, %v15398_v16  ;;  %v6851_v16 = vrot.slane %v6849_v6, 1  ;;  %v15452_v57 = vld [vmem:[#allocation2 + $0x14] sm:$0x3] }
 0x2e2   : > { %v5799_v27 = vor.u32 %v5798_v30, %v5794_v32  ;;  %v5941_v30 = vshrl.u32 %v12110_v8, 16 }
 0x2e3   : > { %v6026_v41 = vrot.slane %v12121_v25, 2 }
 0x2e4   : > { %6465 = vrot.lane.b32.xlu1 %v6452_v51, %s13516_s3  ;;  %v12108_v51 = vcombine.low %v5709_v52, %v15431_v40  ;;  %v5944_v52 = vshll.u32 %v12110_v8, 16  ;;  %v5943_v35 = vrot.slane %v5941_v30, 1 }
 0x2e5   : > { %5988 = vrot.lane.b32.xlu0 %v5955_v39, %s13517_s26  ;;  %v6847_v39 = vshrl.u32 %v12178_v18, 16  ;;  %v6782_v18 = vld [vmem:[#allocation2 + $0x10] sm:$0xe] }
 0x2e6   : > { %v5928_v53 = vshll.u32 %v12108_v51, 16  ;;  %v12186_v6 = vcombine.low %v6782_v18, %v15420_v36 }
 0x2e7   : > { %v6852_v0 = vor.u32 %v6851_v16, %v6847_v39  ;;  %v5725_v39 = vld [vmem:[#allocation2 + $0x8] sm:$0xc] }
 0x2e8   : > { %6469 = vrot.lane.b32.xlu1 %v6454_v11, %s13516_s3  ;;  %v5925_v11 = vshrl.u32 %v12108_v51, 16  ;;  %v5930_v32 = vrot.slane %v5928_v53, 2  ;;  %v5697_v16 = vld [vmem:[#allocation2 + $0x28] sm:$0xf]  ;;  %v6942_v36 = vrot.slane %v12186_v6, 1 }
 0x2e9   : > { %5992 = vrot.lane.b32.xlu0 %v5971_v15, %s13517_s26  ;;  %v6861_v15 = vshrl.u32 %v12180_v12, 16  ;;  %v12194_v12 = vcombine.low %v6782_v18, %v15452_v57  ;;  %v5727_v18 = vld [vmem:[#allocation2 + $0x18] sm:$0xc] }
 0x2ea   : > { %v5927_v38 = vrot.slane %v5925_v11, 1 }
 0x2eb   : > { %v6866_v25 = vor.u32 %v6865_v21, %v6861_v15  ;;  %v6991_v11 = vshrl.u32 %v12194_v12, 16  ;;  %v6994_v53 = vshll.u32 %v12194_v12, 16  ;;  %v12116_v21 = vcombine.low %v5725_v39, %v15431_v40 }
 0x2ec   : > { %5830 = vrot.lane.b32.xlu1 %v5785_v46, %s13515_s25  ;;  %v15454_v46 = vpop.permute.xlu1 %6261  ;;  %v5931_v51 = vor.u32 %v5930_v32, %v5927_v38  ;;  %v15477_v32 = vld [vmem:[#allocation2 + $0x3c] sm:$0x1] }
 0x2ed   : > { %6036 = vrot.lane.b32.xlu0 %v6024_v26, %s13516_s3  ;;  %v6993_v30 = vrot.slane %v6991_v11, 1  ;;  %v6021_v40 = vrot.slane %v12116_v21, 2  ;;  %v6770_v11 = vld [vmem:[#allocation2 + $0x30] sm:$0xf] }
 0x2f0   : > { %5834 = vrot.lane.b32.xlu1 %v5799_v27, %s13515_s25  ;;  %v6784_v27 = vld [vmem:[#allocation2 + $0x20] sm:$0xe] }
 0x2f1   : > { %6040 = vrot.lane.b32.xlu0 %v6026_v41, %s13516_s3  ;;  %v15457_v26 = vpop.permute.xlu0 %4065  ;;  %v5946_v41 = vrot.slane %v5944_v52, 2  ;;  %v12188_v63 = vcombine.low %v6784_v27, %v15428_v14  ;;  %v12196_v8 = vcombine.low %v6784_v27, %v15462_v17  ;;  %v12096_v14 = vcombine.low %v5697_v16, %v15466_v42 }
 0x2f2   : > { %19141 = vst [vmem:[#allocation74_spill] sm:$0xff] %v15457_v26  ;;  %v6996_v52 = vrot.slane %v6994_v53, 2 }
 0x2f3   : > { %v5947_v15 = vor.u32 %v5946_v41, %v5943_v35  ;;  %v6944_v38 = vrot.slane %v12188_v63, 1  ;;  %v7010_v6 = vshll.u32 %v12196_v8, 16  ;;  %v5810_v35 = vshll.u32 %v12096_v14, 16 }
 0x2f4   : > { %5878 = vrot.lane.b32.xlu1 %v5869_v61, %s13514_s24  ;;  %v6997_v39 = vor.u32 %v6996_v52, %v6993_v30  ;;  %v5808_v21 = vshrl.u32 %v12096_v14, 16  ;;  %v6800_v52 = vld [vmem:[#allocation2 + $0x20] sm:$0xc] }
 0x2f5   : > { %6902 = vrot.lane.b32.xlu0 %v6852_v0, %s13515_s25  ;;  %v15472_v0 = vpop.permute.xlu1 %6305  ;;  %v7012_v63 = vrot.slane %v7010_v6, 2  ;;  %v5812_v5 = vrot.slane %v5810_v35, 1  ;;  %v15498_v6 = vld [vmem:[#allocation2 + $0x44] sm:$0x1]  ;;  %v5713_v35 = vld [vmem:[#allocation2 + $0x28] sm:$0xe] }
 0x2f7   : > { %v5813_v14 = vor.u32 %v5812_v5, %v5808_v21  ;;  %v3283_v5 = vld [vmem:[#allocation2 + $0x18] sm:$0xf] }
 0x2f8   : > { %5882 = vrot.lane.b32.xlu1 %v5871_v29, %s13514_s24  ;;  %v5699_v29 = vld [vmem:[#allocation2 + $0x38] sm:$0xf] }
 0x2f9   : > { %v15468_v61 = vpop.permute.xlu0 %4069  ;;  %6906 = vrot.lane.b32.xlu0 %v6866_v25, %s13515_s25  ;;  %v7007_v25 = vshrl.u32 %v12196_v8, 16  ;;  %v15482_v27 = vpop.permute.xlu1 %6309  ;;  %v12098_v41 = vcombine.low %v5699_v29, %v15477_v32  ;;  %v15488_v8 = vld [vmem:[#allocation2 + $0x34] sm:$0x1]  ;;  %v5715_v21 = vld [vmem:[#allocation2 + $0x38] sm:$0xe] }
 0x2fa   : > { %19142 = vst [vmem:[#allocation75_spill] sm:$0xff] %v15468_v61  ;;  %19144 = vst [vmem:[#allocation77_spill] sm:$0xff] %v15482_v27  ;;  %v3285_v61 = vld [vmem:[#allocation2 + $0x20] sm:$0xf] }
 0x2fb   : > { %v7009_v16 = vrot.slane %v7007_v25, 1  ;;  %v6772_v25 = vld [vmem:[#allocation2 + $0x40] sm:$0xf] }
 0x2fc   : > { %5982 = vrot.lane.b32.xlu1 %v5931_v51, %s13517_s26  ;;  %v12118_v51 = vcombine.low %v5727_v18, %v15441_v45  ;;  %v5824_v45 = vshll.u32 %v12098_v41, 16 }
 0x2fd   : > { %6950 = vrot.lane.b32.xlu0 %v6942_v36, %s13514_s24  ;;  %v6798_v36 = vld [vmem:[#allocation2 + $0x10] sm:$0xc]  ;;  %v7013_v18 = vor.u32 %v7012_v63, %v7009_v16  ;;  %v15496_v30 = vpop.permute.xlu1 %6409  ;;  %v12204_v63 = vcombine.low %v6800_v52, %v15462_v17 }
 0x2fe   : > { %v12202_v29 = vcombine.low %v6798_v36, %v15452_v57  ;;  %19146 = vst [vmem:[#allocation79_spill] sm:$0xff] %v15496_v30  ;;  %v15505_v57 = vld [vmem:[#allocation2 + $0x3c] sm:$0x3] }
 0x2ff   : > { %v15480_v12 = vpop.permute.xlu0 %4081  ;;  %v15520_v52 = vcombine.low %v5715_v21, %v15505_v57  ;;  %v7096_v9 = vrot.slane %v12204_v63, 2  ;;  %v13425_v30 = vld [vmem:[#allocation2 + $0x3c] sm:$0x1] }
 0x300   : > { %19143 = vst [vmem:[#allocation76_spill] sm:$0xff] %v15480_v12  ;;  %5986 = vrot.lane.b32.xlu1 %v5947_v15, %s13517_s26  ;;  %v6023_v15 = vrot.slane %v12118_v51, 2  ;;  %v5826_v51 = vrot.slane %v5824_v45, 1  ;;  %v7094_v16 = vrot.slane %v12202_v29, 2  ;;  %v15526_v12 = vld [vmem:[#allocation2 + $0x30] sm:$0xf] }
 0x301   : > { %6954 = vrot.lane.b32.xlu0 %v6944_v38, %s13514_s24  ;;  %v12182_v38 = vcombine.low %v6770_v11, %v15488_v8  ;;  %v15510_v11 = vcombine.low %v6772_v25, %v15498_v6 }
 0x303   : > { %v15490_v53 = vpop.permute.xlu0 %4085  ;;  %v6877_v36 = vshll.u32 %v12182_v38, 16  ;;  %v6875_v50 = vshrl.u32 %v12182_v38, 16  ;;  %v6891_v25 = vshll.u32 %v15510_v11, 16 }
 0x304   : > { %19145 = vst [vmem:[#allocation78_spill] sm:$0xff] %v15490_v53  ;;  %6030 = vrot.lane.b32.xlu1 %v6021_v40, %s13516_s3  ;;  %v5822_v40 = vshrl.u32 %v12098_v41, 16  ;;  %v12104_v41 = vcombine.low %v5713_v35, %v15466_v42  ;;  %v13422_v53 = vld [vmem:[#allocation2 + $0x1c] sm:$0x1] }
 0x305   : > { %7054 = vrot.lane.b32.xlu0 %v6997_v39, %s13517_s26  ;;  %v15503_v39 = vld [vmem:[#allocation2 + $0x2c] sm:$0x3]  ;;  %v6879_v42 = vrot.slane %v6877_v36, 1  ;;  %v12106_v36 = vcombine.low %v5715_v21, %v15477_v32 }
 0x306   : > { %v5827_v17 = vor.u32 %v5826_v51, %v5822_v40  ;;  %v12112_v29 = vcombine.low %v5713_v35, %v15503_v39  ;;  %v13423_v40 = vld [vmem:[#allocation2 + $0x2c] sm:$0x1]  ;;  %v13424_v35 = vld [vmem:[#allocation2 + $0x24] sm:$0x1]  ;;  %v5873_v38 = vrot.slane %v12104_v41, 1 }
 0x307   : > { %v15500_v62 = vpop.permute.xlu0 %4089  ;;  %v11883_v51 = vcombine.low %v3287_v59, %v13423_v40  ;;  %v11882_v24 = vcombine.low %v3285_v61, %v13424_v35  ;;  %v5976_v59 = vshll.u32 %v15520_v52, 16  ;;  %v6889_v61 = vshrl.u32 %v15510_v11, 16  ;;  %v6788_v35 = vld [vmem:[#allocation2 + $0x40] sm:$0xe] }
 0x308   : > { %19147 = vst [vmem:[#allocation80_spill] sm:$0xff] %v15500_v62  ;;  %6034 = vrot.lane.b32.xlu1 %v6023_v15, %s13516_s3  ;;  %v3281_v15 = vld [vmem:[#allocation2 + $0x10] sm:$0xf]  ;;  %v3291_v62 = vld [vmem:[#allocation2 + $0x38] sm:$0xf] }
 0x309   : > { %7058 = vrot.lane.b32.xlu0 %v7013_v18, %s13517_s26  ;;  %v15515_v18 = vpop.permute.xlu1 %6413  ;;  %v11885_v27 = vcombine.low %v3291_v62, %v13425_v30  ;;  %v6880_v62 = vor.u32 %v6879_v42, %v6875_v50  ;;  %v6893_v30 = vrot.slane %v6891_v25, 1  ;;  %v3509_v11 = vsel %vm2469_vm4, %v11883_v51, %v15174_v43  ;;  %v15558_v50 = vld [vmem:[#allocation2 + $0x1c] sm:$0x1]  ;;  %v6769_v42 = vld [vmem:[#allocation2 + $0x28] sm:$0xf] }
 0x30a   : > { %19149 = vst [vmem:[#allocation82_spill] sm:$0xff] %v15515_v18  ;;  %v3497_v18 = vsel %vm2469_vm4, %v11879_v20, %v15068_v58  ;;  %v5957_v58 = vshrl.u32 %v12112_v29, 16  ;;  %v5960_v20 = vshll.u32 %v12112_v29, 16  ;;  %v6786_v29 = vld [vmem:[#allocation2 + $0x30] sm:$0xe]  ;;  %v5875_v43 = vrot.slane %v12106_v36, 1 }
 0x30b   : > { %v15513_v45 = vpop.permute.xlu0 %4093  ;;  %v15560_v25 = vld [vmem:[#allocation2 + $0x2c] sm:$0x1] }
 0x30c   : > { %19148 = vst [vmem:[#allocation81_spill] sm:$0xff] %v15513_v45  ;;  %5838 = vrot.lane.b32.xlu1 %v5813_v14, %s13515_s25  ;;  %v13421_v45 = vld [vmem:[#allocation2 + $0x14] sm:$0x1]  ;;  %v11881_v14 = vcombine.low %v3283_v5, %v13422_v53  ;;  %v5973_v53 = vshrl.u32 %v15520_v52, 16  ;;  %v5962_v40 = vrot.slane %v5960_v20, 2 }
 0x30d   : > { %7102 = vrot.lane.b32.xlu0 %v7094_v16, %s13516_s3  ;;  %v11880_v26 = vcombine.low %v3281_v15, %v13421_v45  ;;  %v15528_v16 = vld [vmem:[#allocation2 + $0x40] sm:$0xf]  ;;  %v13426_v5 = vld [vmem:[#allocation2 + $0x34] sm:$0x1]  ;;  %v13427_v45 = vld [vmem:[#allocation2 + $0x44] sm:$0x1]  ;;  %v15542_v21 = vpop.permute.xlu1 %6457 }
 0x30e   : > { %v11884_v41 = vcombine.low %v15526_v12, %v13426_v5  ;;  %v11886_v32 = vcombine.low %v15528_v16, %v13427_v45  ;;  %v15544_v52 = vld [vmem:[#allocation2 + $0x34] sm:$0x3]  ;;  %v5975_v36 = vrot.slane %v5973_v53, 1  ;;  %v13428_v20 = vld [vmem:[#allocation2 + $0x8] sm:$0xf] }
 0x30f   : > { %v15530_v63 = vpop.permute.xlu0 %6311  ;;  %v3500_v15 = vsel %vm2469_vm4, %v11880_v26, %v15162_v37  ;;  %v3515_v37 = vsel %vm2469_vm4, %v11885_v27, %v15188_v7  ;;  %v15554_v26 = vsel %vm3519_vm0, %v3497_v18, %v15065_v1  ;;  %v5729_v7 = vld [vmem:[#allocation2 + $0x28] sm:$0xc]  ;;  %v6894_v27 = vor.u32 %v6893_v30, %v6889_v61  ;;  %v15604_v53 = vld [vmem:[#allocation2 + $0x1c] sm:$0x3]  ;;  %v15607_v5 = vld [vmem:[#allocation2 + $0x2c] sm:$0x3] }
 0x310   : > { %5842 = vrot.lane.b32.xlu1 %v5827_v17, %s13515_s25  ;;  %v6767_v17 = vld [vmem:[#allocation2 + $0x18] sm:$0xf]  ;;  %v15567_v1 = vsel %vm3519_vm0, %v3500_v15, %v15166_v10  ;;  %v12190_v18 = vcombine.low %v6786_v29, %v15488_v8  ;;  %v12198_v51 = vcombine.low %v6786_v29, %v15544_v52  ;;  %v15584_v10 = vcombine.low %v6769_v42, %v15560_v25 }
 0x311   : > { %7106 = vrot.lane.b32.xlu0 %v7096_v9, %s13516_s3  ;;  %v3503_v9 = vsel %vm2469_vm4, %v11881_v14, %v15221_v34  ;;  %v3506_v34 = vsel %vm2469_vm4, %v11882_v24, %v15225_v54  ;;  %v5959_v14 = vrot.slane %v5957_v58, 1  ;;  %v15574_v54 = vsel %vm3519_vm0, %v3509_v11, %v15093_v22  ;;  %v15600_v61 = vpop.permute.xlu1 %6461  ;;  %v5731_v15 = vld [vmem:[#allocation2 + $0x38] sm:$0xc] }
 0x312   : > { %v15578_v24 = vsel %vm3519_vm0, %v3515_v37, %v15107_v55  ;;  %v15581_v16 = vcombine.low %v6767_v17, %v15558_v50  ;;  %v15590_v8 = vsel %vm3519_vm0, %v3503_v9, %v15079_v56  ;;  %v5978_v58 = vrot.slane %v5976_v59, 2  ;;  %v6783_v11 = vld [vmem:[#allocation2 + $0x18] sm:$0xe] }
 0x313   : > { %v15556_v12 = vpop.permute.xlu0 %6315  ;;  %v15596_v55 = vsel %vm3519_vm0, %v3506_v34, %v15180_v44  ;;  %v5963_v30 = vor.u32 %v5962_v40, %v5959_v14  ;;  %v12120_v56 = vcombine.low %v5729_v7, %v15503_v39  ;;  %v12192_v59 = vcombine.low %v6788_v35, %v15498_v6  ;;  %v13429_v37 = vld [vmem:[#allocation2 + $0x18] sm:$0xf] }
 0x314   : > { %19150 = vst [vmem:[#allocation83_spill] sm:$0xff] %v15556_v12  ;;  %5886 = vrot.lane.b32.xlu1 %v5873_v38, %s13514_s24  ;;  %v15586_v38 = vld [vmem:[#allocation2 + $0x44] sm:$0x3]  ;;  %v6946_v44 = vrot.slane %v12190_v18, 1  ;;  %v7023_v45 = vshrl.u32 %v12198_v51, 16  ;;  %v7026_v17 = vshll.u32 %v12198_v51, 16  ;;  %v3512_v29 = vsel %vm2469_vm4, %v11884_v41, %v15227_v49 }
 0x315   : > { %6910 = vrot.lane.b32.xlu0 %v6880_v62, %s13515_s25  ;;  %v6473_v62 = vsel %vm2469_vm4, %v13428_v20, %v15293_v47  ;;  %v12200_v47 = vcombine.low %v6788_v35, %v15586_v38  ;;  %v3518_v39 = vsel %vm2469_vm4, %v11886_v32, %v15231_v23  ;;  %v6856_v9 = vshll.u32 %v15581_v16, 16  ;;  %v15623_v49 = vld [vmem:[#allocation2 + $0x28] sm:$0xe]  ;;  %v15628_v41 = vpop.permute.xlu1 %6265 }
 0x316   : > { %v6870_v6 = vshll.u32 %v15584_v10, 16  ;;  %v6479_v42 = vsel %vm2469_vm4, %v13429_v37, %v15302_v19  ;;  %v5979_v34 = vor.u32 %v5978_v58, %v5975_v36  ;;  %v12195_v40 = vcombine.low %v6783_v11, %v15604_v53  ;;  %v6771_v37 = vld [vmem:[#allocation2 + $0x38] sm:$0xf] }
 0x317   : > { %v15592_v22 = vpop.permute.xlu0 %6415  ;;  %v6496_v23 = vsel %vm3519_vm0, %v6473_v62, %v15317_v48  ;;  %v6025_v32 = vrot.slane %v12120_v56, 2  ;;  %v12197_v19 = vcombine.low %v15623_v49, %v15607_v5  ;;  %v6948_v7 = vrot.slane %v12192_v59, 1 }
 0x318   : > { %19151 = vst [vmem:[#allocation84_spill] sm:$0xff] %v15592_v22  ;;  %5890 = vrot.lane.b32.xlu1 %v5875_v43, %s13514_s24  ;;  %v12122_v43 = vcombine.low %v5731_v15, %v15505_v57  ;;  %v7025_v57 = vrot.slane %v7023_v45, 1  ;;  %v7039_v18 = vshrl.u32 %v12200_v47, 16  ;;  %v7042_v51 = vshll.u32 %v12200_v47, 16  ;;  %v7311_v47 = vld [vmem:[#allocation2 + $0x18] sm:$0xf] }
 0x319   : > { %6914 = vrot.lane.b32.xlu0 %v6894_v27, %s13515_s25  ;;  %v7028_v27 = vrot.slane %v7026_v17, 2  ;;  %v6854_v35 = vshrl.u32 %v15581_v16, 16  ;;  %v6858_v48 = vrot.slane %v6856_v9, 1  ;;  %v6868_v36 = vshrl.u32 %v15584_v10, 16  ;;  %v15647_v45 = vld [vmem:[#allocation2 + $0x1c] sm:$0x1] }
 0x31a   : > { %v6872_v58 = vrot.slane %v6870_v6, 1  ;;  %v6027_v20 = vrot.slane %v12122_v43, 2  ;;  %v6999_v56 = vshrl.u32 %v12195_v40, 16  ;;  %v7002_v15 = vshll.u32 %v12195_v40, 16 }
 0x31b   : > { %v15620_v14 = vpop.permute.xlu0 %6419  ;;  %v15641_v59 = vsel %vm3519_vm0, %v3512_v29, %v15192_v31  ;;  %v15645_v16 = vsel %vm3519_vm0, %v3518_v39, %v15197_v2  ;;  %v7018_v10 = vshll.u32 %v12197_v19, 16  ;;  %v7029_v17 = vor.u32 %v7028_v27, %v7025_v57 }
 0x31c   : > { %19152 = vst [vmem:[#allocation85_spill] sm:$0xff] %v15620_v14  ;;  %5990 = vrot.lane.b32.xlu1 %v5963_v30, %s13517_s26  ;;  %v12187_v30 = vcombine.low %v6783_v11, %v15558_v50  ;;  %v6500_v50 = vsel %vm3519_vm0, %v6479_v42, %v15330_v28  ;;  %v7041_v9 = vrot.slane %v7039_v18, 1  ;;  %v7044_v6 = vrot.slane %v7042_v51, 2  ;;  %v6802_v28 = vld [vmem:[#allocation2 + $0x30] sm:$0xc] }
 0x31d   : > { %6958 = vrot.lane.b32.xlu0 %v6946_v44, %s13514_s24  ;;  %v7015_v44 = vshrl.u32 %v12197_v19, 16  ;;  %v6512_v31 = vsel %vm4097_vm2, %v6496_v23, %v15353_v33  ;;  %v15656_v2 = vor.u32 %v6858_v48, %v6854_v35  ;;  %v15658_v39 = vor.u32 %v6872_v58, %v6868_v36  ;;  %v6799_v23 = vld [vmem:[#allocation2 + $0x18] sm:$0xc]  ;;  %v6773_v18 = vld [vmem:[#allocation2 + $0x48] sm:$0xf] }
 0x31e   : > { %v12189_v11 = vcombine.low %v15623_v49, %v15560_v25  ;;  %v15664_v42 = vrot.slane %v12187_v30, 1  ;;  %v15668_v40 = vrot.slane %v6999_v56, 1  ;;  %v15670_v33 = vrot.slane %v7002_v15, 2  ;;  %v13430_v25 = vld [vmem:[#allocation2 + $0x10] sm:$0xf] }
 0x31f   : > { %v15635_v62 = vpop.permute.xlu0 %6463  ;;  %v15673_v19 = vcombine.low %v7311_v47, %v15647_v45  ;;  %v6476_v49 = vsel %vm2469_vm4, %v13430_v25, %v15444_v4  ;;  %v15682_v57 = vrot.slane %v7015_v44, 1  ;;  %v15684_v27 = vrot.slane %v7018_v10, 2  ;;  %v15686_v51 = vld [vmem:[#allocation2 + $0x4c] sm:$0x1]  ;;  %v13431_v35 = vld [vmem:[#allocation2 + $0x20] sm:$0xf] }
 0x320   : > { %19153 = vst [vmem:[#allocation86_spill] sm:$0xff] %v15635_v62  ;;  %5994 = vrot.lane.b32.xlu1 %v5979_v34, %s13517_s26  ;;  %v15662_v34 = vld [vmem:[#allocation2 + $0x3c] sm:$0x1]  ;;  %v6482_v48 = vsel %vm2469_vm4, %v13431_v35, %v15454_v46  ;;  %v12206_v4 = vcombine.low %v6802_v28, %v15544_v52  ;;  %v15695_v58 = vld [vmem:[#allocation2 + $0x2c] sm:$0x1]  ;;  %v15699_v30 = vsel %vm4761_vm10, %v6512_v31, %v15389_v13  ;;  %v15706_v15 = vrot.slane %v12189_v11, 1 }
 0x321   : > { %6962 = vrot.lane.b32.xlu0 %v6948_v7, %s13514_s24  ;;  %v15677_v7 = vsel %vm4097_vm2, %v6500_v50, %v15374_v3  ;;  %v7045_v3 = vor.u32 %v7044_v6, %v7041_v9  ;;  %v15692_v36 = vcombine.low %v6771_v37, %v15662_v34  ;;  %v4099_v56 = vsel %vm4097_vm2, %v15554_v26, %v15436_v60  ;;  %v6804_v10 = vld [vmem:[#allocation2 + $0x40] sm:$0xc]  ;;  %v15709_v47 = vld [vmem:[#allocation2 + $0x1c] sm:$0x3]  ;;  %v15723_v9 = vld [vmem:[#allocation2 + $0x2c] sm:$0x3] }
 0x322   : > { %v15654_v29 = vpop.permute.xlu1 %4095  ;;  %v12203_v44 = vcombine.low %v6799_v23, %v15604_v53  ;;  %v6498_v52 = vsel %vm3519_vm0, %v6476_v49, %v15472_v0  ;;  %v19156_v50 = vld [vmem:[#allocation76_spill] sm:$0xff]  ;;  %v15720_v60 = vcombine.low %v6773_v18, %v15686_v51  ;;  %v7394_v26 = vshll.u32 %v15673_v19, 16  ;;  %v19158_v53 = vld [vmem:[#allocation77_spill] sm:$0xff]  ;;  %v15737_v37 = vld [vmem:[#allocation2 + $0x18] sm:$0xe] }
 0x323   : > { %v15666_v43 = vpop.permute.xlu0 %6467  ;;  %v15715_v13 = vsel %vm4114_vm3, %v4099_v56, %v19156_v50  ;;  %v15727_v6 = vsel %vm3519_vm0, %v6482_v48, %v19158_v53  ;;  %v6801_v28 = vld [vmem:[#allocation2 + $0x28] sm:$0xc]  ;;  %v6884_v23 = vshll.u32 %v15692_v36, 16  ;;  %v7098_v25 = vrot.slane %v12206_v4, 2  ;;  %v19159_v35 = vld [vmem:[#allocation79_spill] sm:$0xff]  ;;  %v19162_v31 = vld [vmem:[#allocation78_spill] sm:$0xff] }
 0x324   : > { %19154 = vst [vmem:[#allocation87_spill] sm:$0xff] %v15666_v43  ;;  %6038 = vrot.lane.b32.xlu1 %v6025_v32, %s13516_s3  ;;  %v7313_v32 = vld [vmem:[#allocation2 + $0x28] sm:$0xf]  ;;  %v12208_v49 = vcombine.low %v6804_v10, %v15586_v38  ;;  %v15748_v48 = vsel %vm4097_vm2, %v6498_v52, %v19159_v35  ;;  %v6898_v53 = vshll.u32 %v15720_v60, 16  ;;  %v7392_v52 = vshrl.u32 %v15673_v19, 16 }
 0x325   : > { %7062 = vrot.lane.b32.xlu0 %v7029_v17, %s13517_s26  ;;  %v15735_v11 = vcombine.low %v7313_v32, %v15695_v58  ;;  %v15744_v18 = vld [vmem:[#allocation2 + $0x28] sm:$0xe]  ;;  %v11951_v32 = vcombine.low %v15715_v13, %v15715_v13  ;;  %v7396_v35 = vrot.slane %v7394_v26, 1 }
 0x326   : > { %v15704_v46 = vpop.permute.xlu1 %6269  ;;  %v12241_v4 = vcombine.low %v15744_v18, %v15723_v9  ;;  %v19160_v38 = vld [vmem:[#allocation73_spill] sm:$0xff] }
 0x327   : > { %19155 = vst [vmem:[#allocation88_spill] sm:$0xff] %v15704_v46  ;;  %v15717_v17 = vpop.permute.xlu0 %5828  ;;  %v4103_v10 = vsel %vm4097_vm2, %v15590_v8, %v19160_v38  ;;  %v7408_v8 = vshll.u32 %v15735_v11, 16  ;;  %v6886_v38 = vrot.slane %v6884_v23, 1  ;;  %v4175_v26 = vshrl.u32 %v11951_v32, 16  ;;  %v19164_v46 = vld [vmem:[#allocation74_spill] sm:$0xff] }
 0x328   : > { %19157 = vst [vmem:[#allocation76_spill] sm:$0xff] %v15717_v17  ;;  %6042 = vrot.lane.b32.xlu1 %v6027_v20, %s13516_s3  ;;  %v12239_v20 = vcombine.low %v15737_v37, %v15709_v47  ;;  %v15767_v0 = vsel %vm4114_vm3, %v4103_v10, %v19162_v31  ;;  %v6882_v17 = vshrl.u32 %v15692_v36, 16  ;;  %v4178_v14 = vshll.u32 %v11951_v32, 16 }
 0x329   : > { %7066 = vrot.lane.b32.xlu0 %v7045_v3, %s13517_s26  ;;  %v15754_v3 = vrot.slane %v12203_v44, 2  ;;  %v12205_v44 = vcombine.low %v6801_v28, %v15607_v5  ;;  %v7552_v31 = vshrl.u32 %v12241_v4, 16  ;;  %v7555_v10 = vshll.u32 %v12241_v4, 16 }
 0x32a   : > { %v15752_v56 = vpop.permute.xlu1 %4059  ;;  %v7536_v43 = vshrl.u32 %v12239_v20, 16  ;;  %v7539_v19 = vshll.u32 %v12239_v20, 16  ;;  %v6896_v5 = vshrl.u32 %v15720_v60, 16  ;;  %v6900_v36 = vrot.slane %v6898_v53, 1  ;;  %v19165_v60 = vld [vmem:[#allocation80_spill] sm:$0xff] }
 0x32b   : > { %v15761_v50 = vpop.permute.xlu0 %5832  ;;  %v7397_v23 = vor.u32 %v7396_v35, %v7392_v52  ;;  %v7410_v20 = vrot.slane %v7408_v8, 1  ;;  %v12231_v32 = vcombine.low %v15737_v37, %v15647_v45  ;;  %v15795_v53 = vld [vmem:[#allocation2 + $0x3c] sm:$0x3]  ;;  %v4180_v52 = vrot.slane %v4178_v14, 5  ;;  %v7343_v8 = vld [vmem:[#allocation2 + $0x18] sm:$0xc] }
 0x32c   : > { %19161 = vst [vmem:[#allocation77_spill] sm:$0xff] %v15761_v50  ;;  %6904 = vrot.lane.b32.xlu1 %v15656_v2, %s13515_s25  ;;  %v7100_v50 = vrot.slane %v12208_v49, 2  ;;  %v11955_v2 = vcombine.low %v15767_v0, %v15767_v0  ;;  %v7406_v49 = vshrl.u32 %v15735_v11, 16  ;;  %19166 = vst [vmem:[#allocation73_spill] sm:$0xff] %v15795_v53  ;;  %v4177_v11 = vrot.slane %v4175_v26, 4 }
 0x32d   : > { %7110 = vrot.lane.b32.xlu0 %v7098_v25, %s13516_s3  ;;  %v4107_v25 = vsel %vm4097_vm2, %v15574_v54, %v19164_v46  ;;  %v12233_v54 = vcombine.low %v15744_v18, %v15695_v58  ;;  %v15799_v46 = vrot.slane %v7536_v43, 1  ;;  %v15805_v45 = vrot.slane %v7552_v31, 1  ;;  %v15813_v58 = vld [vmem:[#allocation2 + $0x38] sm:$0xe] }
 0x32e   : > { %v15775_v12 = vpop.permute.xlu1 %4063  ;;  %v15792_v4 = vsel %vm4114_vm3, %v4107_v25, %v19165_v60  ;;  %v15807_v37 = vrot.slane %v7555_v10, 2  ;;  %v4203_v25 = vshrl.u32 %v11955_v2, 16  ;;  %v15809_v60 = vrot.slane %v12205_v44, 2 }
 0x32f   : > { %v15780_v28 = vpop.permute.xlu0 %5876  ;;  %v11952_v14 = vcombine.high %v15715_v13, %v15715_v13  ;;  %v11959_v18 = vcombine.low %v15792_v4, %v15792_v4  ;;  %v15827_v44 = vcombine.low %v15813_v58, %v15795_v53  ;;  %v11956_v26 = vcombine.high %v15767_v0, %v15767_v0 }
 0x330   : > { %19163 = vst [vmem:[#allocation79_spill] sm:$0xff] %v15780_v28  ;;  %6908 = vrot.lane.b32.xlu1 %v15658_v39, %s13515_s25  ;;  %v15801_v39 = vrot.slane %v7539_v19, 2  ;;  %v15811_v28 = vor.u32 %v6886_v38, %v6882_v17  ;;  %v15823_v19 = vor.u32 %v6900_v36, %v6896_v5  ;;  %v7315_v17 = vld [vmem:[#allocation2 + $0x38] sm:$0xf]  ;;  %v15829_v38 = vld [vmem:[#allocation2 + $0x3c] sm:$0x1]  ;;  %v7411_v13 = vor.u32 %v7410_v20, %v7406_v49 }
 0x331   : > { %7114 = vrot.lane.b32.xlu0 %v7100_v50, %s13516_s3  ;;  %v4206_v50 = vshll.u32 %v11955_v2, 16  ;;  %v7487_v31 = vrot.slane %v12231_v32, 1  ;;  %v12247_v10 = vcombine.low %v7343_v8, %v15709_v47  ;;  %v4181_v2 = vor.u32 %v4180_v52, %v4177_v11  ;;  %v19168_v11 = vld [vmem:[#allocation75_spill] sm:$0xff] }
 0x332   : > { %v15803_v35 = vpop.permute.xlu1 %4067  ;;  %v7489_v5 = vrot.slane %v12233_v54, 1  ;;  %v7542_v36 = vor.u32 %v15801_v39, %v15799_v46  ;;  %v4205_v53 = vrot.slane %v4203_v25, 4  ;;  %v15846_v47 = vcombine.low %v7315_v17, %v15829_v38 }
 0x333   : > { %v15815_v43 = vpop.permute.xlu0 %5880  ;;  %v4208_v62 = vrot.slane %v4206_v50, 5  ;;  %v4184_v49 = vshll.u32 %v11952_v14, 16  ;;  %v4231_v20 = vshrl.u32 %v11959_v18, 16  ;;  %v4234_v32 = vshll.u32 %v11959_v18, 16  ;;  %v19169_v50 = vld [vmem:[#allocation81_spill] sm:$0xff] }
 0x334   : > { %19167 = vst [vmem:[#allocation78_spill] sm:$0xff] %v15815_v43  ;;  %6952 = vrot.lane.b32.xlu1 %v15664_v42, %s13514_s24  ;;  %v15857_v52 = vshll.u32 %v11956_v26, 16  ;;  %v11960_v8 = vcombine.high %v15792_v4, %v15792_v4  ;;  %v15862_v25 = vrot.slane %v12247_v10, 2  ;;  %v4182_v18 = vrot.slane %v4181_v2, 4 }
 0x335   : > { %7447 = vrot.lane.b32.xlu0 %v7397_v23, %s13515_s25  ;;  %v15843_v23 = vld [vmem:[#allocation2 + $0x28] sm:$0xc]  ;;  %v19170_v4 = vmov 0  ;;  %v4209_v17 = vor.u32 %v4208_v62, %v4205_v53  ;;  %v15885_v2 = vrot.slane %v4231_v20, 4 }
 0x336   : > { %v4072_v42 = vpop.permute.xlu1 %4071  ;;  %v19171_v4 = vsel %vm15875_vm14, 4294967295, %v19170_v4  ;;  %v4214_v62 = vrot.slane %v15857_v52, 5  ;;  %v15894_v53 = vshll.u32 %v11960_v8, 16 }
 0x337   : > { %v4113_v0 = vsel %vm4097_vm2, %v15645_v16, %v4072_v42  ;;  %v15841_v22 = vpop.permute.xlu0 %5980  ;;  %v4111_v16 = vsel %vm4097_vm2, %v15578_v24, %v19168_v11  ;;  %19172 = vst [vmem:[#allocation74_spill] sm:$0xff] %v19171_v4  ;;  %v15887_v42 = vrot.slane %v4234_v32, 5  ;;  %v19173_v11 = vor.u32 %v15670_v33, %v15668_v40 }
 0x338   : > { %v15850_v54 = vsel %vm4114_vm3, %v4113_v0, %v15654_v29  ;;  %6956 = vrot.lane.b32.xlu1 %v15706_v15, %s13514_s24  ;;  %v15866_v29 = vsel %vm4114_vm3, %v4111_v16, %v19169_v50  ;;  %v4101_v15 = vsel %vm4097_vm2, %v15567_v1, %v15752_v56  ;;  %v4186_v56 = vrot.slane %v4184_v49, 5 }
 0x339   : > { %7451 = vrot.lane.b32.xlu0 %v7411_v13, %s13515_s25  ;;  %v11965_v26 = vcombine.low %v15850_v54, %v15850_v54  ;;  %v11963_v16 = vcombine.low %v15866_v29, %v15866_v29  ;;  %v4105_v49 = vsel %vm4097_vm2, %v15596_v55, %v15775_v12  ;;  %v4210_v33 = vrot.slane %v4209_v17, 4 }
 0x33a   : > { %v4084_v14 = vpop.permute.xlu1 %4083  ;;  %v15904_v40 = vsel %vm15875_vm14, %v4182_v18, %v4186_v56  ;;  %v19174_v55 = vor.u32 %v15684_v27, %v15682_v57 }
 0x33b   : > { %v4118_v13 = vsel %vm4114_vm3, %v4101_v15, %v4084_v14  ;;  %v15882_v10 = vpop.permute.xlu0 %5984  ;;  %v4273_v8 = vshrl.u32 %v11965_v26, 16  ;;  %v4276_v14 = vshll.u32 %v11965_v26, 16  ;;  %v4259_v18 = vshrl.u32 %v11963_v16, 16 }
 0x33c   : > { %v11953_v0 = vcombine.low %v4118_v13, %v4118_v13  ;;  %7056 = vrot.lane.b32.xlu1 %v19173_v11, %s13517_s26  ;;  %v11954_v50 = vcombine.high %v4118_v13, %v4118_v13  ;;  %v4262_v17 = vshll.u32 %v11963_v16, 16 }
 0x33d   : > { %7495 = vrot.lane.b32.xlu0 %v7487_v31, %s13514_s24  ;;  %v4237_v31 = vor.u32 %v15887_v42, %v15885_v2 }
 0x33e   : > { %v4189_v20 = vshrl.u32 %v11953_v0, 16  ;;  %v4192_v32 = vshll.u32 %v11953_v0, 16  ;;  %v4088_v15 = vpop.permute.xlu1 %4087  ;;  %v4198_v56 = vshll.u32 %v11954_v50, 16  ;;  %v4109_v0 = vsel %vm4097_vm2, %v15641_v59, %v15803_v35 }
 0x33f   : > { %v4122_v11 = vsel %vm4114_vm3, %v4105_v49, %v4088_v15  ;;  %v15907_v1 = vpop.permute.xlu0 %6028  ;;  %v4278_v15 = vrot.slane %v4276_v14, 5  ;;  %v4264_v59 = vrot.slane %v4262_v17, 5 }
 0x340   : > { %v4191_v13 = vrot.slane %v4189_v20, 4  ;;  %v4194_v24 = vrot.slane %v4192_v32, 5  ;;  %v11957_v12 = vcombine.low %v4122_v11, %v4122_v11  ;;  %7060 = vrot.lane.b32.xlu1 %v19174_v55, %s13517_s26  ;;  %v11958_v26 = vcombine.high %v4122_v11, %v4122_v11 }
 0x341   : > { %7499 = vrot.lane.b32.xlu0 %v7489_v5, %s13514_s24  ;;  %v4275_v32 = vrot.slane %v4273_v8, 4  ;;  %v4261_v5 = vrot.slane %v4259_v18, 4  ;;  %v4200_v35 = vrot.slane %v4198_v56, 5  ;;  %v11966_v8 = vcombine.high %v15850_v54, %v15850_v54 }
 0x342   : > { %v4195_v2 = vor.u32 %v4194_v24, %v4191_v13  ;;  %v4217_v42 = vshrl.u32 %v11957_v12, 16  ;;  %v4220_v49 = vshll.u32 %v11957_v12, 16  ;;  %v4092_v20 = vpop.permute.xlu1 %4091  ;;  %v4226_v43 = vshll.u32 %v11958_v26, 16 }
 0x343   : > { %v4126_v57 = vsel %vm4114_vm3, %v4109_v0, %v4092_v20  ;;  %v15920_v27 = vpop.permute.xlu0 %6032  ;;  %v7317_v0 = vld [vmem:[#allocation2 + $0x48] sm:$0xf]  ;;  %v4279_v18 = vor.u32 %v4278_v15, %v4275_v32  ;;  %v19175_v20 = vor.u32 %v15807_v37, %v15805_v45  ;;  %v4265_v15 = vor.u32 %v4264_v59, %v4261_v5  ;;  %v13099_v37 = vld [vmem:[%s18908_s7 + $0x14] ss:$0 sps:$4 sm:$0x33]  }
 0x344   : > { %v4219_v16 = vrot.slane %v4217_v42, 4  ;;  %v4222_v50 = vrot.slane %v4220_v49, 5  ;;  %v11961_v11 = vcombine.low %v4126_v57, %v4126_v57  ;;  %v11962_v55 = vcombine.high %v4126_v57, %v4126_v57  ;;  %7104 = vrot.lane.b32.xlu1 %v15754_v3, %s13516_s3  ;;  %v15932_v42 = vld [vmem:[#allocation2 + $0x4c] sm:$0x1] }
 0x345   : > { %v4196_v24 = vrot.slane %v4195_v2, 4  ;;  %7599 = vrot.lane.b32.xlu0 %v7542_v36, %s13517_s26  ;;  %v11964_v3 = vcombine.high %v15866_v29, %v15866_v29  ;;  %v4228_v17 = vrot.slane %v4226_v43, 5  ;;  %v4215_v49 = vsel %vm15875_vm14, %v4210_v33, %v4214_v62 }
 0x346   : > { %v4223_v14 = vor.u32 %v4222_v50, %v4219_v16  ;;  %v4245_v13 = vshrl.u32 %v11961_v11, 16  ;;  %v4248_v12 = vshll.u32 %v11961_v11, 16  ;;  %v15930_v26 = vpop.permute.xlu1 %6313  ;;  %v4254_v2 = vshll.u32 %v11962_v55, 16 }
 0x347   : > { %v4201_v46 = vsel %vm15875_vm14, %v4196_v24, %v4200_v35  ;;  %v15938_v39 = vpop.permute.xlu0 %5836  ;;  %v4238_v29 = vrot.slane %v4237_v31, 4  ;;  %v15952_v32 = vcombine.low %v7317_v0, %v15932_v42  ;;  %v4282_v57 = vshll.u32 %v11966_v8, 16 }
 0x348   : > { %v4224_v36 = vrot.slane %v4223_v14, 4  ;;  %v4247_v54 = vrot.slane %v4245_v13, 4  ;;  %v4250_v56 = vrot.slane %v4248_v12, 5  ;;  %7108 = vrot.lane.b32.xlu1 %v15809_v60, %s13516_s3  ;;  %v11967_v43 = vcombine.low %v15904_v40, %v4201_v46  ;;  %v15998_v46 = vld [vmem:[%s18908_s7] sm:$0xff]  }
 0x349   : > { %7603 = vrot.lane.b32.xlu0 %v19175_v20, %s13517_s26  ;;  %v4242_v62 = vrot.slane %v15894_v53, 5  ;;  %v12191_v45 = vcombine.low %v15813_v58, %v15662_v34  ;;  %v7031_v33 = vshrl.u32 %v15827_v44, 16  ;;  %v4268_v50 = vshll.u32 %v11964_v3, 16  ;;  %v15970_v53 = vld [vmem:[#allocation2 + $0x4c] sm:$0x3] }
 0x34a   : > { %v4229_v60 = vsel %vm15875_vm14, %v4224_v36, %v4228_v17  ;;  %v4251_v52 = vor.u32 %v4250_v56, %v4247_v54  ;;  %v15956_v16 = vpop.permute.xlu1 %6317  ;;  %12688 = vmatprep.mubr.msk.bf16.mxu0 %vm4318_vm12, %v11967_v43  ;;  %v4280_v11 = vrot.slane %v4279_v18, 4  ;;  %v4256_v5 = vrot.slane %v4254_v2, 5  ;;  %v6789_v34 = vld [vmem:[#allocation2 + $0x48] sm:$0xe]  ;;  %v7331_v20 = vld [vmem:[#allocation2 + $0x38] sm:$0xe] }
 0x34b   : > { %v11968_v40 = vcombine.low %v4215_v49, %v4229_v60  ;;  %v15966_v31 = vpop.permute.xlu0 %5840  ;;  %v19176_v58 = vcombine.low %v15843_v23, %v15723_v9  ;;  %v7420_v35 = vshrl.u32 %v15846_v47, 16  ;;  %v19177_v24 = vshll.u32 %v15846_v47, 16  ;;  %v13432_v9 = vld [vmem:[%s18908_s7 + $0xc] sm:$0xff]  }
 0x34c   : > { %v4252_v55 = vrot.slane %v4251_v52, 4  ;;  %6912 = vrot.lane.b32.xlu1 %v15811_v28, %s13515_s25  ;;  %v7436_v14 = vshll.u32 %v15952_v32, 16  ;;  %v4243_v28 = vsel %vm15875_vm14, %v4238_v29, %v4242_v62  ;;  %v4266_v13 = vrot.slane %v4265_v15, 4  ;;  %v19178_v15 = vld [vmem:[#allocation82_spill] sm:$0xff] }
 0x34d   : > { %12689 = vmatmul.mubr.msk.bf16.vlgmr.msra.gmra.mrb[0].mxu0 %vm4318_vm12, %v11968_v40  ;;  %7647 = vrot.lane.b32.xlu0 %v15862_v25, %s13516_s3  ;;  %v7641_v59 = vrot.slane %v19176_v58, 2  ;;  %v7424_v8 = vrot.slane %v19177_v24, 1  ;;  %v4284_v12 = vrot.slane %v4282_v57, 5  ;;  %v12201_v47 = vcombine.low %v6789_v34, %v15970_v53  ;;  %v19180_v58 = vld [vmem:[#allocation71_spill] sm:$0xff] }
 0x34e   : > { %v4257_v0 = vsel %vm15875_vm14, %v4252_v55, %v4256_v5  ;;  %v6418_v25 = vpop.permute.xlu1 %6417  ;;  %12715 = vmatpush3.bf16.msra.mxu0 %v13432_v9  ;;  %v6590_v3 = vsel %vm4331_vm1, %v13099_v37, 0  ;;  %v7034_v18 = vshll.u32 %v15827_v44, 16  ;;  %v4270_v36 = vrot.slane %v4268_v50, 5  ;;  %v19179_v55 = vld [vmem:[#allocation70_spill] sm:$0xff] }
 0x34f   : > { %v11969_v23 = vcombine.low %v4243_v28, %v4257_v0  ;;  %12930 = vmatprep.subr.msk.bf16.mxu0 %vm4331_vm1, %v13099_v37  ;;  %v15993_v17 = vpop.permute.xlu0 %5884  ;;  %v6947_v54 = vrot.slane %v12191_v45, 1  ;;  %v4285_v56 = vsel %vm15875_vm14, %v4280_v11, %v4284_v12  ;;  %v12193_v2 = vcombine.low %v6789_v34, %v15686_v51  ;;  %v7333_v11 = vld [vmem:[#allocation2 + $0x48] sm:$0xe] }
 0x350   : > { %6916 = vrot.lane.b32.xlu1 %v15823_v19, %s13515_s25  ;;  %v6530_v44 = vsel %vm4761_vm10, %v15748_v48, %v15542_v21  ;;  %v7425_v49 = vor.u32 %v7424_v8, %v7420_v35  ;;  %v7434_v29 = vshrl.u32 %v15952_v32, 16  ;;  %v7438_v43 = vrot.slane %v7436_v14, 1  ;;  %v16011_v19 = vld [vmem:[#allocation2 + $0x3c] sm:$0x3]  ;;  %v13433_v34 = vld [vmem:[#allocation2 + $0x28] sm:$0xf] }
 0x351   : > { %12692 = vmatprep.mubr.msk.bf16.mxu0 %vm4318_vm12, %v11969_v23  ;;  %7651 = vrot.lane.b32.xlu0 %v7641_v59, %s13516_s3  ;;  %v6518_v57 = vsel %vm4097_vm2, %v15727_v6, %v19178_v15  ;;  %v4271_v51 = vsel %vm15875_vm14, %v4266_v13, %v4270_v36  ;;  %v7033_v21 = vrot.slane %v7031_v33, 1  ;;  %v7036_v52 = vrot.slane %v7034_v18, 2  ;;  %v16039_v8 = vld [vmem:[#allocation2 + $0x4c] sm:$0x3]  ;;  %v16051_v18 = vld [vmem:[#allocation2 + $0x24] sm:$0x1] }
 0x352   : > { %v16018_v60 = vpop.permute.xlu1 %6421  ;;  %12717 = vmatpush3.bf16.msra.mxu0 %v6590_v3  ;;  %v11970_v48 = vcombine.low %v4271_v51, %v4285_v56  ;;  %v7047_v62 = vshrl.u32 %v12201_v47, 16  ;;  %v7050_v32 = vshll.u32 %v12201_v47, 16  ;;  %v12158_v45 = vcombine.low %v15699_v30, %v6530_v44  ;;  %v6805_v51 = vld [vmem:[#allocation2 + $0x48] sm:$0xc] }
 0x353   : > { %v16020_v40 = vpop.permute.xlu0 %5888  ;;  %12726 = vmatprep.subr.bf16.mxu0 %v15998_v46  ;;  %v6949_v6 = vrot.slane %v12193_v2, 1  ;;  %v12235_v37 = vcombine.low %v7331_v20, %v15829_v38  ;;  %v12243_v50 = vcombine.low %v7331_v20, %v16011_v19  ;;  %v7439_v33 = vor.u32 %v7438_v43, %v7434_v29  ;;  %v13434_v38 = vld [vmem:[#allocation2 + $0x30] sm:$0xf]  ;;  %v13117_v20 = vld [vmem:[%s18908_s7 + $0x8] ss:$0 sps:$4 sm:$0x33]  }
 0x354   : > { %6960 = vrot.lane.b32.xlu1 %v6947_v54, %s13514_s24  ;;  %v6532_v5 = vsel %vm4761_vm10, %v15677_v7, %v19179_v55  ;;  %v6485_v30 = vsel %vm2469_vm4, %v13433_v34, %v19180_v58  ;;  %v6534_v59 = vsel %vm4761_vm10, %v6518_v57, %v15600_v61  ;;  %v6488_v35 = vsel %vm2469_vm4, %v13434_v38, %v15628_v41  ;;  %v6803_v61 = vld [vmem:[#allocation2 + $0x38] sm:$0xc]  ;;  %v19181_v54 = vld [vmem:[#allocation84_spill] sm:$0xff] }
 0x355   : > { %12693 = vmatmul.mubr.msk.bf16.gmra.mrb[4].mxu0 %vm4318_vm12, %v11970_v48  ;;  %7455 = vrot.lane.b32.xlu0 %v7425_v49, %s13515_s25  ;;  %v6506_v14 = vsel %vm3519_vm0, %v6488_v35, %v15930_v26  ;;  %v7037_v7 = vor.u32 %v7036_v52, %v7033_v21  ;;  %v7049_v28 = vrot.slane %v7047_v62, 1  ;;  %v7052_v13 = vrot.slane %v7050_v32, 2  ;;  %v7312_v26 = vld [vmem:[#allocation2 + $0x20] sm:$0xf]  ;;  %v7314_v48 = vld [vmem:[#allocation2 + $0x30] sm:$0xf] }
 0x356   : > { %v6466_v24 = vpop.permute.xlu1 %6465  ;;  %12718 = vmatprep.mubr.msk.bf16.mxu0 %vm6576_vm13, %v12158_v45  ;;  %v6522_v0 = vsel %vm4097_vm2, %v6506_v14, %v6418_v25  ;;  %v7491_v9 = vrot.slane %v12235_v37, 1  ;;  %v12237_v41 = vcombine.low %v7333_v11, %v15932_v42  ;;  %v7568_v23 = vshrl.u32 %v12243_v50, 16  ;;  %v19182_v42 = vld [vmem:[#allocation86_spill] sm:$0xff]  ;;  %v13435_v32 = vld [vmem:[#allocation2 + $0x40] sm:$0xf] }
 0x357   : > { %v16043_v12 = vpop.permute.xlu0 %5988  ;;  %v6504_v47 = vsel %vm3519_vm0, %v6485_v30, %v15530_v63  ;;  %v6538_v3 = vsel %vm4761_vm10, %v6522_v0, %v6466_v24  ;;  %v12245_v36 = vcombine.low %v7333_v11, %v16039_v8  ;;  %v7571_v25 = vshll.u32 %v12243_v50, 16  ;;  %v19183_v63 = vld [vmem:[#allocation73_spill] sm:$0xff]  ;;  %v19184_v45 = vld [vmem:[#allocation88_spill] sm:$0xff]  ;;  %v16070_v37 = vld [vmem:[#allocation2 + $0x34] sm:$0x1] }
 0x358   : > { %6964 = vrot.lane.b32.xlu1 %v6949_v6, %s13514_s24  ;;  %v6520_v56 = vsel %vm4097_vm2, %v6504_v47, %v19181_v54  ;;  %v12159_v44 = vcombine.low %v6532_v5, %v6534_v59  ;;  %v7053_v29 = vor.u32 %v7052_v13, %v7049_v28  ;;  %v12207_v43 = vcombine.low %v6803_v61, %v19183_v63  ;;  %v13436_v55 = vld [vmem:[#allocation2 + $0x38] sm:$0xf]  ;;  %v19185_v5 = vld [vmem:[#allocation72_spill] sm:$0xff]  ;;  %v19187_v13 = vld [vmem:[#allocation85_spill] sm:$0xff] }
 0x359   : > { %7459 = vrot.lane.b32.xlu0 %v7439_v33, %s13515_s25  ;;  %v6536_v49 = vsel %vm4761_vm10, %v6520_v56, %v19182_v42  ;;  %v12224_v21 = vcombine.low %v7312_v26, %v16051_v18  ;;  %v7493_v52 = vrot.slane %v12237_v41, 1  ;;  %v7570_v62 = vrot.slane %v7568_v23, 1  ;;  %v19188_v23 = vld [vmem:[#allocation87_spill] sm:$0xff] }
 0x35a   : > { %v6470_v2 = vpop.permute.xlu1 %6469  ;;  %v12160_v57 = vcombine.low %v6536_v49, %v6538_v3  ;;  %v6494_v6 = vsel %vm2469_vm4, %v13435_v32, %v19184_v45  ;;  %v7573_v50 = vrot.slane %v7571_v25, 2  ;;  %v7584_v33 = vshrl.u32 %v12245_v36, 16  ;;  %v7347_v26 = vld [vmem:[#allocation2 + $0x38] sm:$0xc]  ;;  %v16105_v25 = vld [vmem:[#allocation2 + $0x24] sm:$0x1] }
 0x35b   : > { %v16063_v15 = vpop.permute.xlu0 %5992  ;;  %v7587_v11 = vshll.u32 %v12245_v36, 16  ;;  %v6491_v34 = vsel %vm2469_vm4, %v13436_v55, %v19185_v5  ;;  %v6510_v58 = vsel %vm3519_vm0, %v6494_v6, %v15956_v16  ;;  %v7099_v38 = vrot.slane %v12207_v43, 2  ;;  %v16091_v16 = vld [vmem:[%s18908_s7 + $0x18] sm:$0xff]   ;;  %v7857_v36 = vld [vmem:[#allocation2 + $0x20] sm:$0xf] }
 0x35c   : > { %7064 = vrot.lane.b32.xlu1 %v7037_v7, %s13517_s26  ;;  %v6526_v59 = vsel %vm4097_vm2, %v6510_v58, %v16018_v60  ;;  %v12209_v35 = vcombine.low %v6805_v51, %v15970_v53  ;;  %v6699_v24 = vsel %vm4331_vm1, %v13117_v20, 0  ;;  %v19186_v7 = vld [vmem:[#allocation83_spill] sm:$0xff]  ;;  %v7401_v60 = vshll.u32 %v12224_v21, 16  ;;  %v7859_v51 = vld [vmem:[#allocation2 + $0x30] sm:$0xf] }
 0x35d   : > { %12719 = vmatmul.mubr.msk.bf16.vlgmr.msra.gmra.mrb[8].mxu0 %vm6576_vm13, %v12159_v44  ;;  %7503 = vrot.lane.b32.xlu0 %v7491_v9, %s13514_s24  ;;  %v6542_v28 = vsel %vm4761_vm10, %v6526_v59, %v6470_v2  ;;  %v12226_v53 = vcombine.low %v7314_v48, %v16070_v37  ;;  %v7574_v61 = vor.u32 %v7573_v50, %v7570_v62  ;;  %v7586_v9 = vrot.slane %v7584_v33, 1  ;;  %v16115_v48 = vld [vmem:[#allocation2 + $0x34] sm:$0x1]  ;;  %v7328_v6 = vld [vmem:[#allocation2 + $0x20] sm:$0xe] }
 0x35e   : > { %v16077_v30 = vpop.permute.xlu1 %5830  ;;  %12722 = vmatprep.mubr.msk.bf16.mxu0 %vm6576_vm13, %v12160_v57  ;;  %12727 = vmatpush3.bf16.msra.mxu0 %v15998_v46  ;;  %v6508_v46 = vsel %vm3519_vm0, %v6491_v34, %v19186_v7  ;;  %v7589_v41 = vrot.slane %v7587_v11, 2  ;;  %v7101_v2 = vrot.slane %v12209_v35, 2  ;;  %v7399_v44 = vshrl.u32 %v12224_v21, 16  ;;  %v7349_v57 = vld [vmem:[#allocation2 + $0x48] sm:$0xc] }
 0x35f   : > { %12931 = vmatprep.subr.msk.bf16.mxu0 %vm4331_vm1, %v13117_v20  ;;  %v16086_v14 = vpop.permute.xlu0 %6036  ;;  %v6524_v0 = vsel %vm4097_vm2, %v6508_v46, %v19187_v13  ;;  %v7403_v42 = vrot.slane %v7401_v60, 1  ;;  %v7415_v49 = vshll.u32 %v12226_v53, 16  ;;  %v12251_v63 = vcombine.low %v7347_v26, %v16011_v19  ;;  %v16128_v34 = vld [vmem:[#allocation2 + $0x34] sm:$0x3]  ;;  %v7330_v35 = vld [vmem:[#allocation2 + $0x30] sm:$0xe] }
 0x360   : > { %7068 = vrot.lane.b32.xlu1 %v7053_v29, %s13517_s26  ;;  %v6540_v47 = vsel %vm4761_vm10, %v6524_v0, %v19188_v23  ;;  %v7590_v29 = vor.u32 %v7589_v41, %v7586_v9  ;;  %v12268_v43 = vcombine.low %v7857_v36, %v16105_v25  ;;  %v7413_v32 = vshrl.u32 %v12226_v53, 16  ;;  %v19189_v60 = vld [vmem:[#allocation76_spill] sm:$0xff]  ;;  %v19190_v26 = vld [vmem:[#allocation79_spill] sm:$0xff] }
 0x361   : > { %7507 = vrot.lane.b32.xlu0 %v7493_v52, %s13514_s24  ;;  %v12161_v54 = vcombine.low %v6540_v47, %v6542_v28  ;;  %v16117_v52 = vld [vmem:[#allocation2 + $0x24] sm:$0x3]  ;;  %v7404_v21 = vor.u32 %v7403_v42, %v7399_v44  ;;  %v7417_v45 = vrot.slane %v7415_v49, 1  ;;  %v7643_v19 = vrot.slane %v12251_v63, 2  ;;  %v13437_v28 = vld [vmem:[#allocation2] sm:$0xf] }
 0x362   : > { %v16103_v3 = vpop.permute.xlu1 %5834  ;;  %12729 = vmatpush3.bf16.msra.mxu0 %v6699_v24  ;;  %v12253_v50 = vcombine.low %v7349_v57, %v16039_v8  ;;  %v7940_v33 = vshll.u32 %v12268_v43, 16  ;;  %v12270_v11 = vcombine.low %v7859_v51, %v16115_v48  ;;  %v12240_v5 = vcombine.low %v7328_v6, %v16117_v52  ;;  %v7873_v47 = vld [vmem:[#allocation2 + $0x20] sm:$0xe]  ;;  %v13438_v42 = vld [vmem:[#allocation2 + $0x10] sm:$0xf]  ;;  %v19191_v49 = vld [vmem:[#allocation77_spill] sm:$0xff] }
 0x363   : > { %v16107_v56 = vpop.permute.xlu0 %6040  ;;  %12738 = vmatprep.subr.bf16.mxu0 %v16091_v16  ;;  %v7418_v59 = vor.u32 %v7417_v45, %v7413_v32  ;;  %v7938_v24 = vshrl.u32 %v12268_v43, 16  ;;  %v6046_v53 = vsel %vm2469_vm4, %v13437_v28, %v19189_v60  ;;  %v12242_v0 = vcombine.low %v7330_v35, %v16128_v34 }
 0x364   : > { %7112 = vrot.lane.b32.xlu1 %v7099_v38, %s13516_s3  ;;  %v12232_v38 = vcombine.low %v7328_v6, %v16051_v18  ;;  %v7645_v8 = vrot.slane %v12253_v50, 2  ;;  %v7942_v7 = vrot.slane %v7940_v33, 1  ;;  %v7954_v46 = vshll.u32 %v12270_v11, 16 }
 0x365   : > { %12723 = vmatmul.mubr.msk.bf16.gmra.mrb[12].mxu0 %vm6576_vm13, %v12161_v54  ;;  %7607 = vrot.lane.b32.xlu0 %v7574_v61, %s13517_s26  ;;  %v7544_v61 = vshrl.u32 %v12240_v5, 16  ;;  %v7547_v9 = vshll.u32 %v12240_v5, 16  ;;  %v12234_v23 = vcombine.low %v7330_v35, %v16070_v37  ;;  %v6069_v36 = vsel %vm3519_vm0, %v6046_v53, %v19190_v26  ;;  %v7875_v35 = vld [vmem:[#allocation2 + $0x30] sm:$0xe]  ;;  %v16180_v26 = vld [vmem:[#allocation2 + $0x44] sm:$0x1] }
 0x366   : > { %v5879_v20 = vpop.permute.xlu1 %5878  ;;  %v7488_v18 = vrot.slane %v12232_v38, 1  ;;  %v7943_v54 = vor.u32 %v7942_v7, %v7938_v24  ;;  %v7956_v44 = vrot.slane %v7954_v46, 1  ;;  %v7560_v51 = vshrl.u32 %v12242_v0, 16 }
 0x367   : > { %v16119_v62 = vpop.permute.xlu0 %6902  ;;  %v7546_v43 = vrot.slane %v7544_v61, 1  ;;  %v7549_v57 = vrot.slane %v7547_v9, 2  ;;  %v7563_v37 = vshll.u32 %v12242_v0, 16  ;;  %v12276_v45 = vcombine.low %v7873_v47, %v16105_v25  ;;  %v13440_v61 = vld [vmem:[#allocation2 + $0x18] sm:$0xf] }
 0x368   : > { %7116 = vrot.lane.b32.xlu1 %v7101_v2, %s13516_s3  ;;  %v7952_v2 = vshrl.u32 %v12270_v11, 16  ;;  %v6085_v6 = vsel %vm4097_vm2, %v6069_v36, %v15841_v22  ;;  %v7490_v33 = vrot.slane %v12234_v23, 1  ;;  %v19192_v11 = vld [vmem:[#allocation78_spill] sm:$0xff]  ;;  %v7562_v7 = vrot.slane %v7560_v51, 1 }
 0x369   : > { %7611 = vrot.lane.b32.xlu0 %v7590_v29, %s13517_s26  ;;  %v6052_v29 = vsel %vm2469_vm4, %v13438_v42, %v19191_v49  ;;  %v7550_v24 = vor.u32 %v7549_v57, %v7546_v43  ;;  %v6101_v46 = vsel %vm4761_vm10, %v6085_v6, %v15907_v1  ;;  %v7565_v60 = vrot.slane %v7563_v37, 2  ;;  %v7346_v42 = vld [vmem:[#allocation2 + $0x30] sm:$0xc]  ;;  %v16200_v37 = vld [vmem:[#allocation2 + $0x54] sm:$0x1] }
 0x36a   : > { %v16125_v55 = vpop.permute.xlu1 %5882  ;;  %v6073_v5 = vsel %vm3519_vm0, %v6052_v29, %v19192_v11  ;;  %v7957_v38 = vor.u32 %v7956_v44, %v7952_v2  ;;  %v8033_v53 = vrot.slane %v12276_v45, 1  ;;  %v12278_v23 = vcombine.low %v7875_v35, %v16115_v48  ;;  %v16195_v57 = vld [vmem:[#allocation2 + $0x50] sm:$0xf] }
 0x36b   : > { %v16130_v58 = vpop.permute.xlu0 %6906  ;;  %v6089_v0 = vsel %vm4097_vm2, %v6073_v5, %v15882_v10  ;;  %v7566_v43 = vor.u32 %v7565_v60, %v7562_v7  ;;  %v12250_v5 = vcombine.low %v7346_v42, %v16128_v34  ;;  %v7889_v34 = vld [vmem:[#allocation2 + $0x20] sm:$0xc]  ;;  %vm4503_vm12 = vcmask 60417  }
 0x36c   : > { %7449 = vrot.lane.b32.xlu1 %v7404_v21, %s13515_s25  ;;  %v16147_v21 = vld [vmem:[#allocation2 + $0x24] sm:$0x3]  ;;  %v6105_v48 = vsel %vm4761_vm10, %v6089_v0, %v15920_v27  ;;  %v8035_v51 = vrot.slane %v12278_v23, 1  ;;  %v13150_v27 = vld [vmem:[%s18908_s7 + $0x20] ss:$0 sps:$4 sm:$0x33]  }
 0x36d   : > { %7655 = vrot.lane.b32.xlu0 %v7643_v19, %s13516_s3  ;;  %v13439_v19 = vld [vmem:[#allocation2 + $0x8] sm:$0xf]  ;;  %v12284_v25 = vcombine.low %v7873_v47, %v16147_v21  ;;  %v16178_v47 = vld [vmem:[#allocation2 + $0x40] sm:$0xf]  ;;  %v7642_v60 = vrot.slane %v12250_v5, 2 }
 0x36e   : > { %v5983_v13 = vpop.permute.xlu1 %5982  ;;  %v6049_v50 = vsel %vm2469_vm4, %v13439_v19, %v16077_v30  ;;  %v16163_v30 = vld [vmem:[#allocation2 + $0x34] sm:$0x3]  ;;  %v7861_v7 = vld [vmem:[#allocation2 + $0x40] sm:$0xf] }
 0x36f   : > { %v16138_v41 = vpop.permute.xlu0 %6950  ;;  %v12286_v10 = vcombine.low %v7875_v35, %v16163_v30  ;;  %v8082_v36 = vshrl.u32 %v12284_v25, 16  ;;  %v16218_v35 = vld [vmem:[%s18908_s7 + $0x24] sm:$0xff]  }
 0x370   : > { %7453 = vrot.lane.b32.xlu1 %v7418_v59, %s13515_s25  ;;  %v6071_v59 = vsel %vm3519_vm0, %v6049_v50, %v5879_v20 }
 0x371   : > { %7659 = vrot.lane.b32.xlu0 %v7645_v8, %s13516_s3  ;;  %v6087_v22 = vsel %vm4097_vm2, %v6071_v59, %v5983_v13  ;;  %v6055_v13 = vsel %vm2469_vm4, %v13440_v61, %v16103_v3  ;;  %v8098_v6 = vshrl.u32 %v12286_v10, 16  ;;  %v8101_v19 = vshll.u32 %v12286_v10, 16  ;;  %v7863_v10 = vld [vmem:[#allocation2 + $0x50] sm:$0xf] }
 0x372   : > { %v5987_v63 = vpop.permute.xlu1 %5986  ;;  %v6075_v1 = vsel %vm3519_vm0, %v6055_v13, %v16125_v55 }
 0x373   : > { %v16149_v32 = vpop.permute.xlu0 %6954  ;;  %v6091_v3 = vsel %vm4097_vm2, %v6075_v1, %v5987_v63  ;;  %v12228_v63 = vcombine.low %v16178_v47, %v16180_v26  ;;  %v7891_v1 = vld [vmem:[#allocation2 + $0x30] sm:$0xc] }
 0x374   : > { %7497 = vrot.lane.b32.xlu1 %v7488_v18, %s13514_s24  ;;  %v7344_v18 = vld [vmem:[#allocation2 + $0x20] sm:$0xc]  ;;  %v12294_v42 = vcombine.low %v7891_v1, %v16163_v30 }
 0x375   : > { %7993 = vrot.lane.b32.xlu0 %v7943_v54, %s13515_s25  ;;  %v8085_v54 = vshll.u32 %v12284_v25, 16  ;;  %v12248_v44 = vcombine.low %v7344_v18, %v16117_v52  ;;  %v8084_v52 = vrot.slane %v8082_v36, 1  ;;  %v7429_v59 = vshll.u32 %v12228_v63, 16  ;;  %v16234_v36 = vld [vmem:[#allocation2 + $0x54] sm:$0x1] }
 0x376   : > { %v6031_v8 = vpop.permute.xlu1 %6030  ;;  %v7236_v25 = vsel %vm4331_vm1, %v13150_v27, 0  ;;  %v8187_v30 = vrot.slane %v12294_v42, 2 }
 0x377   : > { %v6103_v28 = vsel %vm4761_vm10, %v6087_v22, %v6031_v8  ;;  %v16168_v20 = vpop.permute.xlu0 %7054  ;;  %v8087_v45 = vrot.slane %v8085_v54, 2  ;;  %v8100_v22 = vrot.slane %v8098_v6, 1  ;;  %v8103_v8 = vrot.slane %v8101_v19, 2  ;;  %v16236_v54 = vld [vmem:[#allocation2 + $0x44] sm:$0x3] }
 0x378   : > { %v12168_v9 = vcombine.low %v6101_v46, %v6103_v28  ;;  %7501 = vrot.lane.b32.xlu1 %v7490_v33, %s13514_s24  ;;  %v7640_v33 = vrot.slane %v12248_v44, 2  ;;  %v16223_v46 = vld [vmem:[#allocation2 + $0x44] sm:$0x1]  ;;  %v7431_v0 = vrot.slane %v7429_v59, 1  ;;  %v7332_v44 = vld [vmem:[#allocation2 + $0x40] sm:$0xe] }
 0x379   : > { %7997 = vrot.lane.b32.xlu0 %v7957_v38, %s13515_s25  ;;  %v12230_v38 = vcombine.low %v16195_v57, %v16200_v37  ;;  %v8104_v13 = vor.u32 %v8103_v8, %v8100_v22  ;;  %v12272_v18 = vcombine.low %v7861_v7, %v16223_v46  ;;  %v12236_v6 = vcombine.low %v7332_v44, %v16180_v26  ;;  %v7334_v19 = vld [vmem:[#allocation2 + $0x50] sm:$0xe] }
 0x37a   : > { %v6035_v2 = vpop.permute.xlu1 %6034  ;;  %12730 = vmatprep.mubr.msk.bf16.mxu0 %vm6576_vm13, %v12168_v9  ;;  %v12292_v9 = vcombine.low %v7889_v34, %v16147_v21 }
 0x37b   : > { %v6107_v55 = vsel %vm4761_vm10, %v6091_v3, %v6035_v2  ;;  %v16190_v49 = vpop.permute.xlu0 %7058  ;;  %v7443_v61 = vshll.u32 %v12230_v38, 16  ;;  %v7492_v26 = vrot.slane %v12236_v6, 1 }
 0x37c   : > { %v12169_v29 = vcombine.low %v6105_v48, %v6107_v55  ;;  %7601 = vrot.lane.b32.xlu1 %v7550_v24, %s13517_s26  ;;  %v7441_v48 = vshrl.u32 %v12230_v38, 16  ;;  %v8185_v21 = vrot.slane %v12292_v9, 2  ;;  %v13441_v38 = vld [vmem:[#allocation2 + $0x20] sm:$0xf]  ;;  %v13442_v9 = vld [vmem:[#allocation2 + $0x30] sm:$0xf] }
 0x37d   : > { %8041 = vrot.lane.b32.xlu0 %v8033_v53, %s13514_s24  ;;  %v7427_v53 = vshrl.u32 %v12228_v63, 16  ;;  %v7445_v55 = vrot.slane %v7443_v61, 1 }
 0x37e   : > { %v16203_v50 = vpop.permute.xlu1 %5838  ;;  %12731 = vmatmul.mubr.msk.bf16.vlgmr.msra.gmra.mrb[8].mxu0 %vm6576_vm13, %v12169_v29  ;;  %v7968_v29 = vshll.u32 %v12272_v18, 16 }
 0x37f   : > { %v16206_v11 = vpop.permute.xlu0 %7102  ;;  %12739 = vmatpush3.bf16.msra.mxu0 %v16091_v16  ;;  %v8088_v16 = vor.u32 %v8087_v45, %v8084_v52  ;;  %v7432_v2 = vor.u32 %v7431_v0, %v7427_v53  ;;  %v7446_v45 = vor.u32 %v7445_v55, %v7441_v48  ;;  %v16266_v55 = vld [vmem:[#allocation2 + $0x44] sm:$0x3] }
 0x380   : > { %7605 = vrot.lane.b32.xlu1 %v7566_v43, %s13517_s26  ;;  %12932 = vmatprep.subr.msk.bf16.mxu0 %vm4331_vm1, %v13150_v27  ;;  %v12274_v43 = vcombine.low %v7863_v10, %v16234_v36  ;;  %v16247_v27 = vld [vmem:[#allocation2 + $0x54] sm:$0x3]  ;;  %v7970_v5 = vrot.slane %v7968_v29, 1 }
 0x381   : > { %8045 = vrot.lane.b32.xlu0 %v8035_v51, %s13514_s24  ;;  %v12244_v51 = vcombine.low %v7332_v44, %v16236_v54  ;;  %v12246_v22 = vcombine.low %v7334_v19, %v16247_v27 }
 0x382   : > { %v16221_v24 = vpop.permute.xlu1 %5842  ;;  %v7982_v59 = vshll.u32 %v12274_v43, 16  ;;  %v7980_v61 = vshrl.u32 %v12274_v43, 16  ;;  %v7879_v43 = vld [vmem:[#allocation2 + $0x50] sm:$0xe] }
 0x383   : > { %v16225_v28 = vpop.permute.xlu0 %7106  ;;  %12741 = vmatpush3.bf16.msra.mxu0 %v7236_v25  ;;  %v6058_v25 = vsel %vm2469_vm4, %v13441_v38, %v15938_v39  ;;  %v7576_v8 = vshrl.u32 %v12244_v51, 16  ;;  %v7579_v34 = vshll.u32 %v12244_v51, 16  ;;  %v7592_v48 = vshrl.u32 %v12246_v22, 16 }
 0x384   : > { %7649 = vrot.lane.b32.xlu1 %v7640_v33, %s13516_s3  ;;  %12750 = vmatprep.subr.bf16.mxu0 %v16218_v35  ;;  %v7966_v33 = vshrl.u32 %v12272_v18, 16  ;;  %v6077_v53 = vsel %vm3519_vm0, %v6058_v25, %v15993_v17  ;;  %v7984_v39 = vrot.slane %v7982_v59, 1  ;;  %v6064_v18 = vsel %vm2469_vm4, %v13442_v9, %v15966_v31 }
 0x385   : > { %8145 = vrot.lane.b32.xlu0 %v8088_v16, %s13517_s26  ;;  %v7578_v10 = vrot.slane %v7576_v8, 1  ;;  %v6093_v17 = vsel %vm4097_vm2, %v6077_v53, %v16043_v12  ;;  %v6081_v51 = vsel %vm3519_vm0, %v6064_v18, %v16020_v40  ;;  %v16300_v53 = vld [vmem:[#allocation2 + $0x2c] sm:$0x1] }
 0x386   : > { %v16232_v23 = vpop.permute.xlu1 %5886  ;;  %v7971_v0 = vor.u32 %v7970_v5, %v7966_v33  ;;  %v7985_v6 = vor.u32 %v7984_v39, %v7980_v61  ;;  %v7594_v33 = vrot.slane %v7592_v48, 1  ;;  %v16283_v5 = vld [vmem:[#allocation2 + $0x54] sm:$0x3]  ;;  %v6097_v25 = vsel %vm4097_vm2, %v6081_v51, %v16063_v15  ;;  %v16315_v48 = vld [vmem:[#allocation2 + $0x38] sm:$0xf] }
 0x387   : > { %v16238_v3 = vpop.permute.xlu0 %6910  ;;  %v12290_v15 = vcombine.low %v7879_v43, %v16283_v5  ;;  %v6113_v39 = vsel %vm4761_vm10, %v6097_v25, %v16107_v56 }
 0x388   : > { %7653 = vrot.lane.b32.xlu1 %v7642_v60, %s13516_s3  ;;  %v12238_v60 = vcombine.low %v7334_v19, %v16200_v37  ;;  %v7595_v37 = vshll.u32 %v12246_v22, 16  ;;  %v13444_v22 = vld [vmem:[#allocation2 + $0x38] sm:$0xf] }
 0x389   : > { %8149 = vrot.lane.b32.xlu0 %v8104_v13, %s13517_s26  ;;  %v7877_v13 = vld [vmem:[#allocation2 + $0x40] sm:$0xe] }
 0x38a   : > { %v16244_v63 = vpop.permute.xlu1 %5890  ;;  %v7494_v29 = vrot.slane %v12238_v60, 1  ;;  %v12280_v31 = vcombine.low %v7877_v13, %v16223_v46  ;;  %v12288_v12 = vcombine.low %v7877_v13, %v16266_v55  ;;  %v6109_v46 = vsel %vm4761_vm10, %v6093_v17, %v16086_v14  ;;  %v16298_v60 = vld [vmem:[#allocation2 + $0x28] sm:$0xf]  ;;  %v16317_v17 = vld [vmem:[#allocation2 + $0x3c] sm:$0x1] }
 0x38b   : > { %v16249_v52 = vpop.permute.xlu0 %6914  ;;  %v7597_v59 = vrot.slane %v7595_v37, 2 }
 0x38c   : > { %7457 = vrot.lane.b32.xlu1 %v7432_v2, %s13515_s25  ;;  %v7581_v2 = vrot.slane %v7579_v34, 2  ;;  %v7348_v34 = vld [vmem:[#allocation2 + $0x40] sm:$0xc] }
 0x38d   : > { %8193 = vrot.lane.b32.xlu0 %v8185_v21, %s13516_s3  ;;  %v13443_v21 = vld [vmem:[#allocation2 + $0x28] sm:$0xf]  ;;  %v7598_v13 = vor.u32 %v7597_v59, %v7594_v33  ;;  %v7893_v33 = vld [vmem:[#allocation2 + $0x40] sm:$0xc] }
 0x38e   : > { %v5991_v16 = vpop.permute.xlu1 %5990  ;;  %v6061_v42 = vsel %vm2469_vm4, %v13443_v21, %v16203_v50 }
 0x38f   : > { %v16257_v7 = vpop.permute.xlu0 %6958 }
 0x390   : > { %7461 = vrot.lane.b32.xlu1 %v7446_v45, %s13515_s25  ;;  %v6079_v45 = vsel %vm3519_vm0, %v6061_v42, %v16232_v23  ;;  %v12282_v23 = vcombine.low %v7879_v43, %v16234_v36  ;;  %v8114_v36 = vshrl.u32 %v12288_v12, 16  ;;  %v8130_v42 = vshrl.u32 %v12290_v15, 16 }
 0x391   : > { %8197 = vrot.lane.b32.xlu0 %v8187_v30, %s13516_s3  ;;  %v6095_v19 = vsel %vm4097_vm2, %v6079_v45, %v5991_v16  ;;  %v7582_v30 = vor.u32 %v7581_v2, %v7578_v10  ;;  %v6067_v16 = vsel %vm2469_vm4, %v13444_v22, %v16221_v24  ;;  %v12252_v10 = vcombine.low %v7348_v34, %v16236_v54  ;;  %v7350_v2 = vld [vmem:[#allocation2 + $0x50] sm:$0xc]  ;;  %v8950_v34 = vld [vmem:[#allocation3 + $0x8] sm:$0xf] }
 0x392   : > { %v5995_v1 = vpop.permute.xlu1 %5994  ;;  %v6083_v14 = vsel %vm3519_vm0, %v6067_v16, %v16244_v63  ;;  %v8039_v37 = vrot.slane %v12282_v23, 1  ;;  %v8116_v56 = vrot.slane %v8114_v36, 1  ;;  %v12254_v51 = vcombine.low %v7350_v2, %v16247_v27  ;;  %v7876_v2 = vld [vmem:[#allocation2 + $0x38] sm:$0xe] }
 0x393   : > { %v16268_v44 = vpop.permute.xlu0 %6962  ;;  %v6099_v24 = vsel %vm4097_vm2, %v6083_v14, %v5995_v1  ;;  %v12269_v1 = vcombine.low %v16298_v60, %v16300_v53  ;;  %v7644_v43 = vrot.slane %v12252_v10, 2  ;;  %v12296_v22 = vcombine.low %v7893_v33, %v16266_v55 }
 0x394   : > { %7505 = vrot.lane.b32.xlu1 %v7492_v26, %s13514_s24  ;;  %v8037_v26 = vrot.slane %v12280_v31, 1 }
 0x395   : > { %8001 = vrot.lane.b32.xlu0 %v7971_v0, %s13515_s25  ;;  %v8117_v0 = vshll.u32 %v12288_v12, 16  ;;  %v7947_v45 = vshll.u32 %v12269_v1, 16  ;;  %v7945_v59 = vshrl.u32 %v12269_v1, 16 }
 0x396   : > { %v6039_v50 = vpop.permute.xlu1 %6038 }
 0x397   : > { %v6111_v40 = vsel %vm4761_vm10, %v6095_v19, %v6039_v50  ;;  %v16288_v38 = vpop.permute.xlu0 %7062  ;;  %v8119_v21 = vrot.slane %v8117_v0, 2  ;;  %v8132_v19 = vrot.slane %v8130_v42, 1  ;;  %v7949_v23 = vrot.slane %v7947_v45, 1  ;;  %v13445_v42 = vld [vmem:[#allocation2 + $0x10] sm:$0xf] }
 0x398   : > { %v12170_v8 = vcombine.low %v6109_v46, %v6111_v40  ;;  %7509 = vrot.lane.b32.xlu1 %v7494_v29, %s13514_s24  ;;  %v8133_v29 = vshll.u32 %v12290_v15, 16  ;;  %v7646_v40 = vrot.slane %v12254_v51, 2 }
 0x399   : > { %8005 = vrot.lane.b32.xlu0 %v7985_v6, %s13515_s25  ;;  %v12271_v6 = vcombine.low %v16315_v48, %v16317_v17  ;;  %v8120_v12 = vor.u32 %v8119_v21, %v8116_v56  ;;  %v7950_v36 = vor.u32 %v7949_v23, %v7945_v59  ;;  %v16351_v21 = vld [vmem:[#allocation2 + $0x3c] sm:$0x3]  ;;  %v13446_v23 = vld [vmem:[#allocation2 + $0x20] sm:$0xf] }
 0x39a   : > { %v6043_v61 = vpop.permute.xlu1 %6042  ;;  %12734 = vmatprep.mubr.msk.bf16.mxu0 %vm6576_vm13, %v12170_v8  ;;  %v8135_v50 = vrot.slane %v8133_v29, 2  ;;  %v7895_v8 = vld [vmem:[#allocation2 + $0x50] sm:$0xc]  ;;  %v7120_v29 = vsel %vm2469_vm4, %v13445_v42, %v16119_v62  ;;  %v7126_v62 = vsel %vm2469_vm4, %v13446_v23, %v16130_v58 }
 0x39b   : > { %v6115_v63 = vsel %vm4761_vm10, %v6099_v24, %v6043_v61  ;;  %v16309_v9 = vpop.permute.xlu0 %7066  ;;  %v7961_v27 = vshll.u32 %v12271_v6, 16  ;;  %v7959_v0 = vshrl.u32 %v12271_v6, 16  ;;  %v16340_v61 = vld [vmem:[#allocation2 + $0x2c] sm:$0x3]  ;;  %v12298_v55 = vcombine.low %v7895_v8, %v16283_v5 }
 0x39c   : > { %v12171_v18 = vcombine.low %v6113_v39, %v6115_v63  ;;  %7609 = vrot.lane.b32.xlu1 %v7582_v30, %s13517_s26  ;;  %v8136_v25 = vor.u32 %v8135_v50, %v8132_v19  ;;  %v7874_v39 = vld [vmem:[#allocation2 + $0x28] sm:$0xe]  ;;  %v8189_v63 = vrot.slane %v12296_v22, 2  ;;  %v12279_v6 = vcombine.low %v7876_v2, %v16317_v17  ;;  %v8974_v19 = vld [vmem:[#allocation3 + $0xc] sm:$0x3] }
 0x39d   : > { %8049 = vrot.lane.b32.xlu0 %v8037_v26, %s13514_s24  ;;  %v8958_v26 = vld [vmem:[#allocation3 + $0xc] sm:$0x1]  ;;  %v7963_v24 = vrot.slane %v7961_v27, 1  ;;  %v12285_v10 = vcombine.low %v7874_v39, %v16340_v61  ;;  %v12277_v56 = vcombine.low %v7874_v39, %v16300_v53  ;;  %v8191_v5 = vrot.slane %v12298_v55, 2  ;;  %v13447_v55 = vld [vmem:[#allocation2 + $0x18] sm:$0xf] }
 0x39e   : > { %v16320_v31 = vpop.permute.xlu1 %6904  ;;  %12735 = vmatmul.mubr.msk.bf16.gmra.mrb[12].mxu0 %vm6576_vm13, %v12171_v18  ;;  %v12355_v15 = vcombine.low %v8950_v34, %v8958_v26  ;;  %v12287_v50 = vcombine.low %v7876_v2, %v16351_v21  ;;  %v7143_v27 = vsel %vm3519_vm0, %v7120_v29, %v16138_v41  ;;  %v7147_v58 = vsel %vm3519_vm0, %v7126_v62, %v16149_v32 }
 0x39f   : > { %v16323_v54 = vpop.permute.xlu0 %7110  ;;  %v8090_v33 = vshrl.u32 %v12285_v10, 16  ;;  %v8093_v53 = vshll.u32 %v12285_v10, 16  ;;  %v7159_v41 = vsel %vm4097_vm2, %v7143_v27, %v16168_v20 }
 0x3a0   : > { %7613 = vrot.lane.b32.xlu1 %v7598_v13, %s13517_s26  ;;  %v9033_v13 = vshll.u32 %v12355_v15, 16  ;;  %v8106_v39 = vshrl.u32 %v12287_v50, 16  ;;  %v7175_v20 = vsel %vm4761_vm10, %v7159_v41, %v16206_v11 }
 0x3a1   : > { %8053 = vrot.lane.b32.xlu0 %v8039_v37, %s13514_s24  ;;  %v7964_v37 = vor.u32 %v7963_v24, %v7959_v0  ;;  %v8092_v0 = vrot.slane %v8090_v33, 1  ;;  %v8095_v24 = vrot.slane %v8093_v53, 2  ;;  %v7870_v33 = vld [vmem:[#allocation2 + $0x4c] sm:$0x1] }
 0x3a2   : > { %v16330_v30 = vpop.permute.xlu1 %6908  ;;  %v9035_v51 = vrot.slane %v9033_v13, 1  ;;  %v7123_v13 = vsel %vm2469_vm4, %v13447_v55, %v16320_v31  ;;  %v8108_v31 = vrot.slane %v8106_v39, 1 }
 0x3a3   : > { %v16332_v46 = vpop.permute.xlu0 %7114 }
 0x3a4   : > { %7657 = vrot.lane.b32.xlu1 %v7644_v43, %s13516_s3  ;;  %v9031_v43 = vshrl.u32 %v12355_v15, 16 }
 0x3a5   : > { %8153 = vrot.lane.b32.xlu0 %v8120_v12, %s13517_s26  ;;  %v8966_v12 = vld [vmem:[#allocation3 + $0x8] sm:$0xe] }
 0x3a6   : > { %v6953_v16 = vpop.permute.xlu1 %6952  ;;  %v12371_v59 = vcombine.low %v8966_v12, %v8974_v19  ;;  %v9036_v17 = vor.u32 %v9035_v51, %v9031_v43  ;;  %v12363_v22 = vcombine.low %v8966_v12, %v8958_v26  ;;  %v8109_v26 = vshll.u32 %v12287_v50, 16  ;;  %v13448_v51 = vld [vmem:[#allocation2 + $0x28] sm:$0xf] }
 0x3a7   : > { %v16337_v14 = vpop.permute.xlu0 %7447  ;;  %v7145_v10 = vsel %vm3519_vm0, %v7123_v13, %v6953_v16  ;;  %v7163_v16 = vsel %vm4097_vm2, %v7147_v58, %v16190_v49  ;;  %v7890_v19 = vld [vmem:[#allocation2 + $0x28] sm:$0xc]  ;;  %v16419_v58 = vld [vmem:[%s18908_s7 + $0x30] sm:$0xff]  }
 0x3a8   : > { %7661 = vrot.lane.b32.xlu1 %v7646_v40, %s13516_s3  ;;  %v9175_v8 = vshrl.u32 %v12371_v59, 16  ;;  %v9178_v34 = vshll.u32 %v12371_v59, 16  ;;  %v9126_v2 = vrot.slane %v12363_v22, 1  ;;  %v16390_v50 = vld [vmem:[#allocation2 + $0x48] sm:$0xf]  ;;  %v12293_v27 = vcombine.low %v7890_v19, %v16340_v61 }
 0x3a9   : > { %8157 = vrot.lane.b32.xlu0 %v8136_v25, %s13517_s26  ;;  %v8034_v25 = vrot.slane %v12277_v56, 1  ;;  %v13172_v22 = vld [vmem:[%s18908_s7 + $0x2c] ss:$0 sps:$4 sm:$0x33]  }
 0x3aa   : > { %v16344_v18 = vpop.permute.xlu1 %6956  ;;  %v9180_v56 = vrot.slane %v9178_v34, 2  ;;  %v7872_v34 = vld [vmem:[#allocation2 + $0x5c] sm:$0x1]  ;;  %v8186_v61 = vrot.slane %v12293_v27, 2  ;;  %v7781_v39 = vsel %vm4331_vm1, %v13172_v22, 0 }
 0x3ab   : > { %v16347_v1 = vpop.permute.xlu0 %7451 }
 0x3ac   : > { %7995 = vrot.lane.b32.xlu1 %v7950_v36, %s13515_s25  ;;  %v8036_v36 = vrot.slane %v12279_v6, 1  ;;  %v7129_v6 = vsel %vm2469_vm4, %v13448_v51, %v16330_v30  ;;  %v7179_v30 = vsel %vm4761_vm10, %v7163_v16, %v16225_v28  ;;  %v16432_v51 = vld [vmem:[#allocation2 + $0x5c] sm:$0x3] }
 0x3ad   : > { %8201 = vrot.lane.b32.xlu0 %v8189_v63, %s13516_s3  ;;  %v7149_v11 = vsel %vm3519_vm0, %v7129_v6, %v16344_v18  ;;  %v7880_v6 = vld [vmem:[#allocation2 + $0x58] sm:$0xe] }
 0x3ae   : > { %v7057_v45 = vpop.permute.xlu1 %7056  ;;  %v12291_v19 = vcombine.low %v7880_v6, %v16432_v51 }
 0x3af   : > { %v16358_v40 = vpop.permute.xlu0 %7495  ;;  %v7161_v42 = vsel %vm4097_vm2, %v7145_v10, %v7057_v45  ;;  %v8111_v45 = vrot.slane %v8109_v26, 2 }
 0x3b0   : > { %7999 = vrot.lane.b32.xlu1 %v7964_v37, %s13515_s25  ;;  %v9177_v37 = vrot.slane %v9175_v8, 1  ;;  %v16404_v8 = vld [vmem:[#allocation2 + $0x58] sm:$0xf] }
 0x3b1   : > { %8205 = vrot.lane.b32.xlu0 %v8191_v5, %s13516_s3  ;;  %v8096_v5 = vor.u32 %v8095_v24, %v8092_v0  ;;  %v8112_v18 = vor.u32 %v8111_v45, %v8108_v31  ;;  %v12275_v24 = vcombine.low %v16404_v8, %v7872_v34 }
 0x3b2   : > { %v7061_v15 = vpop.permute.xlu1 %7060  ;;  %v9181_v53 = vor.u32 %v9180_v56, %v9177_v37 }
 0x3b3   : > { %v16366_v63 = vpop.permute.xlu0 %7499  ;;  %v7165_v49 = vsel %vm4097_vm2, %v7149_v11, %v7061_v15  ;;  %v7989_v26 = vshll.u32 %v12275_v24, 16  ;;  %v7987_v37 = vshrl.u32 %v12275_v24, 16 }
 0x3b4   : > { %8043 = vrot.lane.b32.xlu1 %v8034_v25, %s13514_s24  ;;  %v7892_v25 = vld [vmem:[#allocation2 + $0x38] sm:$0xc] }
 0x3b5   : > { %9086 = vrot.lane.b32.xlu0 %v9036_v17, %s13514_s24  ;;  %v12273_v17 = vcombine.low %v16390_v50, %v7870_v33  ;;  %v7991_v56 = vrot.slane %v7989_v26, 1 }
 0x3b6   : > { %v7105_v32 = vpop.permute.xlu1 %7104 }
 0x3b7   : > { %v7177_v29 = vsel %vm4761_vm10, %v7161_v42, %v7105_v32  ;;  %v16381_v43 = vpop.permute.xlu0 %7599  ;;  %v7975_v0 = vshll.u32 %v12273_v17, 16  ;;  %v16426_v42 = vld [vmem:[#allocation2 + $0x4c] sm:$0x3]  ;;  %v7878_v32 = vld [vmem:[#allocation2 + $0x48] sm:$0xe]  ;;  %v7992_v31 = vor.u32 %v7991_v56, %v7987_v37 }
 0x3b8   : > { %v12213_v12 = vcombine.low %v7175_v20, %v7177_v29  ;;  %8047 = vrot.lane.b32.xlu1 %v8036_v36, %s13514_s24  ;;  %v12295_v36 = vcombine.low %v7892_v25, %v16351_v21  ;;  %v7973_v21 = vshrl.u32 %v12273_v17, 16  ;;  %v12281_v16 = vcombine.low %v7878_v32, %v7870_v33 }
 0x3b9   : > { %9134 = vrot.lane.b32.xlu0 %v9126_v2, %s13516_s3  ;;  %v7977_v13 = vrot.slane %v7975_v0, 1  ;;  %v8138_v17 = vshrl.u32 %v12291_v19, 16  ;;  %v8141_v0 = vshll.u32 %v12291_v19, 16  ;;  %v7896_v19 = vld [vmem:[#allocation2 + $0x58] sm:$0xc] }
 0x3ba   : > { %v7109_v59 = vpop.permute.xlu1 %7108  ;;  %12742 = vmatprep.mubr.msk.bf16.mxu0 %vm6576_vm13, %v12213_v12  ;;  %v13449_v12 = vld [vmem:[#allocation2 + $0x30] sm:$0xf] }
 0x3bb   : > { %v7181_v23 = vsel %vm4761_vm10, %v7165_v49, %v7109_v59  ;;  %v16406_v15 = vpop.permute.xlu0 %7603  ;;  %v7978_v2 = vor.u32 %v7977_v13, %v7973_v21  ;;  %v7132_v45 = vsel %vm2469_vm4, %v13449_v12, %v16238_v3  ;;  %v8140_v13 = vrot.slane %v8138_v17, 1 }
 0x3bc   : > { %v12214_v62 = vcombine.low %v7179_v30, %v7181_v23  ;;  %8147 = vrot.lane.b32.xlu1 %v8096_v5, %s13517_s26  ;;  %v12289_v5 = vcombine.low %v7878_v32, %v16426_v42  ;;  %v8038_v30 = vrot.slane %v12281_v16, 1  ;;  %v12283_v23 = vcombine.low %v7880_v6, %v7872_v34  ;;  %v7894_v32 = vld [vmem:[#allocation2 + $0x48] sm:$0xc] }
 0x3bd   : > { %9238 = vrot.lane.b32.xlu0 %v9181_v53, %s13518_s27  ;;  %v7151_v33 = vsel %vm3519_vm0, %v7132_v45, %v16257_v7  ;;  %v12297_v45 = vcombine.low %v7894_v32, %v16426_v42 }
 0x3be   : > { %v6913_v28 = vpop.permute.xlu1 %6912  ;;  %12743 = vmatmul.mubr.msk.bf16.vlgmr.msra.gmra.mrb[8].mxu0 %vm6576_vm13, %v12214_v62  ;;  %v8122_v53 = vshrl.u32 %v12289_v5, 16  ;;  %v8125_v49 = vshll.u32 %v12289_v5, 16  ;;  %v13450_v62 = vld [vmem:[#allocation2 + $0x40] sm:$0xf]  ;;  %v8040_v34 = vrot.slane %v12283_v23, 1 }
 0x3bf   : > { %12751 = vmatpush3.bf16.msra.mxu0 %v16218_v35  ;;  %v16421_v55 = vpop.permute.xlu0 %7647  ;;  %v8188_v35 = vrot.slane %v12295_v36, 2  ;;  %v13451_v36 = vld [vmem:[#allocation2 + $0x38] sm:$0xf]  ;;  %v16462_v5 = vld [vmem:[#allocation3 + $0x54] sm:$0x1] }
 0x3c0   : > { %8151 = vrot.lane.b32.xlu1 %v8112_v18, %s13517_s26  ;;  %12933 = vmatprep.subr.msk.bf16.mxu0 %vm4331_vm1, %v13172_v22  ;;  %v7138_v18 = vsel %vm2469_vm4, %v13450_v62, %v16249_v52  ;;  %v8124_v3 = vrot.slane %v8122_v53, 1  ;;  %v8127_v25 = vrot.slane %v8125_v49, 2  ;;  %v7167_v22 = vsel %vm4097_vm2, %v7151_v33, %v16288_v38 }
 0x3c1   : > { %v7155_v7 = vsel %vm3519_vm0, %v7138_v18, %v16268_v44  ;;  %v7183_v38 = vsel %vm4761_vm10, %v7167_v22, %v16323_v54  ;;  %v5058_v54 = vld [vmem:[#allocation3 + $0x50] sm:$0xe]  ;;  %v8190_v49 = vrot.slane %v12297_v45, 2 }
 0x3c2   : > { %v6917_v41 = vpop.permute.xlu1 %6916  ;;  %v7171_v26 = vsel %vm4097_vm2, %v7155_v7, %v16309_v9 }
 0x3c3   : > { %12753 = vmatpush3.bf16.msra.mxu0 %v7781_v39  ;;  %v16428_v20 = vpop.permute.xlu0 %7651  ;;  %v7187_v9 = vsel %vm4761_vm10, %v7171_v26, %v16332_v46  ;;  %v12299_v46 = vcombine.low %v7896_v19, %v16432_v51 }
 0x3c4   : > { %8195 = vrot.lane.b32.xlu1 %v8186_v61, %s13516_s3  ;;  %12762 = vmatprep.subr.bf16.mxu0 %v16419_v58  ;;  %v7135_v61 = vsel %vm2469_vm4, %v13451_v36, %v6913_v28  ;;  %v8128_v28 = vor.u32 %v8127_v25, %v8124_v3 }
 0x3c5   : > { %v8192_v62 = vrot.slane %v12299_v46, 2  ;;  %v13457_v46 = vld [vmem:[#allocation2 + $0x38] sm:$0xf] }
 0x3c6   : > { %v6961_v10 = vpop.permute.xlu1 %6960 }
 0x3c7   : > { %v16437_v59 = vpop.permute.xlu0 %7455  ;;  %v7153_v24 = vsel %vm3519_vm0, %v7135_v61, %v6961_v10  ;;  %v8143_v10 = vrot.slane %v8141_v0, 2 }
 0x3c8   : > { %8199 = vrot.lane.b32.xlu1 %v8188_v35, %s13516_s3 }
 0x3ca   : > { %v6965_v29 = vpop.permute.xlu1 %6964 }
 0x3cb   : > { %v16451_v52 = vpop.permute.xlu0 %7459 }
 0x3cc   : > { %8003 = vrot.lane.b32.xlu1 %v7978_v2, %s13515_s25  ;;  %v13452_v2 = vld [vmem:[#allocation2 + $0x48] sm:$0xf] }
 0x3cd   : > { %v7141_v44 = vsel %vm2469_vm4, %v13452_v2, %v6917_v41 }
 0x3ce   : > { %v7065_v11 = vpop.permute.xlu1 %7064  ;;  %v7157_v56 = vsel %vm3519_vm0, %v7141_v44, %v6965_v29  ;;  %v8144_v29 = vor.u32 %v8143_v10, %v8140_v13  ;;  %v13455_v13 = vld [vmem:[#allocation2 + $0x20] sm:$0xf] }
 0x3cf   : > { %v7169_v39 = vsel %vm4097_vm2, %v7153_v24, %v7065_v11  ;;  %v16469_v6 = vpop.permute.xlu0 %7503  ;;  %v12051_v11 = vcombine.low %v5058_v54, %v16462_v5 }
 0x3d0   : > { %8007 = vrot.lane.b32.xlu1 %v7992_v31, %s13515_s25  ;;  %s13520_s25 = smov 32  }
 0x3d1   : > { %v5181_v18 = vshrl.u32 %v12051_v11, 16 }
 0x3d2   : > { %v7069_v27 = vpop.permute.xlu1 %7068 }
 0x3d3   : > { %v7173_v31 = vsel %vm4097_vm2, %v7157_v56, %v7069_v27  ;;  %v16477_v23 = vpop.permute.xlu0 %7507  ;;  %v5066_v27 = vld [vmem:[#allocation3 + $0x54] sm:$0x3] }
 0x3d4   : > { %8051 = vrot.lane.b32.xlu1 %v8038_v30, %s13514_s24  ;;  %v5183_v30 = vshll.u32 %v12051_v11, 16  ;;  %v12059_v22 = vcombine.low %v5058_v54, %v5066_v27 }
 0x3d6   : > { %v7113_v35 = vpop.permute.xlu1 %7112  ;;  %v5185_v42 = vrot.slane %v5183_v30, 1  ;;  %v5234_v51 = vrot.slane %v12059_v22, 1  ;;  %v7677_v30 = vsel %vm2469_vm4, %v13457_v46, %v16437_v59 }
 0x3d7   : > { %v7185_v21 = vsel %vm4761_vm10, %v7169_v39, %v7113_v35  ;;  %v7608_v25 = vpop.permute.xlu0 %7607  ;;  %v13454_v39 = vld [vmem:[#allocation2 + $0x28] sm:$0xf] }
 0x3d8   : > { %v12215_v37 = vcombine.low %v7183_v38, %v7185_v21  ;;  %8055 = vrot.lane.b32.xlu1 %v8040_v34, %s13514_s24  ;;  %v5186_v17 = vor.u32 %v5185_v42, %v5181_v18  ;;  %v13453_v34 = vld [vmem:[#allocation2 + $0x18] sm:$0xf]  ;;  %v7671_v35 = vsel %vm2469_vm4, %v13454_v39, %v16347_v1  ;;  %v13458_v18 = vld [vmem:[#allocation2 + $0x48] sm:$0xf] }
 0x3d9   : > { %v7665_v0 = vsel %vm2469_vm4, %v13453_v34, %v16337_v14  ;;  %v7692_v14 = vsel %vm3519_vm0, %v7671_v35, %v16366_v63  ;;  %v7683_v42 = vsel %vm2469_vm4, %v13458_v18, %v16451_v52 }
 0x3da   : > { %v7117_v16 = vpop.permute.xlu1 %7116  ;;  %12746 = vmatprep.mubr.msk.bf16.mxu0 %vm6576_vm13, %v12215_v37  ;;  %v7688_v24 = vsel %vm3519_vm0, %v7665_v0, %v16358_v40  ;;  %v7708_v10 = vsel %vm4097_vm2, %v7692_v14, %v16406_v15  ;;  %v13177_v15 = vld [vmem:[%s18908_s7 + $0x38] ss:$0 sps:$4 sm:$0x33]   ;;  %v7700_v22 = vsel %vm3519_vm0, %v7683_v42, %v16477_v23 }
 0x3db   : > { %v7189_v41 = vsel %vm4761_vm10, %v7173_v31, %v7117_v16  ;;  %v7612_v61 = vpop.permute.xlu0 %7611  ;;  %v8327_v45 = vsel %vm4331_vm1, %v13177_v15, 0 }
 0x3dc   : > { %v12216_v12 = vcombine.low %v7187_v9, %v7189_v41  ;;  %8155 = vrot.lane.b32.xlu1 %v8128_v28, %s13517_s26  ;;  %v7704_v28 = vsel %vm4097_vm2, %v7688_v24, %v16381_v43  ;;  %v13456_v43 = vld [vmem:[#allocation2 + $0x30] sm:$0xf]  ;;  %v7716_v52 = vsel %vm4097_vm2, %v7700_v22, %v7612_v61 }
 0x3dd   : > { %v7720_v37 = vsel %vm4761_vm10, %v7704_v28, %v16421_v55  ;;  %v7724_v55 = vsel %vm4761_vm10, %v7708_v10, %v16428_v20 }
 0x3de   : > { %v7450_v53 = vpop.permute.xlu1 %7449  ;;  %12747 = vmatmul.mubr.msk.bf16.gmra.mrb[12].mxu0 %vm6576_vm13, %v12216_v12 }
 0x3df   : > { %v7656_v21 = vpop.permute.xlu0 %7655  ;;  %v7668_v26 = vsel %vm2469_vm4, %v13455_v13, %v7450_v53  ;;  %v11979_v13 = vld [vmem:[%s19194_s1] ss:$0 sm:$0xff] }
 0x3e0   : > { %8159 = vrot.lane.b32.xlu1 %v8144_v29, %s13517_s26 }
 0x3e2   : > { %v7454_v33 = vpop.permute.xlu1 %7453 }
 0x3e3   : > { %v7674_v56 = vsel %vm2469_vm4, %v13456_v43, %v7454_v33  ;;  %v7660_v63 = vpop.permute.xlu0 %7659 }
 0x3e4   : > { %8203 = vrot.lane.b32.xlu1 %v8190_v49, %s13516_s3  ;;  %v7732_v39 = vsel %vm4761_vm10, %v7716_v52, %v7660_v63 }
 0x3e6   : > { %v7498_v3 = vpop.permute.xlu1 %7497 }
 0x3e7   : > { %v7690_v2 = vsel %vm3519_vm0, %v7668_v26, %v7498_v3  ;;  %v16512_v29 = vpop.permute.xlu0 %7993 }
 0x3e8   : > { %8207 = vrot.lane.b32.xlu1 %v8192_v62, %s13516_s3 }
 0x3ea   : > { %v7502_v36 = vpop.permute.xlu1 %7501 }
 0x3eb   : > { %v7694_v54 = vsel %vm3519_vm0, %v7674_v56, %v7502_v36  ;;  %v16517_v20 = vpop.permute.xlu0 %7997 }
 0x3ec   : > { %5201 = vrot.lane.b32.xlu1 %v5186_v17, %s13514_s24 }
 0x3ee   : > { %v7602_v7 = vpop.permute.xlu1 %7601 }
 0x3ef   : > { %v7706_v44 = vsel %vm4097_vm2, %v7690_v2, %v7602_v7  ;;  %v16519_v49 = vpop.permute.xlu0 %8041 }
 0x3f0   : > { %5249 = vrot.lane.b32.xlu1 %v5234_v51, %s13516_s3 }
 0x3f2   : > { %v7606_v38 = vpop.permute.xlu1 %7605 }
 0x3f3   : > { %v7710_v31 = vsel %vm4097_vm2, %v7694_v54, %v7606_v38  ;;  %v16525_v62 = vpop.permute.xlu0 %8045 }
 0x3f6   : > { %v7650_v40 = vpop.permute.xlu1 %7649 }
 0x3f7   : > { %v7722_v1 = vsel %vm4761_vm10, %v7706_v44, %v7650_v40  ;;  %v16538_v0 = vpop.permute.xlu0 %8145 }
 0x3f8   : > { %v12258_v32 = vcombine.low %v7720_v37, %v7722_v1 }
 0x3fa   : > { %v7654_v16 = vpop.permute.xlu1 %7653  ;;  %12754 = vmatprep.mubr.msk.bf16.mxu0 %vm6576_vm13, %v12258_v32 }
 0x3fb   : > { %v7726_v9 = vsel %vm4761_vm10, %v7710_v31, %v7654_v16 }
 0x3fc   : > { %v12259_v41 = vcombine.low %v7724_v55, %v7726_v9 }
 0x3fe   : > { %v7458_v12 = vpop.permute.xlu1 %7457  ;;  %12755 = vmatmul.mubr.msk.bf16.vlgmr.msra.gmra.mrb[8].mxu0 %vm6576_vm13, %v12259_v41 }
 0x3ff   : > { %12763 = vmatpush3.bf16.msra.mxu0 %v16419_v58  ;;  %v7696_v58 = vsel %vm3519_vm0, %v7677_v30, %v16469_v6  ;;  %v7680_v17 = vsel %vm2469_vm4, %v16178_v47, %v7458_v12 }
 0x400   : > { %12934 = vmatprep.subr.msk.bf16.mxu0 %vm4331_vm1, %v13177_v15  ;;  %v7712_v3 = vsel %vm4097_vm2, %v7696_v58, %v7608_v25 }
 0x401   : > { %v7728_v51 = vsel %vm4761_vm10, %v7712_v3, %v7656_v21  ;;  %v16548_v21 = vpop.permute.xlu0 %8149 }
 0x402   : > { %v7462_v11 = vpop.permute.xlu1 %7461 }
 0x403   : > { %12765 = vmatpush3.bf16.msra.mxu0 %v8327_v45  ;;  %v7686_v25 = vsel %vm2469_vm4, %v16195_v57, %v7462_v11  ;;  %v11978_v57 = vld [vmem:[%s19193_s28] ss:$0 sm:$0xff] }
 0x405   : > { %v16561_v1 = vpop.permute.xlu0 %8193 }
 0x406   : > { %v7506_v19 = vpop.permute.xlu1 %7505 }
 0x407   : > { %v7698_v59 = vsel %vm3519_vm0, %v7680_v17, %v7506_v19 }
 0x409   : > { %v16581_v46 = vpop.permute.xlu0 %8197 }
 0x40a   : > { %v7510_v53 = vpop.permute.xlu1 %7509 }
 0x40b   : > { %v7702_v7 = vsel %vm3519_vm0, %v7686_v25, %v7510_v53 }
 0x40e   : > { %v7610_v33 = vpop.permute.xlu1 %7609 }
 0x40f   : > { %v7714_v36 = vsel %vm4097_vm2, %v7698_v59, %v7610_v33 }
 0x412   : > { %v7614_v27 = vpop.permute.xlu1 %7613 }
 0x413   : > { %v7718_v23 = vsel %vm4097_vm2, %v7702_v7, %v7614_v27 }
 0x416   : > { %v7658_v6 = vpop.permute.xlu1 %7657 }
 0x417   : > { %v7730_v34 = vsel %vm4761_vm10, %v7714_v36, %v7658_v6 }
 0x418   : > { %v12260_v47 = vcombine.low %v7728_v51, %v7730_v34 }
 0x41a   : > { %v7662_v24 = vpop.permute.xlu1 %7661  ;;  %12758 = vmatprep.mubr.msk.bf16.mxu0 %vm6576_vm13, %v12260_v47  ;;  %v13459_v47 = vld [vmem:[#allocation2 + $0x20] sm:$0xf] }
 0x41b   : > { %v7734_v35 = vsel %vm4761_vm10, %v7718_v23, %v7662_v24  ;;  %v8211_v7 = vsel %vm2469_vm4, %v13459_v47, %v16512_v29 }
 0x41c   : > { %v12261_v38 = vcombine.low %v7732_v39, %v7734_v35  ;;  %v16597_v35 = vpop.permute.xlu0 %8001 }
 0x41e   : > { %v16550_v28 = vpop.permute.xlu1 %7995  ;;  %12759 = vmatmul.mubr.msk.bf16.gmra.mrb[12].mxu0 %vm6576_vm13, %v12261_v38 }
 0x420   : > { %v12690_v61 = vpop.f32.mrb[0].mxu0 }
 0x421   : > { %v4409_v26 = vmul.f32 %v12690_v61, %v11978_v57  ;;  %v4369_v14 = vpop.f32.mrb[1].mxu0 }
 0x422   : > { %v4407_v2 = vmul.f32 %v11978_v57, %v4369_v14  ;;  %v16559_v44 = vpop.permute.xlu1 %7999  ;;  %v12691_v40 = vpop.f32.mrb[2].mxu0 }
 0x423   : > { %v4424_v37 = vadd.f32 %v11979_v13, %v4409_v26  ;;  %v4410_v10 = vmul.f32 %v12691_v40, %v11978_v57  ;;  %v4372_v43 = vpop.f32.mrb[3].mxu0 }
 0x424   : > { %v4422_v56 = vadd.f32 %v11979_v13, %v4407_v2  ;;  %v4408_v32 = vmul.f32 %v11978_v57, %v4372_v43 }
 0x425   : > { %v16563_v54 = vmax.f32 %v4424_v37, 0.0  ;;  %v4425_v63 = vadd.f32 %v11979_v13, %v4410_v10 }
 0x426   : > { %v16565_v31 = vmax.f32 %v4422_v56, 0.0  ;;  %v4423_v16 = vadd.f32 %v11979_v13, %v4408_v32  ;;  %v16567_v55 = vpop.permute.xlu1 %8043  ;;  %v13460_v56 = vld [vmem:[#allocation2 + $0x30] sm:$0xf] }
 0x427   : > { %19195 = vst [vmem:[#allocation80_spill] sm:$0xff] %v16563_v54  ;;  %v12577_v9 = vpack.c.bf16 %v16563_v54, %v16563_v54  ;;  %v16571_v41 = vmax.f32 %v4425_v63, 0.0  ;;  %v8217_v32 = vsel %vm2469_vm4, %v13460_v56, %v16517_v20 }
 0x428   : > { %19196 = vst [vmem:[#allocation75_spill] sm:$0xff] %v16565_v31  ;;  %v12575_v15 = vpack.c.bf16 %v16565_v31, %v16565_v31  ;;  %v16575_v12 = vmax.f32 %v4423_v16, 0.0  ;;  %v12694_v45 = vpop.f32.mrb[4].mxu0 }
 0x429   : > { %19197 = vst [vmem:[#allocation81_spill] sm:$0xff] %v16571_v41  ;;  %v4474_v11 = vrot.slane %v12577_v9, 7  ;;  %v12578_v19 = vpack.c.bf16 %v16571_v41, %v16571_v41  ;;  %v4413_v30 = vmul.f32 %v12694_v45, %v11978_v57  ;;  %v4385_v33 = vpop.f32.mrb[5].mxu0 }
 0x42a   : > { %19198 = vst [vmem:[#allocation82_spill] sm:$0xff] %v16575_v12  ;;  %v4470_v58 = vrot.slane %v12575_v15, 7  ;;  %v12576_v18 = vpack.c.bf16 %v16575_v12, %v16575_v12  ;;  %v4411_v27 = vmul.f32 %v11978_v57, %v4385_v33  ;;  %v16587_v3 = vpop.permute.xlu1 %8047  ;;  %v12695_v17 = vpop.f32.mrb[6].mxu0 }
 0x42b   : > { %v4475_v22 = vrot.slane %v4474_v11, 4  ;;  %4508 = vst.msk [vmem:[#allocation3 + $0x20] sm:$0xe] %vm4503_vm12, %v4474_v11  ;;  %v4476_v59 = vrot.slane %v12578_v19, 7  ;;  %v4428_v36 = vadd.f32 %v11979_v13, %v4413_v30  ;;  %v4388_v6 = vpop.f32.mrb[7].mxu0  ;;  %v4414_v25 = vmul.f32 %v12695_v17, %v11978_v57  ;;  %v16628_v11 = vpop.permute.xlu0 %8005 }
 0x42c   : > { %v4471_v51 = vrot.slane %v4470_v58, 4  ;;  %4504 = vst.msk [vmem:[#allocation3 + $0x10] sm:$0xe] %vm4503_vm12, %v4470_v58  ;;  %v4472_v34 = vrot.slane %v12576_v18, 7  ;;  %v4426_v52 = vadd.f32 %v11979_v13, %v4411_v27  ;;  %v4412_v39 = vmul.f32 %v11978_v57, %v4388_v6 }
 0x42d   : > { %4509 = vst.msk [vmem:[#allocation3 + $0x24] sm:$0x1] %vm650_vm15, %v4475_v22  ;;  %v4477_v23 = vrot.slane %v4476_v59, 4  ;;  %v16595_v24 = vmax.f32 %v4428_v36, 0.0  ;;  %v4429_v26 = vadd.f32 %v11979_v13, %v4414_v25  ;;  %v8234_v57 = vsel %vm3519_vm0, %v8211_v7, %v16519_v49 }
 0x42e   : > { %4510 = vst.msk [vmem:[#allocation3 + $0x28] sm:$0xe] %vm4503_vm12, %v4476_v59  ;;  %v4473_v38 = vrot.slane %v4472_v34, 4  ;;  %4506 = vst.msk [vmem:[#allocation3 + $0x18] sm:$0xe] %vm4503_vm12, %v4472_v34  ;;  %v16601_v61 = vmax.f32 %v4426_v52, 0.0  ;;  %v8148_v14 = vpop.permute.xlu1 %8147  ;;  %v4427_v2 = vadd.f32 %v11979_v13, %v4412_v39  ;;  %v8250_v9 = vsel %vm4097_vm2, %v8234_v57, %v16538_v0 }
 0x42f   : > { %19199 = vst [vmem:[#allocation70_spill] sm:$0xff] %v16595_v24  ;;  %4505 = vst.msk [vmem:[#allocation3 + $0x14] sm:$0x1] %vm650_vm15, %v4471_v51  ;;  %v12581_v29 = vpack.c.bf16 %v16595_v24, %v16595_v24  ;;  %v16611_v37 = vmax.f32 %v4429_v26, 0.0  ;;  %v8214_v19 = vsel %vm2469_vm4, %v16298_v60, %v16550_v28  ;;  %v8238_v18 = vsel %vm3519_vm0, %v8217_v32, %v16525_v62  ;;  %v8050_v39 = vpop.permute.xlu0 %8049 }
 0x430   : > { %19200 = vst [vmem:[#allocation71_spill] sm:$0xff] %v16601_v61  ;;  %4511 = vst.msk [vmem:[#allocation3 + $0x2c] sm:$0x1] %vm650_vm15, %v4477_v23  ;;  %v12579_v40 = vpack.c.bf16 %v16601_v61, %v16601_v61  ;;  %v16613_v43 = vmax.f32 %v4427_v2, 0.0  ;;  %v8236_v27 = vsel %vm3519_vm0, %v8214_v19, %v16567_v55  ;;  %v8266_v60 = vsel %vm4761_vm10, %v8250_v9, %v16561_v1 }
 0x431   : > { %4507 = vst.msk [vmem:[#allocation3 + $0x1c] sm:$0x1] %vm650_vm15, %v4473_v38  ;;  %19201 = vst [vmem:[#allocation84_spill] sm:$0xff] %v16611_v37  ;;  %v4482_v10 = vrot.slane %v12581_v29, 7  ;;  %v12582_v13 = vpack.c.bf16 %v16611_v37, %v16611_v37  ;;  %v8252_v36 = vsel %vm4097_vm2, %v8236_v27, %v8148_v14  ;;  %v8254_v25 = vsel %vm4097_vm2, %v8238_v18, %v16548_v21 }
 0x432   : > { %19202 = vst [vmem:[#allocation86_spill] sm:$0xff] %v16613_v43  ;;  %v4478_v63 = vrot.slane %v12579_v40, 7  ;;  %v8152_v16 = vpop.permute.xlu1 %8151  ;;  %v12580_v45 = vpack.c.bf16 %v16613_v43, %v16613_v43  ;;  %v4796_v0 = vld [vmem:[#allocation3 + $0x20] sm:$0xe]  ;;  %v8220_v1 = vsel %vm2469_vm4, %v16315_v48, %v16559_v44  ;;  %v8270_v48 = vsel %vm4761_vm10, %v8254_v25, %v16581_v46 }
 0x433   : > { %v4483_v15 = vrot.slane %v4482_v10, 4  ;;  %4516 = vst.msk [vmem:[#allocation3 + $0x40] sm:$0xe] %vm4503_vm12, %v4482_v10  ;;  %v4484_v33 = vrot.slane %v12582_v13, 7  ;;  %v4794_v62 = vld [vmem:[#allocation3 + $0x10] sm:$0xe]  ;;  %v8240_v23 = vsel %vm3519_vm0, %v8220_v1, %v16587_v3  ;;  %v8054_v10 = vpop.permute.xlu0 %8053 }
 0x434   : > { %v4479_v30 = vrot.slane %v4478_v63, 4  ;;  %4512 = vst.msk [vmem:[#allocation3 + $0x30] sm:$0xe] %vm4503_vm12, %v4478_v63  ;;  %v4804_v58 = vld [vmem:[#allocation3 + $0x24] sm:$0x3]  ;;  %v4480_v17 = vrot.slane %v12580_v45, 7  ;;  %v8256_v38 = vsel %vm4097_vm2, %v8240_v23, %v8152_v16 }
 0x435   : > { %4517 = vst.msk [vmem:[#allocation3 + $0x44] sm:$0x1] %vm650_vm15, %v4483_v15  ;;  %v12030_v22 = vcombine.low %v4796_v0, %v4804_v58  ;;  %v4485_v28 = vrot.slane %v4484_v33, 4  ;;  %v5053_v21 = vld [vmem:[#allocation3 + $0x28] sm:$0xe] }
 0x436   : > { %v4802_v59 = vld [vmem:[#allocation3 + $0x14] sm:$0x3]  ;;  %4513 = vst.msk [vmem:[#allocation3 + $0x34] sm:$0x1] %vm650_vm15, %v4479_v30  ;;  %v8196_v6 = vpop.permute.xlu1 %8195  ;;  %v4481_v51 = vrot.slane %v4480_v17, 4 }
 0x437   : > { %4518 = vst.msk [vmem:[#allocation3 + $0x48] sm:$0xe] %vm4503_vm12, %v4484_v33  ;;  %4514 = vst.msk [vmem:[#allocation3 + $0x38] sm:$0xe] %vm4503_vm12, %v4480_v17  ;;  %v8268_v55 = vsel %vm4761_vm10, %v8252_v36, %v8196_v6  ;;  %v4972_v34 = vrot.slane %v12030_v22, 1  ;;  %v12028_v52 = vcombine.low %v4794_v62, %v4802_v59  ;;  %v8154_v33 = vpop.permute.xlu0 %8153 }
 0x438   : > { %4519 = vst.msk [vmem:[#allocation3 + $0x4c] sm:$0x1] %vm650_vm15, %v4485_v28  ;;  %v12303_v47 = vcombine.low %v8266_v60, %v8268_v55  ;;  %v5061_v7 = vld [vmem:[#allocation3 + $0x2c] sm:$0x3]  ;;  %4515 = vst.msk [vmem:[#allocation3 + $0x3c] sm:$0x1] %vm650_vm15, %v4481_v51 }
 0x439   : > { %4982 = vrot.lane.b32.xlu0 %v4972_v34, %s13516_s3  ;;  %v4970_v14 = vrot.slane %v12028_v52, 1  ;;  %v12054_v29 = vcombine.low %v5053_v21, %v5061_v7  ;;  %v4549_v3 = vld [vmem:[#allocation3 + $0x2c] sm:$0x3]  ;;  %v4541_v40 = vld [vmem:[#allocation3 + $0x28] sm:$0xe] }
 0x43a   : > { %v8200_v26 = vpop.permute.xlu1 %8199  ;;  %12766 = vmatprep.mubr.msk.bf16.mxu0 %vm6576_vm13, %v12303_v47  ;;  %v12008_v32 = vcombine.low %v4541_v40, %v4549_v3  ;;  %v5059_v63 = vld [vmem:[#allocation3 + $0x1c] sm:$0x3]  ;;  %v16663_v13 = vld [vmem:[#allocation3 + $0x24] sm:$0x1]  ;;  %v5051_v16 = vld [vmem:[#allocation3 + $0x18] sm:$0xe] }
 0x43b   : > { %v8272_v44 = vsel %vm4761_vm10, %v8256_v38, %v8200_v26  ;;  %v5229_v56 = vrot.slane %v12054_v29, 1  ;;  %v12052_v15 = vcombine.low %v5051_v16, %v5059_v63  ;;  %v12022_v45 = vcombine.low %v4796_v0, %v16663_v13  ;;  %v4547_v19 = vld [vmem:[#allocation3 + $0x1c] sm:$0x3]  ;;  %v16667_v30 = vld [vmem:[#allocation3 + $0x14] sm:$0x1]  ;;  %v8158_v6 = vpop.permute.xlu0 %8157 }
 0x43c   : > { %v12304_v2 = vcombine.low %v8270_v48, %v8272_v44  ;;  %v4717_v9 = vrot.slane %v12008_v32, 1  ;;  %v4539_v18 = vld [vmem:[#allocation3 + $0x18] sm:$0xe]  ;;  %v12020_v59 = vcombine.low %v4794_v62, %v16667_v30  ;;  %v16671_v60 = vld [vmem:[#allocation3 + $0x2c] sm:$0x1] }
 0x43d   : > { %4978 = vrot.lane.b32.xlu0 %v4970_v14, %s13516_s3  ;;  %v5227_v27 = vrot.slane %v12052_v15, 1  ;;  %v12006_v17 = vcombine.low %v4539_v18, %v4547_v19  ;;  %v4891_v22 = vshll.u32 %v12022_v45, 16  ;;  %19203 = vst [vmem:[#allocation73_spill] sm:$0xff] %v16671_v60  ;;  %v13461_v28 = vld [vmem:[#allocation2 + $0x40] sm:$0xf]  ;;  %v12000_v52 = vcombine.low %v4541_v40, %v16671_v60 }
 0x43e   : > { %v8004_v57 = vpop.permute.xlu1 %8003  ;;  %12767 = vmatmul.mubr.msk.bf16.vlgmr.msra.gmra.mrb[8].mxu0 %vm6576_vm13, %v12304_v2  ;;  %v8223_v0 = vsel %vm2469_vm4, %v13461_v28, %v16597_v35  ;;  %v4877_v34 = vshll.u32 %v12020_v59, 16  ;;  %v16677_v25 = vld [vmem:[#allocation3 + $0x2c] sm:$0x1]  ;;  %v4889_v62 = vshrl.u32 %v12022_v45, 16  ;;  %v13462_v1 = vld [vmem:[#allocation2 + $0x50] sm:$0xf] }
 0x43f   : > { %v4715_v51 = vrot.slane %v12006_v17, 1  ;;  %v4893_v55 = vrot.slane %v4891_v22, 1  ;;  %v8229_v47 = vsel %vm2469_vm4, %v13462_v1, %v16628_v11  ;;  %v8242_v7 = vsel %vm3519_vm0, %v8223_v0, %v8050_v39  ;;  %v16684_v44 = vld [vmem:[#allocation3 + $0x1c] sm:$0x1]  ;;  %v8202_v14 = vpop.permute.xlu0 %8201  ;;  %v16852_v53 = vld [vmem:[#allocation3 + $0x10] sm:$0xf] }
 0x440   : > { %v4879_v38 = vrot.slane %v4877_v34, 1  ;;  %v4648_v26 = vshll.u32 %v12000_v52, 16  ;;  %v12046_v48 = vcombine.low %v5053_v21, %v16677_v25  ;;  %19204 = vst [vmem:[#allocation88_spill] sm:$0xff] %v16684_v44  ;;  %v4875_v29 = vshrl.u32 %v12020_v59, 16  ;;  %v16692_v21 = vld [vmem:[#allocation3 + $0x1c] sm:$0x1] }
 0x441   : > { %5239 = vrot.lane.b32.xlu0 %v5229_v56, %s13516_s3  ;;  %v4894_v35 = vor.u32 %v4893_v55, %v4889_v62  ;;  %v8226_v2 = vsel %vm2469_vm4, %v16390_v50, %v8004_v57  ;;  %v8246_v3 = vsel %vm3519_vm0, %v8229_v47, %v8054_v10  ;;  %v8258_v11 = vsel %vm4097_vm2, %v8242_v7, %v8154_v33  ;;  %v16854_v20 = vld [vmem:[#allocation3 + $0x28] sm:$0xf]  ;;  %v16876_v54 = vld [vmem:[#allocation3 + $0x18] sm:$0xf] }
 0x442   : > { %v8008_v46 = vpop.permute.xlu1 %8007  ;;  %v4880_v40 = vor.u32 %v4879_v38, %v4875_v29  ;;  %v4650_v56 = vrot.slane %v4648_v26, 1  ;;  %v5148_v32 = vshll.u32 %v12046_v48, 16  ;;  %v11998_v63 = vcombine.low %v4539_v18, %v16684_v44  ;;  %v4808_v26 = vld [vmem:[#allocation3 + $0x44] sm:$0x3]  ;;  %19223 = vst [vmem:[#allocation99_spill] sm:$0xff] %v16854_v20  ;;  %19229 = vst [vmem:[#allocation105_spill] sm:$0xff] %v16876_v54 }
 0x443   : > { %v8262_v15 = vsel %vm4097_vm2, %v8246_v3, %v8158_v6  ;;  %v4646_v45 = vshrl.u32 %v12000_v52, 16  ;;  %v8232_v50 = vsel %vm2469_vm4, %v16404_v8, %v8008_v46  ;;  %v8274_v57 = vsel %vm4761_vm10, %v8258_v11, %v8202_v14  ;;  %v8206_v18 = vpop.permute.xlu0 %8205  ;;  %v5049_v8 = vld [vmem:[#allocation3 + $0x50] sm:$0xf]  ;;  %v5052_v14 = vld [vmem:[#allocation3 + $0x20] sm:$0xe] }
 0x444   : > { %v12044_v33 = vcombine.low %v5051_v16, %v16692_v21  ;;  %v4634_v22 = vshll.u32 %v11998_v63, 16  ;;  %v5146_v0 = vshrl.u32 %v12046_v48, 16  ;;  %v8278_v46 = vsel %vm4761_vm10, %v8262_v15, %v8206_v18  ;;  %v4800_v3 = vld [vmem:[#allocation3 + $0x40] sm:$0xe]  ;;  %v4798_v15 = vld [vmem:[#allocation3 + $0x30] sm:$0xe] }
 0x445   : > { %4729 = vrot.lane.b32.xlu0 %v4717_v9, %s13516_s3  ;;  %v4651_v17 = vor.u32 %v4650_v56, %v4646_v45  ;;  %v12043_v1 = vcombine.low %v5049_v8, %v16462_v5  ;;  %v4806_v56 = vld [vmem:[#allocation3 + $0x34] sm:$0x3]  ;;  %v4797_v8 = vld [vmem:[#allocation3 + $0x28] sm:$0xe] }
 0x446   : > { %v8052_v58 = vpop.permute.xlu1 %8051  ;;  %v4636_v34 = vrot.slane %v4634_v22, 1  ;;  %v5134_v52 = vshll.u32 %v12044_v33, 16  ;;  %v5132_v48 = vshrl.u32 %v12044_v33, 16  ;;  %v4805_v22 = vld [vmem:[#allocation3 + $0x2c] sm:$0x3] }
 0x447   : > { %v8244_v9 = vsel %vm3519_vm0, %v8226_v2, %v8052_v58  ;;  %v5150_v58 = vrot.slane %v5148_v32, 1  ;;  %v4540_v32 = vld [vmem:[#allocation3 + $0x20] sm:$0xe]  ;;  %v16860_v24 = vld [vmem:[#allocation3 + $0x28] sm:$0xf] }
 0x449   : > { %5235 = vrot.lane.b32.xlu0 %v5227_v27, %s13516_s3  ;;  %v5151_v55 = vor.u32 %v5150_v58, %v5146_v0  ;;  %v16722_v0 = vld [vmem:[#allocation3 + $0x44] sm:$0x1] }
 0x44a   : > { %v8056_v36 = vpop.permute.xlu1 %8055 }
 0x44b   : > { %v8248_v28 = vsel %vm3519_vm0, %v8232_v50, %v8056_v36  ;;  %v4632_v36 = vshrl.u32 %v11998_v63, 16  ;;  %v12032_v50 = vcombine.low %v4798_v15, %v4806_v56 }
 0x44d   : > { %4725 = vrot.lane.b32.xlu0 %v4715_v51, %s13516_s3  ;;  %v4637_v7 = vor.u32 %v4636_v34, %v4632_v36  ;;  %v4551_v36 = vld [vmem:[#allocation3 + $0x3c] sm:$0x3] }
 0x44e   : > { %v8156_v23 = vpop.permute.xlu1 %8155 }
 0x44f   : > { %v8260_v10 = vsel %vm4097_vm2, %v8244_v9, %v8156_v23  ;;  %v5136_v23 = vrot.slane %v5134_v52, 1  ;;  %v4803_v52 = vld [vmem:[#allocation3 + $0x1c] sm:$0x3] }
 0x451   : > { %4934 = vrot.lane.b32.xlu0 %v4894_v35, %s13514_s24  ;;  %v5060_v35 = vld [vmem:[#allocation3 + $0x24] sm:$0x3]  ;;  %v5137_v11 = vor.u32 %v5136_v23, %v5132_v48 }
 0x452   : > { %v8160_v39 = vpop.permute.xlu1 %8159  ;;  %v12053_v2 = vcombine.low %v5052_v14, %v5060_v35 }
 0x453   : > { %v8264_v6 = vsel %vm4097_vm2, %v8248_v28, %v8160_v39  ;;  %v12034_v39 = vcombine.low %v4800_v3, %v4808_v26  ;;  %v5063_v28 = vld [vmem:[#allocation3 + $0x3c] sm:$0x3]  ;;  %vm8928_vm2 = vcmask 261120  }
 0x454   : > { %v5228_v63 = vrot.slane %v12053_v2, 1 }
 0x455   : > { %4930 = vrot.lane.b32.xlu0 %v4880_v40, %s13514_s24  ;;  %v4548_v40 = vld [vmem:[#allocation3 + $0x24] sm:$0x3]  ;;  %v4976_v45 = vrot.slane %v12034_v39, 1  ;;  %v16738_v39 = vld [vmem:[#allocation3 + $0x4c] sm:$0x1] }
 0x456   : > { %v8204_v19 = vpop.permute.xlu1 %8203  ;;  %v12007_v9 = vcombine.low %v4540_v32, %v4548_v40 }
 0x457   : > { %v8276_v27 = vsel %vm4761_vm10, %v8260_v10, %v8204_v19  ;;  %v5065_v10 = vld [vmem:[#allocation3 + $0x4c] sm:$0x3]  ;;  %v4538_v19 = vld [vmem:[#allocation3 + $0x10] sm:$0xe] }
 0x458   : > { %v12305_v59 = vcombine.low %v8274_v57, %v8276_v27  ;;  %v4546_v57 = vld [vmem:[#allocation3 + $0x14] sm:$0x3]  ;;  %v4716_v33 = vrot.slane %v12007_v9, 1  ;;  %v5057_v27 = vld [vmem:[#allocation3 + $0x48] sm:$0xe] }
 0x459   : > { %4681 = vrot.lane.b32.xlu0 %v4651_v17, %s13514_s24  ;;  %v12005_v18 = vcombine.low %v4538_v19, %v4546_v57  ;;  %v4974_v17 = vrot.slane %v12032_v50, 1  ;;  %v12058_v58 = vcombine.low %v5057_v27, %v5065_v10  ;;  %v12050_v50 = vcombine.low %v5057_v27, %v16738_v39  ;;  %v16743_v57 = vld [vmem:[#allocation3 + $0x2c] sm:$0x1]  ;;  %v16746_v10 = vld [vmem:[#allocation3 + $0x3c] sm:$0x1] }
 0x45a   : > { %v8208_v51 = vpop.permute.xlu1 %8207  ;;  %12770 = vmatprep.mubr.msk.bf16.mxu0 %vm6576_vm13, %v12305_v59  ;;  %v16719_v59 = vld [vmem:[#allocation3 + $0x24] sm:$0x1]  ;;  %19207 = vst [vmem:[#allocation85_spill] sm:$0xff] %v16746_v10 }
 0x45b   : > { %v8280_v16 = vsel %vm4761_vm10, %v8264_v6, %v8208_v51  ;;  %19205 = vst [vmem:[#allocation72_spill] sm:$0xff] %v16719_v59  ;;  %v12031_v6 = vcombine.low %v4797_v8, %v4805_v22  ;;  %v5055_v51 = vld [vmem:[#allocation3 + $0x38] sm:$0xe] }
 0x45c   : > { %v12306_v62 = vcombine.low %v8278_v46, %v8280_v16  ;;  %v4714_v46 = vrot.slane %v12005_v18, 1  ;;  %v11999_v16 = vcombine.low %v4540_v32, %v16719_v59  ;;  %v12056_v34 = vcombine.low %v5055_v51, %v5063_v28 }
 0x45d   : > { %5191 = vrot.lane.b32.xlu0 %v5151_v55, %s13514_s24  ;;  %v5233_v55 = vrot.slane %v12058_v58, 1  ;;  %v4973_v23 = vrot.slane %v12031_v6, 1  ;;  %v16751_v6 = vld [vmem:[#allocation3 + $0x1c] sm:$0x1] }
 0x45e   : > { %v5202_v47 = vpop.permute.xlu1 %5201  ;;  %12771 = vmatmul.mubr.msk.bf16.gmra.mrb[12].mxu0 %vm6576_vm13, %v12306_v62  ;;  %v12026_v62 = vcombine.low %v4800_v3, %v16722_v0  ;;  %v4641_v26 = vshll.u32 %v11999_v16, 16  ;;  %19208 = vst [vmem:[#allocation87_spill] sm:$0xff] %v16751_v6  ;;  %vm5355_vm13 = vcmask 392192  }
 0x45f   : > { %v5274_v38 = vsel %vm3519_vm0, %v12043_v1, %v5202_v47  ;;  %v16727_v1 = vld [vmem:[#allocation3 + $0x24] sm:$0x1]  ;;  %v16730_v47 = vld [vmem:[#allocation3 + $0x34] sm:$0x1] }
 0x460   : > { %v12045_v48 = vcombine.low %v5052_v14, %v16727_v1  ;;  %v12024_v3 = vcombine.low %v4798_v15, %v16730_v47  ;;  %v4643_v56 = vrot.slane %v4641_v26, 1  ;;  %v4639_v15 = vshrl.u32 %v11999_v16, 16 }
 0x461   : > { %4677 = vrot.lane.b32.xlu0 %v4637_v7, %s13514_s24  ;;  %v4795_v7 = vld [vmem:[#allocation3 + $0x18] sm:$0xe] }
 0x462   : > { %v5250_v29 = vpop.permute.xlu1 %5249  ;;  %v12029_v35 = vcombine.low %v4795_v7, %v4803_v52  ;;  %v5141_v32 = vshll.u32 %v12045_v48, 16  ;;  %v4644_v18 = vor.u32 %v4643_v56, %v4639_v15  ;;  %v5139_v16 = vshrl.u32 %v12045_v48, 16 }
 0x463   : > { %v5290_v5 = vsel %vm4761_vm10, %v5274_v38, %v5250_v29  ;;  %v4543_v38 = vld [vmem:[#allocation3 + $0x38] sm:$0xe]  ;;  %v5231_v29 = vrot.slane %v12056_v34, 1  ;;  %v4903_v34 = vshrl.u32 %v12024_v3, 16  ;;  %v5174_v48 = vshrl.u32 %v12050_v50, 16 }
 0x464   : > { %5337 = vrot.lane.b32.xlu1 %v5290_v5, %s13519_s22  ;;  %v12010_v2 = vcombine.low %v4543_v38, %v4551_v36  ;;  %v4919_v5 = vshll.u32 %v12026_v62, 16  ;;  %v4971_v40 = vrot.slane %v12029_v35, 1  ;;  %v12002_v27 = vcombine.low %v4543_v38, %v16746_v10 }
 0x465   : > { %5187 = vrot.lane.b32.xlu0 %v5137_v11, %s13514_s24  ;;  %v16735_v11 = vld [vmem:[#allocation3 + $0x14] sm:$0x1] }
 0x466   : > { %19206 = vst [vmem:[#allocation83_spill] sm:$0xff] %v16735_v11  ;;  %v4719_v9 = vrot.slane %v12010_v2, 1  ;;  %v4921_v14 = vrot.slane %v4919_v5, 1  ;;  %v4662_v26 = vshll.u32 %v12002_v27, 16 }
 0x468   : > { %5237 = vrot.lane.b32.xlu1 %v5228_v63, %s13516_s3  ;;  %v11997_v63 = vcombine.low %v4538_v19, %v16735_v11  ;;  %v12023_v19 = vcombine.low %v4797_v8, %v16743_v57  ;;  %v12021_v8 = vcombine.low %v4795_v7, %v16751_v6  ;;  %v4664_v56 = vrot.slane %v4662_v26, 1  ;;  %v4550_v26 = vld [vmem:[#allocation3 + $0x34] sm:$0x3]  ;;  %v16971_v6 = vld [vmem:[#allocation3 + $0x48] sm:$0xf] }
 0x469   : > { %4990 = vrot.lane.b32.xlu0 %v4976_v45, %s13516_s3  ;;  %v4905_v45 = vshll.u32 %v12024_v3, 16 }
 0x46a   : > { %v4627_v58 = vshll.u32 %v11997_v63, 16  ;;  %v4898_v36 = vshll.u32 %v12023_v19, 16  ;;  %v4896_v7 = vshrl.u32 %v12023_v19, 16 }
 0x46b   : > { %v4907_v28 = vrot.slane %v4905_v45, 1  ;;  %v8982_v45 = vld [vmem:[#allocation3 + $0x8] sm:$0xc] }
 0x46c   : > { %4727 = vrot.lane.b32.xlu1 %v4716_v33, %s13516_s3  ;;  %v4917_v33 = vshrl.u32 %v12026_v62, 16  ;;  %v4629_v62 = vrot.slane %v4627_v58, 1  ;;  %v4900_v5 = vrot.slane %v4898_v36, 1  ;;  %v13463_v58 = vld [vmem:[#allocation3 + $0xc] sm:$0x3] }
 0x46d   : > { %4986 = vrot.lane.b32.xlu0 %v4974_v17, %s13516_s3  ;;  %v5143_v17 = vrot.slane %v5141_v32, 1  ;;  %v5062_v36 = vld [vmem:[#allocation3 + $0x34] sm:$0x3] }
 0x46e   : > { %v4922_v22 = vor.u32 %v4921_v14, %v4917_v33  ;;  %v4901_v14 = vor.u32 %v4900_v5, %v4896_v7  ;;  %v5064_v33 = vld [vmem:[#allocation3 + $0x44] sm:$0x3]  ;;  %v4807_v7 = vld [vmem:[#allocation3 + $0x3c] sm:$0x3] }
 0x46f   : > { %v5144_v52 = vor.u32 %v5143_v17, %v5139_v16  ;;  %v5056_v17 = vld [vmem:[#allocation3 + $0x40] sm:$0xe]  ;;  %v4552_v16 = vld [vmem:[#allocation3 + $0x44] sm:$0x3] }
 0x470   : > { %4723 = vrot.lane.b32.xlu1 %v4714_v46, %s13516_s3  ;;  %v5176_v46 = vshll.u32 %v12050_v50, 16  ;;  %v4882_v50 = vshrl.u32 %v12021_v8, 16  ;;  %v12057_v19 = vcombine.low %v5056_v17, %v5064_v33  ;;  %v16770_v5 = vld [vmem:[#allocation3 + $0x44] sm:$0x1]  ;;  %v16778_v33 = vld [vmem:[#allocation3 + $0x34] sm:$0x1] }
 0x471   : > { %5247 = vrot.lane.b32.xlu0 %v5233_v55, %s13516_s3  ;;  %v16754_v55 = vld [vmem:[#allocation3 + $0x3c] sm:$0x1]  ;;  %19210 = vst [vmem:[#allocation79_spill] sm:$0xff] %v16770_v5  ;;  %19212 = vst [vmem:[#allocation78_spill] sm:$0xff] %v16778_v33 }
 0x472   : > { %19209 = vst [vmem:[#allocation76_spill] sm:$0xff] %v16754_v55  ;;  %v5178_v35 = vrot.slane %v5176_v46, 1  ;;  %v12048_v38 = vcombine.low %v5055_v51, %v16754_v55 }
 0x474   : > { %4984 = vrot.lane.b32.xlu1 %v4973_v23, %s13516_s3  ;;  %v4908_v23 = vor.u32 %v4907_v28, %v4903_v34  ;;  %v5179_v3 = vor.u32 %v5178_v35, %v5174_v48  ;;  %v5162_v32 = vshll.u32 %v12048_v38, 16 }
 0x475   : > { %5243 = vrot.lane.b32.xlu0 %v5231_v29, %s13516_s3  ;;  %v4625_v29 = vshrl.u32 %v11997_v63, 16 }
 0x476   : > { %v5164_v63 = vrot.slane %v5162_v32, 1 }
 0x477   : > { %v4630_v2 = vor.u32 %v4629_v62, %v4625_v29 }
 0x478   : > { %4980 = vrot.lane.b32.xlu1 %v4971_v40, %s13516_s3  ;;  %v4884_v40 = vshll.u32 %v12021_v8, 16  ;;  %v5054_v8 = vld [vmem:[#allocation3 + $0x30] sm:$0xe] }
 0x479   : > { %4733 = vrot.lane.b32.xlu0 %v4719_v9, %s13516_s3  ;;  %v4660_v9 = vshrl.u32 %v12002_v27, 16  ;;  %v4544_v27 = vld [vmem:[#allocation3 + $0x40] sm:$0xe]  ;;  %v12055_v35 = vcombine.low %v5054_v8, %v5062_v36 }
 0x47a   : > { %v4886_v51 = vrot.slane %v4884_v40, 1  ;;  %v12011_v62 = vcombine.low %v4544_v27, %v4552_v16  ;;  %v4801_v40 = vld [vmem:[#allocation3 + $0x48] sm:$0xe]  ;;  %v12003_v32 = vcombine.low %v4544_v27, %v16770_v5  ;;  %v8536_v27 = vld [vmem:[#allocation3] sm:$0xe] }
 0x47b   : > { %v4665_v15 = vor.u32 %v4664_v56, %v4660_v9  ;;  %v5230_v29 = vrot.slane %v12055_v35, 1  ;;  %v16774_v9 = vld [vmem:[#allocation3 + $0x44] sm:$0x1] }
 0x47c   : > { %4679 = vrot.lane.b32.xlu1 %v4644_v18, %s13514_s24  ;;  %v5160_v18 = vshrl.u32 %v12048_v38, 16  ;;  %v4887_v28 = vor.u32 %v4886_v51, %v4882_v50  ;;  %v4542_v38 = vld [vmem:[#allocation3 + $0x30] sm:$0xe]  ;;  %19211 = vst [vmem:[#allocation77_spill] sm:$0xff] %v16774_v9  ;;  %v8520_v50 = vld [vmem:[#allocation3] sm:$0xf] }
 0x47d   : > { %4942 = vrot.lane.b32.xlu0 %v4922_v22, %s13514_s24  ;;  %v12379_v22 = vcombine.low %v8982_v45, %v13463_v58  ;;  %v12009_v48 = vcombine.low %v4542_v38, %v4550_v26 }
 0x47e   : > { %v5165_v46 = vor.u32 %v5164_v63, %v5160_v18  ;;  %v12049_v63 = vcombine.low %v5056_v17, %v16774_v9 }
 0x47f   : > { %v9278_v34 = vrot.slane %v12379_v22, 2 }
 0x480   : > { %5189 = vrot.lane.b32.xlu1 %v5144_v52, %s13514_s24  ;;  %v5232_v52 = vrot.slane %v12057_v19, 1  ;;  %v5169_v22 = vshll.u32 %v12049_v63, 16  ;;  %v8528_v19 = vld [vmem:[#allocation3 + $0x4] sm:$0x1] }
 0x481   : > { %4938 = vrot.lane.b32.xlu0 %v4908_v23, %s13514_s24  ;;  %v4720_v23 = vrot.slane %v12011_v62, 1  ;;  %v12323_v16 = vcombine.low %v8520_v50, %v8528_v19 }
 0x482   : > { %v5171_v35 = vrot.slane %v5169_v22, 1 }
 0x483   : > { %v8601_v62 = vshrl.u32 %v12323_v16, 16  ;;  %v8603_v36 = vshll.u32 %v12323_v16, 16  ;;  %v8552_v16 = vld [vmem:[#allocation3] sm:$0xc] }
 0x484   : > { %4675 = vrot.lane.b32.xlu1 %v4630_v2, %s13514_s24  ;;  %v4809_v2 = vld [vmem:[#allocation3 + $0x4c] sm:$0x3] }
 0x485   : > { %5199 = vrot.lane.b32.xlu0 %v5179_v3, %s13514_s24  ;;  %v4718_v3 = vrot.slane %v12009_v48, 1  ;;  %v12035_v56 = vcombine.low %v4801_v40, %v4809_v2  ;;  %v16786_v48 = vld [vmem:[#allocation3 + $0x4c] sm:$0x1]  ;;  %v12331_v2 = vcombine.low %v8536_v27, %v8528_v19 }
 0x486   : > { %19214 = vst [vmem:[#allocation90_spill] sm:$0xff] %v16786_v48  ;;  %v12027_v50 = vcombine.low %v4801_v40, %v16786_v48 }
 0x487   : > { %v4977_v51 = vrot.slane %v12035_v56, 1 }
 0x488   : > { %4936 = vrot.lane.b32.xlu1 %v4901_v14, %s13514_s24  ;;  %v4799_v14 = vld [vmem:[#allocation3 + $0x38] sm:$0xe] }
 0x489   : > { %4685 = vrot.lane.b32.xlu0 %v4665_v15, %s13514_s24  ;;  %v12033_v45 = vcombine.low %v4799_v14, %v4807_v7  ;;  %v4669_v15 = vshll.u32 %v12003_v32, 16  ;;  %v5167_v7 = vshrl.u32 %v12049_v63, 16 }
 0x48b   : > { %v4975_v18 = vrot.slane %v12033_v45, 1  ;;  %v4671_v58 = vrot.slane %v4669_v15, 1  ;;  %v5172_v45 = vor.u32 %v5171_v35, %v5167_v7 }
 0x48c   : > { %4932 = vrot.lane.b32.xlu1 %v4887_v28, %s13514_s24  ;;  %v12001_v28 = vcombine.low %v4542_v38, %v16778_v33  ;;  %v8605_v38 = vrot.slane %v8603_v36, 1 }
 0x48d   : > { %5195 = vrot.lane.b32.xlu0 %v5165_v46, %s13514_s24  ;;  %v16782_v46 = vld [vmem:[#allocation3 + $0x34] sm:$0x1] }
 0x48e   : > { %19213 = vst [vmem:[#allocation89_spill] sm:$0xff] %v16782_v46  ;;  %v4655_v26 = vshll.u32 %v12001_v28, 16  ;;  %v4653_v19 = vshrl.u32 %v12001_v28, 16 }
 0x490   : > { %5245 = vrot.lane.b32.xlu1 %v5232_v52, %s13516_s3  ;;  %v4667_v52 = vshrl.u32 %v12003_v32, 16  ;;  %v4657_v32 = vrot.slane %v4655_v26, 1 }
 0x491   : > { %9286 = vrot.lane.b32.xlu0 %v9278_v34, %s13520_s25  ;;  %v8544_v34 = vld [vmem:[#allocation3 + $0x4] sm:$0x3] }
 0x492   : > { %v12339_v17 = vcombine.low %v8536_v27, %v8544_v34  ;;  %v8521_v27 = vld [vmem:[#allocation3 + $0x8] sm:$0xf]  ;;  %v4658_v63 = vor.u32 %v4657_v32, %v4653_v19 }
 0x494   : > { %4735 = vrot.lane.b32.xlu1 %v4720_v23, %s13516_s3  ;;  %v4672_v23 = vor.u32 %v4671_v58, %v4667_v52  ;;  %v8748_v56 = vshll.u32 %v12339_v17, 16  ;;  %v8529_v52 = vld [vmem:[#allocation3 + $0xc] sm:$0x1] }
 0x495   : > { %v12324_v26 = vcombine.low %v8521_v27, %v8529_v52 }
 0x496   : > { %v8750_v22 = vrot.slane %v8748_v56, 2  ;;  %v4924_v56 = vshrl.u32 %v12027_v50, 16 }
 0x497   : > { %v8610_v7 = vshll.u32 %v12324_v26, 16 }
 0x498   : > { %5241 = vrot.lane.b32.xlu1 %v5230_v29, %s13516_s3  ;;  %v12047_v29 = vcombine.low %v5054_v8, %v16782_v46  ;;  %v8696_v8 = vrot.slane %v12331_v2, 1 }
 0x49a   : > { %v5155_v15 = vshll.u32 %v12047_v29, 16  ;;  %v5153_v35 = vshrl.u32 %v12047_v29, 16  ;;  %v8608_v29 = vshrl.u32 %v12324_v26, 16 }
 0x49c   : > { %4731 = vrot.lane.b32.xlu1 %v4718_v3, %s13516_s3  ;;  %v8745_v3 = vshrl.u32 %v12339_v17, 16  ;;  %v5157_v17 = vrot.slane %v5155_v15, 1  ;;  %v8612_v15 = vrot.slane %v8610_v7, 1 }
 0x49e   : > { %v8747_v58 = vrot.slane %v8745_v3, 1 }
 0x4a0   : > { %4992 = vrot.lane.b32.xlu1 %v4977_v51, %s13516_s3  ;;  %v8606_v51 = vor.u32 %v8605_v38, %v8601_v62  ;;  %v4926_v62 = vshll.u32 %v12027_v50, 16  ;;  %v8751_v40 = vor.u32 %v8750_v22, %v8747_v58  ;;  %v5158_v38 = vor.u32 %v5157_v17, %v5153_v35 }
 0x4a1   : > { %v8613_v22 = vor.u32 %v8612_v15, %v8608_v29 }
 0x4a2   : > { %8656 = vrot.lane.b32.xlu0 %v8606_v51, %s13514_s24  ;;  %v4928_v2 = vrot.slane %v4926_v62, 1  ;;  %v8537_v51 = vld [vmem:[#allocation3 + $0x8] sm:$0xe] }
 0x4a3   : > { %v12332_v50 = vcombine.low %v8537_v51, %v8529_v52 }
 0x4a4   : > { %4988 = vrot.lane.b32.xlu1 %v4975_v18, %s13516_s3  ;;  %v16790_v18 = vld [vmem:[#allocation3 + $0x3c] sm:$0x1] }
 0x4a5   : > { %19215 = vst [vmem:[#allocation91_spill] sm:$0xff] %v16790_v18  ;;  %v12025_v36 = vcombine.low %v4799_v14, %v16790_v18  ;;  %v16799_v14 = vld [vmem:[#allocation3 + $0xc] sm:$0x3]  ;;  %v8697_v27 = vrot.slane %v12332_v50, 1 }
 0x4a6   : > { %8704 = vrot.lane.b32.xlu0 %v8696_v8, %s13516_s3  ;;  %v12340_v8 = vcombine.low %v8537_v51, %v16799_v14  ;;  %v16836_v51 = vld [vmem:[%s18910_s9] ss:$0 sm:$0xff] }
 0x4a7   : > { %v4912_v3 = vshll.u32 %v12025_v36, 16 }
 0x4a8   : > { %4687 = vrot.lane.b32.xlu1 %v4672_v23, %s13514_s24  ;;  %v12347_v23 = vcombine.low %v8552_v16, %v8544_v34  ;;  %v4910_v34 = vshrl.u32 %v12025_v36, 16  ;;  %v8753_v19 = vshrl.u32 %v12340_v8, 16  ;;  %v8756_v16 = vshll.u32 %v12340_v8, 16  ;;  %v16808_v36 = vpop.permute.xlu0 %9086 }
 0x4a9   : > { %v4914_v32 = vrot.slane %v4912_v3, 1  ;;  %19216 = vst [vmem:[#allocation92_spill] sm:$0xff] %v16808_v36  ;;  %v16827_v3 = vld [vmem:[%s18909_s8] ss:$0 sm:$0xff] }
 0x4aa   : > { %8808 = vrot.lane.b32.xlu0 %v8751_v40, %s13518_s27  ;;  %v8848_v28 = vrot.slane %v12347_v23, 2  ;;  %v8758_v17 = vrot.slane %v8756_v16, 2 }
 0x4ab   : > { %v4915_v58 = vor.u32 %v4914_v32, %v4910_v34 }
 0x4ac   : > { %5197 = vrot.lane.b32.xlu1 %v5172_v45, %s13514_s24  ;;  %v4929_v45 = vor.u32 %v4928_v2, %v4924_v56  ;;  %v16810_v40 = vpop.permute.xlu0 %9134 }
 0x4ad   : > { %19217 = vst [vmem:[#allocation93_spill] sm:$0xff] %v16810_v40 }
 0x4ae   : > { %8856 = vrot.lane.b32.xlu0 %v8848_v28, %s13520_s25 }
 0x4b0   : > { %4683 = vrot.lane.b32.xlu1 %v4658_v63, %s13514_s24  ;;  %v8755_v63 = vrot.slane %v8753_v19, 1  ;;  %v16812_v23 = vpop.permute.xlu0 %9238 }
 0x4b1   : > { %19218 = vst [vmem:[#allocation94_spill] sm:$0xff] %v16812_v23 }
 0x4b2   : > { %v8759_v62 = vor.u32 %v8758_v17, %v8755_v63 }
 0x4b4   : > { %5193 = vrot.lane.b32.xlu1 %v5158_v38, %s13514_s24  ;;  %v16814_v35 = vpop.permute.xlu0 %4982 }
 0x4b8   : > { %4944 = vrot.lane.b32.xlu1 %v4929_v45, %s13514_s24  ;;  %v16818_v26 = vpop.permute.xlu0 %4978 }
 0x4bc   : > { %4940 = vrot.lane.b32.xlu1 %v4915_v58, %s13514_s24  ;;  %v16822_v2 = vpop.permute.xlu0 %5239 }
 0x4c0   : > { %8658 = vrot.lane.b32.xlu1 %v8613_v22, %s13514_s24  ;;  %v16831_v56 = vpop.permute.xlu0 %4729 }
 0x4c1   : > { %19221 = vst [vmem:[#allocation97_spill] sm:$0xff] %v16831_v56 }
 0x4c4   : > { %8706 = vrot.lane.b32.xlu1 %v8697_v27, %s13516_s3  ;;  %v16847_v63 = vpop.permute.xlu0 %5235 }
 0x4c8   : > { %8810 = vrot.lane.b32.xlu1 %v8759_v62, %s13518_s27 }
 0x4d6   : > { %v16816_v52 = vpop.permute.xlu1 %5337 }
 0x4d7   : > { %19219 = vst [vmem:[#allocation95_spill] sm:$0xff] %v16816_v52 }
 0x4da   : > { %v16820_v38 = vpop.permute.xlu1 %5237 }
 0x4de   : > { %v16829_v28 = vpop.permute.xlu1 %4727 }
 0x4df   : > { %19220 = vst [vmem:[#allocation96_spill] sm:$0xff] %v16829_v28 }
 0x4e2   : > { %v16844_v19 = vpop.permute.xlu1 %4723 }
 0x4e3   : > { %19222 = vst [vmem:[#allocation98_spill] sm:$0xff] %v16844_v19 }
 0x511   : > { %v12768_v7 = vpop.f32.mrb[8].mxu0 }
 0x512   : > { %v8411_v45 = vmul.f32 %v12768_v7, %v16827_v3  ;;  %v8363_v32 = vpop.f32.mrb[9].mxu0 }
 0x513   : > { %v8409_v34 = vmul.f32 %v16827_v3, %v8363_v32  ;;  %v12769_v29 = vpop.f32.mrb[10].mxu0 }
 0x514   : > { %v8426_v15 = vadd.f32 %v16836_v51, %v8411_v45  ;;  %v8412_v8 = vmul.f32 %v12769_v29, %v16827_v3  ;;  %v8366_v58 = vpop.f32.mrb[11].mxu0  ;;  %v16850_v29 = vld [vmem:[#allocation3 + $0x20] sm:$0xf] }
 0x515   : > { %v8424_v22 = vadd.f32 %v16836_v51, %v8409_v34  ;;  %v8410_v50 = vmul.f32 %v16827_v3, %v8366_v58 }
 0x516   : > { %v8434_v16 = vmax.f32 %v8426_v15, 0.0  ;;  %v8427_v27 = vadd.f32 %v16836_v51, %v8412_v8  ;;  %v16856_v15 = vld [vmem:[#allocation3 + $0x20] sm:$0xf] }
 0x517   : > { %v8432_v17 = vmax.f32 %v8424_v22, 0.0  ;;  %v8425_v62 = vadd.f32 %v16836_v51, %v8410_v50  ;;  %19224 = vst [vmem:[#allocation100_spill] sm:$0xff] %v16856_v15  ;;  %v16858_v8 = vld [vmem:[#allocation3 + $0x20] sm:$0xf]  ;;  %v16862_v50 = vpop.permute.xlu1 %4984 }
 0x518   : > { %v12585_v7 = vpack.c.bf16 %v8434_v16, %v8434_v16  ;;  %v8435_v32 = vmax.f32 %v8427_v27, 0.0  ;;  %19225 = vst [vmem:[#allocation101_spill] sm:$0xff] %v16862_v50  ;;  %v16864_v16 = vld [vmem:[#allocation3 + $0x10] sm:$0xf]  ;;  %v16958_v50 = vld [vmem:[#allocation3 + $0x40] sm:$0xf] }
 0x519   : > { %v12583_v45 = vpack.c.bf16 %v8432_v17, %v8432_v17  ;;  %v8433_v49 = vmax.f32 %v8425_v62, 0.0  ;;  %19226 = vst [vmem:[#allocation102_spill] sm:$0xff] %v16864_v16  ;;  %v16867_v62 = vpop.permute.xlu0 %4725 }
 0x51a   : > { %v8476_v34 = vrot.slane %v12585_v7, 7  ;;  %v12586_v58 = vpack.c.bf16 %v8435_v32, %v8435_v32  ;;  %19227 = vst [vmem:[#allocation103_spill] sm:$0xff] %v16867_v62  ;;  %v16869_v7 = vld [vmem:[#allocation3 + $0x18] sm:$0xf]  ;;  %v16871_v32 = vld [vmem:[#allocation3 + $0x28] sm:$0xf] }
 0x51b   : > { %v8472_v42 = vrot.slane %v12583_v45, 7  ;;  %v12584_v22 = vpack.c.bf16 %v8433_v49, %v8433_v49  ;;  %19228 = vst [vmem:[#allocation104_spill] sm:$0xff] %v16869_v7  ;;  %v16874_v45 = vld [vmem:[#allocation3 + $0x18] sm:$0xf] }
 0x51c   : > { %v8477_v27 = vrot.slane %v8476_v34, 4  ;;  %8508 = vst.msk [vmem:[#allocation3 + $0x20] sm:$0xe] %vm4503_vm12, %v8476_v34  ;;  %v8478_v17 = vrot.slane %v12586_v58, 7 }
 0x51d   : > { %v8473_v37 = vrot.slane %v8472_v42, 4  ;;  %8504 = vst.msk [vmem:[#allocation3 + $0x10] sm:$0xe] %vm4503_vm12, %v8472_v42  ;;  %v8474_v49 = vrot.slane %v12584_v22, 7  ;;  %v16884_v42 = vpop.permute.xlu1 %4980  ;;  %v16886_v58 = vpop.permute.xlu0 %4934 }
 0x51e   : > { %8509 = vst.msk [vmem:[#allocation3 + $0x24] sm:$0x1] %vm650_vm15, %v8477_v27  ;;  %v8479_v41 = vrot.slane %v8478_v17, 4  ;;  %19230 = vst [vmem:[#allocation106_spill] sm:$0xff] %v16884_v42 }
 0x51f   : > { %8510 = vst.msk [vmem:[#allocation3 + $0x28] sm:$0xe] %vm4503_vm12, %v8478_v17  ;;  %v8475_v34 = vrot.slane %v8474_v49, 4  ;;  %8506 = vst.msk [vmem:[#allocation3 + $0x18] sm:$0xe] %vm4503_vm12, %v8474_v49 }
 0x520   : > { %8505 = vst.msk [vmem:[#allocation3 + $0x14] sm:$0x1] %vm650_vm15, %v8473_v37  ;;  %8511 = vst.msk [vmem:[#allocation3 + $0x2c] sm:$0x1] %vm650_vm15, %v8479_v41 }
 0x521   : > { %8507 = vst.msk [vmem:[#allocation3 + $0x1c] sm:$0x1] %vm650_vm15, %v8475_v34  ;;  %v16888_v4 = vpop.permute.xlu1 %4679  ;;  %v16890_v28 = vpop.permute.xlu0 %4930 }
 0x522   : > { %19231 = vst [vmem:[#allocation107_spill] sm:$0xff] %v16888_v4 }
 0x523   : > { %v8969_v61 = vld [vmem:[#allocation3 + $0x20] sm:$0xe] }
 0x524   : > { %v8538_v12 = vld [vmem:[#allocation3 + $0x10] sm:$0xe]  ;;  %v8985_v52 = vld [vmem:[#allocation3 + $0x20] sm:$0xc] }
 0x525   : > { %v8961_v22 = vld [vmem:[#allocation3 + $0x24] sm:$0x1]  ;;  %v8967_v5 = vld [vmem:[#allocation3 + $0x10] sm:$0xe]  ;;  %v8953_v59 = vld [vmem:[#allocation3 + $0x20] sm:$0xf]  ;;  %v16896_v7 = vpop.permute.xlu1 %5189 }
 0x526   : > { %v8977_v43 = vld [vmem:[#allocation3 + $0x24] sm:$0x3]  ;;  %v12366_v27 = vcombine.low %v8969_v61, %v8961_v22  ;;  %v8970_v41 = vld [vmem:[#allocation3 + $0x28] sm:$0xe]  ;;  %v8522_v23 = vld [vmem:[#allocation3 + $0x10] sm:$0xf] }
 0x527   : > { %v8530_v31 = vld [vmem:[#allocation3 + $0x14] sm:$0x1]  ;;  %v8962_v37 = vld [vmem:[#allocation3 + $0x2c] sm:$0x1]  ;;  %v12382_v19 = vcombine.low %v8985_v52, %v8977_v43  ;;  %v8986_v11 = vld [vmem:[#allocation3 + $0x28] sm:$0xc]  ;;  %v16912_v60 = vcombine.low %v8969_v61, %v8977_v43 }
 0x528   : > { %v12333_v17 = vcombine.low %v8538_v12, %v8530_v31  ;;  %v9129_v49 = vrot.slane %v12366_v27, 1  ;;  %v12367_v62 = vcombine.low %v8970_v41, %v8962_v37  ;;  %v8959_v56 = vld [vmem:[#allocation3 + $0x14] sm:$0x1]  ;;  %v8978_v33 = vld [vmem:[#allocation3 + $0x2c] sm:$0x3]  ;;  %v16910_v20 = vcombine.low %v8522_v23, %v8530_v31 }
 0x529   : > { %v9281_v10 = vrot.slane %v12382_v19, 2  ;;  %v12364_v16 = vcombine.low %v8967_v5, %v8959_v56  ;;  %v8975_v15 = vld [vmem:[#allocation3 + $0x14] sm:$0x3]  ;;  %v12383_v27 = vcombine.low %v8986_v11, %v8978_v33  ;;  %v16894_v52 = vld [vmem:[#allocation3 + $0x1c] sm:$0x1]  ;;  %v16905_v19 = vcombine.low %v8953_v59, %v8961_v22  ;;  %v16939_v9 = vpop.permute.xlu1 %4675 }
 0x52a   : > { %v8698_v34 = vrot.slane %v12333_v17, 1  ;;  %9140 = vrot.lane.b32.xlu1 %v9129_v49, %s13516_s3  ;;  %v9130_v4 = vrot.slane %v12367_v62, 1  ;;  %v16898_v17 = vld [vmem:[#allocation3 + $0x14] sm:$0x3]  ;;  %v8983_v49 = vld [vmem:[#allocation3 + $0x10] sm:$0xc]  ;;  %v16931_v48 = vcombine.low %v8970_v41, %v8978_v33 }
 0x52b   : > { %v16901_v44 = vld [vmem:[#allocation3 + $0x1c] sm:$0x1]  ;;  %v12380_v62 = vcombine.low %v8983_v49, %v8975_v15  ;;  %v16908_v11 = vld [vmem:[#allocation3 + $0x18] sm:$0xe]  ;;  %v8954_v40 = vld [vmem:[#allocation3 + $0x28] sm:$0xf]  ;;  %v16919_v59 = vcombine.low %v8538_v12, %v16898_v17  ;;  %v16933_v12 = vcombine.low %v8967_v5, %v8975_v15 }
 0x52c   : > { %8708 = vrot.lane.b32.xlu0 %v8698_v34, %s13516_s3  ;;  %v16903_v34 = vpop.permute.xlu0 %4681  ;;  %v9127_v36 = vrot.slane %v12364_v16, 1  ;;  %v16916_v18 = vld [vmem:[#allocation3 + $0x18] sm:$0xe]  ;;  %v16921_v22 = vcombine.low %v8954_v40, %v8962_v37  ;;  %v8951_v49 = vld [vmem:[#allocation3 + $0x10] sm:$0xf]  ;;  %v9052_v42 = vshrl.u32 %v16905_v19, 16 }
 0x52d   : > { %19232 = vst [vmem:[#allocation108_spill] sm:$0xff] %v16903_v34  ;;  %v9282_v34 = vrot.slane %v12383_v27, 2  ;;  %v12334_v31 = vcombine.low %v16916_v18, %v16901_v44  ;;  %v16925_v61 = vld [vmem:[#allocation3 + $0x1c] sm:$0x3]  ;;  %v16928_v16 = vcombine.low %v8951_v49, %v8959_v56  ;;  %v9279_v27 = vrot.slane %v12380_v62, 2  ;;  %19233 = vst [vmem:[#allocation109_spill] sm:$0xff] %v16939_v9 }
 0x52e   : > { %9292 = vrot.lane.b32.xlu1 %v9281_v10, %s13520_s25  ;;  %v12365_v10 = vcombine.low %v16908_v11, %v16894_v52  ;;  %v8984_v46 = vld [vmem:[#allocation3 + $0x18] sm:$0xc] }
 0x52f   : > { %v12381_v15 = vcombine.low %v8984_v46, %v16925_v61  ;;  %v8699_v49 = vrot.slane %v12334_v31, 1 }
 0x530   : > { %9142 = vrot.lane.b32.xlu0 %v9130_v4, %s13516_s3  ;;  %v9128_v5 = vrot.slane %v12365_v10, 1  ;;  %v16944_v41 = vpop.permute.xlu0 %5191  ;;  %v9202_v10 = vshll.u32 %v16912_v60, 16 }
 0x531   : > { %v12772_v4 = vpop.f32.mrb[12].mxu0 }
 0x532   : > { %v8415_v43 = vmul.f32 %v12772_v4, %v16827_v3  ;;  %v8379_v23 = vpop.f32.mrb[13].mxu0  ;;  %9136 = vrot.lane.b32.xlu1 %v9127_v36, %s13516_s3  ;;  %v9054_v4 = vshll.u32 %v16905_v19, 16 }
 0x533   : > { %v8413_v40 = vmul.f32 %v16827_v3, %v8379_v23  ;;  %v12773_v37 = vpop.f32.mrb[14].mxu0  ;;  %v8617_v23 = vshll.u32 %v16910_v20, 16 }
 0x534   : > { %9294 = vrot.lane.b32.xlu0 %v9282_v34, %s13520_s25  ;;  %v8430_v56 = vadd.f32 %v16836_v51, %v8415_v43  ;;  %v8416_v33 = vmul.f32 %v12773_v37, %v16827_v3  ;;  %v8382_v36 = vpop.f32.mrb[15].mxu0  ;;  %v9199_v43 = vshrl.u32 %v16912_v60, 16 }
 0x535   : > { %v8428_v34 = vadd.f32 %v16836_v51, %v8413_v40  ;;  %v8414_v62 = vmul.f32 %v16827_v3, %v8382_v36  ;;  %v9056_v40 = vrot.slane %v9054_v4, 1  ;;  %v8761_v3 = vshrl.u32 %v16919_v59, 16  ;;  %v16966_v4 = vld [vmem:[#allocation3 + $0x40] sm:$0xf] }
 0x536   : > { %v8438_v19 = vmax.f32 %v8430_v56, 0.0  ;;  %v8431_v9 = vadd.f32 %v16836_v51, %v8416_v33  ;;  %9288 = vrot.lane.b32.xlu1 %v9279_v27, %s13520_s25  ;;  %v8615_v56 = vshrl.u32 %v16910_v20, 16  ;;  %v8764_v33 = vshll.u32 %v16919_v59, 16  ;;  %v16960_v27 = vld [vmem:[#allocation3 + $0x40] sm:$0xf]  ;;  %19235 = vst [vmem:[#allocation111_spill] sm:$0xff] %v16966_v4 }
 0x537   : > { %v8436_v37 = vmax.f32 %v8428_v34, 0.0  ;;  %v8429_v46 = vadd.f32 %v16836_v51, %v8414_v62  ;;  %19234 = vst [vmem:[#allocation110_spill] sm:$0xff] %v16960_v27  ;;  %v9280_v34 = vrot.slane %v12381_v15, 2  ;;  %v8619_v54 = vrot.slane %v8617_v23, 1  ;;  %v16962_v51 = vld [vmem:[#allocation3 + $0x30] sm:$0xf] }
 0x538   : > { %9138 = vrot.lane.b32.xlu0 %v9128_v5, %s13516_s3  ;;  %v12589_v31 = vpack.c.bf16 %v8438_v19, %v8438_v19  ;;  %v8439_v36 = vmax.f32 %v8431_v9, 0.0  ;;  %v16964_v5 = vpop.permute.xlu1 %4936  ;;  %v9201_v20 = vrot.slane %v9199_v43, 1  ;;  %v9204_v59 = vrot.slane %v9202_v10, 2  ;;  %v16969_v19 = vpop.permute.xlu0 %4677  ;;  %v16975_v15 = vld [vmem:[#allocation3 + $0x30] sm:$0xf] }
 0x539   : > { %v12587_v55 = vpack.c.bf16 %v8436_v37, %v8436_v37  ;;  %v8437_v60 = vmax.f32 %v8429_v46, 0.0  ;;  %19236 = vst [vmem:[#allocation112_spill] sm:$0xff] %v16969_v19  ;;  %v16973_v37 = vld [vmem:[#allocation3 + $0x30] sm:$0xf]  ;;  %19238 = vst [vmem:[#allocation114_spill] sm:$0xff] %v16975_v15  ;;  %v9057_v27 = vor.u32 %v9056_v40, %v9052_v42  ;;  %v8763_v4 = vrot.slane %v8761_v3, 1 }
 0x53a   : > { %v8484_v62 = vrot.slane %v12589_v31, 7  ;;  %v12590_v9 = vpack.c.bf16 %v8439_v36, %v8439_v36  ;;  %8710 = vrot.lane.b32.xlu1 %v8699_v49, %s13516_s3  ;;  %19237 = vst [vmem:[#allocation113_spill] sm:$0xff] %v16973_v37  ;;  %v16978_v31 = vld [vmem:[#allocation3 + $0x38] sm:$0xf]  ;;  %v16982_v49 = vld [vmem:[#allocation3 + $0x48] sm:$0xf]  ;;  %v8620_v40 = vor.u32 %v8619_v54, %v8615_v56 }
 0x53b   : > { %v8480_v23 = vrot.slane %v12587_v55, 7  ;;  %v12588_v46 = vpack.c.bf16 %v8437_v60, %v8437_v60  ;;  %19239 = vst [vmem:[#allocation115_spill] sm:$0xff] %v16978_v31  ;;  %v16980_v36 = vld [vmem:[#allocation3 + $0x38] sm:$0xf]  ;;  %19240 = vst [vmem:[#allocation116_spill] sm:$0xff] %v16982_v49  ;;  %v8766_v19 = vrot.slane %v8764_v33, 2 }
 0x53c   : > { %9290 = vrot.lane.b32.xlu0 %v9280_v34, %s13520_s25  ;;  %v8485_v43 = vrot.slane %v8484_v62, 4  ;;  %8516 = vst.msk [vmem:[#allocation3 + $0x40] sm:$0xe] %vm4503_vm12, %v8484_v62  ;;  %v8486_v10 = vrot.slane %v12590_v9, 7  ;;  %v9040_v37 = vshll.u32 %v16928_v16, 16  ;;  %v9061_v3 = vshll.u32 %v16921_v22, 16  ;;  %v16998_v56 = vpop.permute.xlu1 %4932 }
 0x53d   : > { %v16986_v15 = vld [vmem:[#allocation3 + $0x38] sm:$0xf]  ;;  %v8481_v55 = vrot.slane %v8480_v23, 4  ;;  %8512 = vst.msk [vmem:[#allocation3 + $0x30] sm:$0xe] %vm4503_vm12, %v8480_v23  ;;  %v8482_v42 = vrot.slane %v12588_v46, 7  ;;  %v9205_v46 = vor.u32 %v9204_v59, %v9201_v20 }
 0x53e   : > { %19241 = vst [vmem:[#allocation117_spill] sm:$0xff] %v16986_v15  ;;  %8517 = vst.msk [vmem:[#allocation3 + $0x44] sm:$0x1] %vm650_vm15, %v8485_v43  ;;  %v8487_v60 = vrot.slane %v8486_v10, 4  ;;  %v8952_v34 = vld [vmem:[#allocation3 + $0x18] sm:$0xf]  ;;  %9092 = vrot.lane.b32.xlu1 %v9057_v27, %s13514_s24 }
 0x53f   : > { %8518 = vst.msk [vmem:[#allocation3 + $0x48] sm:$0xe] %vm4503_vm12, %v8486_v10  ;;  %v8523_v62 = vld [vmem:[#allocation3 + $0x18] sm:$0xf]  ;;  %v8483_v33 = vrot.slane %v8482_v42, 4  ;;  %v12357_v9 = vcombine.low %v8952_v34, %v16894_v52  ;;  %v9042_v43 = vrot.slane %v9040_v37, 1  ;;  %v8767_v52 = vor.u32 %v8766_v19, %v8763_v4 }
 0x540   : > { %8513 = vst.msk [vmem:[#allocation3 + $0x34] sm:$0x1] %vm650_vm15, %v8481_v55  ;;  %v12326_v54 = vcombine.low %v8523_v62, %v16901_v44  ;;  %8660 = vrot.lane.b32.xlu0 %v8620_v40, %s13514_s24  ;;  %8519 = vst.msk [vmem:[#allocation3 + $0x4c] sm:$0x1] %vm650_vm15, %v8487_v60  ;;  %v17001_v23 = vld [vmem:[#allocation3 + $0x1c] sm:$0x3]  ;;  %v17005_v55 = vpop.permute.xlu0 %5187 }
 0x541   : > { %8514 = vst.msk [vmem:[#allocation3 + $0x38] sm:$0xe] %vm4503_vm12, %v8482_v42  ;;  %v9183_v27 = vshrl.u32 %v16933_v12, 16  ;;  %v9186_v10 = vshll.u32 %v16933_v12, 16  ;;  %v9063_v44 = vrot.slane %v9061_v3, 1  ;;  %v9207_v42 = vshrl.u32 %v16931_v48, 16 }
 0x542   : > { %8515 = vst.msk [vmem:[#allocation3 + $0x3c] sm:$0x1] %vm650_vm15, %v8483_v33  ;;  %v9210_v40 = vshll.u32 %v16931_v48, 16  ;;  %9244 = vrot.lane.b32.xlu1 %v9205_v46, %s13518_s27  ;;  %v9038_v60 = vshrl.u32 %v16928_v16, 16  ;;  %v12342_v20 = vcombine.low %v16916_v18, %v17001_v23  ;;  %v12373_v12 = vcombine.low %v16908_v11, %v16925_v61  ;;  %v17018_v46 = vpop.permute.xlu1 %5245 }
 0x543   : > { %v9059_v59 = vshrl.u32 %v16921_v22, 16  ;;  %v9185_v19 = vrot.slane %v9183_v27, 1  ;;  %v9188_v37 = vrot.slane %v9186_v10, 2  ;;  %v8624_v3 = vshll.u32 %v12326_v54, 16  ;;  %19242 = vst [vmem:[#allocation118_spill] sm:$0xff] %v17018_v46 }
 0x544   : > { %8812 = vrot.lane.b32.xlu0 %v8767_v52, %s13518_s27  ;;  %v9043_v4 = vor.u32 %v9042_v43, %v9038_v60  ;;  %v9209_v48 = vrot.slane %v9207_v42, 1  ;;  %v9212_v62 = vrot.slane %v9210_v40, 2  ;;  %v9047_v33 = vshll.u32 %v12357_v9, 16  ;;  %v17021_v18 = vpop.permute.xlu0 %4990 }
 0x545   : > { %v9064_v34 = vor.u32 %v9063_v44, %v9059_v59  ;;  %v9189_v11 = vor.u32 %v9188_v37, %v9185_v19  ;;  %v8626_v61 = vrot.slane %v8624_v3, 1  ;;  %v8769_v16 = vshrl.u32 %v12342_v20, 16  ;;  %v8965_v3 = vld [vmem:[#allocation3 + $0x44] sm:$0x1] }
 0x546   : > { %9088 = vrot.lane.b32.xlu1 %v9043_v4, %s13514_s24  ;;  %v8772_v22 = vshll.u32 %v12342_v20, 16  ;;  %v9213_v43 = vor.u32 %v9212_v62, %v9209_v48  ;;  %v9049_v27 = vrot.slane %v9047_v33, 1  ;;  %v9191_v10 = vshrl.u32 %v12373_v12, 16  ;;  %v17026_v40 = vpop.permute.xlu1 %4735 }
 0x547   : > { %v9194_v52 = vshll.u32 %v12373_v12, 16  ;;  %v8622_v44 = vshrl.u32 %v12326_v54, 16  ;;  %v9045_v42 = vshrl.u32 %v12357_v9, 16  ;;  %19243 = vst [vmem:[#allocation119_spill] sm:$0xff] %v17026_v40  ;;  %v8771_v59 = vrot.slane %v8769_v16, 1 }
 0x548   : > { %9094 = vrot.lane.b32.xlu0 %v9064_v34, %s13514_s24  ;;  %v8774_v4 = vrot.slane %v8772_v22, 2  ;;  %v17028_v34 = vpop.permute.xlu0 %4986  ;;  %v9193_v37 = vrot.slane %v9191_v10, 1  ;;  %v8973_v54 = vld [vmem:[#allocation3 + $0x40] sm:$0xe]  ;;  %v8956_v9 = vld [vmem:[#allocation3 + $0x38] sm:$0xf] }
 0x549   : > { %v8627_v60 = vor.u32 %v8626_v61, %v8622_v44  ;;  %v9050_v19 = vor.u32 %v9049_v27, %v9045_v42  ;;  %v9196_v20 = vrot.slane %v9194_v52, 2  ;;  %v8964_v12 = vld [vmem:[#allocation3 + $0x3c] sm:$0x1]  ;;  %v12370_v62 = vcombine.low %v8973_v54, %v8965_v3  ;;  %v8972_v33 = vld [vmem:[#allocation3 + $0x38] sm:$0xe] }
 0x54a   : > { %9240 = vrot.lane.b32.xlu1 %v9189_v11, %s13518_s27  ;;  %v8775_v48 = vor.u32 %v8774_v4, %v8771_v59  ;;  %v12361_v61 = vcombine.low %v8956_v9, %v8964_v12  ;;  %v12369_v16 = vcombine.low %v8972_v33, %v8964_v12  ;;  %v8981_v22 = vld [vmem:[#allocation3 + $0x44] sm:$0x3]  ;;  %v8980_v27 = vld [vmem:[#allocation3 + $0x3c] sm:$0x3]  ;;  %v8989_v52 = vld [vmem:[#allocation3 + $0x40] sm:$0xc] }
 0x54b   : > { %v9197_v11 = vor.u32 %v9196_v20, %v9193_v37  ;;  %v9133_v44 = vrot.slane %v12370_v62, 1  ;;  %v12386_v42 = vcombine.low %v8989_v52, %v8981_v22  ;;  %v12377_v4 = vcombine.low %v8972_v33, %v8980_v27  ;;  %v8963_v37 = vld [vmem:[#allocation3 + $0x34] sm:$0x1]  ;;  %v8957_v12 = vld [vmem:[#allocation3 + $0x40] sm:$0xf] }
 0x54c   : > { %9246 = vrot.lane.b32.xlu0 %v9213_v43, %s13518_s27  ;;  %v17032_v43 = vpop.permute.xlu1 %5241  ;;  %v17035_v10 = vpop.permute.xlu0 %5247  ;;  %v9132_v59 = vrot.slane %v12369_v16, 1  ;;  %v9075_v20 = vshll.u32 %v12361_v61, 16  ;;  %v12362_v40 = vcombine.low %v8957_v12, %v8965_v3  ;;  %v8979_v16 = vld [vmem:[#allocation3 + $0x34] sm:$0x3]  ;;  %v8524_v12 = vld [vmem:[#allocation3 + $0x20] sm:$0xf] }
 0x54d   : > { %19244 = vst [vmem:[#allocation120_spill] sm:$0xff] %v17032_v43  ;;  %v9285_v31 = vrot.slane %v12386_v42, 2  ;;  %v9223_v33 = vshrl.u32 %v12377_v4, 16  ;;  %v12378_v43 = vcombine.low %v8973_v54, %v8981_v22  ;;  %v8554_v22 = vld [vmem:[#allocation3 + $0x10] sm:$0xc]  ;;  %vm5585_vm15 = vcmask 1043456  }
 0x54e   : > { %8662 = vrot.lane.b32.xlu1 %v8627_v60, %s13514_s24  ;;  %v8988_v60 = vld [vmem:[#allocation3 + $0x38] sm:$0xc]  ;;  %v9077_v52 = vrot.slane %v9075_v20, 1  ;;  %v9082_v42 = vshll.u32 %v12362_v40, 16  ;;  %vm5572_vm12 = vcmask 588800  }
 0x54f   : > { %v9225_v46 = vrot.slane %v9223_v33, 1  ;;  %v12349_v33 = vcombine.low %v8554_v22, %v16898_v17 }
 0x550   : > { %9090 = vrot.lane.b32.xlu0 %v9050_v19, %s13514_s24  ;;  %v12385_v19 = vcombine.low %v8988_v60, %v8980_v27  ;;  %v17040_v9 = vpop.permute.xlu1 %4731  ;;  %v17042_v15 = vpop.permute.xlu0 %5243  ;;  %v9226_v27 = vshll.u32 %v12377_v4, 16  ;;  %v17045_v60 = vld [vmem:[#allocation3 + $0x24] sm:$0x1]  ;;  %v8955_v4 = vld [vmem:[#allocation3 + $0x30] sm:$0xf] }
 0x551   : > { %19245 = vst [vmem:[#allocation121_spill] sm:$0xff] %v17040_v9  ;;  %19246 = vst [vmem:[#allocation122_spill] sm:$0xff] %v17042_v15  ;;  %v12327_v20 = vcombine.low %v8524_v12, %v17045_v60 }
 0x552   : > { %8814 = vrot.lane.b32.xlu1 %v8775_v48, %s13518_s27  ;;  %v8971_v48 = vld [vmem:[#allocation3 + $0x30] sm:$0xe]  ;;  %v9284_v62 = vrot.slane %v12385_v19, 2  ;;  %v9228_v19 = vrot.slane %v9226_v27, 2 }
 0x553   : > { %v8631_v27 = vshll.u32 %v12327_v20, 16  ;;  %v12376_v12 = vcombine.low %v8971_v48, %v8979_v16  ;;  %v8629_v17 = vshrl.u32 %v12327_v20, 16  ;;  %v8553_v20 = vld [vmem:[#allocation3 + $0x8] sm:$0xc] }
 0x554   : > { %9242 = vrot.lane.b32.xlu0 %v9197_v11, %s13518_s27  ;;  %v12368_v11 = vcombine.low %v8971_v48, %v8963_v37  ;;  %v17049_v15 = vpop.permute.xlu1 %4992 }
 0x555   : > { %19247 = vst [vmem:[#allocation123_spill] sm:$0xff] %v17049_v15  ;;  %v8633_v15 = vrot.slane %v8631_v27, 1  ;;  %v9218_v48 = vshll.u32 %v12376_v12, 16 }
 0x556   : > { %9148 = vrot.lane.b32.xlu1 %v9133_v44, %s13516_s3  ;;  %v9073_v44 = vshrl.u32 %v12361_v61, 16  ;;  %v9131_v9 = vrot.slane %v12368_v11, 1  ;;  %v9084_v61 = vrot.slane %v9082_v42, 1  ;;  %v9231_v11 = vshrl.u32 %v12378_v43, 16 }
 0x558   : > { %9146 = vrot.lane.b32.xlu0 %v9132_v59, %s13516_s3  ;;  %v8987_v59 = vld [vmem:[#allocation3 + $0x30] sm:$0xc]  ;;  %v9078_v49 = vor.u32 %v9077_v52, %v9073_v44  ;;  %v9229_v52 = vor.u32 %v9228_v19, %v9225_v46  ;;  %v9080_v44 = vshrl.u32 %v12362_v40, 16  ;;  %v9215_v40 = vshrl.u32 %v12376_v12, 16 }
 0x559   : > { %v12384_v3 = vcombine.low %v8987_v59, %v8979_v16  ;;  %v9234_v59 = vshll.u32 %v12378_v43, 16  ;;  %v12014_v16 = vcombine.low %v16850_v29, %v16663_v13  ;;  %v8634_v19 = vor.u32 %v8633_v15, %v8629_v17  ;;  %v17072_v13 = vld [vmem:[#allocation3 + $0x2c] sm:$0x1] }
 0x55a   : > { %9300 = vrot.lane.b32.xlu1 %v9285_v31, %s13520_s25  ;;  %v17052_v31 = vpop.permute.xlu0 %4733  ;;  %v12348_v15 = vcombine.low %v8553_v20, %v16799_v14  ;;  %v19252_v20 = vld [vmem:[#allocation101_spill] sm:$0xff] }
 0x55b   : > { %19248 = vst [vmem:[#allocation124_spill] sm:$0xff] %v17052_v31  ;;  %v9283_v54 = vrot.slane %v12384_v3, 2  ;;  %v8850_v31 = vrot.slane %v12349_v33, 2  ;;  %v5002_v22 = vsel %vm3519_vm0, %v12014_v16, %v16886_v58  ;;  %v12012_v33 = vcombine.low %v16852_v53, %v16667_v30 }
 0x55c   : > { %9298 = vrot.lane.b32.xlu0 %v9284_v62, %s13520_s25  ;;  %v12360_v62 = vcombine.low %v8955_v4, %v8963_v37  ;;  %v9085_v37 = vor.u32 %v9084_v61, %v9080_v44  ;;  %v9233_v4 = vrot.slane %v9231_v11, 1  ;;  %v5023_v29 = vsel %vm4761_vm10, %v5002_v22, %v16814_v35 }
 0x55d   : > { %v4996_v58 = vsel %vm3519_vm0, %v12012_v33, %v16890_v28  ;;  %v12038_v30 = vcombine.low %v16860_v24, %v16677_v25  ;;  %v8849_v35 = vrot.slane %v12348_v15, 2  ;;  %v19254_v15 = vld [vmem:[#allocation111_spill] sm:$0xff] }
 0x55e   : > { %9144 = vrot.lane.b32.xlu1 %v9131_v9, %s13516_s3  ;;  %v17058_v9 = vpop.permute.xlu1 %4988  ;;  %v9068_v3 = vshll.u32 %v12360_v62, 16  ;;  %v4943_v42 = vpop.permute.xlu0 %4942  ;;  %v9066_v61 = vshrl.u32 %v12360_v62, 16  ;;  %v8525_v62 = vld [vmem:[#allocation3 + $0x28] sm:$0xf]  ;;  %v5019_v14 = vsel %vm4761_vm10, %v4996_v58, %v16818_v26 }
 0x55f   : > { %v12328_v53 = vcombine.low %v8525_v62, %v17072_v13  ;;  %v5259_v28 = vsel %vm3519_vm0, %v12038_v30, %v16944_v41  ;;  %v19256_v30 = vld [vmem:[#allocation122_spill] sm:$0xff] }
 0x560   : > { %9098 = vrot.lane.b32.xlu0 %v9078_v49, %s13514_s24  ;;  %v9236_v49 = vrot.slane %v9234_v59, 2  ;;  %v9070_v43 = vrot.slane %v9068_v3, 1  ;;  %v9217_v59 = vrot.slane %v9215_v40, 1  ;;  %v12036_v3 = vcombine.low %v16874_v45, %v16692_v21 }
 0x561   : > { %v5280_v25 = vsel %vm4761_vm10, %v5259_v28, %v16822_v2  ;;  %v8636_v45 = vshrl.u32 %v12328_v53, 16  ;;  %v19258_v28 = vld [vmem:[#allocation114_spill] sm:$0xff] }
 0x562   : > { %9296 = vrot.lane.b32.xlu1 %v9283_v54, %s13520_s25  ;;  %v9237_v46 = vor.u32 %v9236_v49, %v9233_v4  ;;  %v17064_v54 = vpop.permute.xlu1 %4687  ;;  %v4939_v11 = vpop.permute.xlu0 %4938  ;;  %v8638_v49 = vshll.u32 %v12328_v53, 16  ;;  %v5253_v26 = vsel %vm3519_vm0, %v12036_v3, %v17005_v55  ;;  %v12037_v55 = vcombine.low %v16858_v8, %v16727_v1  ;;  %v8526_v8 = vld [vmem:[#allocation3 + $0x30] sm:$0xf] }
 0x563   : > { %v5276_v21 = vsel %vm4761_vm10, %v5253_v26, %v16847_v63  ;;  %v12015_v1 = vcombine.low %v16871_v32, %v16743_v57 }
 0x564   : > { %9250 = vrot.lane.b32.xlu0 %v9229_v52, %s13518_s27  ;;  %v9220_v52 = vrot.slane %v9218_v48, 2  ;;  %v12016_v48 = vcombine.low %v16962_v51, %v16730_v47  ;;  %v12042_v47 = vcombine.low %v16971_v6, %v16738_v39  ;;  %v19249_v39 = vld [vmem:[#allocation87_spill] sm:$0xff]  ;;  %v19250_v6 = vld [vmem:[#allocation105_spill] sm:$0xff] }
 0x565   : > { %v12013_v22 = vcombine.low %v19250_v6, %v19249_v39  ;;  %v19264_v39 = vld [vmem:[#allocation117_spill] sm:$0xff] }
 0x566   : > { %9100 = vrot.lane.b32.xlu1 %v9085_v37, %s13514_s24  ;;  %v17081_v27 = vpop.permute.xlu1 %5197  ;;  %v9221_v44 = vor.u32 %v9220_v52, %v9217_v59  ;;  %v5200_v12 = vpop.permute.xlu0 %5199  ;;  %v8555_v37 = vld [vmem:[#allocation3 + $0x18] sm:$0xc] }
 0x567   : > { %v12350_v4 = vcombine.low %v8555_v37, %v17001_v23  ;;  %v8640_v23 = vrot.slane %v8638_v49, 1  ;;  %v5271_v32 = vsel %vm3519_vm0, %v12042_v47, %v5200_v12  ;;  %v4999_v52 = vsel %vm3519_vm0, %v12013_v22, %v16998_v56  ;;  %v17165_v12 = vld [vmem:[#allocation3 + $0x24] sm:$0x3]  ;;  %v13342_v47 = vld [vmem:[%s18905_s4 + $0x10] sm:$0xff]  }
 0x568   : > { %8860 = vrot.lane.b32.xlu0 %v8850_v31, %s13520_s25  ;;  %v9071_v31 = vor.u32 %v9070_v43, %v9066_v61 }
 0x569   : > { %v8851_v17 = vrot.slane %v12350_v4, 2  ;;  %v8641_v40 = vor.u32 %v8640_v23, %v8636_v45 }
 0x56a   : > { %9252 = vrot.lane.b32.xlu1 %v9237_v46, %s13518_s27  ;;  %v17095_v24 = vpop.permute.xlu1 %4683  ;;  %v17102_v41 = vpop.permute.xlu0 %4685  ;;  %v12018_v46 = vcombine.low %v16958_v50, %v16722_v0  ;;  %v5256_v0 = vsel %vm3519_vm0, %v12037_v55, %v16896_v7  ;;  %v17121_v50 = vld [vmem:[#allocation3 + $0x34] sm:$0x1] }
 0x56b   : > { %v5278_v7 = vsel %vm4761_vm10, %v5256_v0, %v16820_v38  ;;  %v19260_v55 = vld [vmem:[#allocation90_spill] sm:$0xff] }
 0x56c   : > { %8664 = vrot.lane.b32.xlu0 %v8634_v19, %s13514_s24  ;;  %v5014_v2 = vsel %vm3519_vm0, %v12018_v46, %v4943_v42  ;;  %v5008_v42 = vsel %vm3519_vm0, %v12016_v48, %v4939_v11  ;;  %v5005_v19 = vsel %vm3519_vm0, %v12015_v1, %v16964_v5  ;;  %v19251_v11 = vld [vmem:[#allocation76_spill] sm:$0xff]  ;;  %v8542_v0 = vld [vmem:[#allocation3 + $0x30] sm:$0xe] }
 0x56d   : > { %v5031_v63 = vsel %vm4761_vm10, %v5014_v2, %v17021_v18  ;;  %v12329_v18 = vcombine.low %v8526_v8, %v17121_v50  ;;  %v5027_v57 = vsel %vm4761_vm10, %v5008_v42, %v17028_v34  ;;  %v12040_v38 = vcombine.low %v16980_v36, %v19251_v11  ;;  %v17185_v2 = vld [vmem:[#allocation3 + $0x3c] sm:$0x1] }
 0x56e   : > { %9096 = vrot.lane.b32.xlu1 %v9071_v31, %s13514_s24  ;;  %v5194_v43 = vpop.permute.xlu1 %5193  ;;  %v5196_v16 = vpop.permute.xlu0 %5195  ;;  %v5025_v31 = vsel %vm4761_vm10, %v5005_v19, %v19252_v20  ;;  %v5288_v34 = vsel %vm4761_vm10, %v5271_v32, %v17035_v10  ;;  %v12337_v1 = vcombine.low %v8542_v0, %v17121_v50  ;;  %v19265_v11 = vld [vmem:[#allocation123_spill] sm:$0xff] }
 0x56f   : > { %v8645_v59 = vshll.u32 %v12329_v18, 16  ;;  %v5265_v33 = vsel %vm3519_vm0, %v12040_v38, %v5196_v16  ;;  %v8643_v4 = vshrl.u32 %v12329_v18, 16  ;;  %v17190_v16 = vld [vmem:[#allocation3 + $0x34] sm:$0x3] }
 0x570   : > { %5303 = vrot.lane.b32.xlu0 %v5023_v29, %s13518_s27  ;;  %v19253_v29 = vld [vmem:[#allocation77_spill] sm:$0xff]  ;;  %v5284_v10 = vsel %vm4761_vm10, %v5265_v33, %v19256_v30  ;;  %v12345_v19 = vcombine.low %v8542_v0, %v17190_v16  ;;  %v8702_v20 = vrot.slane %v12337_v1, 1  ;;  %v17249_v0 = vld [vmem:[#allocation3 + $0x24] sm:$0x1] }
 0x571   : > { %v12041_v58 = vcombine.low %v19254_v15, %v19253_v29  ;;  %v8647_v56 = vrot.slane %v8645_v59, 1  ;;  %v13344_v59 = vld [vmem:[%s18905_s4 + $0x18] sm:$0xff]  }
 0x572   : > { %9248 = vrot.lane.b32.xlu1 %v9221_v44, %s13518_s27  ;;  %v17129_v51 = vpop.permute.xlu0 %9286  ;;  %v4945_v61 = vpop.permute.xlu1 %4944  ;;  %v19255_v44 = vld [vmem:[#allocation106_spill] sm:$0xff]  ;;  %v8793_v33 = vshrl.u32 %v12345_v19, 16  ;;  %v8796_v29 = vshll.u32 %v12345_v19, 16 }
 0x573   : > { %v5268_v62 = vsel %vm3519_vm0, %v12041_v58, %v17081_v27  ;;  %v5021_v53 = vsel %vm4761_vm10, %v4999_v52, %v19255_v44  ;;  %v19257_v27 = vld [vmem:[#allocation89_spill] sm:$0xff]  ;;  %v8648_v46 = vor.u32 %v8647_v56, %v8643_v4 }
 0x574   : > { %5299 = vrot.lane.b32.xlu0 %v5019_v14, %s13518_s27  ;;  %v13335_v14 = vld [vmem:[%s18905_s4] sm:$0xff]   ;;  %v12039_v37 = vcombine.low %v19258_v28, %v19257_v27  ;;  %v17224_v44 = vld [vmem:[#allocation3 + $0x2c] sm:$0x3]  ;;  %v8795_v56 = vrot.slane %v8793_v33, 1  ;;  %v8798_v30 = vrot.slane %v8796_v29, 2 }
 0x575   : > { %12696 = vmatprep.subr.bf16.mxu1 %v13335_v14  ;;  %v8541_v27 = vld [vmem:[#allocation3 + $0x28] sm:$0xe] }
 0x576   : > { %8858 = vrot.lane.b32.xlu1 %v8849_v35, %s13520_s25  ;;  %v17147_v5 = vpop.permute.xlu0 %8656  ;;  %v4941_v36 = vpop.permute.xlu1 %4940  ;;  %v13338_v35 = vld [vmem:[%s18905_s4 + $0x8] sm:$0xff]   ;;  %v5262_v23 = vsel %vm3519_vm0, %v12039_v37, %v5194_v43  ;;  %12697 = vmatpush3.bf16.msra.mxu1 %v13335_v14  ;;  %v8527_v43 = vld [vmem:[#allocation3 + $0x38] sm:$0xf] }
 0x577   : > { %12698 = vmatprep.subr.bf16.mxu1 %v13338_v35  ;;  %v12330_v8 = vcombine.low %v8527_v43, %v17185_v2  ;;  %v9613_v43 = vld [vmem:[#allocation3 + $0x20] sm:$0xf] }
 0x578   : > { %5327 = vrot.lane.b32.xlu0 %v5280_v25, %s13519_s22  ;;  %v19259_v25 = vld [vmem:[#allocation118_spill] sm:$0xff] }
 0x579   : > { %v5286_v26 = vsel %vm4761_vm10, %v5268_v62, %v19259_v25  ;;  %v8650_v14 = vshrl.u32 %v12330_v8, 16  ;;  %v12336_v25 = vcombine.low %v8541_v27, %v17072_v13 }
 0x57a   : > { %8862 = vrot.lane.b32.xlu1 %v8851_v17, %s13520_s25  ;;  %v17176_v49 = vpop.permute.xlu0 %8704  ;;  %v17178_v3 = vpop.permute.xlu1 %8658  ;;  %v8540_v17 = vld [vmem:[#allocation3 + $0x20] sm:$0xe]  ;;  %12699 = vmatpush3.bf16.msra.mxu1 %v13338_v35  ;;  %v17230_v35 = vld [vmem:[#allocation3 + $0x14] sm:$0x1] }
 0x57b   : > { %v12343_v45 = vcombine.low %v8540_v17, %v17165_v12  ;;  %12700 = vmatprep.subr.bf16.mxu1 %v13342_v47 }
 0x57c   : > { %5323 = vrot.lane.b32.xlu0 %v5276_v21, %s13519_s22  ;;  %v12335_v21 = vcombine.low %v8540_v17, %v17045_v60  ;;  %v19262_v60 = vld [vmem:[#allocation120_spill] sm:$0xff] }
 0x57d   : > { %v5282_v42 = vsel %vm4761_vm10, %v5262_v23, %v19262_v60  ;;  %v8780_v32 = vshll.u32 %v12343_v45, 16  ;;  %v8556_v17 = vld [vmem:[#allocation3 + $0x20] sm:$0xc]  ;;  %v9611_v23 = vld [vmem:[#allocation3 + $0x10] sm:$0xf]  ;;  %v8701_v60 = vrot.slane %v12336_v25, 1 }
 0x57e   : > { %8666 = vrot.lane.b32.xlu1 %v8641_v40, %s13514_s24  ;;  %v19261_v40 = vld [vmem:[#allocation116_spill] sm:$0xff]  ;;  %v17201_v18 = vpop.permute.xlu0 %8808  ;;  %v17206_v22 = vpop.permute.xlu1 %8706  ;;  %12701 = vmatpush3.bf16.msra.mxu1 %v13342_v47  ;;  %v9627_v25 = vld [vmem:[#allocation3 + $0x10] sm:$0xe] }
 0x57f   : > { %v12019_v48 = vcombine.low %v19261_v40, %v19260_v55  ;;  %12702 = vmatprep.subr.bf16.mxu1 %v13344_v59  ;;  %v17245_v55 = vld [vmem:[#allocation3 + $0x3c] sm:$0x3]  ;;  %v12414_v40 = vcombine.low %v9611_v23, %v17230_v35 }
 0x580   : > { %5311 = vrot.lane.b32.xlu0 %v5031_v63, %s13518_s27 }
 0x581   : > { %v5017_v63 = vsel %vm3519_vm0, %v12019_v48, %v4945_v61  ;;  %v19263_v61 = vld [vmem:[#allocation91_spill] sm:$0xff] }
 0x582   : > { %5325 = vrot.lane.b32.xlu1 %v5278_v7, %s13519_s22  ;;  %v8700_v7 = vrot.slane %v12335_v21, 1  ;;  %v12017_v6 = vcombine.low %v19264_v39, %v19263_v61  ;;  %v5033_v38 = vsel %vm4761_vm10, %v5017_v63, %v19265_v11  ;;  %v17218_v15 = vpop.permute.xlu0 %8856  ;;  %v17220_v58 = vpop.permute.xlu1 %8810  ;;  %12703 = vmatpush3.bf16.msra.mxu1 %v13344_v59  ;;  %v8799_v21 = vor.u32 %v8798_v30, %v8795_v56  ;;  %v8543_v48 = vld [vmem:[#allocation3 + $0x38] sm:$0xe]  ;;  %v17272_v56 = vld [vmem:[#allocation3 + $0x1c] sm:$0x1] }
 0x583   : > { %v12338_v13 = vcombine.low %v8543_v48, %v17185_v2  ;;  %v8557_v30 = vld [vmem:[#allocation3 + $0x28] sm:$0xc] }
 0x584   : > { %5307 = vrot.lane.b32.xlu0 %v5027_v57, %s13518_s27  ;;  %v8777_v57 = vshrl.u32 %v12343_v45, 16  ;;  %v5011_v50 = vsel %vm3519_vm0, %v12017_v6, %v4941_v36  ;;  %v12351_v45 = vcombine.low %v8556_v17, %v17165_v12  ;;  %v12346_v12 = vcombine.low %v8543_v48, %v17245_v55  ;;  %v9629_v48 = vld [vmem:[#allocation3 + $0x20] sm:$0xe] }
 0x585   : > { %v5029_v36 = vsel %vm4761_vm10, %v5011_v50, %v17058_v9  ;;  %v13354_v9 = vld [vmem:[%s18911_s10 + $0x14] sm:$0xff]   ;;  %v8703_v2 = vrot.slane %v12338_v13, 1 }
 0x586   : > { %5305 = vrot.lane.b32.xlu1 %v5025_v31, %s13518_s27  ;;  %v8652_v31 = vshll.u32 %v12330_v8, 16  ;;  %v8779_v52 = vrot.slane %v8777_v57, 1  ;;  %v9694_v57 = vshll.u32 %v12414_v40, 16  ;;  %v8801_v50 = vshrl.u32 %v12346_v12, 16 }
 0x587   : > { %v8804_v11 = vshll.u32 %v12346_v12, 16  ;;  %v4521_v12 = vld [vmem:[#allocation3 + $0x8] sm:$0xf] }
 0x588   : > { %5335 = vrot.lane.b32.xlu0 %v5288_v34, %s13519_s22  ;;  %v8782_v34 = vrot.slane %v8780_v32, 2  ;;  %v8654_v62 = vrot.slane %v8652_v31, 1  ;;  %v12416_v32 = vcombine.low %v9613_v43, %v17249_v0  ;;  %v9696_v31 = vrot.slane %v9694_v57, 1  ;;  %v8559_v43 = vld [vmem:[#allocation3 + $0x38] sm:$0xc] }
 0x589   : > { %v8803_v33 = vrot.slane %v8801_v50, 1  ;;  %v8806_v29 = vrot.slane %v8804_v11, 2 }
 0x58a   : > { %5301 = vrot.lane.b32.xlu1 %v5021_v53, %s13518_s27  ;;  %v8783_v53 = vor.u32 %v8782_v34, %v8779_v52  ;;  %v8655_v4 = vor.u32 %v8654_v62, %v8650_v14  ;;  %v9708_v59 = vshll.u32 %v12416_v32, 16  ;;  %v9706_v14 = vshrl.u32 %v12416_v32, 16 }
 0x58c   : > { %5331 = vrot.lane.b32.xlu0 %v5284_v10, %s13519_s22  ;;  %v13346_v10 = vld [vmem:[%s18905_s4 + $0x20] ss:$0 sps:$4 sm:$0xff]  }
 0x58d   : > { %12929 = vmatprep.subr.msk.bf16.mxu1 %vm5585_vm15, %v13346_v10  ;;  %v5587_v28 = vsel %vm5585_vm15, %v13346_v10, 0  ;;  %v17275_v10 = vld [vmem:[#allocation3 + $0x14] sm:$0x3] }
 0x58e   : > { %5333 = vrot.lane.b32.xlu1 %v5286_v26, %s13519_s22  ;;  %v12344_v26 = vcombine.low %v8541_v27, %v17224_v44  ;;  %12705 = vmatpush3.bf16.msra.mxu1 %v5587_v28  ;;  %v9612_v27 = vld [vmem:[#allocation3 + $0x18] sm:$0xf] }
 0x58f   : > { %12774 = vmatprep.subr.bf16.mxu1 %v13354_v9  ;;  %v12352_v9 = vcombine.low %v8557_v30, %v17224_v44  ;;  %v17289_v44 = vld [vmem:[#allocation3 + $0x24] sm:$0x3] }
 0x590   : > { %8668 = vrot.lane.b32.xlu0 %v8648_v46, %s13514_s24  ;;  %v8785_v1 = vshrl.u32 %v12344_v26, 16  ;;  %v8788_v8 = vshll.u32 %v12344_v26, 16  ;;  %v12415_v26 = vcombine.low %v9612_v27, %v17272_v56  ;;  %v12432_v32 = vcombine.low %v9629_v48, %v17289_v44  ;;  %v19280_v30 = vld [vmem:[#allocation92_spill] sm:$0xff] }
 0x591   : > { %v8853_v13 = vrot.slane %v12352_v9, 2 }
 0x592   : > { %5329 = vrot.lane.b32.xlu1 %v5282_v42, %s13519_s22  ;;  %v8558_v42 = vld [vmem:[#allocation3 + $0x30] sm:$0xc]  ;;  %v8787_v39 = vrot.slane %v8785_v1, 1  ;;  %v8790_v6 = vrot.slane %v8788_v8, 2  ;;  %v12354_v1 = vcombine.low %v8559_v43, %v17245_v55  ;;  %v9701_v8 = vshll.u32 %v12415_v26, 16  ;;  %s13521_s22 = smov 120  }
 0x593   : > { %v12353_v19 = vcombine.low %v8558_v42, %v17190_v16  ;;  %v9692_v16 = vshrl.u32 %v12414_v40, 16  ;;  %v17286_v40 = vld [vmem:[#allocation3 + $0x2c] sm:$0x1]  ;;  %v17316_v43 = vld [vmem:[#allocation3 + $0x1c] sm:$0x3] }
 0x594   : > { %8712 = vrot.lane.b32.xlu0 %v8700_v7, %s13516_s3  ;;  %v8852_v7 = vrot.slane %v12351_v45, 2  ;;  %v8791_v34 = vor.u32 %v8790_v6, %v8787_v39  ;;  %v12430_v45 = vcombine.low %v9627_v25, %v17275_v10  ;;  %v13464_v6 = vld [vmem:[#allocation3 + $0xc] sm:$0x1]  ;;  %v8855_v55 = vrot.slane %v12354_v1, 2 }
 0x595   : > { %v9697_v62 = vor.u32 %v9696_v31, %v9692_v16  ;;  %v11988_v50 = vcombine.low %v4521_v12, %v13464_v6  ;;  %v19284_v12 = vld [vmem:[#allocation93_spill] sm:$0xff] }
 0x596   : > { %5313 = vrot.lane.b32.xlu1 %v5033_v38, %s13518_s27  ;;  %v9839_v39 = vshll.u32 %v12430_v45, 16 }
 0x598   : > { %8716 = vrot.lane.b32.xlu0 %v8702_v20, %s13516_s3  ;;  %v8854_v20 = vrot.slane %v12353_v19, 2 }
 0x59a   : > { %5309 = vrot.lane.b32.xlu1 %v5029_v36, %s13518_s27 }
 0x59c   : > { %8816 = vrot.lane.b32.xlu0 %v8783_v53, %s13518_s27  ;;  %v17238_v37 = vpop.permute.xlu1 %9140  ;;  %v9710_v53 = vrot.slane %v9708_v59, 1 }
 0x59d   : > { %19266 = vst [vmem:[#allocation87_spill] sm:$0xff] %v17238_v37 }
 0x59e   : > { %v17242_v46 = vpop.permute.xlu0 %8708  ;;  %8670 = vrot.lane.b32.xlu1 %v8655_v4, %s13514_s24  ;;  %v8807_v4 = vor.u32 %v8806_v29, %v8803_v33  ;;  %v9711_v23 = vor.u32 %v9710_v53, %v9706_v14  ;;  %v9852_v33 = vshrl.u32 %v12432_v32, 16  ;;  %v9855_v29 = vshll.u32 %v12432_v32, 16  ;;  %v13465_v53 = vld [vmem:[#allocation3 + $0x8] sm:$0xf] }
 0x59f   : > { %19267 = vst [vmem:[#allocation105_spill] sm:$0xff] %v17242_v46  ;;  %v9304_v14 = vsel %vm3519_vm0, %v13465_v53, %v19280_v30  ;;  %v19291_v53 = vld [vmem:[#allocation88_spill] sm:$0xff] }
 0x5a0   : > { %8820 = vrot.lane.b32.xlu0 %v8799_v21, %s13518_s27  ;;  %v17253_v63 = vpop.permute.xlu1 %9292  ;;  %v12422_v21 = vcombine.low %v9627_v25, %v17230_v35  ;;  %v12424_v35 = vcombine.low %v9629_v48, %v17249_v0  ;;  %v19282_v25 = vld [vmem:[#allocation68_spill] sm:$0xff]  ;;  %v9854_v48 = vrot.slane %v9852_v33, 1  ;;  %v9327_v1 = vsel %vm4761_vm10, %v9304_v14, %v19284_v12  ;;  %v17337_v33 = vld [vmem:[#allocation3 + $0x2c] sm:$0x3] }
 0x5a1   : > { %19268 = vst [vmem:[#allocation76_spill] sm:$0xff] %v17253_v63  ;;  %v19292_v30 = vld [vmem:[#allocation104_spill] sm:$0xff] }
 0x5a2   : > { %v17256_v47 = vpop.permute.xlu0 %9142  ;;  %8714 = vrot.lane.b32.xlu1 %v8701_v60, %s13516_s3  ;;  %v9614_v60 = vld [vmem:[#allocation3 + $0x28] sm:$0xf]  ;;  %v9787_v57 = vrot.slane %v12422_v21, 1  ;;  %v9789_v0 = vrot.slane %v12424_v35, 1  ;;  %v9628_v35 = vld [vmem:[#allocation3 + $0x18] sm:$0xe]  ;;  %v11990_v14 = vcombine.low %v19292_v30, %v19291_v53 }
 0x5a3   : > { %19269 = vst [vmem:[#allocation101_spill] sm:$0xff] %v17256_v47  ;;  %v12431_v6 = vcombine.low %v9628_v35, %v17316_v43 }
 0x5a4   : > { %8864 = vrot.lane.b32.xlu0 %v8852_v7, %s13520_s25  ;;  %v17262_v61 = vpop.permute.xlu1 %9136  ;;  %v12417_v7 = vcombine.low %v9614_v60, %v17286_v40  ;;  %v17319_v60 = vld [vmem:[#allocation3 + $0x34] sm:$0x1] }
 0x5a5   : > { %19270 = vst [vmem:[#allocation77_spill] sm:$0xff] %v17262_v61  ;;  %v17680_v61 = vld [vmem:[#allocation3 + $0x44] sm:$0x3] }
 0x5a6   : > { %v17264_v38 = vpop.permute.xlu0 %9294  ;;  %8718 = vrot.lane.b32.xlu1 %v8703_v2, %s13516_s3  ;;  %v9836_v2 = vshrl.u32 %v12430_v45, 16  ;;  %v9715_v31 = vshll.u32 %v12417_v7, 16 }
 0x5a7   : > { %19271 = vst [vmem:[#allocation111_spill] sm:$0xff] %v17264_v38 }
 0x5a8   : > { %8868 = vrot.lane.b32.xlu0 %v8854_v20, %s13520_s25  ;;  %v17268_v52 = vpop.permute.xlu1 %9288  ;;  %v9703_v20 = vrot.slane %v9701_v8, 1  ;;  %v9838_v16 = vrot.slane %v9836_v2, 1  ;;  %v19285_v8 = vld [vmem:[#allocation69_spill] sm:$0xff] }
 0x5a9   : > { %19272 = vst [vmem:[#allocation106_spill] sm:$0xff] %v17268_v52 }
 0x5aa   : > { %v17270_v36 = vpop.permute.xlu0 %9138  ;;  %8818 = vrot.lane.b32.xlu1 %v8791_v34, %s13518_s27  ;;  %v9841_v34 = vrot.slane %v9839_v39, 2  ;;  %v12423_v39 = vcombine.low %v9628_v35, %v17272_v56  ;;  %v19298_v35 = vld [vmem:[#allocation85_spill] sm:$0xff] }
 0x5ab   : > { %19273 = vst [vmem:[#allocation122_spill] sm:$0xff] %v17270_v36  ;;  %v17629_v36 = vld [vmem:[#allocation3 + $0x3c] sm:$0x3] }
 0x5ac   : > { %9747 = vrot.lane.b32.xlu0 %v9697_v62, %s13514_s24  ;;  %v17279_v28 = vpop.permute.xlu1 %8710  ;;  %v9699_v62 = vshrl.u32 %v12415_v26, 16  ;;  %v9842_v45 = vor.u32 %v9841_v34, %v9838_v16  ;;  %v9713_v26 = vshrl.u32 %v12417_v7, 16  ;;  %v9643_v7 = vld [vmem:[#allocation3 + $0x10] sm:$0xc] }
 0x5ad   : > { %19274 = vst [vmem:[#allocation89_spill] sm:$0xff] %v17279_v28  ;;  %v12438_v34 = vcombine.low %v9643_v7, %v17275_v10  ;;  %v9630_v10 = vld [vmem:[#allocation3 + $0x28] sm:$0xe]  ;;  %v19300_v7 = vld [vmem:[#allocation79_spill] sm:$0xff] }
 0x5ae   : > { %v17282_v17 = vpop.permute.xlu0 %9290  ;;  %8822 = vrot.lane.b32.xlu1 %v8807_v4, %s13518_s27  ;;  %v9704_v27 = vor.u32 %v9703_v20, %v9699_v62  ;;  %v9717_v4 = vrot.slane %v9715_v31, 1  ;;  %v19290_v62 = vld [vmem:[#allocation94_spill] sm:$0xff]  ;;  %v12433_v30 = vcombine.low %v9630_v10, %v17337_v33 }
 0x5af   : > { %19275 = vst [vmem:[#allocation114_spill] sm:$0xff] %v17282_v17  ;;  %v9343_v56 = vsel %vm4114_vm3, %v9327_v1, %v19290_v62  ;;  %v9645_v62 = vld [vmem:[#allocation3 + $0x20] sm:$0xc]  ;;  %v9650_v17 = vld [vmem:[#allocation3 + $0x48] sm:$0xc] }
 0x5b0   : > { %9751 = vrot.lane.b32.xlu0 %v9711_v23, %s13514_s24  ;;  %v17292_v42 = vpop.permute.xlu1 %9092  ;;  %v4739_v23 = vsel %vm3519_vm0, %v11988_v50, %v19282_v25  ;;  %v9718_v2 = vor.u32 %v9717_v4, %v9713_v26  ;;  %v9615_v50 = vld [vmem:[#allocation3 + $0x30] sm:$0xf]  ;;  %v19294_v4 = vld [vmem:[#allocation100_spill] sm:$0xff] }
 0x5b1   : > { %19276 = vst [vmem:[#allocation118_spill] sm:$0xff] %v17292_v42  ;;  %v10197_v42 = vld [vmem:[#allocation3 + $0x20] sm:$0xc] }
 0x5b2   : > { %v17297_v19 = vpop.permute.xlu0 %8660  ;;  %8866 = vrot.lane.b32.xlu1 %v8853_v13, %s13520_s25  ;;  %v9857_v13 = vrot.slane %v9855_v29, 2  ;;  %v17340_v29 = vcombine.low %v9615_v50, %v17319_v60  ;;  %v19301_v50 = vld [vmem:[#allocation110_spill] sm:$0xff] }
 0x5b3   : > { %19277 = vst [vmem:[#allocation90_spill] sm:$0xff] %v17297_v19 }
 0x5b4   : > { %9795 = vrot.lane.b32.xlu0 %v9787_v57, %s13516_s3  ;;  %v17302_v11 = vpop.permute.xlu1 %9244  ;;  %v17326_v57 = vsel %vm4761_vm10, %v4739_v23, %v19285_v8  ;;  %v9858_v16 = vor.u32 %v9857_v13, %v9854_v48  ;;  %v19295_v23 = vld [vmem:[#allocation83_spill] sm:$0xff]  ;;  %v17351_v48 = vld [vmem:[#allocation3 + $0x44] sm:$0x1] }
 0x5b5   : > { %19278 = vst [vmem:[#allocation116_spill] sm:$0xff] %v17302_v11  ;;  %v19297_v13 = vld [vmem:[#allocation108_spill] sm:$0xff]  ;;  %v19299_v8 = vld [vmem:[#allocation115_spill] sm:$0xff]  ;;  %v10170_v11 = vld [vmem:[#allocation3 + $0x48] sm:$0xf] }
 0x5b6   : > { %v17304_v59 = vpop.permute.xlu0 %8812  ;;  %8870 = vrot.lane.b32.xlu1 %v8855_v55, %s13520_s25  ;;  %v19287_v55 = vld [vmem:[#allocation73_spill] sm:$0xff]  ;;  %v11994_v1 = vcombine.low %v19299_v8, %v19298_v35  ;;  %v9722_v35 = vshll.u32 %v17340_v29, 16 }
 0x5b7   : > { %19279 = vst [vmem:[#allocation120_spill] sm:$0xff] %v17304_v59  ;;  %v9863_v59 = vshll.u32 %v12433_v30, 16 }
 0x5b8   : > { %9799 = vrot.lane.b32.xlu0 %v9789_v0, %s13516_s3  ;;  %v17310_v9 = vpop.permute.xlu1 %9088  ;;  %v19288_v0 = vld [vmem:[#allocation99_spill] sm:$0xff]  ;;  %v4757_v28 = vsel %vm3519_vm0, %v11994_v1, %v17102_v41  ;;  %v17395_v41 = vld [vmem:[#allocation3 + $0x34] sm:$0x3] }
 0x5b9   : > { %19281 = vst [vmem:[#allocation91_spill] sm:$0xff] %v17310_v9  ;;  %v11992_v20 = vcombine.low %v19288_v0, %v19287_v55  ;;  %v11995_v55 = vcombine.low %v19301_v50, %v19300_v7  ;;  %v12425_v0 = vcombine.low %v9630_v10, %v17286_v40  ;;  %v19304_v40 = vld [vmem:[#allocation112_spill] sm:$0xff]  ;;  %v19305_v7 = vld [vmem:[#allocation78_spill] sm:$0xff]  ;;  %v17397_v1 = vld [vmem:[#allocation3 + $0x3c] sm:$0x1] }
 0x5ba   : > { %v17314_v21 = vpop.permute.xlu0 %9094  ;;  %9749 = vrot.lane.b32.xlu1 %v9704_v27, %s13514_s24  ;;  %v19293_v27 = vld [vmem:[#allocation72_spill] sm:$0xff]  ;;  %v4745_v8 = vsel %vm3519_vm0, %v11990_v14, %v19304_v40  ;;  %v10200_v9 = vld [vmem:[#allocation3 + $0x38] sm:$0xc] }
 0x5bb   : > { %19283 = vst [vmem:[#allocation117_spill] sm:$0xff] %v17314_v21  ;;  %v11991_v25 = vcombine.low %v19294_v4, %v19293_v27  ;;  %v4751_v12 = vsel %vm3519_vm0, %v11992_v20, %v19297_v13  ;;  %v9844_v27 = vshrl.u32 %v12431_v6, 16  ;;  %v9847_v4 = vshll.u32 %v12431_v6, 16  ;;  %v19307_v6 = vld [vmem:[#allocation97_spill] sm:$0xff] }
 0x5bc   : > { %9899 = vrot.lane.b32.xlu0 %v9842_v45, %s13518_s27  ;;  %v17328_v32 = vpop.permute.xlu1 %9240  ;;  %v19296_v45 = vld [vmem:[#allocation102_spill] sm:$0xff]  ;;  %v12440_v13 = vcombine.low %v9645_v62, %v17289_v44  ;;  %v17378_v10 = vsel %vm4761_vm10, %v4751_v12, %v19307_v6  ;;  %v19309_v62 = vld [vmem:[#allocation109_spill] sm:$0xff]  ;;  %v9790_v14 = vrot.slane %v12425_v0, 1  ;;  %v13466_v12 = vld [vmem:[#allocation3] sm:$0xf] }
 0x5bd   : > { %19286 = vst [vmem:[#allocation123_spill] sm:$0xff] %v17328_v32  ;;  %v11989_v26 = vcombine.low %v19296_v45, %v19295_v23  ;;  %v9617_v23 = vld [vmem:[#allocation3 + $0x40] sm:$0xf]  ;;  %v9939_v45 = vrot.slane %v12438_v34, 2  ;;  %v19308_v34 = vld [vmem:[#allocation107_spill] sm:$0xff]  ;;  %v8874_v6 = vsel %vm3519_vm0, %v13466_v12, %v17147_v5  ;;  %v17419_v12 = vsel %vm8928_vm2, %v9343_v56, %v17129_v51 }
 0x5be   : > { %v17334_v31 = vpop.permute.xlu0 %9246  ;;  %9753 = vrot.lane.b32.xlu1 %v9718_v2, %s13514_s24  ;;  %v9788_v2 = vrot.slane %v12423_v39, 1  ;;  %v19306_v39 = vld [vmem:[#allocation113_spill] sm:$0xff]  ;;  %v4748_v44 = vsel %vm3519_vm0, %v11991_v25, %v19308_v34  ;;  %v9941_v34 = vrot.slane %v12440_v13, 2  ;;  %v19312_v0 = vld [vmem:[#allocation103_spill] sm:$0xff]  ;;  %v19314_v5 = vld [vmem:[#allocation96_spill] sm:$0xff]  ;;  %19316 = vst [vmem:[#allocation99_spill] sm:$0xff] %v17419_v12 }
 0x5bf   : > { %19289 = vst [vmem:[#allocation92_spill] sm:$0xff] %v17334_v31  ;;  %v11993_v50 = vcombine.low %v19306_v39, %v19305_v7  ;;  %v9846_v7 = vrot.slane %v9844_v27, 1  ;;  %v9860_v39 = vshrl.u32 %v12433_v30, 16  ;;  %v17401_v27 = vsel %vm4761_vm10, %v4745_v8, %v19312_v0  ;;  %v19313_v30 = vld [vmem:[#allocation124_spill] sm:$0xff]  ;;  %v19315_v13 = vld [vmem:[#allocation98_spill] sm:$0xff] }
 0x5c0   : > { %9903 = vrot.lane.b32.xlu0 %v9858_v16, %s13518_s27  ;;  %v17361_v53 = vpop.permute.xlu1 %8662  ;;  %v17369_v16 = vcombine.low %v9617_v23, %v17351_v48  ;;  %v4742_v23 = vsel %vm3519_vm0, %v11989_v26, %v19309_v62  ;;  %v9724_v26 = vrot.slane %v9722_v35, 1  ;;  %v13467_v8 = vld [vmem:[#allocation3 + $0x8] sm:$0xf]  ;;  %v9631_v0 = vld [vmem:[#allocation3 + $0x30] sm:$0xe]  ;;  %v9865_v51 = vrot.slane %v9863_v59, 2 }
 0x5c1   : > { %19302 = vst [vmem:[#allocation68_spill] sm:$0xff] %v17361_v53  ;;  %v17413_v35 = vsel %vm4761_vm10, %v4742_v23, %v19315_v13  ;;  %v8897_v23 = vsel %vm4761_vm10, %v8874_v6, %v17176_v49  ;;  %v9616_v56 = vld [vmem:[#allocation3 + $0x38] sm:$0xf]  ;;  %v17431_v13 = vld [vmem:[#allocation3 + $0x4c] sm:$0x1]  ;;  %v4754_v49 = vsel %vm3519_vm0, %v11993_v50, %v17095_v24  ;;  %v12426_v24 = vcombine.low %v9631_v0, %v17319_v60 }
 0x5c2   : > { %v17364_v20 = vpop.permute.xlu0 %9090  ;;  %9797 = vrot.lane.b32.xlu1 %v9788_v2, %s13516_s3  ;;  %v9849_v2 = vrot.slane %v9847_v4, 2  ;;  %v9736_v62 = vshll.u32 %v17369_v16, 16  ;;  %v17405_v4 = vsel %vm4761_vm10, %v4757_v28, %v19313_v30  ;;  %v8877_v28 = vsel %vm3519_vm0, %v13467_v8, %v17178_v3  ;;  %v17425_v30 = vld [vmem:[#allocation3 + $0x44] sm:$0x3]  ;;  %v9633_v8 = vld [vmem:[#allocation3 + $0x40] sm:$0xe] }
 0x5c3   : > { %19303 = vst [vmem:[#allocation93_spill] sm:$0xff] %v17364_v20  ;;  %v17437_v46 = vcombine.low %v9616_v56, %v17397_v1  ;;  %v9644_v59 = vld [vmem:[#allocation3 + $0x18] sm:$0xc]  ;;  %v9646_v50 = vld [vmem:[#allocation3 + $0x28] sm:$0xc] }
 0x5c4   : > { %9947 = vrot.lane.b32.xlu0 %v9939_v45, %s13520_s25  ;;  %v17387_v40 = vpop.permute.xlu1 %8814  ;;  %v17409_v45 = vsel %vm4761_vm10, %v4748_v44, %v19314_v5  ;;  %v9720_v44 = vshrl.u32 %v17340_v29, 16  ;;  %v12434_v29 = vcombine.low %v9631_v0, %v17395_v41  ;;  %v19319_v6 = vld [vmem:[#allocation119_spill] sm:$0xff]  ;;  %v17591_v31 = vld [vmem:[#allocation3 + $0x4c] sm:$0x1]  ;;  %v10186_v12 = vld [vmem:[#allocation3 + $0x48] sm:$0xe] }
 0x5c5   : > { %19310 = vst [vmem:[#allocation69_spill] sm:$0xff] %v17387_v40 }
 0x5c6   : > { %v17391_v25 = vpop.permute.xlu0 %9242  ;;  %9801 = vrot.lane.b32.xlu1 %v9790_v14, %s13516_s3  ;;  %v4760_v14 = vsel %vm3519_vm0, %v11995_v55, %v17064_v54  ;;  %v9850_v54 = vor.u32 %v9849_v2, %v9846_v7  ;;  %v9862_v55 = vrot.slane %v9860_v39, 1  ;;  %v9725_v3 = vor.u32 %v9724_v26, %v9720_v44  ;;  %v9618_v39 = vld [vmem:[#allocation3 + $0x48] sm:$0xf] }
 0x5c7   : > { %19311 = vst [vmem:[#allocation73_spill] sm:$0xff] %v17391_v25  ;;  %v8899_v7 = vsel %vm4761_vm10, %v8877_v28, %v17206_v22  ;;  %v12436_v2 = vcombine.low %v9633_v8, %v17425_v30  ;;  %v17447_v26 = vsel %vm4761_vm10, %v4760_v14, %v19319_v6  ;;  %v12439_v44 = vcombine.low %v9644_v59, %v17316_v43  ;;  %v9632_v59 = vld [vmem:[#allocation3 + $0x38] sm:$0xe]  ;;  %v10198_v25 = vld [vmem:[#allocation3 + $0x28] sm:$0xc] }
 0x5c8   : > { %9951 = vrot.lane.b32.xlu0 %v9941_v34, %s13520_s25  ;;  %v17429_v5 = vpop.permute.xlu1 %9148  ;;  %v9738_v34 = vrot.slane %v9736_v62, 1  ;;  %v9734_v62 = vshrl.u32 %v17369_v16, 16  ;;  %v17454_v22 = vcombine.low %v9618_v39, %v17431_v13  ;;  %v8913_v28 = vsel %vm4114_vm3, %v8897_v23, %v17201_v18  ;;  %v17465_v39 = vld [vmem:[#allocation3 + $0x3c] sm:$0x3] }
 0x5c9   : > { %19317 = vst [vmem:[#allocation94_spill] sm:$0xff] %v17429_v5  ;;  %v9866_v56 = vor.u32 %v9865_v51, %v9862_v55  ;;  %v12441_v14 = vcombine.low %v9646_v50, %v17337_v33  ;;  %v9729_v43 = vshll.u32 %v17437_v46, 16  ;;  %v9868_v60 = vshrl.u32 %v12434_v29, 16  ;;  %v17472_v55 = vld [vmem:[#allocation3 + $0x4c] sm:$0x3] }
 0x5ca   : > { %v17433_v40 = vpop.permute.xlu0 %9146  ;;  %9901 = vrot.lane.b32.xlu1 %v9850_v54, %s13518_s27  ;;  %v9739_v16 = vor.u32 %v9738_v34, %v9734_v62  ;;  %v9871_v0 = vshll.u32 %v12434_v29, 16  ;;  %v17469_v18 = vsel %vm4114_vm3, %v8899_v7, %v17220_v58  ;;  %v9884_v23 = vshrl.u32 %v12436_v2, 16  ;;  %v19323_v51 = vld [vmem:[#allocation121_spill] sm:$0xff] }
 0x5cb   : > { %19318 = vst [vmem:[#allocation88_spill] sm:$0xff] %v17433_v40  ;;  %19322 = vst [vmem:[#allocation100_spill] sm:$0xff] %v17469_v18  ;;  %v9887_v33 = vshll.u32 %v12436_v2, 16  ;;  %v17478_v34 = vsel %vm4761_vm10, %v4754_v49, %v19323_v51  ;;  %v17482_v29 = vsel %vm8928_vm2, %v8913_v28, %v17218_v15  ;;  %v9940_v58 = vrot.slane %v12439_v44, 2  ;;  %v17486_v62 = vld [vmem:[#allocation3 + $0x2c] sm:$0x1] }
 0x5cc   : > { %9755 = vrot.lane.b32.xlu0 %v9725_v3, %s13514_s24  ;;  %v17458_v54 = vpop.permute.xlu1 %9300  ;;  %v12428_v3 = vcombine.low %v9633_v8, %v17351_v48  ;;  %v17474_v48 = vld [vmem:[#allocation3 + $0x1c] sm:$0x1]  ;;  %19324 = vst [vmem:[#allocation83_spill] sm:$0xff] %v17478_v34  ;;  %19325 = vst [vmem:[#allocation102_spill] sm:$0xff] %v17482_v29  ;;  %v9791_v8 = vrot.slane %v12426_v24, 1  ;;  %v9743_v7 = vshll.u32 %v17454_v22, 16  ;;  %v12427_v53 = vcombine.low %v9632_v59, %v17397_v1 }
 0x5cd   : > { %19320 = vst [vmem:[#allocation104_spill] sm:$0xff] %v17458_v54  ;;  %v9942_v50 = vrot.slane %v12441_v14, 2  ;;  %v12435_v49 = vcombine.low %v9632_v59, %v17465_v39  ;;  %v9634_v51 = vld [vmem:[#allocation3 + $0x48] sm:$0xe]  ;;  %v9731_v28 = vrot.slane %v9729_v43, 1  ;;  %v9873_v44 = vrot.slane %v9871_v0, 2 }
 0x5ce   : > { %v17462_v6 = vpop.permute.xlu0 %9298  ;;  %9905 = vrot.lane.b32.xlu1 %v9866_v56, %s13518_s27  ;;  %v9793_v56 = vrot.slane %v12428_v3, 1  ;;  %v12437_v24 = vcombine.low %v9634_v51, %v17472_v55  ;;  %v10166_v29 = vld [vmem:[#allocation3 + $0x28] sm:$0xf]  ;;  %v17496_v19 = vrot.slane %v9884_v23, 1  ;;  %v17498_v14 = vrot.slane %v9887_v33, 2 }
 0x5cf   : > { %19321 = vst [vmem:[#allocation72_spill] sm:$0xff] %v17462_v6  ;;  %v10164_v6 = vld [vmem:[#allocation3 + $0x18] sm:$0xf]  ;;  %v9647_v3 = vld [vmem:[#allocation3 + $0x30] sm:$0xc]  ;;  %v17504_v59 = vcombine.low %v10166_v29, %v17486_v62  ;;  %v9727_v43 = vshrl.u32 %v17437_v46, 16 }
 0x5d0   : > { %9759 = vrot.lane.b32.xlu0 %v9739_v16, %s13514_s24  ;;  %v17488_v2 = vpop.permute.xlu1 %9144  ;;  %v9870_v16 = vrot.slane %v9868_v60, 1  ;;  %v17501_v1 = vcombine.low %v10164_v6, %v17474_v48  ;;  %v9745_v60 = vrot.slane %v9743_v7, 1  ;;  %v12442_v0 = vcombine.low %v9647_v3, %v17395_v41  ;;  %v9649_v23 = vld [vmem:[#allocation3 + $0x40] sm:$0xc]  ;;  %v17510_v18 = vld [vmem:[#allocation3 + $0x1c] sm:$0x3] }
 0x5d1   : > { %19326 = vst [vmem:[#allocation108_spill] sm:$0xff] %v17488_v2  ;;  %v9741_v6 = vshrl.u32 %v17454_v22, 16  ;;  %v17515_v54 = vrot.slane %v12427_v53, 1  ;;  %v12444_v29 = vcombine.low %v9649_v23, %v17425_v30  ;;  %v9876_v40 = vshrl.u32 %v12435_v49, 16  ;;  %v10180_v23 = vld [vmem:[#allocation3 + $0x18] sm:$0xe] }
 0x5d2   : > { %v17492_v15 = vpop.permute.xlu0 %9098  ;;  %9949 = vrot.lane.b32.xlu1 %v9940_v58, %s13520_s25  ;;  %v12429_v58 = vcombine.low %v9634_v51, %v17431_v13  ;;  %v9732_v7 = vor.u32 %v9731_v28, %v9727_v43  ;;  %v9879_v41 = vshll.u32 %v12435_v49, 16  ;;  %v9892_v3 = vshrl.u32 %v12437_v24, 16  ;;  %v17522_v51 = vld [vmem:[#allocation3 + $0x24] sm:$0x1]  ;;  %v10718_v34 = vld [vmem:[#allocation3 + $0x20] sm:$0xf] }
 0x5d3   : > { %19327 = vst [vmem:[#allocation85_spill] sm:$0xff] %v17492_v15  ;;  %v9895_v13 = vshll.u32 %v12437_v24, 16  ;;  %v9874_v5 = vor.u32 %v9873_v44, %v9870_v16  ;;  %v9890_v53 = vor.u32 %v17498_v14, %v17496_v19  ;;  %v10247_v22 = vshll.u32 %v17501_v1, 16  ;;  %v10182_v15 = vld [vmem:[#allocation3 + $0x28] sm:$0xe] }
 0x5d4   : > { %9803 = vrot.lane.b32.xlu0 %v9791_v8, %s13516_s3  ;;  %v17512_v33 = vpop.permute.xlu1 %9296  ;;  %v17518_v8 = vld [vmem:[#allocation3 + $0x2c] sm:$0x3]  ;;  %v10261_v30 = vshll.u32 %v17504_v59, 16  ;;  %v9746_v28 = vor.u32 %v9745_v60, %v9741_v6  ;;  %v17530_v49 = vrot.slane %v12442_v0, 2  ;;  %v17532_v24 = vrot.slane %v12429_v58, 1 }
 0x5d5   : > { %19328 = vst [vmem:[#allocation115_spill] sm:$0xff] %v17512_v33  ;;  %v12478_v43 = vcombine.low %v10180_v23, %v17510_v18  ;;  %v17535_v16 = vld [vmem:[#allocation3 + $0x34] sm:$0x1]  ;;  %v17539_v19 = vrot.slane %v12444_v29, 2  ;;  %v17541_v14 = vrot.slane %v9876_v40, 1  ;;  %v12480_v38 = vcombine.low %v10182_v15, %v17518_v8 }
 0x5d6   : > { %v17520_v46 = vpop.permute.xlu0 %9250  ;;  %9953 = vrot.lane.b32.xlu1 %v9942_v50, %s13520_s25  ;;  %v10165_v50 = vld [vmem:[#allocation3 + $0x20] sm:$0xf]  ;;  %v17549_v0 = vrot.slane %v9879_v41, 2  ;;  %v17551_v58 = vrot.slane %v9892_v3, 1  ;;  %v17553_v6 = vrot.slane %v9895_v13, 2  ;;  %v10249_v40 = vrot.slane %v10247_v22, 1 }
 0x5d7   : > { %19329 = vst [vmem:[#allocation79_spill] sm:$0xff] %v17520_v46  ;;  %v9648_v46 = vld [vmem:[#allocation3 + $0x38] sm:$0xc]  ;;  %v10167_v29 = vld [vmem:[#allocation3 + $0x30] sm:$0xf]  ;;  %v10263_v33 = vrot.slane %v10261_v30, 1  ;;  %v12445_v3 = vcombine.low %v9650_v17, %v17472_v55  ;;  %v17617_v2 = vcombine.low %v10170_v11, %v17591_v31 }
 0x5d8   : > { %9807 = vrot.lane.b32.xlu0 %v9793_v56, %s13516_s3  ;;  %v17537_v44 = vpop.permute.xlu1 %9100  ;;  %v17545_v56 = vcombine.low %v10165_v50, %v17522_v51  ;;  %v12443_v63 = vcombine.low %v9648_v46, %v17465_v39  ;;  %v17559_v50 = vcombine.low %v10167_v29, %v17535_v16  ;;  %v10245_v41 = vshrl.u32 %v17501_v1, 16  ;;  %v10181_v30 = vld [vmem:[#allocation3 + $0x20] sm:$0xe] }
 0x5d9   : > { %19330 = vst [vmem:[#allocation110_spill] sm:$0xff] %v17537_v44  ;;  %v12470_v44 = vcombine.low %v10180_v23, %v17474_v48  ;;  %v10389_v13 = vshrl.u32 %v12478_v43, 16  ;;  %v10259_v46 = vshrl.u32 %v17504_v59, 16  ;;  %v10405_v22 = vshrl.u32 %v12480_v38, 16  ;;  %v17569_v23 = vld [vmem:[#allocation3 + $0x24] sm:$0x3] }
 0x5da   : > { %v17547_v60 = vpop.permute.xlu0 %8860  ;;  %9757 = vrot.lane.b32.xlu1 %v9732_v7, %s13514_s24  ;;  %v12472_v7 = vcombine.low %v10182_v15, %v17486_v62  ;;  %v10254_v48 = vshll.u32 %v17545_v56, 16  ;;  %v17577_v55 = vrot.slane %v12443_v63, 2  ;;  %v10408_v1 = vshll.u32 %v12480_v38, 16  ;;  %v10183_v59 = vld [vmem:[#allocation3 + $0x30] sm:$0xe] }
 0x5db   : > { %19331 = vst [vmem:[#allocation112_spill] sm:$0xff] %v17547_v60  ;;  %v10392_v60 = vshll.u32 %v12478_v43, 16  ;;  %v17579_v43 = vld [vmem:[#allocation3 + $0x34] sm:$0x3]  ;;  %v17582_v62 = vor.u32 %v10249_v40, %v10245_v41  ;;  %v17584_v15 = vor.u32 %v10263_v33, %v10259_v46  ;;  %v17594_v63 = vrot.slane %v12445_v3, 2 }
 0x5dc   : > { %9907 = vrot.lane.b32.xlu0 %v9874_v5, %s13518_s27  ;;  %v17564_v39 = vpop.permute.xlu1 %9252  ;;  %v17589_v5 = vld [vmem:[#allocation3 + $0x3c] sm:$0x1]  ;;  %v17596_v38 = vrot.slane %v10389_v13, 1  ;;  %v10168_v33 = vld [vmem:[#allocation3 + $0x38] sm:$0xf]  ;;  %v10256_v41 = vrot.slane %v10254_v48, 1  ;;  %v12481_v47 = vcombine.low %v10183_v59, %v17579_v43 }
 0x5dd   : > { %19332 = vst [vmem:[#allocation78_spill] sm:$0xff] %v17564_v39  ;;  %v17586_v39 = vrot.slane %v12470_v44, 1  ;;  %v17598_v17 = vrot.slane %v10392_v60, 2  ;;  %v17603_v44 = vrot.slane %v12472_v7, 1  ;;  %v17605_v46 = vrot.slane %v10405_v22, 1 }
 0x5de   : > { %v17571_v29 = vpop.permute.xlu0 %8664  ;;  %9761 = vrot.lane.b32.xlu1 %v9746_v28, %s13514_s24  ;;  %v12479_v28 = vcombine.low %v10181_v30, %v17569_v23  ;;  %v17610_v3 = vrot.slane %v10408_v1, 2  ;;  %v12471_v60 = vcombine.low %v10181_v30, %v17522_v51  ;;  %v10196_v13 = vld [vmem:[#allocation3 + $0x18] sm:$0xc]  ;;  %v17614_v37 = vcombine.low %v10168_v33, %v17589_v5 }
 0x5df   : > { %19333 = vst [vmem:[#allocation113_spill] sm:$0xff] %v17571_v29  ;;  %v10268_v29 = vshll.u32 %v17559_v50, 16  ;;  %v10252_v7 = vshrl.u32 %v17545_v56, 16  ;;  %v12486_v22 = vcombine.low %v10196_v13, %v17510_v18  ;;  %v12473_v1 = vcombine.low %v10183_v59, %v17535_v16  ;;  %v17636_v59 = vld [vmem:[#allocation3 + $0x4c] sm:$0x3] }
 0x5e0   : > { %9911 = vrot.lane.b32.xlu0 %v9890_v53, %s13518_s27  ;;  %v17601_v40 = vpop.permute.xlu1 %9096  ;;  %v10266_v11 = vshrl.u32 %v17559_v50, 16  ;;  %v10397_v30 = vshrl.u32 %v12479_v28, 16  ;;  %v10400_v33 = vshll.u32 %v12479_v28, 16  ;;  %v12488_v18 = vcombine.low %v10198_v25, %v17518_v8  ;;  %v10169_v50 = vld [vmem:[#allocation3 + $0x40] sm:$0xf] }
 0x5e1   : > { %19334 = vst [vmem:[#allocation97_spill] sm:$0xff] %v17601_v40  ;;  %v10270_v48 = vrot.slane %v10268_v29, 1  ;;  %v17633_v56 = vor.u32 %v10256_v41, %v10252_v7  ;;  %v10413_v16 = vshrl.u32 %v12481_v47, 16  ;;  %v10416_v29 = vshll.u32 %v12481_v47, 16  ;;  %v10184_v7 = vld [vmem:[#allocation3 + $0x38] sm:$0xe] }
 0x5e2   : > { %v17608_v53 = vpop.permute.xlu0 %5303  ;;  %9805 = vrot.lane.b32.xlu1 %v17515_v54, %s13516_s3  ;;  %v17644_v28 = vrot.slane %v12471_v60, 1  ;;  %v10275_v51 = vshll.u32 %v17614_v37, 16  ;;  %v10289_v41 = vshll.u32 %v17617_v2, 16  ;;  %v17652_v25 = vrot.slane %v12486_v22, 2 }
 0x5e3   : > { %v17650_v47 = vor.u32 %v10270_v48, %v10266_v11  ;;  %v17654_v8 = vrot.slane %v12473_v1, 1  ;;  %v17659_v60 = vrot.slane %v10397_v30, 1  ;;  %v17661_v21 = vrot.slane %v10400_v33, 2  ;;  %v10199_v30 = vld [vmem:[#allocation3 + $0x30] sm:$0xc] }
 0x5e4   : > { %9955 = vrot.lane.b32.xlu0 %v17530_v49, %s13520_s25  ;;  %v17631_v54 = vpop.permute.xlu1 %9248  ;;  %v17638_v49 = vld [vmem:[#allocation3 + $0x44] sm:$0x1]  ;;  %v17669_v1 = vrot.slane %v12488_v18, 2  ;;  %v17671_v11 = vrot.slane %v10413_v16, 1  ;;  %v17673_v40 = vrot.slane %v10416_v29, 2  ;;  %v10273_v20 = vshrl.u32 %v17614_v37, 16 }
 0x5e5   : > { %19335 = vst [vmem:[#allocation107_spill] sm:$0xff] %v17631_v54  ;;  %v12482_v54 = vcombine.low %v10184_v7, %v17629_v36  ;;  %v17665_v48 = vcombine.low %v10169_v50, %v17638_v49  ;;  %v10277_v52 = vrot.slane %v10275_v51, 1  ;;  %v10291_v32 = vrot.slane %v10289_v41, 1 }
 0x5e6   : > { %v17640_v13 = vpop.permute.xlu0 %5299  ;;  %9809 = vrot.lane.b32.xlu1 %v17532_v24, %s13516_s3  ;;  %v12484_v24 = vcombine.low %v10186_v12, %v17636_v59  ;;  %v12474_v50 = vcombine.low %v10184_v7, %v17589_v5  ;;  %v19337_v18 = vor.u32 %v17549_v0, %v17541_v14  ;;  %v10287_v16 = vshrl.u32 %v17617_v2, 16  ;;  %v17693_v7 = vld [vmem:[#allocation3 + $0x24] sm:$0x1] }
 0x5e7   : > { %v10424_v29 = vshll.u32 %v12482_v54, 16  ;;  %v10282_v5 = vshll.u32 %v17665_v48, 16 }
 0x5e8   : > { %9959 = vrot.lane.b32.xlu0 %v17539_v19, %s13520_s25  ;;  %v17667_v22 = vpop.permute.xlu1 %8858  ;;  %v12487_v19 = vcombine.low %v10197_v42, %v17569_v23  ;;  %v12489_v42 = vcombine.low %v10199_v30, %v17579_v43  ;;  %v10421_v23 = vshrl.u32 %v12482_v54, 16  ;;  %v10437_v51 = vshrl.u32 %v12484_v24, 16  ;;  %v17703_v54 = vld [vmem:[#allocation3 + $0x34] sm:$0x1] }
 0x5e9   : > { %19336 = vst [vmem:[#allocation109_spill] sm:$0xff] %v17667_v22  ;;  %v10185_v22 = vld [vmem:[#allocation3 + $0x40] sm:$0xe]  ;;  %v10440_v41 = vshll.u32 %v12484_v24, 16  ;;  %v12476_v43 = vcombine.low %v10186_v12, %v17591_v31  ;;  %v17707_v37 = vor.u32 %v10291_v32, %v10287_v16  ;;  %v17709_v24 = vrot.slane %v12474_v50, 1 }
 0x5ea   : > { %v17676_v33 = vpop.permute.xlu0 %5327  ;;  %9909 = vrot.lane.b32.xlu1 %v19337_v18, %s13518_s27  ;;  %v17699_v0 = vrot.slane %v12487_v19, 2  ;;  %v17705_v18 = vor.u32 %v10277_v52, %v10273_v20  ;;  %v19339_v19 = vor.u32 %v17553_v6, %v17551_v58  ;;  %v17716_v31 = vrot.slane %v12489_v42, 2  ;;  %v10202_v52 = vld [vmem:[#allocation3 + $0x48] sm:$0xc]  ;;  %v10720_v20 = vld [vmem:[#allocation3 + $0x30] sm:$0xf] }
 0x5eb   : > { %v17718_v12 = vrot.slane %v10421_v23, 1  ;;  %v17720_v2 = vrot.slane %v10424_v29, 2  ;;  %v17723_v32 = vcombine.low %v10718_v34, %v17693_v7  ;;  %v17729_v50 = vrot.slane %v10440_v41, 2  ;;  %v17734_v6 = vld [vmem:[#allocation3 + $0x24] sm:$0x3] }
 0x5ec   : > { %10300 = vrot.lane.b32.xlu0 %v17582_v62, %s13514_s24  ;;  %v17695_v14 = vpop.permute.xlu1 %8862  ;;  %v12483_v62 = vcombine.low %v10185_v22, %v17680_v61  ;;  %v17732_v58 = vcombine.low %v10720_v20, %v17703_v54  ;;  %v17738_v42 = vrot.slane %v12476_v43, 1  ;;  %v12490_v34 = vcombine.low %v10200_v9, %v17629_v36  ;;  %v10734_v43 = vld [vmem:[#allocation3 + $0x20] sm:$0xe] }
 0x5ed   : > { %19338 = vst [vmem:[#allocation103_spill] sm:$0xff] %v17695_v14  ;;  %v12475_v14 = vcombine.low %v10185_v22, %v17638_v49  ;;  %v10284_v49 = vrot.slane %v10282_v5, 1  ;;  %v17727_v22 = vrot.slane %v10437_v51, 1  ;;  %19341 = vst [vmem:[#allocation96_spill] sm:$0xff] %v17729_v50  ;;  %v10280_v51 = vshrl.u32 %v17665_v48, 16 }
 0x5ee   : > { %v5324_v30 = vpop.permute.xlu0 %5323  ;;  %9913 = vrot.lane.b32.xlu1 %v19339_v19, %s13518_s27  ;;  %v10429_v23 = vshrl.u32 %v12483_v62, 16  ;;  %v10432_v29 = vshll.u32 %v12483_v62, 16  ;;  %v17741_v19 = vld [vmem:[#allocation3 + $0x2c] sm:$0x1]  ;;  %v12492_v20 = vcombine.low %v10202_v52, %v17636_v59  ;;  %v10801_v9 = vshll.u32 %v17723_v32, 16 }
 0x5ef   : > { %19340 = vst [vmem:[#allocation124_spill] sm:$0xff] %v17727_v22  ;;  %v17749_v41 = vrot.slane %v12475_v14, 1  ;;  %v17763_v48 = vor.u32 %v10284_v49, %v10280_v51  ;;  %v10815_v14 = vshll.u32 %v17732_v58, 16  ;;  %v5344_v62 = vsel %vm4114_vm3, %v17401_v27, %v17608_v53  ;;  %v10201_v49 = vld [vmem:[#allocation3 + $0x40] sm:$0xc] }
 0x5f0   : > { %10304 = vrot.lane.b32.xlu0 %v17584_v15, %s13514_s24  ;;  %v17736_v16 = vpop.permute.xlu1 %8666  ;;  %v5340_v15 = vsel %vm4114_vm3, %v17326_v57, %v17640_v13  ;;  %v12526_v57 = vcombine.low %v10734_v43, %v17734_v6  ;;  %v10719_v13 = vld [vmem:[#allocation3 + $0x28] sm:$0xf]  ;;  %v17774_v52 = vrot.slane %v12490_v34, 2  ;;  %v17782_v51 = vsel %vm5355_vm13, %v5344_v62, %v17676_v33  ;;  %v10736_v53 = vld [vmem:[#allocation3 + $0x30] sm:$0xe] }
 0x5f1   : > { %19342 = vst [vmem:[#allocation98_spill] sm:$0xff] %v17736_v16  ;;  %19343 = vst [vmem:[#allocation119_spill] sm:$0xff] %v17749_v41  ;;  %v17753_v16 = vsel %vm5355_vm13, %v5340_v15, %v5324_v30  ;;  %v17776_v15 = vrot.slane %v10429_v23, 1  ;;  %v12491_v36 = vcombine.low %v10201_v49, %v17680_v61  ;;  %v12518_v27 = vcombine.low %v10734_v43, %v17693_v7  ;;  %v17790_v34 = vld [vmem:[#allocation3 + $0x34] sm:$0x3] }
 0x5f2   : > { %v17746_v5 = vpop.permute.xlu0 %5311  ;;  %9957 = vrot.lane.b32.xlu1 %v17577_v55, %s13520_s25  ;;  %v17769_v55 = vcombine.low %v10719_v13, %v17741_v19  ;;  %19344 = vst [vmem:[#allocation121_spill] sm:$0xff] %v17774_v52  ;;  %v12060_v13 = vcombine.low %v17753_v16, %v17753_v16  ;;  %v10803_v23 = vrot.slane %v10801_v9, 1  ;;  %v10943_v33 = vshrl.u32 %v12526_v57, 16  ;;  %v17817_v50 = vld [vmem:[#allocation3 + $0x28] sm:$0xe] }
 0x5f3   : > { %19345 = vst [vmem:[#allocation125_spill] sm:$0xff] %v17776_v15  ;;  %v10946_v62 = vshll.u32 %v12526_v57, 16  ;;  %v17797_v52 = vrot.slane %v12492_v20, 2  ;;  %v10799_v61 = vshrl.u32 %v17723_v32, 16  ;;  %v10817_v49 = vrot.slane %v10815_v14, 1 }
 0x5f4   : > { %10348 = vrot.lane.b32.xlu0 %v17586_v39, %s13516_s3  ;;  %v5326_v30 = vpop.permute.xlu1 %5325  ;;  %v17778_v39 = vrot.slane %v10432_v29, 2  ;;  %v12520_v29 = vcombine.low %v10736_v53, %v17703_v54  ;;  %v10808_v7 = vshll.u32 %v17769_v55, 16  ;;  %v12064_v43 = vcombine.low %v17782_v51, %v17782_v51  ;;  %v17811_v20 = vld [vmem:[#allocation3 + $0x3c] sm:$0x1] }
 0x5f5   : > { %19347 = vst [vmem:[#allocation127_spill] sm:$0xff] %v17797_v52  ;;  %v10813_v54 = vshrl.u32 %v17732_v58, 16  ;;  %v17809_v9 = vcombine.low %v10736_v53, %v17790_v34  ;;  %v5413_v32 = vshrl.u32 %v12060_v13, 16  ;;  %v5416_v57 = vshll.u32 %v12060_v13, 16  ;;  %v10171_v13 = vld [vmem:[#allocation3 + $0x50] sm:$0xf] }
 0x5f6   : > { %19346 = vst [vmem:[#allocation126_spill] sm:$0xff] %v17778_v39  ;;  %v17786_v59 = vpop.permute.xlu0 %5307  ;;  %9961 = vrot.lane.b32.xlu1 %v17594_v63, %s13520_s25  ;;  %v17813_v52 = vrot.slane %v12491_v36, 2  ;;  %v17815_v22 = vrot.slane %v12518_v27, 1  ;;  %v17821_v63 = vor.u32 %v10803_v23, %v10799_v61  ;;  %v17823_v58 = vrot.slane %v12520_v29, 1  ;;  %v17829_v39 = vld [vmem:[#allocation3 + $0x2c] sm:$0x3] }
 0x5f7   : > { %v17825_v53 = vrot.slane %v10943_v33, 1  ;;  %v17827_v15 = vrot.slane %v10946_v62, 2  ;;  %v19350_v36 = vor.u32 %v17598_v17, %v17596_v38  ;;  %v17835_v27 = vld [vmem:[#allocation3 + $0x54] sm:$0x1]  ;;  %v10810_v23 = vrot.slane %v10808_v7, 1 }
 0x5f8   : > { %10352 = vrot.lane.b32.xlu0 %v17603_v44, %s13516_s3  ;;  %v17803_v41 = vpop.permute.xlu1 %5305  ;;  %v10721_v44 = vld [vmem:[#allocation3 + $0x38] sm:$0xf]  ;;  %19348 = vst [vmem:[#allocation128_spill] sm:$0xff] %v17815_v22  ;;  %19349 = vst [vmem:[#allocation129_spill] sm:$0xff] %v17823_v58  ;;  %v17837_v22 = vor.u32 %v10817_v49, %v10813_v54  ;;  %v5441_v33 = vshrl.u32 %v12064_v43, 16  ;;  %v5444_v62 = vshll.u32 %v12064_v43, 16  ;;  %v12519_v17 = vcombine.low %v17817_v50, %v17741_v19 }
 0x5f9   : > { %v17841_v29 = vcombine.low %v10721_v44, %v17811_v20  ;;  %v10959_v58 = vshrl.u32 %v17809_v9, 16  ;;  %v5415_v38 = vrot.slane %v5413_v32, 4  ;;  %v12061_v7 = vcombine.high %v17753_v16, %v17753_v16 }
 0x5fa   : > { %v5336_v14 = vpop.permute.xlu0 %5335  ;;  %10302 = vrot.lane.b32.xlu1 %v17633_v56, %s13514_s24  ;;  %v10806_v56 = vshrl.u32 %v17769_v55, 16  ;;  %v17850_v55 = vcombine.low %v17817_v50, %v17829_v39  ;;  %v17858_v19 = vcombine.low %v10171_v13, %v17835_v27  ;;  %v19351_v50 = vor.u32 %v17610_v3, %v17605_v46 }
 0x5fb   : > { %v5446_v13 = vrot.slane %v5444_v62, 5  ;;  %v5352_v46 = vsel %vm4114_vm3, %v17405_v4, %v17746_v5  ;;  %v5348_v4 = vsel %vm4114_vm3, %v17378_v10, %v17786_v59 }
 0x5fc   : > { %10452 = vrot.lane.b32.xlu0 %v19350_v36, %s13518_s27  ;;  %v5302_v61 = vpop.permute.xlu1 %5301  ;;  %v5418_v36 = vrot.slane %v5416_v57, 5  ;;  %v17866_v32 = vor.u32 %v10810_v23, %v10806_v56  ;;  %v5443_v57 = vrot.slane %v5441_v33, 4  ;;  %v17880_v16 = vsel %vm5355_vm13, %v5352_v46, %v5336_v14 }
 0x5fd   : > { %v5342_v49 = vsel %vm4114_vm3, %v17413_v35, %v5302_v61  ;;  %v10962_v33 = vshll.u32 %v17809_v9, 16 }
 0x5fe   : > { %v5332_v54 = vpop.permute.xlu0 %5331  ;;  %v5359_v43 = vsel %vm5355_vm13, %v5342_v49, %v5326_v30  ;;  %10306 = vrot.lane.b32.xlu1 %v17650_v47, %s13514_s24  ;;  %v10822_v30 = vshll.u32 %v17841_v29, 16  ;;  %v12065_v47 = vcombine.high %v17782_v51, %v17782_v51  ;;  %v5419_v44 = vor.u32 %v5418_v36, %v5415_v38 }
 0x5ff   : > { %v12062_v35 = vcombine.low %v5359_v43, %v5359_v43  ;;  %v12063_v61 = vcombine.high %v5359_v43, %v5359_v43  ;;  %v17884_v51 = vrot.slane %v10959_v58, 1  ;;  %v5447_v14 = vor.u32 %v5446_v13, %v5443_v57 }
 0x600   : > { %10456 = vrot.lane.b32.xlu0 %v19351_v50, %s13518_s27  ;;  %v17872_v49 = vpop.permute.xlu1 %5333  ;;  %v5422_v50 = vshll.u32 %v12061_v7, 16  ;;  %v5450_v36 = vshll.u32 %v12065_v47, 16  ;;  %v17896_v58 = vsel %vm5355_vm13, %v5348_v4, %v5332_v54  ;;  %v12072_v43 = vcombine.low %v17880_v16, %v17880_v16 }
 0x601   : > { %v5427_v3 = vshrl.u32 %v12062_v35, 16  ;;  %v5430_v56 = vshll.u32 %v12062_v35, 16  ;;  %v5436_v38 = vshll.u32 %v12063_v61, 16  ;;  %v5420_v35 = vrot.slane %v5419_v44, 4 }
 0x602   : > { %v17877_v23 = vpop.permute.xlu0 %8668  ;;  %10350 = vrot.lane.b32.xlu1 %v17644_v28, %s13516_s3  ;;  %v5346_v28 = vsel %vm4114_vm3, %v17409_v45, %v17803_v41  ;;  %v10294_v45 = vshrl.u32 %v17858_v19, 16  ;;  %v17906_v41 = vrot.slane %v12519_v17, 1  ;;  %v5424_v54 = vrot.slane %v5422_v50, 5 }
 0x603   : > { %v5429_v5 = vrot.slane %v5427_v3, 4  ;;  %v5432_v62 = vrot.slane %v5430_v56, 5  ;;  %v5438_v47 = vrot.slane %v5436_v38, 5  ;;  %v12068_v13 = vcombine.low %v17896_v58, %v17896_v58 }
 0x604   : > { %10500 = vrot.lane.b32.xlu0 %v17652_v25, %s13520_s25  ;;  %v5330_v7 = vpop.permute.xlu1 %5329  ;;  %v5448_v44 = vrot.slane %v5447_v14, 4  ;;  %v5452_v3 = vrot.slane %v5450_v36, 5  ;;  %v5425_v38 = vsel %vm15875_vm14, %v5420_v35, %v5424_v54  ;;  %v19353_v36 = vor.u32 %v17661_v21, %v17659_v60 }
 0x605   : > { %v5363_v10 = vsel %vm5355_vm13, %v5346_v28, %v5330_v7  ;;  %v5433_v61 = vor.u32 %v5432_v62, %v5429_v5  ;;  %v5497_v62 = vshrl.u32 %v12072_v43, 16  ;;  %v5500_v7 = vshll.u32 %v12072_v43, 16 }
 0x606   : > { %v17901_v59 = vpop.permute.xlu0 %8712  ;;  %v12066_v25 = vcombine.low %v5363_v10, %v5363_v10  ;;  %v12067_v57 = vcombine.high %v5363_v10, %v5363_v10  ;;  %10354 = vrot.lane.b32.xlu1 %v17654_v8, %s13516_s3  ;;  %v5453_v21 = vsel %vm15875_vm14, %v5448_v44, %v5452_v3  ;;  %v19356_v44 = vor.u32 %v17673_v40, %v17671_v11  ;;  %v17951_v3 = vld [vmem:[%s18911_s10 + $0x24] ss:$0 sps:$4 sm:$0xff]  }
 0x607   : > { %v5434_v46 = vrot.slane %v5433_v61, 4  ;;  %v5469_v61 = vshrl.u32 %v12068_v13, 16  ;;  %v17935_v60 = vrot.slane %v5497_v62, 4  ;;  %v5502_v62 = vrot.slane %v5500_v7, 5 }
 0x608   : > { %10504 = vrot.lane.b32.xlu0 %v17669_v1, %s13520_s25  ;;  %v5455_v56 = vshrl.u32 %v12066_v25, 16  ;;  %v5458_v4 = vshll.u32 %v12066_v25, 16  ;;  %v5314_v5 = vpop.permute.xlu1 %5313  ;;  %v5464_v14 = vshll.u32 %v12067_v57, 16  ;;  %v5472_v25 = vshll.u32 %v12068_v13, 16  ;;  %v19355_v13 = vld [vmem:[#allocation83_spill] sm:$0xff] }
 0x609   : > { %v5354_v8 = vsel %vm4114_vm3, %v17447_v26, %v5314_v5  ;;  %v5439_v28 = vsel %vm15875_vm14, %v5434_v46, %v5438_v47  ;;  %v19354_v26 = vld [vmem:[#allocation95_spill] sm:$0xff]  ;;  %v10296_v46 = vshll.u32 %v17858_v19, 16  ;;  %v10824_v57 = vrot.slane %v10822_v30, 1 }
 0x60a   : > { %v17914_v17 = vpop.permute.xlu0 %8716  ;;  %v5457_v1 = vrot.slane %v5455_v56, 4  ;;  %v5460_v10 = vrot.slane %v5458_v4, 5  ;;  %10454 = vrot.lane.b32.xlu1 %v19353_v36, %s13518_s27  ;;  %v5371_v5 = vsel %vm5355_vm13, %v5354_v8, %v19354_v26  ;;  %v12076_v35 = vcombine.low %v5425_v38, %v5439_v28  ;;  %v17931_v56 = vld [vmem:[#allocation3 + $0x20] sm:$0xc] }
 0x60b   : > { %v12074_v47 = vcombine.low %v5371_v5, %v5371_v5  ;;  %v12534_v8 = vcombine.low %v17931_v56, %v17734_v6  ;;  %v5466_v28 = vrot.slane %v5464_v14, 5  ;;  %v5474_v36 = vrot.slane %v5472_v25, 5 }
 0x60c   : > { %10308 = vrot.lane.b32.xlu0 %v17705_v18, %s13514_s24  ;;  %v5461_v54 = vor.u32 %v5460_v10, %v5457_v1  ;;  %v5310_v43 = vpop.permute.xlu1 %5309  ;;  %12706 = vmatprep.mubr.msk.bf16.mxu1 %vm5572_vm12, %v12076_v35  ;;  %v5471_v10 = vrot.slane %v5469_v61, 4  ;;  %v12075_v26 = vcombine.high %v5371_v5, %v5371_v5  ;;  %v12073_v5 = vcombine.high %v17880_v16, %v17880_v16  ;;  %v13468_v16 = vld [vmem:[#allocation3 + $0x10] sm:$0xf] }
 0x60d   : > { %v5350_v4 = vsel %vm4114_vm3, %v19355_v13, %v5310_v43  ;;  %v5511_v30 = vshrl.u32 %v12074_v47, 16  ;;  %v5514_v1 = vshll.u32 %v12074_v47, 16  ;;  %v17980_v56 = vrot.slane %v10962_v33, 2 }
 0x60e   : > { %v17940_v18 = vpop.permute.xlu0 %8816  ;;  %v5462_v38 = vrot.slane %v5461_v54, 4  ;;  %10458 = vrot.lane.b32.xlu1 %v19356_v44, %s13518_s27  ;;  %v5367_v6 = vsel %vm5355_vm13, %v5350_v4, %v17872_v49  ;;  %v12069_v54 = vcombine.high %v17896_v58, %v17896_v58  ;;  %v17968_v49 = vld [vmem:[#allocation3 + $0x3c] sm:$0x3]  ;;  %v17976_v58 = vsel %vm5585_vm15, %v17951_v3, 0  ;;  %v13469_v44 = vld [vmem:[%s18911_s10 + $0x14] sm:$0xff]  }
 0x60f   : > { %v5513_v40 = vrot.slane %v5511_v30, 4  ;;  %v5516_v11 = vrot.slane %v5514_v1, 5  ;;  %v12070_v7 = vcombine.low %v5367_v6, %v5367_v6  ;;  %v12071_v61 = vcombine.high %v5367_v6, %v5367_v6 }
 0x610   : > { %10312 = vrot.lane.b32.xlu0 %v17707_v37, %s13514_s24  ;;  %v5467_v14 = vsel %vm15875_vm14, %v5462_v38, %v5466_v28  ;;  %v17959_v35 = vpop.permute.xlu1 %8670  ;;  %v13356_v37 = vld [vmem:[%s18911_s10 + $0x1c] sm:$0xff]   ;;  %v5475_v13 = vor.u32 %v5474_v36, %v5471_v10  ;;  %v5503_v9 = vor.u32 %v5502_v62, %v17935_v60  ;;  %v5520_v33 = vshll.u32 %v12075_v26, 16 }
 0x611   : > { %v12077_v47 = vcombine.low %v5453_v21, %v5467_v14  ;;  %v5517_v43 = vor.u32 %v5516_v11, %v5513_v40  ;;  %v17982_v21 = vld [vmem:[#allocation3 + $0x38] sm:$0xe]  ;;  %v5483_v4 = vshrl.u32 %v12070_v7, 16  ;;  %v5486_v38 = vshll.u32 %v12070_v7, 16 }
 0x612   : > { %v17963_v25 = vpop.permute.xlu0 %8820  ;;  %10502 = vrot.lane.b32.xlu1 %v17699_v0, %s13520_s25  ;;  %v12521_v0 = vcombine.low %v17982_v21, %v17811_v20  ;;  %v19357_v28 = vld [vmem:[#allocation91_spill] sm:$0xff]  ;;  %v5478_v10 = vshll.u32 %v12069_v54, 16  ;;  %v5492_v14 = vshll.u32 %v12071_v61, 16  ;;  %vm9415_vm13 = vcmask 326656  }
 0x613   : > { %12707 = vmatmul.mubr.msk.bf16.vlgmr.msra.gmra.mrb[0].mxu1 %vm5572_vm12, %v12077_v47  ;;  %v9307_v30 = vsel %vm3519_vm0, %v13468_v16, %v19357_v28  ;;  %v5485_v36 = vrot.slane %v5483_v4, 4  ;;  %v5488_v6 = vrot.slane %v5486_v38, 5  ;;  %v5506_v60 = vshll.u32 %v12073_v5, 16  ;;  %v19359_v47 = vld [vmem:[#allocation77_spill] sm:$0xff]  ;;  %v10752_v5 = vld [vmem:[#allocation3 + $0x30] sm:$0xc] }
 0x614   : > { %10356 = vrot.lane.b32.xlu0 %v17709_v24, %s13516_s3  ;;  %v17992_v1 = vpop.permute.xlu1 %8714  ;;  %12775 = vmatpush3.bf16.msra.mxu1 %v13469_v44  ;;  %v17999_v24 = vcombine.low %v17982_v21, %v17968_v49  ;;  %v5518_v62 = vrot.slane %v5517_v43, 4  ;;  %v10298_v26 = vrot.slane %v10296_v46, 1  ;;  %v19358_v11 = vshrl.u32 %v17841_v29, 16  ;;  %v19360_v43 = vld [vmem:[#allocation123_spill] sm:$0xff] }
 0x615   : > { %12776 = vmatprep.subr.bf16.mxu1 %v13356_v37  ;;  %v9329_v54 = vsel %vm4761_vm10, %v9307_v30, %v19359_v47  ;;  %v5476_v4 = vrot.slane %v5475_v13, 4  ;;  %v5489_v38 = vor.u32 %v5488_v6, %v5485_v36  ;;  %v18013_v61 = vrot.slane %v12534_v8, 2  ;;  %v19361_v36 = vld [vmem:[#allocation106_spill] sm:$0xff]  ;;  %v19374_v21 = vld [vmem:[#allocation87_spill] sm:$0xff] }
 0x616   : > { %v18001_v40 = vpop.permute.xlu0 %8864  ;;  %10506 = vrot.lane.b32.xlu1 %v17716_v31, %s13520_s25  ;;  %v18007_v7 = vor.u32 %v10824_v57, %v19358_v11  ;;  %v9345_v16 = vsel %vm4114_vm3, %v9329_v54, %v19360_v43  ;;  %v5504_v31 = vrot.slane %v5503_v9, 4  ;;  %v5522_v46 = vrot.slane %v5520_v33, 5  ;;  %v10187_v33 = vld [vmem:[#allocation3 + $0x50] sm:$0xe]  ;;  %v19362_v11 = vld [vmem:[#allocation93_spill] sm:$0xff] }
 0x617   : > { %v12536_v29 = vcombine.low %v10752_v5, %v17790_v34  ;;  %v5480_v57 = vrot.slane %v5478_v10, 5  ;;  %v5490_v30 = vrot.slane %v5489_v38, 4  ;;  %v5494_v13 = vrot.slane %v5492_v14, 5  ;;  %v13470_v14 = vld [vmem:[#allocation3 + $0x18] sm:$0xf] }
 0x618   : > { %10360 = vrot.lane.b32.xlu0 %v17738_v42, %s13516_s3  ;;  %v18017_v28 = vpop.permute.xlu1 %8718  ;;  %12777 = vmatpush3.bf16.msra.mxu1 %v13356_v37  ;;  %v18027_v42 = vld [vmem:[%s18911_s10] sm:$0xff]   ;;  %v5508_v9 = vrot.slane %v5506_v60, 5  ;;  %v5523_v34 = vsel %vm15875_vm14, %v5518_v62, %v5522_v46  ;;  %v10299_v37 = vor.u32 %v10298_v26, %v10294_v45  ;;  %v10951_v10 = vshrl.u32 %v17850_v55, 16  ;;  %v13471_v62 = vld [vmem:[#allocation3 + $0x30] sm:$0xf]  ;;  %v19364_v26 = vld [vmem:[#allocation97_spill] sm:$0xff] }
 0x619   : > { %12935 = vmatprep.subr.msk.bf16.mxu1 %vm5585_vm15, %v17951_v3  ;;  %v18037_v3 = vld [vmem:[#allocation3 + $0x54] sm:$0x3]  ;;  %v9361_v6 = vsel %vm8928_vm2, %v9345_v16, %v19361_v36  ;;  %v9310_v60 = vsel %vm3519_vm0, %v13470_v14, %v19362_v11  ;;  %v19363_v19 = vor.u32 %v17720_v2, %v17718_v12  ;;  %v5495_v45 = vsel %vm15875_vm14, %v5490_v30, %v5494_v13  ;;  %v18060_v43 = vld [vmem:[#allocation3 + $0x44] sm:$0x1]  ;;  %v13472_v2 = vld [vmem:[#allocation3 + $0x20] sm:$0xf] }
 0x61a   : > { %v18020_v44 = vpop.permute.xlu0 %8868  ;;  %10310 = vrot.lane.b32.xlu1 %v17763_v48, %s13514_s24  ;;  %v5481_v48 = vsel %vm15875_vm14, %v5476_v4, %v5480_v57  ;;  %v9319_v47 = vsel %vm3519_vm0, %v13471_v62, %v19364_v26  ;;  %v5509_v54 = vsel %vm15875_vm14, %v5504_v31, %v5508_v9  ;;  %v10954_v4 = vshll.u32 %v17850_v55, 16  ;;  %v19365_v12 = vld [vmem:[#allocation118_spill] sm:$0xff]  ;;  %v13473_v31 = vld [vmem:[#allocation3 + $0x28] sm:$0xf]  ;;  %v19367_v55 = vld [vmem:[#allocation99_spill] sm:$0xff] }
 0x61b   : > { %v12078_v5 = vcombine.low %v5481_v48, %v5495_v45  ;;  %v9313_v16 = vsel %vm3519_vm0, %v13472_v2, %v19365_v12  ;;  %v12079_v57 = vcombine.low %v5509_v54, %v5523_v34  ;;  %v12477_v30 = vcombine.low %v10187_v33, %v17835_v27  ;;  %v19366_v13 = vld [vmem:[#allocation117_spill] sm:$0xff]  ;;  %v19368_v36 = vld [vmem:[#allocation122_spill] sm:$0xff]  ;;  %v10722_v34 = vld [vmem:[#allocation3 + $0x40] sm:$0xf] }
 0x61c   : > { %10460 = vrot.lane.b32.xlu0 %v19363_v19, %s13518_s27  ;;  %v18056_v38 = vpop.permute.xlu1 %8818  ;;  %12779 = vmatpush3.bf16.msra.mxu1 %v17976_v58  ;;  %v12485_v50 = vcombine.low %v10187_v33, %v18037_v3  ;;  %v9316_v58 = vsel %vm3519_vm0, %v13473_v31, %v19366_v13  ;;  %v12392_v9 = vcombine.low %v19367_v55, %v9361_v6  ;;  %v18079_v27 = vrot.slane %v12521_v0, 1  ;;  %v19369_v33 = vld [vmem:[#allocation73_spill] sm:$0xff]  ;;  %v19370_v48 = vld [vmem:[#allocation108_spill] sm:$0xff]  ;;  %v19375_v62 = vld [vmem:[#allocation107_spill] sm:$0xff] }
 0x61d   : > { %12788 = vmatprep.subr.bf16.mxu1 %v18027_v42  ;;  %v9331_v14 = vsel %vm4761_vm10, %v9310_v60, %v19368_v36  ;;  %12710 = vmatprep.mubr.msk.bf16.mxu1 %vm5572_vm12, %v12078_v5  ;;  %v9337_v19 = vsel %vm4761_vm10, %v9319_v47, %v19370_v48  ;;  %v19371_v6 = vld [vmem:[#allocation96_spill] sm:$0xff]  ;;  %v18093_v20 = vcombine.low %v10722_v34, %v18060_v43  ;;  %v18102_v54 = vrot.slane %v10951_v10, 1  ;;  %v19382_v10 = vld [vmem:[#allocation114_spill] sm:$0xff]  ;;  %v19383_v34 = vld [vmem:[#allocation119_spill] sm:$0xff] }
 0x61e   : > { %v18064_v46 = vpop.permute.xlu0 %9747  ;;  %10314 = vrot.lane.b32.xlu1 %v10299_v37, %s13514_s24  ;;  %v9347_v11 = vsel %vm4114_vm3, %v9331_v14, %v19369_v33  ;;  %12711 = vmatmul.mubr.msk.bf16.gmra.mrb[4].mxu1 %vm5572_vm12, %v12079_v57  ;;  %v19372_v60 = vld [vmem:[#allocation124_spill] sm:$0xff]  ;;  %v18090_v37 = vrot.slane %v12536_v29, 2  ;;  %v9333_v0 = vsel %vm4761_vm10, %v9313_v16, %v19374_v21  ;;  %v9353_v26 = vsel %vm4114_vm3, %v9337_v19, %v19375_v62  ;;  %v19379_v57 = vld [vmem:[#allocation101_spill] sm:$0xff]  ;;  %v18158_v8 = vld [vmem:[#allocation3 + $0x54] sm:$0x1] }
 0x61f   : > { %v19373_v45 = vor.u32 %v19371_v6, %v19372_v60  ;;  %12780 = vmatprep.mubr.msk.bf16.mxu1 %vm9415_vm13, %v12392_v9  ;;  %19376 = vst [vmem:[#allocation74_spill] sm:$0xff] %v18102_v54  ;;  %v10967_v5 = vshrl.u32 %v17999_v24, 16  ;;  %v18105_v2 = vld [vmem:[#allocation3 + $0x44] sm:$0x3]  ;;  %v9335_v31 = vsel %vm4761_vm10, %v9316_v58, %v19379_v57  ;;  %v10347_v13 = vrot.slane %v12477_v30, 1  ;;  %v19384_v58 = vld [vmem:[#allocation110_spill] sm:$0xff] }
 0x620   : > { %v18100_v47 = vpop.permute.xlu1 %8822  ;;  %19377 = vst [vmem:[#allocation95_spill] sm:$0xff] %v18105_v2  ;;  %v19378_v29 = vld [vmem:[#allocation116_spill] sm:$0xff]  ;;  %v18113_v55 = vrot.slane %v10954_v4, 2  ;;  %v9363_v14 = vsel %vm8928_vm2, %v9347_v11, %v19382_v10  ;;  %v10445_v33 = vshrl.u32 %v12485_v50, 16  ;;  %v10448_v48 = vshll.u32 %v12485_v50, 16  ;;  %v19385_v30 = vld [vmem:[#allocation115_spill] sm:$0xff] }
 0x621   : > { %10464 = vrot.lane.b32.xlu0 %v19373_v45, %s13518_s27  ;;  %v9349_v12 = vsel %vm4114_vm3, %v9333_v0, %v19378_v29  ;;  %v19381_v9 = vld [vmem:[#allocation92_spill] sm:$0xff]  ;;  %v10751_v19 = vld [vmem:[#allocation3 + $0x28] sm:$0xc]  ;;  %v9369_v4 = vsel %vm8928_vm2, %v9353_v26, %v19385_v30  ;;  %v10827_v57 = vshrl.u32 %v18093_v20, 16  ;;  %v19388_v10 = vld [vmem:[#allocation111_spill] sm:$0xff]  ;;  %v10970_v30 = vshll.u32 %v17999_v24, 16 }
 0x622   : > { %v18111_v16 = vpop.permute.xlu0 %9751  ;;  %19380 = vst [vmem:[#allocation83_spill] sm:$0xff] %v18113_v55  ;;  %v9351_v36 = vsel %vm4114_vm3, %v9335_v31, %v19381_v9  ;;  %10358 = vrot.lane.b32.xlu1 %v19383_v34, %s13516_s3  ;;  %v10738_v6 = vld [vmem:[#allocation3 + $0x40] sm:$0xe]  ;;  %v19386_v21 = vld [vmem:[#allocation121_spill] sm:$0xff]  ;;  %v12535_v0 = vcombine.low %v10751_v19, %v17829_v39  ;;  %v10829_v31 = vshll.u32 %v18093_v20, 16  ;;  %v19390_v20 = vld [vmem:[#allocation94_spill] sm:$0xff] }
 0x623   : > { %v13474_v60 = vld [vmem:[#allocation3 + $0x40] sm:$0xf]  ;;  %v12530_v11 = vcombine.low %v10738_v6, %v18105_v2  ;;  %v12522_v9 = vcombine.low %v10738_v6, %v18060_v43  ;;  %v9367_v26 = vsel %vm8928_vm2, %v9351_v36, %v19388_v10  ;;  %v10447_v36 = vrot.slane %v10445_v33, 1  ;;  %v19399_v24 = vld [vmem:[#allocation125_spill] sm:$0xff]  ;;  %v10203_v2 = vld [vmem:[#allocation3 + $0x50] sm:$0xc] }
 0x624   : > { %v9325_v45 = vsel %vm3519_vm0, %v13474_v60, %v19384_v58  ;;  %v19387_v62 = vld [vmem:[#allocation76_spill] sm:$0xff]  ;;  %v18131_v50 = vpop.permute.xlu1 %8866  ;;  %v13475_v60 = vld [vmem:[#allocation3 + $0x38] sm:$0xf]  ;;  %v19389_v58 = vld [vmem:[#allocation85_spill] sm:$0xff]  ;;  %v12394_v6 = vcombine.low %v9367_v26, %v9369_v4  ;;  %v10831_v26 = vrot.slane %v10829_v31, 1 }
 0x625   : > { %10508 = vrot.lane.b32.xlu0 %v19386_v21, %s13520_s25  ;;  %v9365_v29 = vsel %vm8928_vm2, %v9349_v12, %v19387_v62  ;;  %v9322_v39 = vsel %vm3519_vm0, %v13475_v60, %v19389_v58  ;;  %v13367_v12 = vld [vmem:[%s18911_s10 + $0x8] sm:$0xff]   ;;  %v9341_v43 = vsel %vm4761_vm10, %v9325_v45, %v19390_v20  ;;  %v19392_v60 = vld [vmem:[#allocation127_spill] sm:$0xff]  ;;  %v10724_v58 = vld [vmem:[#allocation3 + $0x50] sm:$0xf]  ;;  %v10975_v45 = vshrl.u32 %v12530_v11, 16 }
 0x626   : > { %v12393_v34 = vcombine.low %v9363_v14, %v9365_v29  ;;  %v18140_v19 = vpop.permute.xlu0 %9795  ;;  %v18146_v21 = vld [vmem:[#allocation3 + $0x4c] sm:$0x1]  ;;  %10362 = vrot.lane.b32.xlu1 %v10347_v13, %s13516_s3  ;;  %v10450_v14 = vrot.slane %v10448_v48, 2  ;;  %v10723_v62 = vld [vmem:[#allocation3 + $0x48] sm:$0xf]  ;;  %v19391_v29 = vld [vmem:[#allocation78_spill] sm:$0xff]  ;;  %v18191_v54 = vcombine.low %v10724_v58, %v18158_v8 }
 0x627   : > { %v9357_v10 = vsel %vm4114_vm3, %v9341_v43, %v19391_v29  ;;  %v10978_v4 = vshll.u32 %v12530_v11, 16  ;;  %v19393_v13 = vld [vmem:[#allocation88_spill] sm:$0xff]  ;;  %v10753_v20 = vld [vmem:[#allocation3 + $0x38] sm:$0xc]  ;;  %v18169_v43 = vcombine.low %v10723_v62, %v18146_v21  ;;  %v18194_v55 = vld [vmem:[#allocation3 + $0x48] sm:$0xe] }
 0x628   : > { %12781 = vmatmul.mubr.msk.bf16.vlgmr.msra.gmra.mrb[8].mxu1 %vm9415_vm13, %v12393_v34  ;;  %v9339_v33 = vsel %vm4761_vm10, %v9322_v39, %v19393_v13  ;;  %v18163_v48 = vpop.permute.xlu1 %8870  ;;  %v18166_v34 = vrot.slane %v10967_v5, 1  ;;  %v19394_v29 = vld [vmem:[#allocation79_spill] sm:$0xff]  ;;  %v13369_v39 = vld [vmem:[%s18911_s10 + $0x10] ss:$0 sps:$4 sm:$0xff]   ;;  %v18182_v5 = vrot.slane %v12522_v9, 1  ;;  %v19397_v31 = vld [vmem:[#allocation104_spill] sm:$0xff] }
 0x629   : > { %10512 = vrot.lane.b32.xlu0 %v19392_v60, %s13520_s25  ;;  %12784 = vmatprep.mubr.msk.bf16.mxu1 %vm9415_vm13, %v12394_v6  ;;  %v9355_v60 = vsel %vm4114_vm3, %v9339_v33, %v19394_v29  ;;  %v18178_v6 = vrot.slane %v10970_v30, 2  ;;  %v9373_v62 = vsel %vm8928_vm2, %v9357_v10, %v19397_v31  ;;  %v19398_v13 = vld [vmem:[#allocation126_spill] sm:$0xff]  ;;  %v10451_v29 = vor.u32 %v10450_v14, %v10447_v36  ;;  %v19402_v9 = vld [vmem:[#allocation100_spill] sm:$0xff]  ;;  %v18205_v36 = vld [vmem:[#allocation3 + $0x4c] sm:$0x3] }
 0x62a   : > { %12789 = vmatpush3.bf16.msra.mxu1 %v18027_v42  ;;  %v18173_v11 = vpop.permute.xlu0 %9799  ;;  %v18180_v42 = vrot.slane %v12535_v0, 2  ;;  %19396 = vst [vmem:[#allocation77_spill] sm:$0xff] %v18182_v5  ;;  %v19400_v33 = vor.u32 %v19398_v13, %v19399_v24  ;;  %v12537_v30 = vcombine.low %v10753_v20, %v17968_v49  ;;  %v19401_v0 = vld [vmem:[#allocation109_spill] sm:$0xff]  ;;  %v18201_v10 = vrot.slane %v10975_v45, 1  ;;  %19403 = vst [vmem:[#allocation123_spill] sm:$0xff] %v18205_v36  ;;  %v19404_v49 = vld [vmem:[#allocation90_spill] sm:$0xff] }
 0x62b   : > { %12790 = vmatprep.subr.bf16.mxu1 %v13367_v12  ;;  %v8932_v5 = vsel %vm8928_vm2, %v19402_v9, %v19401_v0  ;;  %v18203_v24 = vrot.slane %v10978_v4, 2  ;;  %v13476_v58 = vld [vmem:[#allocation3 + $0x10] sm:$0xf]  ;;  %v19405_v31 = vld [vmem:[#allocation72_spill] sm:$0xff]  ;;  %v10836_v45 = vshll.u32 %v18169_v43, 16 }
 0x62c   : > { %19395 = vst [vmem:[#allocation91_spill] sm:$0xff] %v18180_v42  ;;  %10462 = vrot.lane.b32.xlu1 %v19400_v33, %s13518_s27  ;;  %v8880_v20 = vsel %vm3519_vm0, %v13476_v58, %v19404_v49  ;;  %v9371_v13 = vsel %vm8928_vm2, %v9355_v60, %v19405_v31  ;;  %v18213_v33 = vpop.permute.xlu1 %9749  ;;  %v13477_v4 = vld [vmem:[#allocation3 + $0x18] sm:$0xf]  ;;  %v19406_v0 = vld [vmem:[#allocation68_spill] sm:$0xff]  ;;  %v9544_v58 = vsel %vm5585_vm15, %v13369_v39, 0  ;;  %v12493_v60 = vcombine.low %v10203_v2, %v18037_v3 }
 0x62d   : > { %10854 = vrot.lane.b32.xlu0 %v17821_v63, %s13514_s24  ;;  %v18215_v63 = vor.u32 %v10831_v26, %v10827_v57  ;;  %v8883_v9 = vsel %vm3519_vm0, %v13477_v4, %v19406_v0  ;;  %v12395_v42 = vcombine.low %v9371_v13, %v9373_v62  ;;  %v18228_v57 = vld [vmem:[%s18911_s10 + $0x28] sm:$0xff]   ;;  %v10843_v49 = vshll.u32 %v18191_v54, 16  ;;  %v19409_v13 = vld [vmem:[#allocation120_spill] sm:$0xff] }
 0x62e   : > { %12791 = vmatpush3.bf16.msra.mxu1 %v13367_v12  ;;  %v18220_v14 = vpop.permute.xlu0 %9899  ;;  %v19407_v12 = vld [vmem:[#allocation102_spill] sm:$0xff]  ;;  %v18237_v31 = vcombine.low %v18194_v55, %v18205_v36  ;;  %v18244_v2 = vrot.slane %v12537_v30, 2  ;;  %v19410_v0 = vld [vmem:[#allocation89_spill] sm:$0xff] }
 0x62f   : > { %12936 = vmatprep.subr.msk.bf16.mxu1 %vm5585_vm15, %v13369_v39  ;;  %v12403_v26 = vcombine.low %v19407_v12, %v8932_v5  ;;  %v19408_v39 = vld [vmem:[#allocation105_spill] sm:$0xff]  ;;  %v10834_v5 = vshrl.u32 %v18169_v43, 16  ;;  %v8903_v12 = vsel %vm4761_vm10, %v8883_v9, %v19410_v0  ;;  %v10740_v30 = vld [vmem:[#allocation3 + $0x50] sm:$0xe]  ;;  %v10838_v43 = vrot.slane %v10836_v45, 1  ;;  %v19414_v45 = vld [vmem:[#allocation103_spill] sm:$0xff] }
 0x630   : > { %10466 = vrot.lane.b32.xlu1 %v10451_v29, %s13518_s27  ;;  %v8901_v3 = vsel %vm4761_vm10, %v8880_v20, %v19408_v39  ;;  %12785 = vmatmul.mubr.msk.bf16.gmra.mrb[12].mxu1 %vm9415_vm13, %v12395_v42  ;;  %v13478_v62 = vld [vmem:[#allocation3 + $0x28] sm:$0xf]  ;;  %v19411_v20 = vld [vmem:[#allocation98_spill] sm:$0xff]  ;;  %v10499_v9 = vrot.slane %v12493_v60, 2 }
 0x631   : > { %10858 = vrot.lane.b32.xlu0 %v17837_v22, %s13514_s24  ;;  %v8917_v4 = vsel %vm4114_vm3, %v8901_v3, %v19409_v13  ;;  %v8889_v42 = vsel %vm3519_vm0, %v13478_v62, %v19411_v20  ;;  %12794 = vmatprep.mubr.msk.bf16.mxu1 %vm9415_vm13, %v12403_v26  ;;  %v18256_v22 = vpop.permute.xlu1 %9753  ;;  %v19412_v39 = vld [vmem:[#allocation69_spill] sm:$0xff]  ;;  %v10841_v62 = vshrl.u32 %v18191_v54, 16  ;;  %v18266_v0 = vld [vmem:[#allocation3 + $0x54] sm:$0x3]  ;;  %v13479_v26 = vld [vmem:[#allocation3 + $0x20] sm:$0xf] }
 0x632   : > { %12793 = vmatpush3.bf16.msra.mxu1 %v9544_v58  ;;  %v8919_v29 = vsel %vm4114_vm3, %v8903_v12, %v19412_v39  ;;  %v8907_v3 = vsel %vm4761_vm10, %v8889_v42, %v17992_v1  ;;  %v18262_v13 = vpop.permute.xlu0 %9903  ;;  %v19413_v20 = vld [vmem:[#allocation113_spill] sm:$0xff]  ;;  %v10845_v1 = vrot.slane %v10843_v49, 1  ;;  %v13480_v54 = vld [vmem:[#allocation3 + $0x38] sm:$0xf]  ;;  %v19416_v49 = vld [vmem:[#allocation112_spill] sm:$0xff] }
 0x633   : > { %12802 = vmatprep.subr.bf16.mxu1 %v18228_v57  ;;  %v8886_v58 = vsel %vm3519_vm0, %v13479_v26, %v19413_v20  ;;  %v8936_v36 = vsel %vm8928_vm2, %v8919_v29, %v19414_v45  ;;  %v8923_v12 = vsel %vm4114_vm3, %v8907_v3, %v18056_v38  ;;  %v8895_v42 = vsel %vm3519_vm0, %v13480_v54, %v17959_v35  ;;  %v19415_v26 = vld [vmem:[#allocation128_spill] sm:$0xff]  ;;  %v18287_v38 = vld [vmem:[%s18911_s10 + $0x38] ss:$0 sps:$4 sm:$0xff]  }
 0x634   : > { %10510 = vrot.lane.b32.xlu1 %v17813_v52, %s13520_s25  ;;  %v8905_v60 = vsel %vm4761_vm10, %v8886_v58, %v17901_v59  ;;  %v8940_v39 = vsel %vm8928_vm2, %v8923_v12, %v18131_v50  ;;  %v12524_v52 = vcombine.low %v10740_v30, %v18158_v8  ;;  %v8934_v59 = vsel %vm8928_vm2, %v8917_v4, %v19416_v49  ;;  %v13481_v58 = vld [vmem:[#allocation3 + $0x30] sm:$0xf] }
 0x635   : > { %10902 = vrot.lane.b32.xlu0 %v19415_v26, %s13516_s3  ;;  %v8921_v29 = vsel %vm4114_vm3, %v8905_v60, %v17940_v18  ;;  %v8911_v35 = vsel %vm4761_vm10, %v8895_v42, %v18017_v28  ;;  %v9798_v50 = vpop.permute.xlu1 %9797  ;;  %v18297_v3 = vcombine.low %v10740_v30, %v18266_v0  ;;  %v12404_v20 = vcombine.low %v8934_v59, %v8936_v36  ;;  %v13382_v18 = vld [vmem:[%s18911_s10 + $0x30] sm:$0xff]   ;;  %v19417_v60 = vld [vmem:[#allocation129_spill] sm:$0xff] }
 0x636   : > { %v8892_v45 = vsel %vm3519_vm0, %v13481_v58, %v17877_v23  ;;  %v8938_v8 = vsel %vm8928_vm2, %v8921_v29, %v18001_v40  ;;  %v8927_v4 = vsel %vm4114_vm3, %v8911_v35, %v18100_v47  ;;  %v9948_v12 = vpop.permute.xlu0 %9947  ;;  %v18313_v23 = vor.u32 %v10838_v43, %v10834_v5  ;;  %v11309_v40 = vld [vmem:[%s18914_s13] sm:$0x3]  ;;  %v13485_v35 = vld [vmem:[#allocation3 + $0x28] sm:$0xf] }
 0x637   : > { %v8909_v28 = vsel %vm4761_vm10, %v8892_v45, %v17914_v17  ;;  %v12405_v30 = vcombine.low %v8938_v8, %v8940_v39  ;;  %v8944_v36 = vsel %vm8928_vm2, %v8927_v4, %v18163_v48  ;;  %v10089_v17 = vsel %vm5585_vm15, %v18287_v38, 0  ;;  %12940 = vmatprep.subr.msk.bf16.mxu0 %vm4331_vm1, %v11309_v40  ;;  %v19421_v8 = vld [vmem:[#allocation14_spill] sm:$0xff] }
 0x638   : > { %10514 = vrot.lane.b32.xlu1 %v10499_v9, %s13520_s25  ;;  %v8925_v47 = vsel %vm4114_vm3, %v8909_v28, %v17963_v25  ;;  %12795 = vmatmul.mubr.msk.bf16.vlgmr.msra.gmra.mrb[8].mxu1 %vm9415_vm13, %v12404_v20  ;;  %v18325_v48 = vor.u32 %v10845_v1, %v10841_v62  ;;  %v11384_v5 = vsel %vm4331_vm1, %v11309_v40, 0  ;;  %v13482_v9 = vld [vmem:[#allocation3 + $0x10] sm:$0xf]  ;;  %v13483_v25 = vld [vmem:[#allocation3 + $0x20] sm:$0xf]  ;;  %v18336_v62 = vrot.slane %v12524_v52, 1 }
 0x639   : > { %10906 = vrot.lane.b32.xlu0 %v19417_v60, %s13516_s3  ;;  %v8942_v43 = vsel %vm8928_vm2, %v8925_v47, %v18020_v44  ;;  %v9965_v54 = vsel %vm3519_vm0, %v13482_v9, %v18064_v46  ;;  %v9971_v42 = vsel %vm3519_vm0, %v13483_v25, %v18111_v16  ;;  %12798 = vmatprep.mubr.msk.bf16.mxu1 %vm9415_vm13, %v12405_v30  ;;  %v9802_v39 = vpop.permute.xlu1 %9801  ;;  %v10991_v46 = vshrl.u32 %v18297_v3, 16  ;;  %v13484_v16 = vld [vmem:[#allocation3 + $0x18] sm:$0xf]  ;;  %v19422_v28 = vld [vmem:[#allocation4_spill] sm:$0xff]  ;;  %v19424_v40 = vld [vmem:[#allocation6_spill] sm:$0xff] }
 0x63a   : > { %12803 = vmatpush3.bf16.msra.mxu1 %v18228_v57  ;;  %v9988_v1 = vsel %vm4761_vm10, %v9965_v54, %v18140_v19  ;;  %v12406_v26 = vcombine.low %v8942_v43, %v8944_v36  ;;  %v9992_v44 = vsel %vm4761_vm10, %v9971_v42, %v18173_v11  ;;  %v9952_v49 = vpop.permute.xlu0 %9951  ;;  %v9968_v59 = vsel %vm3519_vm0, %v13484_v16, %v18213_v33  ;;  %v19418_v19 = vld [vmem:[#allocation12_spill] sm:$0xff]  ;;  %v19419_v11 = vld [vmem:[#allocation13_spill] sm:$0xff]  ;;  %v19426_v60 = vld [vmem:[#allocation7_spill] sm:$0xff] }
 0x63b   : > { %12804 = vmatprep.subr.bf16.mxu1 %v13382_v18  ;;  %v10004_v57 = vsel %vm4114_vm3, %v9988_v1, %v18220_v14  ;;  %12845 = vmatpush3.bf16.msra.mxu0 %v11384_v5  ;;  %v2982_v52 = vunpack.c.l.b16 %v19418_v19  ;;  %v2983_v29 = vunpack.c.l.b16 %v19419_v11  ;;  %v9974_v20 = vsel %vm3519_vm0, %v13485_v35, %v18256_v22  ;;  %v19423_v22 = vld [vmem:[#allocation5_spill] sm:$0xff]  ;;  %v19427_v43 = vld [vmem:[#allocation16_spill] sm:$0xff]  ;;  %v19433_v19 = vld [vmem:[#allocation19_spill] sm:$0xff] }
 0x63c   : > { %10856 = vrot.lane.b32.xlu1 %v17866_v32, %s13514_s24  ;;  %v10008_v58 = vsel %vm4114_vm3, %v9992_v44, %v18262_v13  ;;  %v9990_v33 = vsel %vm4761_vm10, %v9968_v59, %v9798_v50  ;;  %v18358_v45 = vsel %vm8928_vm2, %v10004_v57, %v9948_v12  ;;  %v19420_v32 = vor.u32 %v17827_v15, %v17825_v53  ;;  %v18379_v15 = vld [vmem:[%s18911_s10 + $0x3c] sm:$0xff]   ;;  %v19428_v54 = vld [vmem:[#allocation17_spill] sm:$0xff]  ;;  %v19431_v44 = vld [vmem:[#allocation18_spill] sm:$0xff] }
 0x63d   : > { %v9902_v14 = vpop.permute.xlu1 %9901  ;;  %v2984_v4 = vunpack.c.l.b16 %v19421_v8  ;;  %v2990_v30 = vunpack.c.l.b16 %v19422_v28  ;;  %v2991_v36 = vunpack.c.l.b16 %v19423_v22  ;;  %v2992_v13 = vunpack.c.l.b16 %v19424_v40  ;;  %v19425_v53 = vld [vmem:[#allocation15_spill] sm:$0xff]  ;;  %v19429_v42 = vld [vmem:[#allocation8_spill] sm:$0xff]  ;;  %v19432_v16 = vld [vmem:[#allocation9_spill] sm:$0xff] }
 0x63e   : > { %11006 = vrot.lane.b32.xlu0 %v19420_v32, %s13518_s27  ;;  %12805 = vmatpush3.bf16.msra.mxu1 %v13382_v18  ;;  %v9994_v50 = vsel %vm4761_vm10, %v9974_v20, %v9802_v39  ;;  %v18370_v12 = vsel %vm8928_vm2, %v10008_v58, %v9952_v49  ;;  %v18372_v47 = vpop.permute.xlu0 %9755  ;;  %v2985_v18 = vunpack.c.l.b16 %v19425_v53  ;;  %v2993_v5 = vunpack.c.l.b16 %v19426_v60  ;;  %v19434_v35 = vld [vmem:[#allocation10_spill] sm:$0xff]  ;;  %v19435_v20 = vld [vmem:[#allocation11_spill] sm:$0xff]  ;;  %v19436_v28 = vld [vmem:[#allocation28_spill] sm:$0xff] }
 0x63f   : > { %12937 = vmatprep.subr.msk.bf16.mxu1 %vm5585_vm15, %v18287_v38  ;;  %v2986_v9 = vunpack.c.l.b16 %v19427_v43  ;;  %v2987_v25 = vunpack.c.l.b16 %v19428_v54  ;;  %v2994_v39 = vunpack.c.l.b16 %v19429_v42  ;;  %v11310_v38 = vsel %vm3184_vm11, %v2983_v29, %v2982_v52  ;;  %v19438_v40 = vld [vmem:[#allocation30_spill] sm:$0xff]  ;;  %v19439_v53 = vld [vmem:[#allocation31_spill] sm:$0xff]  ;;  %v19440_v43 = vld [vmem:[#allocation20_spill] sm:$0xff] }
 0x640   : > { %10860 = vrot.lane.b32.xlu1 %v18007_v7, %s13514_s24  ;;  %12799 = vmatmul.mubr.msk.bf16.gmra.mrb[12].mxu1 %vm9415_vm13, %v12406_v26  ;;  %v19430_v1 = vor.u32 %v17980_v56, %v17884_v51  ;;  %v2988_v49 = vunpack.c.l.b16 %v19431_v44  ;;  %v2995_v59 = vunpack.c.l.b16 %v19432_v16  ;;  %vm11311_vm1 = vcmask 1042434   ;;  %v19441_v54 = vld [vmem:[#allocation21_spill] sm:$0xff] }
 0x641   : > { %v11318_v7 = vsel %vm3184_vm11, %v2991_v36, %v2990_v30  ;;  %v9906_v57 = vpop.permute.xlu1 %9905  ;;  %v2989_v11 = vunpack.c.l.b16 %v19433_v19  ;;  %v2996_v52 = vunpack.c.l.b16 %v19434_v35  ;;  %v11312_v26 = vsel %vm11311_vm1, %v2984_v4, %v11310_v38  ;;  %v19444_v35 = vld [vmem:[#allocation32_spill] sm:$0xff] }
 0x642   : > { %11010 = vrot.lane.b32.xlu0 %v19430_v1, %s13518_s27  ;;  %12807 = vmatpush3.bf16.msra.mxu1 %v10089_v17  ;;  %v11319_v29 = vsel %vm11311_vm1, %v2992_v13, %v11318_v7  ;;  %v10006_v51 = vsel %vm4114_vm3, %v9990_v33, %v9902_v14  ;;  %v18402_v56 = vpop.permute.xlu0 %9759  ;;  %v2997_v58 = vunpack.c.l.b16 %v19435_v20  ;;  %v11313_v32 = vsel %vm3174_vm5, %v2985_v18, %v11312_v26  ;;  %v19437_v33 = vld [vmem:[#allocation29_spill] sm:$0xff]  ;;  %v19442_v1 = vld [vmem:[#allocation22_spill] sm:$0xff]  ;;  %v19443_v7 = vld [vmem:[#allocation23_spill] sm:$0xff] }
 0x643   : > { %12816 = vmatprep.subr.bf16.mxu1 %v18379_v15  ;;  %v11320_v17 = vsel %vm3174_vm5, %v2993_v5, %v11319_v29  ;;  %v11314_v8 = vsel %vm3176_vm6, %v2986_v9, %v11313_v32  ;;  %v2998_v30 = vunpack.c.l.b16 %v19436_v28  ;;  %v2999_v14 = vunpack.c.l.b16 %v19437_v33  ;;  %v19446_v29 = vld [vmem:[#allocation34_spill] sm:$0xff]  ;;  %v19447_v20 = vld [vmem:[#allocation24_spill] sm:$0xff] }
 0x644   : > { %10904 = vrot.lane.b32.xlu1 %v17906_v41, %s13516_s3  ;;  %v11321_v4 = vsel %vm3176_vm6, %v2994_v39, %v11320_v17  ;;  %v11315_v22 = vsel %vm3178_vm7, %v2987_v25, %v11314_v8  ;;  %v3000_v13 = vunpack.c.l.b16 %v19438_v40  ;;  %v3001_v18 = vunpack.c.l.b16 %v19439_v53 }
 0x645   : > { %v11322_v36 = vsel %vm3178_vm7, %v2995_v59, %v11321_v4  ;;  %v9950_v41 = vpop.permute.xlu1 %9949  ;;  %v11316_v60 = vsel %vm3180_vm8, %v2988_v49, %v11315_v22  ;;  %v3006_v9 = vunpack.c.l.b16 %v19440_v43  ;;  %v3007_v42 = vunpack.c.l.b16 %v19441_v54  ;;  %v19450_v22 = vld [vmem:[#allocation26_spill] sm:$0xff] }
 0x646   : > { %11054 = vrot.lane.b32.xlu0 %v18013_v61, %s13520_s25  ;;  %v11323_v5 = vsel %vm3180_vm8, %v2996_v52, %v11322_v36  ;;  %v10022_v39 = vsel %vm8928_vm2, %v10006_v51, %v9950_v41  ;;  %v18425_v61 = vpop.permute.xlu0 %9803  ;;  %v11317_v25 = vsel %vm3182_vm9, %v2989_v11, %v11316_v60  ;;  %v3008_v44 = vunpack.c.l.b16 %v19442_v1  ;;  %v19445_v11 = vld [vmem:[#allocation33_spill] sm:$0xff]  ;;  %v19451_v60 = vld [vmem:[#allocation83_spill] sm:$0xff] }
 0x647   : > { %v11324_v38 = vsel %vm3182_vm9, %v2997_v58, %v11323_v5  ;;  %v10010_v16 = vsel %vm4114_vm3, %v9994_v50, %v9906_v57  ;;  %v12451_v49 = vcombine.low %v18358_v45, %v10022_v39  ;;  %v3009_v19 = vunpack.c.l.b16 %v19443_v7  ;;  %v18442_v45 = vld [vmem:[#allocation3 + $0x58] sm:$0xf]  ;;  %v19452_v5 = vld [vmem:[#allocation74_spill] sm:$0xff] }
 0x648   : > { %10908 = vrot.lane.b32.xlu1 %v18079_v27, %s13516_s3  ;;  %v11367_v59 = vpack.c.b16 %v11324_v38, %v11317_v25  ;;  %v3002_v52 = vunpack.c.l.b16 %v19444_v35  ;;  %v3003_v26 = vunpack.c.l.b16 %v19445_v11  ;;  %v3004_v51 = vunpack.c.l.b16 %v19446_v29  ;;  %v18444_v27 = vld [vmem:[#allocation3 + $0x5c] sm:$0x1]  ;;  %v19457_v35 = vld [vmem:[#allocation46_spill] sm:$0xff] }
 0x649   : > { %v3010_v58 = vunpack.c.l.b16 %v19447_v20  ;;  %v9954_v50 = vpop.permute.xlu1 %9953  ;;  %12808 = vmatprep.mubr.msk.bf16.mxu1 %vm9415_vm13, %v12451_v49  ;;  %v19448_v57 = vld [vmem:[#allocation35_spill] sm:$0xff]  ;;  %v11325_v8 = vsel %vm3184_vm11, %v2999_v14, %v2998_v30  ;;  %v11332_v4 = vsel %vm3184_vm11, %v3007_v42, %v3006_v9  ;;  %v3012_v36 = vunpack.c.l.b16 %v19450_v22  ;;  %v13406_v30 = vld [vmem:[%s18911_s10 + $0x44] sm:$0xff]  }
 0x64a   : > { %11058 = vrot.lane.b32.xlu0 %v18090_v37, %s13520_s25  ;;  %12846 = vmatprep.mubr.msk.bf16.mxu0 %vm2469_vm4, %v11367_v59  ;;  %v3005_v32 = vunpack.c.l.b16 %v19448_v57  ;;  %v19449_v37 = vld [vmem:[#allocation25_spill] sm:$0xff]  ;;  %v10026_v28 = vsel %vm8928_vm2, %v10010_v16, %v9954_v50  ;;  %v18452_v33 = vpop.permute.xlu0 %9807  ;;  %v11326_v40 = vsel %vm11311_vm1, %v3000_v13, %v11325_v8  ;;  %v11333_v53 = vsel %vm11311_vm1, %v3008_v44, %v11332_v4  ;;  %v19454_v14 = vld [vmem:[#allocation27_spill] sm:$0xff]  ;;  %v19455_v16 = vld [vmem:[#allocation44_spill] sm:$0xff] }
 0x64b   : > { %v3011_v17 = vunpack.c.l.b16 %v19449_v37  ;;  %v12452_v41 = vcombine.low %v18370_v12, %v10026_v28  ;;  %v19453_v43 = vor.u32 %v19451_v60, %v19452_v5  ;;  %v3013_v9 = vunpack.c.l.b16 %v19454_v14  ;;  %v19459_v20 = vld [vmem:[#allocation47_spill] sm:$0xff]  ;;  %v19461_v57 = vld [vmem:[#allocation37_spill] sm:$0xff]  ;;  %v19464_v22 = vld [vmem:[#allocation48_spill] sm:$0xff] }
 0x64c   : > { %v11327_v54 = vsel %vm3174_vm5, %v3001_v18, %v11326_v40  ;;  %v11334_v42 = vsel %vm3174_vm5, %v3009_v19, %v11333_v53  ;;  %v18472_v12 = vcombine.low %v18442_v45, %v18444_v27  ;;  %v10994_v13 = vshll.u32 %v18297_v3, 16  ;;  %v19463_v4 = vld [vmem:[#allocation39_spill] sm:$0xff]  ;;  %v19465_v40 = vld [vmem:[#allocation40_spill] sm:$0xff]  ;;  %v19467_v5 = vld [vmem:[#allocation41_spill] sm:$0xff] }
 0x64d   : > { %11008 = vrot.lane.b32.xlu1 %v19453_v43, %s13518_s27  ;;  %v11328_v39 = vsel %vm3176_vm6, %v3002_v52, %v11327_v54  ;;  %v11335_v25 = vsel %vm3176_vm6, %v3010_v58, %v11334_v42  ;;  %v18477_v38 = vpop.permute.xlu1 %9757  ;;  %12809 = vmatmul.mubr.msk.bf16.vlgmr.msra.gmra.mrb[8].mxu1 %vm9415_vm13, %v12452_v41  ;;  %v18482_v18 = vrot.slane %v10991_v46, 1  ;;  %v3014_v49 = vunpack.c.l.b16 %v19455_v16  ;;  %v19456_v46 = vld [vmem:[#allocation45_spill] sm:$0xff]  ;;  %v19460_v58 = vld [vmem:[#allocation36_spill] sm:$0xff]  ;;  %v19468_v54 = vld [vmem:[#allocation91_spill] sm:$0xff] }
 0x64e   : > { %10862 = vrot.lane.b32.xlu0 %v18215_v63, %s13514_s24  ;;  %v13407_v63 = vld [vmem:[%s18911_s10 + $0x4c] ss:$0 sps:$4 sm:$0xff]   ;;  %v11329_v1 = vsel %vm3178_vm7, %v3003_v26, %v11328_v39  ;;  %v11336_v44 = vsel %vm3178_vm7, %v3011_v17, %v11335_v25  ;;  %v18490_v59 = vpop.permute.xlu0 %9907  ;;  %12817 = vmatpush3.bf16.msra.mxu1 %v18379_v15  ;;  %v3015_v19 = vunpack.c.l.b16 %v19456_v46  ;;  %v3016_v52 = vunpack.c.l.b16 %v19457_v35  ;;  %v19462_v17 = vld [vmem:[#allocation38_spill] sm:$0xff]  ;;  %v19473_v46 = vld [vmem:[#allocation43_spill] sm:$0xff] }
 0x64f   : > { %v11330_v7 = vsel %vm3180_vm8, %v3004_v51, %v11329_v1  ;;  %v11337_v3 = vsel %vm3180_vm8, %v3012_v36, %v11336_v44  ;;  %v19458_v11 = vor.u32 %v18178_v6, %v18166_v34  ;;  %12818 = vmatprep.subr.bf16.mxu1 %v13406_v30  ;;  %v3017_v15 = vunpack.c.l.b16 %v19459_v20  ;;  %v18529_v42 = vld [vmem:[%s18911_s10 + $0x50] sm:$0xff]  }
 0x650   : > { %v11331_v26 = vsel %vm3182_vm9, %v3005_v32, %v11330_v7  ;;  %v11338_v29 = vsel %vm3182_vm9, %v3013_v9, %v11337_v3  ;;  %v3022_v51 = vunpack.c.l.b16 %v19460_v58  ;;  %v3023_v37 = vunpack.c.l.b16 %v19461_v57  ;;  %v19470_v25 = vld [vmem:[#allocation42_spill] sm:$0xff]  ;;  %v19472_v7 = vld [vmem:[#allocation51_spill] sm:$0xff] }
 0x651   : > { %11012 = vrot.lane.b32.xlu1 %v19458_v11, %s13518_s27  ;;  %v11368_v50 = vpack.c.b16 %v11338_v29, %v11331_v26  ;;  %v3024_v8 = vunpack.c.l.b16 %v19462_v17  ;;  %v3025_v34 = vunpack.c.l.b16 %v19463_v4  ;;  %v18510_v6 = vpop.permute.xlu1 %9761  ;;  %v10850_v32 = vshll.u32 %v18472_v12, 16  ;;  %v19475_v17 = vld [vmem:[#allocation53_spill] sm:$0xff]  ;;  %v19476_v4 = vld [vmem:[#allocation54_spill] sm:$0xff] }
 0x652   : > { %10866 = vrot.lane.b32.xlu0 %v18325_v48, %s13514_s24  ;;  %v10642_v28 = vsel %vm5585_vm15, %v13407_v63, 0  ;;  %v3018_v36 = vunpack.c.l.b16 %v19464_v22  ;;  %v3026_v53 = vunpack.c.l.b16 %v19465_v40  ;;  %v18516_v41 = vpop.permute.xlu0 %9911  ;;  %12819 = vmatpush3.bf16.msra.mxu1 %v13406_v30  ;;  %v19466_v48 = vld [vmem:[#allocation49_spill] sm:$0xff]  ;;  %v3027_v43 = vunpack.c.l.b16 %v19467_v5  ;;  %v19469_v30 = vld [vmem:[#allocation50_spill] sm:$0xff]  ;;  %v19477_v22 = vld [vmem:[#allocation60_spill] sm:$0xff] }
 0x653   : > { %12847 = vmatmul.mubr.msk.bf16.vlgmr.msra.gmra.mrb[16].mxu0 %vm2469_vm4, %v11368_v50  ;;  %v3019_v60 = vunpack.c.l.b16 %v19466_v48  ;;  %v11339_v14 = vsel %vm3184_vm11, %v3015_v19, %v3014_v49  ;;  %v11346_v9 = vsel %vm3184_vm11, %v3023_v37, %v3022_v51  ;;  %12938 = vmatprep.subr.msk.bf16.mxu1 %vm5585_vm15, %v13407_v63  ;;  %v3020_v39 = vunpack.c.l.b16 %v19469_v30  ;;  %v19471_v49 = vld [vmem:[#allocation77_spill] sm:$0xff] }
 0x654   : > { %v3028_v1 = vunpack.c.l.b16 %v19470_v25  ;;  %v11340_v44 = vsel %vm11311_vm1, %v3016_v52, %v11339_v14  ;;  %v11347_v16 = vsel %vm11311_vm1, %v3024_v8, %v11346_v9  ;;  %v3021_v3 = vunpack.c.l.b16 %v19472_v7  ;;  %v19481_v9 = vld [vmem:[#allocation63_spill] sm:$0xff]  ;;  %v19482_v25 = vld [vmem:[#allocation56_spill] sm:$0xff]  ;;  %v19484_v7 = vld [vmem:[#allocation57_spill] sm:$0xff] }
 0x655   : > { %11056 = vrot.lane.b32.xlu1 %v19468_v54, %s13520_s25  ;;  %v3029_v63 = vunpack.c.l.b16 %v19473_v46  ;;  %v11341_v19 = vsel %vm3174_vm5, %v3017_v15, %v11340_v44  ;;  %v11348_v35 = vsel %vm3174_vm5, %v3025_v34, %v11347_v16  ;;  %v18541_v11 = vpop.permute.xlu1 %9805  ;;  %v10848_v26 = vshrl.u32 %v18472_v12, 16  ;;  %v19474_v15 = vld [vmem:[#allocation52_spill] sm:$0xff]  ;;  %v19485_v46 = vld [vmem:[#allocation65_spill] sm:$0xff] }
 0x656   : > { %10910 = vrot.lane.b32.xlu0 %v19471_v49, %s13516_s3  ;;  %v10996_v29 = vrot.slane %v10994_v13, 2  ;;  %v11342_v52 = vsel %vm3176_vm6, %v3018_v36, %v11341_v19  ;;  %v11349_v20 = vsel %vm3176_vm6, %v3026_v53, %v11348_v35  ;;  %v18546_v58 = vpop.permute.xlu0 %9955  ;;  %v10852_v51 = vrot.slane %v10850_v32, 1  ;;  %12821 = vmatpush3.bf16.msra.mxu1 %v10642_v28  ;;  %v19483_v44 = vld [vmem:[#allocation64_spill] sm:$0xff]  ;;  %v18576_v49 = vld [vmem:[#allocation3 + $0x5c] sm:$0x3] }
 0x657   : > { %v11343_v50 = vsel %vm3178_vm7, %v3019_v60, %v11342_v52  ;;  %v11350_v57 = vsel %vm3178_vm7, %v3027_v43, %v11349_v20  ;;  %v3030_v37 = vunpack.c.l.b16 %v19474_v15  ;;  %12830 = vmatprep.subr.bf16.mxu1 %v18529_v42  ;;  %v3031_v8 = vunpack.c.l.b16 %v19475_v17  ;;  %v19479_v60 = vld [vmem:[#allocation55_spill] sm:$0xff]  ;;  %v19480_v43 = vld [vmem:[#allocation62_spill] sm:$0xff]  ;;  %v10754_v15 = vld [vmem:[#allocation3 + $0x40] sm:$0xc] }
 0x658   : > { %v11344_v12 = vsel %vm3180_vm8, %v3020_v39, %v11343_v50  ;;  %v11351_v13 = vsel %vm3180_vm8, %v3028_v1, %v11350_v57  ;;  %v3032_v34 = vunpack.c.l.b16 %v19476_v4  ;;  %v3038_v36 = vunpack.c.l.b16 %v19477_v22  ;;  %v19488_v52 = vld [vmem:[#allocation66_spill] sm:$0xff]  ;;  %v19490_v17 = vld [vmem:[#allocation67_spill] sm:$0xff] }
 0x659   : > { %11060 = vrot.lane.b32.xlu1 %v18244_v2, %s13520_s25  ;;  %v11345_v32 = vsel %vm3182_vm9, %v3021_v3, %v11344_v12  ;;  %v11352_v28 = vsel %vm3182_vm9, %v3029_v63, %v11351_v13  ;;  %v19478_v2 = vld [vmem:[#allocation61_spill] sm:$0xff]  ;;  %v18564_v53 = vpop.permute.xlu1 %9809  ;;  %v3033_v5 = vunpack.c.l.b16 %v19479_v60  ;;  %v3040_v14 = vunpack.c.l.b16 %v19480_v43  ;;  %v10756_v12 = vld [vmem:[#allocation3 + $0x50] sm:$0xc] }
 0x65a   : > { %10914 = vrot.lane.b32.xlu0 %v18336_v62, %s13516_s3  ;;  %v3039_v40 = vunpack.c.l.b16 %v19478_v2  ;;  %v11369_v48 = vpack.c.b16 %v11352_v28, %v11345_v32  ;;  %v3041_v54 = vunpack.c.l.b16 %v19481_v9  ;;  %v18569_v30 = vpop.permute.xlu0 %9959  ;;  %v10853_v62 = vor.u32 %v10852_v51, %v10848_v26  ;;  %v10741_v26 = vld [vmem:[#allocation3 + $0x58] sm:$0xe] }
 0x65b   : > { %v10997_v39 = vor.u32 %v10996_v29, %v18482_v18  ;;  %v3034_v1 = vunpack.c.l.b16 %v19482_v25  ;;  %v3042_v16 = vunpack.c.l.b16 %v19483_v44  ;;  %v3035_v3 = vunpack.c.l.b16 %v19484_v7  ;;  %v19487_v29 = vld [vmem:[#allocation58_spill] sm:$0xff]  ;;  %v19491_v32 = vld [vmem:[#allocation95_spill] sm:$0xff] }
 0x65c   : > { %12850 = vmatprep.mubr.msk.bf16.mxu0 %vm2469_vm4, %v11369_v48  ;;  %v3043_v63 = vunpack.c.l.b16 %v19485_v46  ;;  %v11353_v19 = vsel %vm3184_vm11, %v3031_v8, %v3030_v37  ;;  %v11360_v35 = vsel %vm3184_vm11, %v3039_v40, %v3038_v36  ;;  %v19486_v18 = vor.u32 %v18203_v24, %v18201_v10  ;;  %v19489_v37 = vld [vmem:[#allocation59_spill] sm:$0xff] }
 0x65d   : > { %10864 = vrot.lane.b32.xlu1 %v18313_v23, %s13514_s24  ;;  %v3036_v23 = vunpack.c.l.b16 %v19487_v29  ;;  %v3044_v20 = vunpack.c.l.b16 %v19488_v52  ;;  %v11354_v51 = vsel %vm11311_vm1, %v3032_v34, %v11353_v19  ;;  %v11361_v50 = vsel %vm11311_vm1, %v3040_v14, %v11360_v35  ;;  %v9910_v57 = vpop.permute.xlu1 %9909  ;;  %v13487_v7 = vld [vmem:[#allocation3 + $0x38] sm:$0xf] }
 0x65e   : > { %11014 = vrot.lane.b32.xlu0 %v19486_v18, %s13518_s27  ;;  %v3037_v13 = vunpack.c.l.b16 %v19489_v37  ;;  %v3045_v8 = vunpack.c.l.b16 %v19490_v17  ;;  %v11355_v4 = vsel %vm3174_vm5, %v3033_v5, %v11354_v51  ;;  %v11362_v10 = vsel %vm3174_vm5, %v3041_v54, %v11361_v50  ;;  %v18595_v24 = vpop.permute.xlu0 %10300  ;;  %v13489_v50 = vld [vmem:[#allocation3 + $0x48] sm:$0xf] }
 0x65f   : > { %v12538_v28 = vcombine.low %v10754_v15, %v19491_v32  ;;  %v12533_v22 = vcombine.low %v10741_v26, %v18576_v49  ;;  %v11356_v34 = vsel %vm3176_vm6, %v3034_v1, %v11355_v4  ;;  %v11363_v36 = vsel %vm3176_vm6, %v3042_v16, %v11362_v10  ;;  %v13486_v16 = vld [vmem:[#allocation3 + $0x30] sm:$0xf]  ;;  %v19494_v32 = vld [vmem:[#allocation75_spill] sm:$0xff] }
 0x660   : > { %v12525_v2 = vcombine.low %v10741_v26, %v18444_v27  ;;  %v11357_v40 = vsel %vm3178_vm7, %v3035_v3, %v11356_v34  ;;  %v11364_v48 = vsel %vm3178_vm7, %v3043_v63, %v11363_v36  ;;  %v19492_v60 = vcombine.low %v18194_v55, %v18146_v21  ;;  %v19493_v10 = vld [vmem:[#allocation82_spill] sm:$0xff]  ;;  %v19496_v36 = vld [vmem:[#allocation123_spill] sm:$0xff] }
 0x661   : > { %10868 = vrot.lane.b32.xlu1 %v10853_v62, %s13514_s24  ;;  %v12540_v43 = vcombine.low %v10756_v12, %v18266_v0  ;;  %v11358_v14 = vsel %vm3180_vm8, %v3036_v23, %v11357_v40  ;;  %v11365_v9 = vsel %vm3180_vm8, %v3044_v20, %v11364_v48  ;;  %v9914_v54 = vpop.permute.xlu1 %9913  ;;  %v10983_v62 = vshrl.u32 %v18237_v31, 16  ;;  %v13488_v20 = vld [vmem:[#allocation3 + $0x40] sm:$0xf]  ;;  %v19497_v48 = vld [vmem:[#allocation86_spill] sm:$0xff] }
 0x662   : > { %11018 = vrot.lane.b32.xlu0 %v10997_v39, %s13518_s27  ;;  %v10899_v5 = vrot.slane %v19492_v60, 1  ;;  %v10986_v27 = vshll.u32 %v18237_v31, 16  ;;  %v11359_v25 = vsel %vm3182_vm9, %v3037_v13, %v11358_v14  ;;  %v11366_v1 = vsel %vm3182_vm9, %v3045_v8, %v11365_v9  ;;  %v18616_v39 = vpop.permute.xlu0 %10304  ;;  %v19498_v60 = vld [vmem:[#allocation71_spill] sm:$0xff] }
 0x663   : > { %v11050_v44 = vrot.slane %v12538_v28, 2  ;;  %v10999_v55 = vshrl.u32 %v12533_v22, 16  ;;  %v11370_v21 = vpack.c.b16 %v11366_v1, %v11359_v25  ;;  %v9977_v0 = vsel %vm3519_vm0, %v13486_v16, %v18372_v47  ;;  %v10755_v28 = vld [vmem:[#allocation3 + $0x48] sm:$0xc] }
 0x664   : > { %v9980_v3 = vsel %vm3519_vm0, %v13487_v7, %v18477_v38  ;;  %v10901_v31 = vrot.slane %v12525_v2, 1  ;;  %v11002_v46 = vshll.u32 %v12533_v22, 16  ;;  %v9996_v63 = vsel %vm4761_vm10, %v9977_v0, %v18425_v61  ;;  %v10757_v22 = vld [vmem:[#allocation3 + $0x58] sm:$0xc]  ;;  %v19503_v0 = vld [vmem:[#allocation84_spill] sm:$0xff]  ;;  %v19504_v7 = vld [vmem:[#allocation70_spill] sm:$0xff] }
 0x665   : > { %10912 = vrot.lane.b32.xlu1 %v10899_v5, %s13516_s3  ;;  %v9998_v19 = vsel %vm4761_vm10, %v9980_v3, %v18541_v11  ;;  %v11052_v35 = vrot.slane %v12540_v43, 2  ;;  %12851 = vmatmul.mubr.msk.bf16.gmra.mrb[20].mxu0 %vm2469_vm4, %v11370_v21  ;;  %v10012_v47 = vsel %vm4114_vm3, %v9996_v63, %v18490_v59  ;;  %v9958_v18 = vpop.permute.xlu1 %9957  ;;  %v10985_v26 = vrot.slane %v10983_v62, 1  ;;  %v13490_v63 = vld [vmem:[#allocation3 + $0x18] sm:$0xf] }
 0x666   : > { %11062 = vrot.lane.b32.xlu0 %v11050_v44, %s13520_s25  ;;  %v10014_v38 = vsel %vm4114_vm3, %v9998_v19, %v9910_v57  ;;  %v10988_v29 = vrot.slane %v10986_v27, 2  ;;  %v10028_v23 = vsel %vm8928_vm2, %v10012_v47, %v18546_v58  ;;  %v10349_v52 = vpop.permute.xlu0 %10348  ;;  %v11001_v11 = vrot.slane %v10999_v55, 1  ;;  %v19500_v44 = vld [vmem:[#allocation81_spill] sm:$0xff]  ;;  %v19501_v55 = vld [vmem:[#allocation80_spill] sm:$0xff] }
 0x667   : > { %v10030_v61 = vsel %vm8928_vm2, %v10014_v38, %v9958_v18  ;;  %v9983_v51 = vsel %vm3519_vm0, %v13488_v20, %v18402_v56  ;;  %v9986_v59 = vsel %vm3519_vm0, %v13489_v50, %v18510_v6  ;;  %v11004_v57 = vrot.slane %v11002_v46, 2  ;;  %v13493_v50 = vld [vmem:[#allocation3 + $0x30] sm:$0xf] }
 0x668   : > { %v12453_v15 = vcombine.low %v10028_v23, %v10030_v61  ;;  %v10000_v12 = vsel %vm4761_vm10, %v9983_v51, %v18452_v33  ;;  %v10002_v58 = vsel %vm4761_vm10, %v9986_v59, %v18564_v53  ;;  %v10989_v6 = vor.u32 %v10988_v29, %v10985_v26  ;;  %v13492_v51 = vld [vmem:[#allocation3 + $0x28] sm:$0xf] }
 0x669   : > { %10916 = vrot.lane.b32.xlu1 %v10901_v31, %s13516_s3  ;;  %v10016_v37 = vsel %vm4114_vm3, %v10000_v12, %v18516_v41  ;;  %v10018_v56 = vsel %vm4114_vm3, %v10002_v58, %v9914_v54  ;;  %v9962_v13 = vpop.permute.xlu1 %9961  ;;  %v11005_v53 = vor.u32 %v11004_v57, %v11001_v11  ;;  %v19495_v41 = vpack.c.bf16 %v19493_v10, %v19494_v32 }
 0x66a   : > { %11066 = vrot.lane.b32.xlu0 %v11052_v35, %s13520_s25  ;;  %12812 = vmatprep.mubr.msk.bf16.mxu1 %vm9415_vm13, %v12453_v15  ;;  %v10032_v17 = vsel %vm8928_vm2, %v10016_v37, %v18569_v30  ;;  %v10034_v8 = vsel %vm8928_vm2, %v10018_v56, %v9962_v13  ;;  %v10353_v33 = vpop.permute.xlu0 %10352  ;;  %v12539_v2 = vcombine.low %v10755_v28, %v19496_v36  ;;  %v13491_v35 = vld [vmem:[#allocation3 + $0x20] sm:$0xf] }
 0x66b   : > { %v12454_v4 = vcombine.low %v10032_v17, %v10034_v8  ;;  %v12541_v40 = vcombine.low %v10757_v22, %v18576_v49  ;;  %v19499_v5 = vpack.c.bf16 %v19497_v48, %v19498_v60  ;;  %v19502_v21 = vpack.c.bf16 %v19500_v44, %v19501_v55  ;;  %v13409_v17 = vld [vmem:[%s18911_s10 + $0x58] sm:$0xff]   ;;  %v13496_v55 = vld [vmem:[#allocation3 + $0x48] sm:$0xf] }
 0x66c   : > { %v11051_v14 = vrot.slane %v12539_v2, 2  ;;  %v19505_v3 = vpack.c.bf16 %v19503_v0, %v19504_v7  ;;  %v10518_v19 = vsel %vm3519_vm0, %v13490_v63, %v18595_v24  ;;  %v10524_v24 = vsel %vm3519_vm0, %v13492_v51, %v18616_v39  ;;  %v13494_v48 = vld [vmem:[#allocation3 + $0x38] sm:$0xf] }
 0x66d   : > { %11016 = vrot.lane.b32.xlu1 %v10989_v6, %s13518_s27  ;;  %v10303_v34 = vpop.permute.xlu1 %10302  ;;  %12813 = vmatmul.mubr.msk.bf16.gmra.mrb[12].mxu1 %vm9415_vm13, %v12454_v4  ;;  %v11053_v54 = vrot.slane %v12541_v40, 2  ;;  %v10541_v38 = vsel %vm4761_vm10, %v10518_v19, %v10349_v52  ;;  %v10545_v15 = vsel %vm4761_vm10, %v10524_v24, %v10353_v33  ;;  %v13410_v4 = vld [vmem:[%s18911_s10 + $0x60] ss:$0 sps:$4 sm:$0xff]  }
 0x66e   : > { %11498 = vrot.lane.b32.xlu0 %v19495_v41, %s13521_s22  ;;  %v10453_v30 = vpop.permute.xlu0 %10452  ;;  %v10521_v47 = vsel %vm3519_vm0, %v13491_v35, %v10303_v34  ;;  %v11196_v32 = vsel %vm5585_vm15, %v13410_v4, 0  ;;  %v18705_v41 = vld [vmem:[%s18917_s16] sm:$0xf] }
 0x66f   : > { %v10557_v26 = vsel %vm4114_vm3, %v10541_v38, %v10453_v30 }
 0x671   : > { %11020 = vrot.lane.b32.xlu1 %v11005_v53, %s13518_s27  ;;  %v10307_v43 = vpop.permute.xlu1 %10306 }
 0x672   : > { %11502 = vrot.lane.b32.xlu0 %v19499_v5, %s13521_s22  ;;  %v10457_v9 = vpop.permute.xlu0 %10456  ;;  %v10527_v59 = vsel %vm3519_vm0, %v13493_v50, %v10307_v43  ;;  %v13495_v5 = vld [vmem:[#allocation3 + $0x40] sm:$0xf] }
 0x673   : > { %v10561_v12 = vsel %vm4114_vm3, %v10545_v15, %v10457_v9 }
 0x675   : > { %11064 = vrot.lane.b32.xlu1 %v11051_v14, %s13520_s25  ;;  %v10351_v62 = vpop.permute.xlu1 %10350 }
 0x676   : > { %v10501_v27 = vpop.permute.xlu0 %10500  ;;  %v10543_v18 = vsel %vm4761_vm10, %v10521_v47, %v10351_v62 }
 0x677   : > { %v10573_v61 = vsel %vm8928_vm2, %v10557_v26, %v10501_v27 }
 0x679   : > { %11068 = vrot.lane.b32.xlu1 %v11053_v54, %s13520_s25  ;;  %v10355_v25 = vpop.permute.xlu1 %10354 }
 0x67a   : > { %v10505_v1 = vpop.permute.xlu0 %10504  ;;  %v10547_v57 = vsel %vm4761_vm10, %v10527_v59, %v10355_v25 }
 0x67b   : > { %v10577_v56 = vsel %vm8928_vm2, %v10561_v12, %v10505_v1 }
 0x67d   : > { %11500 = vrot.lane.b32.xlu1 %v19502_v21, %s13521_s22  ;;  %v10455_v49 = vpop.permute.xlu1 %10454 }
 0x67e   : > { %v10309_v16 = vpop.permute.xlu0 %10308  ;;  %v10559_v29 = vsel %vm4114_vm3, %v10543_v18, %v10455_v49  ;;  %v13497_v49 = vld [vmem:[#allocation3 + $0x50] sm:$0xf] }
 0x67f   : > { %v10530_v60 = vsel %vm3519_vm0, %v13494_v48, %v10309_v16 }
 0x681   : > { %11504 = vrot.lane.b32.xlu1 %v19505_v3, %s13521_s22  ;;  %v10459_v31 = vpop.permute.xlu1 %10458 }
 0x682   : > { %v18671_v46 = vpop.permute.xlu0 %10312  ;;  %v10563_v58 = vsel %vm4114_vm3, %v10547_v57, %v10459_v31  ;;  %v13499_v57 = vld [vmem:[#allocation3 + $0x28] sm:$0xf] }
 0x683   : > { %v10536_v21 = vsel %vm3519_vm0, %v13496_v55, %v18671_v46  ;;  %v13502_v55 = vld [vmem:[#allocation3 + $0x40] sm:$0xf] }
 0x685   : > { %v10503_v23 = vpop.permute.xlu1 %10502 }
 0x686   : > { %v10575_v11 = vsel %vm8928_vm2, %v10559_v29, %v10503_v23  ;;  %v10357_v20 = vpop.permute.xlu0 %10356 }
 0x687   : > { %v12499_v52 = vcombine.low %v10573_v61, %v10575_v11  ;;  %v10549_v14 = vsel %vm4761_vm10, %v10530_v60, %v10357_v20  ;;  %v11519_v60 = vsel %vm5585_vm15, %v18705_v41, 0 }
 0x689   : > { %v10507_v37 = vpop.permute.xlu1 %10506  ;;  %12822 = vmatprep.mubr.msk.bf16.mxu1 %vm9415_vm13, %v12499_v52  ;;  %v13498_v52 = vld [vmem:[#allocation3 + $0x20] sm:$0xf] }
 0x68a   : > { %v10579_v13 = vsel %vm8928_vm2, %v10563_v58, %v10507_v37  ;;  %v10361_v39 = vpop.permute.xlu0 %10360 }
 0x68b   : > { %v12500_v6 = vcombine.low %v10577_v56, %v10579_v13  ;;  %v10553_v7 = vsel %vm4761_vm10, %v10536_v21, %v10361_v39 }
 0x68d   : > { %v10311_v8 = vpop.permute.xlu1 %10310  ;;  %12823 = vmatmul.mubr.msk.bf16.vlgmr.msra.gmra.mrb[8].mxu1 %vm9415_vm13, %v12500_v6 }
 0x68e   : > { %v10461_v33 = vpop.permute.xlu0 %10460  ;;  %12831 = vmatpush3.bf16.msra.mxu1 %v18529_v42  ;;  %v10533_v43 = vsel %vm3519_vm0, %v13495_v5, %v10311_v8 }
 0x68f   : > { %12832 = vmatprep.subr.bf16.mxu1 %v13409_v17  ;;  %v10565_v54 = vsel %vm4114_vm3, %v10549_v14, %v10461_v33  ;;  %v13500_v33 = vld [vmem:[#allocation3 + $0x30] sm:$0xf] }
 0x691   : > { %v10315_v53 = vpop.permute.xlu1 %10314 }
 0x692   : > { %12833 = vmatpush3.bf16.msra.mxu1 %v13409_v17  ;;  %v10539_v16 = vsel %vm3519_vm0, %v13497_v49, %v10315_v53  ;;  %v13501_v53 = vld [vmem:[#allocation3 + $0x38] sm:$0xf]  ;;  %v13503_v49 = vld [vmem:[#allocation3 + $0x50] sm:$0xf] }
 0x693   : > { %v10465_v10 = vpop.permute.xlu0 %10464  ;;  %12939 = vmatprep.subr.msk.bf16.mxu1 %vm5585_vm15, %v13410_v4 }
 0x694   : > { %v10569_v31 = vsel %vm4114_vm3, %v10553_v7, %v10465_v10 }
 0x695   : > { %v10359_v28 = vpop.permute.xlu1 %10358 }
 0x696   : > { %12835 = vmatpush3.bf16.msra.mxu1 %v11196_v32  ;;  %v10551_v9 = vsel %vm4761_vm10, %v10533_v43, %v10359_v28 }
 0x697   : > { %v10509_v22 = vpop.permute.xlu0 %10508  ;;  %12941 = vmatprep.subr.msk.bf16.mxu1 %vm5585_vm15, %v18705_v41  ;;  %v13504_v41 = vld [vmem:[#allocation3 + $0x48] sm:$0xf] }
 0x698   : > { %v10581_v25 = vsel %vm8928_vm2, %v10565_v54, %v10509_v22 }
 0x699   : > { %v10363_v42 = vpop.permute.xlu1 %10362 }
 0x69a   : > { %v10555_v3 = vsel %vm4761_vm10, %v10539_v16, %v10363_v42 }
 0x69b   : > { %v10513_v34 = vpop.permute.xlu0 %10512 }
 0x69c   : > { %v10585_v35 = vsel %vm8928_vm2, %v10569_v31, %v10513_v34 }
 0x69e   : > { %v10463_v36 = vpop.permute.xlu1 %10462 }
 0x69f   : > { %v10855_v2 = vpop.permute.xlu0 %10854  ;;  %v10567_v62 = vsel %vm4114_vm3, %v10551_v9, %v10463_v36 }
 0x6a0   : > { %v11072_v15 = vsel %vm3519_vm0, %v13498_v52, %v10855_v2 }
 0x6a2   : > { %v10467_v30 = vpop.permute.xlu1 %10466 }
 0x6a3   : > { %v10859_v40 = vpop.permute.xlu0 %10858  ;;  %v10571_v63 = vsel %vm4114_vm3, %v10555_v3, %v10467_v30 }
 0x6a4   : > { %v11078_v4 = vsel %vm3519_vm0, %v13500_v33, %v10859_v40  ;;  %v12565_v33 = vld [vmem:[%s18916_s15] ss:$0 sm:$0xff] }
 0x6a6   : > { %v10511_v27 = vpop.permute.xlu1 %10510 }
 0x6a7   : > { %v10583_v1 = vsel %vm8928_vm2, %v10567_v62, %v10511_v27  ;;  %v10903_v44 = vpop.permute.xlu0 %10902 }
 0x6a8   : > { %v12501_v0 = vcombine.low %v10581_v25, %v10583_v1  ;;  %v11095_v37 = vsel %vm4761_vm10, %v11072_v15, %v10903_v44 }
 0x6aa   : > { %v10515_v19 = vpop.permute.xlu1 %10514  ;;  %12826 = vmatprep.mubr.msk.bf16.mxu1 %vm9415_vm13, %v12501_v0 }
 0x6ab   : > { %v10587_v47 = vsel %vm8928_vm2, %v10571_v63, %v10515_v19  ;;  %v10907_v46 = vpop.permute.xlu0 %10906 }
 0x6ac   : > { %v12502_v38 = vcombine.low %v10585_v35, %v10587_v47  ;;  %v11099_v28 = vsel %vm4761_vm10, %v11078_v4, %v10907_v46 }
 0x6ae   : > { %v10857_v18 = vpop.permute.xlu1 %10856  ;;  %12827 = vmatmul.mubr.msk.bf16.gmra.mrb[12].mxu1 %vm9415_vm13, %v12502_v38 }
 0x6af   : > { %v11075_v12 = vsel %vm3519_vm0, %v13499_v57, %v10857_v18 }
 0x6b0   : > { %v11007_v26 = vpop.permute.xlu0 %11006 }
 0x6b1   : > { %v11111_v13 = vsel %vm4114_vm3, %v11095_v37, %v11007_v26 }
 0x6b2   : > { %v10861_v29 = vpop.permute.xlu1 %10860 }
 0x6b3   : > { %v11081_v10 = vsel %vm3519_vm0, %v13501_v53, %v10861_v29 }
 0x6b4   : > { %v11011_v23 = vpop.permute.xlu0 %11010 }
 0x6b5   : > { %v11115_v42 = vsel %vm4114_vm3, %v11099_v28, %v11011_v23 }
 0x6b6   : > { %v10905_v61 = vpop.permute.xlu1 %10904 }
 0x6b7   : > { %v11097_v56 = vsel %vm4761_vm10, %v11075_v12, %v10905_v61 }
 0x6b8   : > { %v11055_v11 = vpop.permute.xlu0 %11054 }
 0x6b9   : > { %v11127_v17 = vsel %vm8928_vm2, %v11111_v13, %v11055_v11 }
 0x6ba   : > { %v10909_v20 = vpop.permute.xlu1 %10908 }
 0x6bb   : > { %v11101_v22 = vsel %vm4761_vm10, %v11081_v10, %v10909_v20 }
 0x6bc   : > { %v11059_v51 = vpop.permute.xlu0 %11058 }
 0x6bd   : > { %v11131_v30 = vsel %vm8928_vm2, %v11115_v42, %v11059_v51 }
 0x6bf   : > { %v11009_v24 = vpop.permute.xlu1 %11008 }
 0x6c0   : > { %v10863_v50 = vpop.permute.xlu0 %10862  ;;  %v11113_v39 = vsel %vm4114_vm3, %v11097_v56, %v11009_v24 }
 0x6c1   : > { %v11084_v21 = vsel %vm3519_vm0, %v13502_v55, %v10863_v50 }
 0x6c3   : > { %v11013_v59 = vpop.permute.xlu1 %11012 }
 0x6c4   : > { %v10867_v58 = vpop.permute.xlu0 %10866  ;;  %v11117_v34 = vsel %vm4114_vm3, %v11101_v22, %v11013_v59 }
 0x6c5   : > { %v11090_v16 = vsel %vm3519_vm0, %v13503_v49, %v10867_v58 }
 0x6c7   : > { %v11057_v6 = vpop.permute.xlu1 %11056 }
 0x6c8   : > { %v11129_v8 = vsel %vm8928_vm2, %v11113_v39, %v11057_v6  ;;  %v10911_v36 = vpop.permute.xlu0 %10910  ;;  %v12564_v6 = vld [vmem:[%s18915_s14] ss:$0 sm:$0xff] }
 0x6c9   : > { %v12547_v32 = vcombine.low %v11127_v17, %v11129_v8  ;;  %v11103_v7 = vsel %vm4761_vm10, %v11084_v21, %v10911_v36 }
 0x6cb   : > { %v11061_v2 = vpop.permute.xlu1 %11060  ;;  %12836 = vmatprep.mubr.msk.bf16.mxu1 %vm9415_vm13, %v12547_v32 }
 0x6cc   : > { %v11133_v40 = vsel %vm8928_vm2, %v11117_v34, %v11061_v2  ;;  %v10915_v43 = vpop.permute.xlu0 %10914 }
 0x6cd   : > { %v12548_v48 = vcombine.low %v11131_v30, %v11133_v40  ;;  %v11107_v35 = vsel %vm4761_vm10, %v11090_v16, %v10915_v43 }
 0x6cf   : > { %v10865_v5 = vpop.permute.xlu1 %10864  ;;  %12837 = vmatmul.mubr.msk.bf16.vlgmr.msra.gmra.mrb[8].mxu1 %vm9415_vm13, %v12548_v48 }
 0x6d0   : > { %12855 = vmatpush3.bf16.msra.mxu1 %v11519_v60  ;;  %v11015_v9 = vpop.permute.xlu0 %11014  ;;  %v11087_v0 = vsel %vm3519_vm0, %v13504_v41, %v10865_v5 }
 0x6d1   : > { %v11119_v31 = vsel %vm4114_vm3, %v11103_v7, %v11015_v9  ;;  %v12558_v7 = vld [vmem:[%s18912_s11] ss:$0 sm:$0xff] }
 0x6d3   : > { %v10869_v14 = vpop.permute.xlu1 %10868 }
 0x6d4   : > { %v11019_v27 = vpop.permute.xlu0 %11018  ;;  %v11093_v38 = vsel %vm3519_vm0, %v18442_v45, %v10869_v14 }
 0x6d5   : > { %v11123_v11 = vsel %vm4114_vm3, %v11107_v35, %v11019_v27 }
 0x6d7   : > { %v10913_v54 = vpop.permute.xlu1 %10912 }
 0x6d8   : > { %v11063_v1 = vpop.permute.xlu0 %11062  ;;  %v11105_v3 = vsel %vm4761_vm10, %v11087_v0, %v10913_v54 }
 0x6d9   : > { %v11135_v47 = vsel %vm8928_vm2, %v11119_v31, %v11063_v1  ;;  %v12559_v31 = vld [vmem:[%s18913_s12] ss:$0 sm:$0xff] }
 0x6db   : > { %v10917_v62 = vpop.permute.xlu1 %10916 }
 0x6dc   : > { %v11067_v18 = vpop.permute.xlu0 %11066  ;;  %v11109_v23 = vsel %vm4761_vm10, %v11093_v38, %v10917_v62 }
 0x6dd   : > { %v11139_v50 = vsel %vm8928_vm2, %v11123_v11, %v11067_v18 }
 0x6df   : > { %v11017_v25 = vpop.permute.xlu1 %11016 }
 0x6e0   : > { %v11121_v63 = vsel %vm4114_vm3, %v11105_v3, %v11017_v25  ;;  %v11499_v15 = vpop.permute.xlu0 %11498 }
 0x6e3   : > { %v11021_v44 = vpop.permute.xlu1 %11020 }
 0x6e4   : > { %v11125_v20 = vsel %vm4114_vm3, %v11109_v23, %v11021_v44  ;;  %v11503_v37 = vpop.permute.xlu0 %11502 }
 0x6e6   : > { %v18760_v29 = vpop.f32.mrb[0].mxu1 }
 0x6e7   : > { %v11065_v19 = vpop.permute.xlu1 %11064  ;;  %v18763_v61 = vpop.f32.mrb[1].mxu1 }
 0x6e8   : > { %v11137_v46 = vsel %vm8928_vm2, %v11121_v63, %v11065_v19  ;;  %v18767_v24 = vpop.f32.mrb[2].mxu1 }
 0x6e9   : > { %v12549_v26 = vcombine.low %v11135_v47, %v11137_v46  ;;  %v18772_v59 = vpop.f32.mrb[3].mxu1 }
 0x6eb   : > { %v11069_v51 = vpop.permute.xlu1 %11068  ;;  %12840 = vmatprep.mubr.msk.bf16.mxu1 %vm9415_vm13, %v12549_v26 }
 0x6ec   : > { %v11141_v45 = vsel %vm8928_vm2, %v11125_v20, %v11069_v51 }
 0x6ed   : > { %v12550_v52 = vcombine.low %v11139_v50, %v11141_v45 }
 0x6ef   : > { %12841 = vmatmul.mubr.msk.bf16.gmra.mrb[12].mxu1 %vm9415_vm13, %v12550_v52  ;;  %v11501_v12 = vpop.permute.xlu1 %11500 }
 0x6f0   : > { %12856 = vmatprep.mubr.msk.bf16.mxu1 %vm3519_vm0, %v11499_v15 }
 0x6f1   : > { %v18776_v57 = vpop.f32.mrb[4].mxu1 }
 0x6f2   : > { %v18778_v58 = vpop.f32.mrb[5].mxu1 }
 0x6f3   : > { %v18780_v56 = vpop.f32.mrb[6].mxu1  ;;  %v11505_v39 = vpop.permute.xlu1 %11504 }
 0x6f4   : > { %v18783_v13 = vpop.f32.mrb[7].mxu1 }
 0x6f7   : > { %12857 = vmatmul.mubr.msk.bf16.vlgmr.msra.gmra.mrb[16].mxu1 %vm3519_vm0, %v11501_v12 }
 0x6f8   : > { %12860 = vmatprep.mubr.msk.bf16.mxu1 %vm3519_vm0, %v11503_v37 }
 0x6ff   : > { %12861 = vmatmul.mubr.msk.bf16.gmra.mrb[20].mxu1 %vm3519_vm0, %v11505_v39 }
 0x726   : > { %v12848_v17 = vpop.f32.mrb[16].mxu0 }
 0x727   : > { %v11460_v8 = vmul.f32 %v12848_v17, %v12564_v6  ;;  %v11420_v4 = vpop.f32.mrb[17].mxu0 }
 0x728   : > { %v11458_v53 = vmul.f32 %v12564_v6, %v11420_v4  ;;  %v12849_v10 = vpop.f32.mrb[18].mxu0 }
 0x729   : > { %v11461_v32 = vmul.f32 %v12849_v10, %v12564_v6  ;;  %v11423_v28 = vpop.f32.mrb[19].mxu0  ;;  %v11475_v22 = vadd.f32 %v12565_v33, %v11460_v8 }
 0x72a   : > { %v11473_v42 = vadd.f32 %v12565_v33, %v11458_v53  ;;  %v11459_v34 = vmul.f32 %v12564_v6, %v11423_v28  ;;  %v12570_v28 = vld [vmem:[%s18918_s17] ss:$0 sm:$0xff] }
 0x72b   : > { %v11476_v2 = vadd.f32 %v12565_v33, %v11461_v32  ;;  %v11483_v40 = vmax.f32 %v11475_v22, 0.0 }
 0x72c   : > { %v11481_v36 = vmax.f32 %v11473_v42, 0.0  ;;  %v11474_v30 = vadd.f32 %v12565_v33, %v11459_v34 }
 0x72d   : > { %v11484_v60 = vmax.f32 %v11476_v2, 0.0 }
 0x72e   : > { %v11482_v48 = vmax.f32 %v11474_v30, 0.0  ;;  %11664 = vrot.lane.b32.xlu0 %v11481_v36, %s13516_s3  ;;  %v12571_v36 = vld [vmem:[%s18919_s18] ss:$0 sm:$0xff] }
 0x730   : > { %11666 = vrot.lane.b32.xlu1 %v11482_v48, %s13516_s3 }
 0x732   : > { %11668 = vrot.lane.b32.xlu0 %v11483_v40, %s13516_s3 }
 0x734   : > { %11670 = vrot.lane.b32.xlu1 %v11484_v60, %s13516_s3 }
 0x738   : > { %v12852_v5 = vpop.f32.mrb[20].mxu0 }
 0x739   : > { %v11464_v43 = vmul.f32 %v12852_v5, %v12564_v6  ;;  %v11436_v14 = vpop.f32.mrb[21].mxu0 }
 0x73a   : > { %v11462_v9 = vmul.f32 %v12564_v6, %v11436_v14  ;;  %v12853_v54 = vpop.f32.mrb[22].mxu0 }
 0x73b   : > { %v11465_v62 = vmul.f32 %v12853_v54, %v12564_v6  ;;  %v11439_v27 = vpop.f32.mrb[23].mxu0  ;;  %v11479_v25 = vadd.f32 %v12565_v33, %v11464_v43 }
 0x73c   : > { %v11477_v1 = vadd.f32 %v12565_v33, %v11462_v9  ;;  %v11463_v44 = vmul.f32 %v12564_v6, %v11439_v27 }
 0x73d   : > { %v11480_v21 = vadd.f32 %v12565_v33, %v11465_v62  ;;  %v11487_v16 = vmax.f32 %v11479_v25, 0.0 }
 0x73e   : > { %v11485_v55 = vmax.f32 %v11477_v1, 0.0  ;;  %v11478_v49 = vadd.f32 %v12565_v33, %v11463_v44 }
 0x73f   : > { %v11488_v0 = vmax.f32 %v11480_v21, 0.0 }
 0x740   : > { %v11486_v41 = vmax.f32 %v11478_v49, 0.0  ;;  %11672 = vrot.lane.b32.xlu0 %v11485_v55, %s13516_s3 }
 0x742   : > { %11674 = vrot.lane.b32.xlu1 %v11486_v41, %s13516_s3 }
 0x744   : > { %11676 = vrot.lane.b32.xlu0 %v11487_v16, %s13516_s3 }
 0x746   : > { %11678 = vrot.lane.b32.xlu1 %v11488_v0, %s13516_s3 }
 0x7a2   : > { %v12838_v3 = vpop.f32.mrb[8].mxu1 }
 0x7a3   : > { %v11280_v63 = vmul.f32 %v12838_v3, %v12558_v7  ;;  %v11232_v19 = vpop.f32.mrb[9].mxu1 }
 0x7a4   : > { %v11278_v35 = vmul.f32 %v12558_v7, %v11232_v19  ;;  %v12839_v47 = vpop.f32.mrb[10].mxu1 }
 0x7a5   : > { %v11295_v46 = vadd.f32 %v12559_v31, %v11280_v63  ;;  %v11281_v38 = vmul.f32 %v12839_v47, %v12558_v7  ;;  %v11235_v18 = vpop.f32.mrb[11].mxu1 }
 0x7a6   : > { %v11279_v26 = vmul.f32 %v12558_v7, %v11235_v18  ;;  %v11293_v11 = vadd.f32 %v12559_v31, %v11278_v35 }
 0x7a7   : > { %v11303_v23 = vmax.f32 %v11295_v46, 0.0  ;;  %v11296_v20 = vadd.f32 %v12559_v31, %v11281_v38 }
 0x7a8   : > { %v11294_v50 = vadd.f32 %v12559_v31, %v11279_v26  ;;  %v11301_v45 = vmax.f32 %v11293_v11, 0.0  ;;  %v11665_v11 = vpop.permute.xlu0 %11664 }
 0x7a9   : > { %v11304_v51 = vmax.f32 %v11296_v20, 0.0  ;;  %11636 = vrot.lane.b32.xlu0 %v11303_v23, %s13514_s24  ;;  %v11667_v20 = vpop.permute.xlu1 %11666 }
 0x7aa   : > { %v11302_v52 = vmax.f32 %v11294_v50, 0.0 }
 0x7ab   : > { %11638 = vrot.lane.b32.xlu1 %v11304_v51, %s13514_s24 }
 0x7ac   : > { %v11669_v51 = vpop.permute.xlu0 %11668 }
 0x7ad   : > { %11632 = vrot.lane.b32.xlu0 %v11301_v45, %s13514_s24  ;;  %v11671_v50 = vpop.permute.xlu1 %11670 }
 0x7af   : > { %11634 = vrot.lane.b32.xlu1 %v11302_v52, %s13514_s24 }
 0x7b2   : > { %v11673_v45 = vpop.permute.xlu0 %11672 }
 0x7b4   : > { %v18829_v52 = vpop.permute.xlu1 %11674 }
 0x7c2   : > { %v12842_v15 = vpop.f32.mrb[12].mxu1 }
 0x7c3   : > { %v11284_v12 = vmul.f32 %v12842_v15, %v12558_v7  ;;  %v11248_v37 = vpop.f32.mrb[13].mxu1  ;;  %v18831_v15 = vpop.permute.xlu0 %11676 }
 0x7c4   : > { %v11282_v39 = vmul.f32 %v12558_v7, %v11248_v37  ;;  %v12843_v6 = vpop.f32.mrb[14].mxu1 }
 0x7c5   : > { %v11299_v17 = vadd.f32 %v12559_v31, %v11284_v12  ;;  %v11285_v8 = vmul.f32 %v12843_v6, %v12558_v7  ;;  %v11251_v33 = vpop.f32.mrb[15].mxu1  ;;  %v18833_v12 = vpop.permute.xlu1 %11678 }
 0x7c6   : > { %v11283_v4 = vmul.f32 %v12558_v7, %v11251_v33  ;;  %v11297_v10 = vadd.f32 %v12559_v31, %v11282_v39  ;;  %v12089_v39 = vld [vmem:[%s18906_s5] ss:$0 sm:$0xff] }
 0x7c7   : > { %v11307_v53 = vmax.f32 %v11299_v17, 0.0  ;;  %v11300_v32 = vadd.f32 %v12559_v31, %v11285_v8  ;;  %v5663_v17 = vmul.f32 %v18760_v29, %v12089_v39  ;;  %v12090_v8 = vld [vmem:[%s18907_s6] ss:$0 sm:$0xff]  ;;  %v5665_v29 = vmul.f32 %v12089_v39, %v18778_v58 }
 0x7c8   : > { %v11298_v42 = vadd.f32 %v12559_v31, %v11283_v4  ;;  %v11305_v2 = vmax.f32 %v11297_v10, 0.0  ;;  %v5664_v4 = vmul.f32 %v18767_v24, %v12089_v39  ;;  %v5666_v24 = vmul.f32 %v12089_v39, %v18783_v13 }
 0x7c9   : > { %v11308_v22 = vmax.f32 %v11300_v32, 0.0  ;;  %11644 = vrot.lane.b32.xlu0 %v11307_v53, %s13514_s24  ;;  %v5678_v10 = vadd.f32 %v12090_v8, %v5663_v17  ;;  %v5661_v32 = vmul.f32 %v12089_v39, %v18763_v61  ;;  %v5680_v58 = vadd.f32 %v12090_v8, %v5665_v29 }
 0x7ca   : > { %v12858_v34 = vpop.f32.mrb[16].mxu1  ;;  %v11306_v5 = vmax.f32 %v11298_v42, 0.0  ;;  %v5662_v42 = vmul.f32 %v12089_v39, %v18772_v59  ;;  %v5667_v59 = vmul.f32 %v18776_v57, %v12089_v39 }
 0x7cb   : > { %v11595_v30 = vmul.f32 %v12858_v34, %v12570_v28  ;;  %v11555_v40 = vpop.f32.mrb[17].mxu1  ;;  %11646 = vrot.lane.b32.xlu1 %v11308_v22, %s13514_s24  ;;  %v5679_v22 = vadd.f32 %v12090_v8, %v5664_v4 }
 0x7cc   : > { %v11593_v48 = vmul.f32 %v12570_v28, %v11555_v40  ;;  %v12859_v60 = vpop.f32.mrb[18].mxu1 }
 0x7cd   : > { %v11610_v43 = vadd.f32 %v12571_v36, %v11595_v30  ;;  %v11596_v14 = vmul.f32 %v12859_v60, %v12570_v28  ;;  %v11558_v9 = vpop.f32.mrb[19].mxu1  ;;  %11640 = vrot.lane.b32.xlu0 %v11305_v2, %s13514_s24  ;;  %v5676_v2 = vadd.f32 %v12090_v8, %v5661_v32  ;;  %v5687_v40 = vmax.f32 %v5679_v22, 0.0 }
 0x7ce   : > { %v11594_v54 = vmul.f32 %v12570_v28, %v11558_v9  ;;  %v11608_v27 = vadd.f32 %v12571_v36, %v11593_v48  ;;  %v5677_v48 = vadd.f32 %v12090_v8, %v5662_v42 }
 0x7cf   : > { %v11618_v62 = vmax.f32 %v11610_v43, 0.0  ;;  %v11611_v25 = vadd.f32 %v12571_v36, %v11596_v14  ;;  %11642 = vrot.lane.b32.xlu1 %v11306_v5, %s13514_s24  ;;  %v5684_v43 = vmax.f32 %v5676_v2, 0.0 }
 0x7d0   : > { %v11609_v44 = vadd.f32 %v12571_v36, %v11594_v54  ;;  %v11616_v21 = vmax.f32 %v11608_v27, 0.0  ;;  %v5685_v54 = vmax.f32 %v5677_v48, 0.0  ;;  %v5668_v27 = vmul.f32 %v18780_v56, %v12089_v39 }
 0x7d1   : > { %v11619_v1 = vmax.f32 %v11611_v25, 0.0  ;;  %11700 = vrot.lane.b32.xlu0 %v11618_v62, %s13518_s27  ;;  %v5681_v25 = vadd.f32 %v12090_v8, %v5666_v24 }
 0x7d2   : > { %v12862_v55 = vpop.f32.mrb[20].mxu1  ;;  %v11617_v7 = vmax.f32 %v11609_v44, 0.0 }
 0x7d3   : > { %v11571_v49 = vpop.f32.mrb[21].mxu1  ;;  %11702 = vrot.lane.b32.xlu1 %v11619_v1, %s13518_s27  ;;  %v11599_v16 = vmul.f32 %v12862_v55, %v12570_v28 }
 0x7d4   : > { %v11597_v41 = vmul.f32 %v12570_v28, %v11571_v49  ;;  %v12863_v0 = vpop.f32.mrb[22].mxu1  ;;  %v5688_v49 = vmax.f32 %v5680_v58, 0.0 }
 0x7d5   : > { %v11574_v3 = vpop.f32.mrb[23].mxu1  ;;  %11696 = vrot.lane.b32.xlu0 %v11616_v21, %s13518_s27  ;;  %v11600_v63 = vmul.f32 %v12863_v0, %v12570_v28  ;;  %v11614_v35 = vadd.f32 %v12571_v36, %v11599_v16  ;;  %v5682_v21 = vadd.f32 %v12090_v8, %v5667_v59  ;;  %v5683_v0 = vadd.f32 %v12090_v8, %v5668_v27 }
 0x7d6   : > { %v11612_v31 = vadd.f32 %v12571_v36, %v11597_v41  ;;  %v11598_v19 = vmul.f32 %v12570_v28, %v11574_v3 }
 0x7d7   : > { %11698 = vrot.lane.b32.xlu1 %v11617_v7, %s13518_s27  ;;  %v11615_v38 = vadd.f32 %v12571_v36, %v11600_v63  ;;  %v11622_v26 = vmax.f32 %v11614_v35, 0.0  ;;  %v5689_v7 = vmax.f32 %v5681_v25, 0.0  ;;  %v5690_v35 = vmax.f32 %v5682_v21, 0.0 }
 0x7d8   : > { %v11620_v47 = vmax.f32 %v11612_v31, 0.0  ;;  %v11613_v46 = vadd.f32 %v12571_v36, %v11598_v19  ;;  %v5686_v36 = vmax.f32 %v5678_v10, 0.0 }
 0x7d9   : > { %v11623_v23 = vmax.f32 %v11615_v38, 0.0 }
 0x7da   : > { %v11621_v18 = vmax.f32 %v11613_v46, 0.0  ;;  %11704 = vrot.lane.b32.xlu0 %v11620_v47, %s13518_s27 }
 0x7dc   : > { %11706 = vrot.lane.b32.xlu1 %v11621_v18, %s13518_s27  ;;  %v5691_v18 = vmax.f32 %v5683_v0, 0.0 }
 0x7de   : > { %11708 = vrot.lane.b32.xlu0 %v11622_v26, %s13518_s27 }
 0x7e0   : > { %11710 = vrot.lane.b32.xlu1 %v11623_v23, %s13518_s27 }
 0x81b   : > { %v11637_v37 = vpop.permute.xlu0 %11636 }
 0x81c   : > { %v11722_v60 = vsel %vm3519_vm0, %v5686_v36, %v11637_v37 }
 0x81d   : > { %v11639_v6 = vpop.permute.xlu1 %11638  ;;  %v11730_v14 = vsel %vm4761_vm10, %v11722_v60, %v11669_v51 }
 0x81e   : > { %v11723_v61 = vsel %vm3519_vm0, %v5687_v40, %v11639_v6 }
 0x81f   : > { %v11633_v33 = vpop.permute.xlu0 %11632  ;;  %v11731_v1 = vsel %vm4761_vm10, %v11723_v61, %v11671_v50 }
 0x820   : > { %v11720_v13 = vsel %vm3519_vm0, %v5684_v43, %v11633_v33 }
 0x821   : > { %v11635_v53 = vpop.permute.xlu1 %11634  ;;  %v11728_v16 = vsel %vm4761_vm10, %v11720_v13, %v11665_v11 }
 0x822   : > { %v11721_v57 = vsel %vm3519_vm0, %v5685_v54, %v11635_v53 }
 0x823   : > { %v11729_v31 = vsel %vm4761_vm10, %v11721_v57, %v11667_v20 }
 0x83b   : > { %v11645_v28 = vpop.permute.xlu0 %11644 }
 0x83c   : > { %v11726_v26 = vsel %vm3519_vm0, %v5690_v35, %v11645_v28 }
 0x83d   : > { %v11647_v34 = vpop.permute.xlu1 %11646 }
 0x83e   : > { %v11727_v51 = vsel %vm3519_vm0, %v5691_v18, %v11647_v34 }
 0x83f   : > { %v11641_v30 = vpop.permute.xlu0 %11640  ;;  %v11735_v6 = vsel %vm4761_vm10, %v11727_v51, %v18833_v12 }
 0x840   : > { %v11724_v3 = vsel %vm3519_vm0, %v5688_v49, %v11641_v30 }
 0x841   : > { %v11643_v5 = vpop.permute.xlu1 %11642  ;;  %v11732_v46 = vsel %vm4761_vm10, %v11724_v3, %v11673_v45  ;;  %v11734_v45 = vsel %vm4761_vm10, %v11726_v26, %v18831_v15 }
 0x842   : > { %v11725_v47 = vsel %vm3519_vm0, %v5689_v7, %v11643_v5 }
 0x843   : > { %v11701_v9 = vpop.permute.xlu0 %11700  ;;  %v11733_v11 = vsel %vm4761_vm10, %v11725_v47, %v18829_v52 }
 0x844   : > { %v11738_v62 = vsel %vm4114_vm3, %v11730_v14, %v11701_v9 }
 0x845   : > { %11746 = vst.msk [vmem:[%s18853_s2 + $0x10] sm:$0xff] %vm8928_vm2, %v11738_v62  ;;  %v11703_v44 = vpop.permute.xlu1 %11702 }
 0x846   : > { %v11739_v55 = vsel %vm4114_vm3, %v11731_v1, %v11703_v44 }
 0x847   : > { %11747 = vst.msk [vmem:[%s18853_s2 + $0x18] sm:$0xff] %vm8928_vm2, %v11739_v55  ;;  %v11697_v41 = vpop.permute.xlu0 %11696 }
 0x848   : > { %v11736_v56 = vsel %vm4114_vm3, %v11728_v16, %v11697_v41 }
 0x849   : > { %11744 = vst.msk [vmem:[%s18853_s2] sm:$0xff] %vm8928_vm2, %v11736_v56  ;;  %v11699_v63 = vpop.permute.xlu1 %11698 }
 0x84a   : > { %v11737_v19 = vsel %vm4114_vm3, %v11729_v31, %v11699_v63 }
 0x84b   : > { %11745 = vst.msk [vmem:[%s18853_s2 + $0x8] sm:$0xff] %vm8928_vm2, %v11737_v19 }
 0x84c   : > { %v11705_v38 = vpop.permute.xlu0 %11704 }
 0x84d   : > { %v11740_v23 = vsel %vm4114_vm3, %v11732_v46, %v11705_v38 }
 0x84e   : > { %11748 = vst.msk [vmem:[%s18853_s2 + $0x20] sm:$0xff] %vm8928_vm2, %v11740_v23  ;;  %v11707_v20 = vpop.permute.xlu1 %11706 }
 0x84f   : > { %v11741_v50 = vsel %vm4114_vm3, %v11733_v11, %v11707_v20 }
 0x850   : > { %11749 = vst.msk [vmem:[%s18853_s2 + $0x28] sm:$0xff] %vm8928_vm2, %v11741_v50  ;;  %v11709_v37 = vpop.permute.xlu0 %11708 }
 0x851   : > { %v11742_v39 = vsel %vm4114_vm3, %v11734_v45, %v11709_v37 }
 0x852   : > { %11750 = vst.msk [vmem:[%s18853_s2 + $0x30] sm:$0xff] %vm8928_vm2, %v11742_v39  ;;  %v11711_v17 = vpop.permute.xlu1 %11710 }
 0x853   : > { %v11743_v52 = vsel %vm4114_vm3, %v11735_v6, %v11711_v17 }
 0x854   : > { %11751 = vst.msk [vmem:[%s18853_s2 + $0x38] sm:$0xff] %vm8928_vm2, %v11743_v52 }
 0x855 PF: > { %s29_s0 = sadd.s32 1, %s13511_s0  }
 0x856   : > { %p26_p4 = scmp.ge.s32.totalorder %s29_s0, 4  }
 0x858   :  { %28 = sbr.rel (!%p26_p4) target bundleno = 5 (0x5), region = 144 }

</bundles_post_ra>
